<compile_context>
chip_gen: v7x
topology: tpu7x:2x2x1
jax: 0.10.0
libtpu: 0.0.40
codegen_flags: <defaults>
</compile_context>

<pallas_src>
import functools
import math

import numpy as np
import jax
import jax.numpy as jnp
from jax.experimental import pallas as pl
from jax.experimental.pallas import tpu as pltpu


_INV_SQRT2 = 1.0 / math.sqrt(2.0)


def _gelu(x):
    # exact (erf) GELU, matching torch.nn.functional.gelu default
    return 0.5 * x * (1.0 + jax.lax.erf(x * _INV_SQRT2))


@functools.lru_cache(maxsize=None)
def _vmem_limit_bytes():
    """Per-generation scoped-VMEM budget: <=48 MiB on v7x (64 MiB physical),
    up to 96 MiB on v5e/v6e (128 MiB physical)."""
    try:
        cap = int(pltpu.get_tpu_info().vmem_capacity_bytes)
        return int(min(96 * 1024 * 1024, (cap * 3) // 4))
    except Exception:  # attribute / backend mismatch -> conservative default
        return 48 * 1024 * 1024


def _pick_s_tile(s, per_lane_bytes, budget):
    """Largest multiple-of-128 divisor of s whose block fits `budget` bytes.
    Falls back to the full extent (always a legal BlockSpec dim)."""
    if s % 128 == 0:
        cap = max(128, (budget // max(per_lane_bytes, 1)) // 128 * 128)
        t = min(s, cap)
        t -= t % 128
        while t >= 128:
            if s % t == 0:
                return t
            t -= 128
    return s


# ----------------------------------------------------------------------------
# Pallas kernels (all channels-first: [C, S] tiles, S on the lane axis)
# ----------------------------------------------------------------------------
def _cf_mlp2_kernel(x_ref, w1_ref, b1_ref, w2_ref, b2_ref, o_ref):
    """Fused two-layer pointwise MLP on one (Cin, S) tile:
       o = w2 @ gelu(w1 @ x + b1) + b2, bf16 MXU operands, f32 accumulation."""
    x = x_ref[0].astype(jnp.bfloat16)                                  # (Cin, S)
    h = jnp.dot(w1_ref[...], x, preferred_element_type=jnp.float32)    # (Cmid, S)
    h = _gelu(h + b1_ref[...]).astype(jnp.bfloat16)
    o = jnp.dot(w2_ref[...], h, preferred_element_type=jnp.float32) + b2_ref[...]
    o_ref[0] = o.astype(o_ref.dtype)


def _cf_linear_kernel(x_ref, w_ref, o_ref):
    """Pointwise linear (1x1x1 conv, no bias): o = w @ x."""
    x = x_ref[0].astype(jnp.bfloat16)
    o_ref[0] = jnp.dot(w_ref[...], x,
                       preferred_element_type=jnp.float32).astype(o_ref.dtype)


def _cf_gelu_kernel(x_ref, o_ref):
    o_ref[...] = _gelu(x_ref[...]).astype(o_ref.dtype)


def _spectral_kernel(x_ref, w_ref, o_ref):
    # Per-mode complex channel mixing as one real contraction:
    #   x = [xr | xi]  (K = 2*Cin),  w = [[wr wi], [-wi wr]]  (N = 2*Cout)
    x = x_ref[...].astype(jnp.bfloat16)
    o_ref[...] = jnp.einsum(
        "mbi,mio->mbo", x, w_ref[...],
        preferred_element_type=jnp.float32).astype(o_ref.dtype)


# ----------------------------------------------------------------------------
# Pallas wrappers
# ----------------------------------------------------------------------------
def cf_mlp2(x, w1_t, b1, w2_t, b2):
    """x: [B, Cin, S] -> [B, Cout, S]; fused pointwise GELU-MLP, channels-first."""
    bsz, cin, s = x.shape
    cmid, cout = w1_t.shape[0], w2_t.shape[0]
    vmem = _vmem_limit_bytes()
    tile_s = _pick_s_tile(s, 4 * (cin + cmid + cout), vmem // 6)
    return pl.pallas_call(
        _cf_mlp2_kernel,
        out_shape=jax.ShapeDtypeStruct((bsz, cout, s), jnp.float32),
        grid=(bsz, s // tile_s),
        in_specs=[
            pl.BlockSpec((1, cin, tile_s), lambda b, j: (b, 0, j)),
            pl.BlockSpec((cmid, cin), lambda b, j: (0, 0)),
            pl.BlockSpec((cmid, 1), lambda b, j: (0, 0)),
            pl.BlockSpec((cout, cmid), lambda b, j: (0, 0)),
            pl.BlockSpec((cout, 1), lambda b, j: (0, 0)),
        ],
        out_specs=pl.BlockSpec((1, cout, tile_s), lambda b, j: (b, 0, j)),
        compiler_params=pltpu.CompilerParams(
            dimension_semantics=("parallel", "parallel"),
            vmem_limit_bytes=vmem),
    )(x, w1_t, b1, w2_t, b2)


def cf_linear(x, w_t):
    """x: [B, Cin, S] -> [B, Cout, S]; pointwise linear, no bias."""
    bsz, cin, s = x.shape
    cout = w_t.shape[0]
    vmem = _vmem_limit_bytes()
    tile_s = _pick_s_tile(s, 4 * (cin + cout), vmem // 6)
    return pl.pallas_call(
        _cf_linear_kernel,
        out_shape=jax.ShapeDtypeStruct((bsz, cout, s), jnp.float32),
        grid=(bsz, s // tile_s),
        in_specs=[
            pl.BlockSpec((1, cin, tile_s), lambda b, j: (b, 0, j)),
            pl.BlockSpec((cout, cin), lambda b, j: (0, 0)),
        ],
        out_specs=pl.BlockSpec((1, cout, tile_s), lambda b, j: (b, 0, j)),
        compiler_params=pltpu.CompilerParams(
            dimension_semantics=("parallel", "parallel"),
            vmem_limit_bytes=vmem),
    )(x, w_t)


def cf_gelu(x):
    """Elementwise GELU on [B, C, S] (lane-dense)."""
    bsz, c, s = x.shape
    vmem = _vmem_limit_bytes()
    tile_s = _pick_s_tile(s, 8 * c, vmem // 6)
    return pl.pallas_call(
        _cf_gelu_kernel,
        out_shape=jax.ShapeDtypeStruct((bsz, c, s), jnp.float32),
        grid=(bsz, s // tile_s),
        in_specs=[pl.BlockSpec((1, c, tile_s), lambda b, j: (b, 0, j))],
        out_specs=pl.BlockSpec((1, c, tile_s), lambda b, j: (b, 0, j)),
        compiler_params=pltpu.CompilerParams(
            dimension_semantics=("parallel", "parallel"),
            vmem_limit_bytes=vmem),
    )(x)


def spectral_contract(xcat, wcat):
    """Per-mode real-encoded complex mixing.
    xcat: [M, B, 2*Cin] f32, wcat: [M, 2*Cin, 2*Cout] bf16 -> [M, B, 2*Cout] f32."""
    m, b, k = xcat.shape
    n_out = wcat.shape[-1]
    vmem = _vmem_limit_bytes()
    # 2 even grid steps keep both v7x TensorCores busy; on single-TC parts the
    # extra step costs <1us (the kernel is weight-DMA bound anyway).
    tile_m = m // 2 if (m % 2 == 0 and m >= 2) else m
    return pl.pallas_call(
        _spectral_kernel,
        out_shape=jax.ShapeDtypeStruct((m, b, n_out), jnp.float32),
        grid=(m // tile_m,),
        in_specs=[
            pl.BlockSpec((tile_m, b, k), lambda i: (i, 0, 0)),
            pl.BlockSpec((tile_m, k, n_out), lambda i: (i, 0, 0)),
        ],
        out_specs=pl.BlockSpec((tile_m, b, n_out), lambda i: (i, 0, 0)),
        compiler_params=pltpu.CompilerParams(
            dimension_semantics=("parallel",), vmem_limit_bytes=vmem),
    )(xcat, wcat)


# ----------------------------------------------------------------------------
# FFT glue (no Pallas FFT primitive exists)
# ----------------------------------------------------------------------------
def _kept_idx(n, m):
    """Indices of the m lowest-|frequency| modes of an FFT axis of length n."""
    m = min(m, n)
    pos = (m + 1) // 2
    neg = m - pos
    if neg:
        return np.concatenate([np.arange(pos), np.arange(n - neg, n)])
    return np.arange(pos)


def fno_block(h, layer, n_modes, out_spatial, apply_act):
    """One FNO block with the skip path folded into the frequency domain:
         out_spec = skip_w . spec|resample-kept  +  (wr + i wi) . spec|corner
         out_spec[DC] += bias ; y = irfft(out_spec) ; h_next = gelu?(y)
    Only one rfftn / irfftn pair per block."""
    bsz, chid = h.shape[:2]
    d1, d2, d3 = h.shape[2:]
    o1, o2, o3 = out_spatial
    d3r, o3r = d3 // 2 + 1, o3 // 2 + 1
    m_t, m_h, m_w = n_modes
    m_wr = m_w // 2 + 1

    # TODO(synk): FFT has no Pallas equivalent; rfftn/irfftn stay in plain JAX.
    spec = jnp.fft.rfftn(h, axes=(-3, -2, -1), norm="forward")
    spec_r, spec_i = jnp.real(spec), jnp.imag(spec)

    # ---- skip path: 1x1x1 conv applied to all Fourier-resampled modes -------
    k1, k2, k3 = min(d1, o1), min(d2, o2), min(d3r, o3r)
    same = (d1, d2, d3) == (o1, o2, o3)
    r3 = np.arange(k3)
    if same:
        kr, ki = spec_r, spec_i
    else:
        r1s, r2s = _kept_idx(d1, k1), _kept_idx(d2, k2)
        kr = spec_r[:, :, r1s[:, None, None], r2s[None, :, None], r3[None, None, :]]
        ki = spec_i[:, :, r1s[:, None, None], r2s[None, :, None], r3[None, None, :]]
    sk = k1 * k2 * k3
    skip_in = jnp.concatenate([kr.reshape(bsz, chid, sk),
                               ki.reshape(bsz, chid, sk)], axis=-1)      # [B, C, 2*sk]
    skip_out = cf_linear(skip_in, layer["skip_wT"])                       # [B, C, 2*sk]
    s_r = skip_out[..., :sk].reshape(bsz, chid, k1, k2, k3)
    s_i = skip_out[..., sk:].reshape(bsz, chid, k1, k2, k3)
    if same:
        out_r, out_i = s_r, s_i
    else:
        r1d, r2d = _kept_idx(o1, k1), _kept_idx(o2, k2)
        zeros = jnp.zeros((bsz, chid, o1, o2, o3r), jnp.float32)
        out_r = zeros.at[:, :, r1d[:, None, None], r2d[None, :, None],
                         r3[None, None, :]].set(s_r)
        out_i = zeros.at[:, :, r1d[:, None, None], r2d[None, :, None],
                         r3[None, None, :]].set(s_i)

    # ---- spectral path: per-mode complex mixing on the n_modes corner -------
    # TODO(synk): verify mode ordering / fft_norm against the pinned neuralop
    #             SpectralConv3d.
    m1, m2, m3 = min(m_t, d1, o1), min(m_h, d2, o2), min(m_wr, d3r, o3r)
    i1s, i2s = _kept_idx(d1, m1), _kept_idx(d2, m2)
    i3 = np.arange(m3)
    cr = spec_r[:, :, i1s[:, None, None], i2s[None, :, None], i3[None, None, :]]
    ci = spec_i[:, :, i1s[:, None, None], i2s[None, :, None], i3[None, None, :]]
    m_total = m1 * m2 * m3
    xr = jnp.transpose(cr, (2, 3, 4, 0, 1)).reshape(m_total, bsz, chid)
    xi = jnp.transpose(ci, (2, 3, 4, 0, 1)).reshape(m_total, bsz, chid)
    xcat = jnp.concatenate([xr, xi], axis=-1)                            # [M, B, 2C]
    wcat = layer["spec_wcat"][:m1, :m2, :m3].reshape(m_total, 2 * chid, 2 * chid)
    ycat = spectral_contract(xcat, wcat)                                  # [M, B, 2C]
    yr = jnp.transpose(ycat[..., :chid].reshape(m1, m2, m3, bsz, chid), (3, 4, 0, 1, 2))
    yi = jnp.transpose(ycat[..., chid:].reshape(m1, m2, m3, bsz, chid), (3, 4, 0, 1, 2))
    i1d, i2d = _kept_idx(o1, m1), _kept_idx(o2, m2)
    out_r = out_r.at[:, :, i1d[:, None, None], i2d[None, :, None],
                     i3[None, None, :]].add(yr)
    out_i = out_i.at[:, :, i1d[:, None, None], i2d[None, :, None],
                     i3[None, None, :]].add(yi)

    # spectral bias is uniform in space -> fold into the DC bin
    # (norm="forward": the inverse FFT applies no 1/N scaling).
    out_r = out_r.at[:, :, 0, 0, 0].add(layer["spec_b"])

    y = jnp.fft.irfftn(jax.lax.complex(out_r, out_i), s=out_spatial,
                       axes=(-3, -2, -1), norm="forward")                 # [B, C, o1, o2, o3]
    if apply_act:
        y = cf_gelu(y.reshape(bsz, chid, -1)).reshape(bsz, chid, o1, o2, o3)
    return y


# ----------------------------------------------------------------------------
# Parameters & forward
# ----------------------------------------------------------------------------
def init_params(key, in_channels, hidden, lifting, projection, out_channels,
                n_modes, n_layers):
    m_t, m_h, m_w = n_modes
    m_wr = m_w // 2 + 1
    keys = jax.random.split(key, 4 + n_layers)

    def dense_t(k, cin, cout):
        # transposed [Cout, Cin] weight, stored bf16 for native-rate MXU
        std = math.sqrt(2.0 / (cin + cout))
        return (jax.random.normal(k, (cout, cin), jnp.float32) * std).astype(jnp.bfloat16)

    params = {
        "lift_w1T": dense_t(keys[0], in_channels, lifting),
        "lift_b1": jnp.zeros((lifting, 1), jnp.float32),
        "lift_w2T": dense_t(keys[1], lifting, hidden),
        "lift_b2": jnp.zeros((hidden, 1), jnp.float32),
        "proj_w1T": dense_t(keys[2], hidden, projection),
        "proj_b1": jnp.zeros((projection, 1), jnp.float32),
        "proj_w2T": dense_t(keys[3], projection, out_channels),
        "proj_b2": jnp.zeros((out_channels, 1), jnp.float32),
        "layers": [],
    }
    std = math.sqrt(2.0 / (hidden + hidden))
    for l in range(n_layers):
        k0, k1, k2 = jax.random.split(keys[4 + l], 3)
        wr = jax.random.normal(k0, (hidden, hidden, m_t, m_h, m_wr), jnp.float32) * std
        wi = jax.random.normal(k1, (hidden, hidden, m_t, m_h, m_wr), jnp.float32) * std
        # precompute the per-mode real-encoded complex weight block once:
        #   [xr xi] @ [[wr wi], [-wi wr]] = [yr yi]
        wm_r = jnp.transpose(wr, (2, 3, 4, 0, 1))   # [mt, mh, mwr, Cin, Cout]
        wm_i = jnp.transpose(wi, (2, 3, 4, 0, 1))
        wcat = jnp.concatenate(
            [jnp.concatenate([wm_r, wm_i], axis=-1),
             jnp.concatenate([-wm_i, wm_r], axis=-1)], axis=-2)
        params["layers"].append({
            "spec_wcat": wcat.astype(jnp.bfloat16),   # [mt, mh, mwr, 2Cin, 2Cout]
            "spec_b": jnp.zeros((hidden,), jnp.float32),
            "skip_wT": dense_t(k2, hidden, hidden),    # 1x1x1 conv skip, no bias
        })
    return params


def fno3d_forward(x, params, *, n_modes, n_layers, teacher_forcing_steps=15):
    """x: [B, T, C, H, W] -> [B, teacher_forcing_steps + (T - tfs), C, H, W]."""
    _, t_in, _, height, width = x.shape
    # replicate FNO3DModule.forward output_shape update logic
    if n_modes[0] != t_in - teacher_forcing_steps:
        out_spatial = (t_in - teacher_forcing_steps, height, width)
    else:
        out_spatial = tuple(n_modes)

    # the PyTorch module hardcodes a 10-step conditioning window: x[:, :10]
    xin = jnp.transpose(x[:, :10], (0, 2, 1, 3, 4))        # [B, C, 10, H, W]
    bsz = xin.shape[0]
    hidden = params["lift_w2T"].shape[0]

    # lifting: fused channels-first pointwise MLP ([B, C, S] is a free reshape)
    h = cf_mlp2(xin.reshape(bsz, xin.shape[1], -1),
                params["lift_w1T"], params["lift_b1"],
                params["lift_w2T"], params["lift_b2"])
    h = h.reshape(bsz, hidden, *xin.shape[2:])

    for l in range(n_layers):
        h = fno_block(h, params["layers"][l], n_modes, out_spatial,
                      apply_act=(l < n_layers - 1))

    # projection: fused channels-first pointwise MLP
    out_ch = params["proj_w2T"].shape[0]
    p = cf_mlp2(h.reshape(bsz, hidden, -1),
                params["proj_w1T"], params["proj_b1"],
                params["proj_w2T"], params["proj_b2"])
    y = p.reshape(bsz, out_ch, *out_spatial)                # [B, Cout, t_out, H, W]
    outs = jnp.transpose(y, (0, 2, 1, 3, 4))                # [B, t_out, Cout, H, W]
    return jnp.concatenate([x[:, :teacher_forcing_steps], outs], axis=1)


if __name__ == "__main__":
    key = jax.random.PRNGKey(0)
    k_in, k_params = jax.random.split(key)

    batch, t_steps, channels, height, width = 2, 16, 4, 16, 16
    n_modes = (4, 4, 4)
    hidden_channels = 32
    lifting_channels = 32
    projection_channels = 32
    out_channels = channels
    n_layers = 2
    teacher_forcing_steps = 8

    x = jax.random.normal(k_in, (batch, t_steps, channels, height, width), jnp.float32)
    params = init_params(k_params, channels, hidden_channels, lifting_channels,
                         projection_channels, out_channels, n_modes, n_layers)

    fwd = jax.jit(functools.partial(
        fno3d_forward,
        n_modes=n_modes,
        n_layers=n_layers,
        teacher_forcing_steps=teacher_forcing_steps,
    ))

    out = fwd(x, params)
    jax.block_until_ready(out)
    assert out.shape == (batch, t_steps, channels, height, width), out.shape
    assert bool(jnp.all(jnp.isfinite(out)))
    print("KERNEL_OK")
</pallas_src>

<mosaic_0001>
module attributes {stable_mosaic.version = 11 : i64} {
  func.func private @main(%arg0: i32) attributes {dimension_semantics = [#tpu.dimension_semantics<core_parallel>], iteration_bounds = array<i64: 2>, tpu.core_type = #tpu.core_type<sc_scalar_subcore>, window_params = []} {
    return
  }
}

module attributes {stable_mosaic.version = 11 : i64} {
  func.func private @main(%arg0: i32) attributes {dimension_semantics = [#tpu.dimension_semantics<core_parallel>], iteration_bounds = array<i64: 2>, tpu.core_type = #tpu.core_type<sc_scalar_subcore>, window_params = []} {
    return
  }
}

module attributes {stable_mosaic.version = 11 : i64} {
  func.func @_cf_mlp2_kernel(%arg0: i32, %arg1: i32, %arg2: memref<1x4x2560xf32, #tpu.memory_space<vmem>>, %arg3: memref<32x4xbf16, #tpu.memory_space<vmem>>, %arg4: memref<32x1xf32, #tpu.memory_space<vmem>>, %arg5: memref<32x32xbf16, #tpu.memory_space<vmem>>, %arg6: memref<32x1xf32, #tpu.memory_space<vmem>>, %arg7: memref<1x32x2560xf32, #tpu.memory_space<vmem>>) attributes {dimension_semantics = [#tpu.dimension_semantics<parallel>, #tpu.dimension_semantics<parallel>], iteration_bounds = array<i64: 2, 1>, scalar_prefetch = 0 : i64, scratch_operands = 0 : i64, tpu.core_type = #tpu.core_type<tc>, window_params = [{transform_indices = @transform_0, window_bounds = array<i64: 1, 4, 2560>}, {pipeline_mode = #tpu.pipeline_mode<synchronous>, transform_indices = @transform_1, window_bounds = array<i64: 32, 4>}, {pipeline_mode = #tpu.pipeline_mode<synchronous>, transform_indices = @transform_2, window_bounds = array<i64: 32, 1>}, {pipeline_mode = #tpu.pipeline_mode<synchronous>, transform_indices = @transform_3, window_bounds = array<i64: 32, 32>}, {pipeline_mode = #tpu.pipeline_mode<synchronous>, transform_indices = @transform_4, window_bounds = array<i64: 32, 1>}, {transform_indices = @transform_5, window_bounds = array<i64: 1, 32, 2560>}]} {
    %c0 = arith.constant 0 : index
    %c0_0 = arith.constant 0 : index
    %c0_1 = arith.constant 0 : index
    %0 = vector.load %arg2[%c0, %c0_0, %c0_1] : memref<1x4x2560xf32, #tpu.memory_space<vmem>>, vector<1x4x2560xf32>
    %1 = vector.shape_cast %0 : vector<1x4x2560xf32> to vector<4x2560xf32>
    %2 = arith.truncf %1 : vector<4x2560xf32> to vector<4x2560xbf16>
    %c0_2 = arith.constant 0 : index
    %c0_3 = arith.constant 0 : index
    %3 = vector.load %arg3[%c0_2, %c0_3] : memref<32x4xbf16, #tpu.memory_space<vmem>>, vector<32x4xbf16>
    %cst = arith.constant dense<0.000000e+00> : vector<32x2560xf32>
    %4 = tpu.matmul %3, %2, %cst {dimension_numbers = #tpu.dot_dimension_numbers<[1], [0], [0], [1], [0, 0, 1, 1], [], []>} : vector<32x4xbf16>, vector<4x2560xbf16>, vector<32x2560xf32> -> vector<32x2560xf32>
    %c0_4 = arith.constant 0 : index
    %c0_5 = arith.constant 0 : index
    %5 = vector.load %arg4[%c0_4, %c0_5] : memref<32x1xf32, #tpu.memory_space<vmem>>, vector<32x1xf32>
    %6 = vector.broadcast %5 : vector<32x1xf32> to vector<32x2560xf32>
    %7 = arith.addf %4, %6 : vector<32x2560xf32>
    %cst_6 = arith.constant 5.000000e-01 : f32
    %8 = vector.broadcast %cst_6 : f32 to vector<32x2560xf32>
    %9 = arith.mulf %8, %7 : vector<32x2560xf32>
    %cst_7 = arith.constant 0.707106769 : f32
    %10 = vector.broadcast %cst_7 : f32 to vector<32x2560xf32>
    %11 = arith.mulf %7, %10 : vector<32x2560xf32>
    %12 = math.erf %11 : vector<32x2560xf32>
    %cst_8 = arith.constant 1.000000e+00 : f32
    %13 = vector.broadcast %cst_8 : f32 to vector<32x2560xf32>
    %14 = arith.addf %13, %12 : vector<32x2560xf32>
    %15 = arith.mulf %9, %14 : vector<32x2560xf32>
    %16 = arith.truncf %15 : vector<32x2560xf32> to vector<32x2560xbf16>
    %c0_9 = arith.constant 0 : index
    %c0_10 = arith.constant 0 : index
    %17 = vector.load %arg5[%c0_9, %c0_10] : memref<32x32xbf16, #tpu.memory_space<vmem>>, vector<32x32xbf16>
    %cst_11 = arith.constant dense<0.000000e+00> : vector<32x2560xf32>
    %18 = tpu.matmul %17, %16, %cst_11 {dimension_numbers = #tpu.dot_dimension_numbers<[1], [0], [0], [1], [0, 0, 1, 1], [], []>} : vector<32x32xbf16>, vector<32x2560xbf16>, vector<32x2560xf32> -> vector<32x2560xf32>
    %c0_12 = arith.constant 0 : index
    %c0_13 = arith.constant 0 : index
    %19 = vector.load %arg6[%c0_12, %c0_13] : memref<32x1xf32, #tpu.memory_space<vmem>>, vector<32x1xf32>
    %20 = vector.broadcast %19 : vector<32x1xf32> to vector<32x2560xf32>
    %21 = arith.addf %18, %20 : vector<32x2560xf32>
    %c0_14 = arith.constant 0 : index
    %c0_15 = arith.constant 0 : index
    %c0_16 = arith.constant 0 : index
    %22 = vector.load %arg7[%c0_14, %c0_15, %c0_16] : memref<1x32x2560xf32, #tpu.memory_space<vmem>>, vector<1x32x2560xf32>
    %23 = vector.shape_cast %22 : vector<1x32x2560xf32> to vector<32x2560xf32>
    %24 = vector.shape_cast %21 : vector<32x2560xf32> to vector<1x32x2560xf32>
    tpu.vector_store %arg7[%c0_14, %c0_15, %c0_16], %24 {strides = array<i32>} : memref<1x32x2560xf32, #tpu.memory_space<vmem>>, vector<1x32x2560xf32>,
    return
  }
  func.func @transform_0(%arg0: i32, %arg1: i32) -> (i32, i32, i32) {
    %c0_i32 = arith.constant 0 : i32
    %c0_i32_0 = arith.constant 0 : i32
    return %arg0, %c0_i32, %arg1 : i32, i32, i32
  }
  func.func @transform_1(%arg0: i32, %arg1: i32) -> (i32, i32) {
    %c0_i32 = arith.constant 0 : i32
    %c0_i32_0 = arith.constant 0 : i32
    %c0_i32_1 = arith.constant 0 : i32
    return %c0_i32, %c0_i32_0 : i32, i32
  }
  func.func @transform_2(%arg0: i32, %arg1: i32) -> (i32, i32) {
    %c0_i32 = arith.constant 0 : i32
    %c0_i32_0 = arith.constant 0 : i32
    %c0_i32_1 = arith.constant 0 : i32
    return %c0_i32, %c0_i32_0 : i32, i32
  }
  func.func @transform_3(%arg0: i32, %arg1: i32) -> (i32, i32) {
    %c0_i32 = arith.constant 0 : i32
    %c0_i32_0 = arith.constant 0 : i32
    %c0_i32_1 = arith.constant 0 : i32
    return %c0_i32, %c0_i32_0 : i32, i32
  }
  func.func @transform_4(%arg0: i32, %arg1: i32) -> (i32, i32) {
    %c0_i32 = arith.constant 0 : i32
    %c0_i32_0 = arith.constant 0 : i32
    %c0_i32_1 = arith.constant 0 : i32
    return %c0_i32, %c0_i32_0 : i32, i32
  }
  func.func @transform_5(%arg0: i32, %arg1: i32) -> (i32, i32, i32) {
    %c0_i32 = arith.constant 0 : i32
    %c0_i32_0 = arith.constant 0 : i32
    return %arg0, %c0_i32, %arg1 : i32, i32, i32
  }
}

module attributes {stable_mosaic.version = 11 : i64} {
  func.func @_spectral_kernel(%arg0: i32, %arg1: memref<24x2x64xf32, #tpu.memory_space<vmem>>, %arg2: memref<24x64x64xbf16, #tpu.memory_space<vmem>>, %arg3: memref<24x2x64xf32, #tpu.memory_space<vmem>>) attributes {dimension_semantics = [#tpu.dimension_semantics<parallel>], iteration_bounds = array<i64: 2>, scalar_prefetch = 0 : i64, scratch_operands = 0 : i64, tpu.core_type = #tpu.core_type<tc>, window_params = [{transform_indices = @transform_0, window_bounds = array<i64: 24, 2, 64>}, {transform_indices = @transform_1, window_bounds = array<i64: 24, 64, 64>}, {transform_indices = @transform_2, window_bounds = array<i64: 24, 2, 64>}]} {
    %c0 = arith.constant 0 : index
    %c0_0 = arith.constant 0 : index
    %c0_1 = arith.constant 0 : index
    %0 = vector.load %arg1[%c0, %c0_0, %c0_1] : memref<24x2x64xf32, #tpu.memory_space<vmem>>, vector<24x2x64xf32>
    %1 = arith.truncf %0 : vector<24x2x64xf32> to vector<24x2x64xbf16>
    %c0_2 = arith.constant 0 : index
    %c0_3 = arith.constant 0 : index
    %c0_4 = arith.constant 0 : index
    %2 = vector.load %arg2[%c0_2, %c0_3, %c0_4] : memref<24x64x64xbf16, #tpu.memory_space<vmem>>, vector<24x64x64xbf16>
    "tpu.trace_start"() <{level = 10 : i32, message = "mbi,mio->mbo"}> : () -> ()
    %cst = arith.constant dense<0.000000e+00> : vector<24x2x64xf32>
    %3 = tpu.matmul %1, %2, %cst {dimension_numbers = #tpu.dot_dimension_numbers<[2], [1], [1], [2], [0, 0, 0, 1, 1, 2], [0], [0]>} : vector<24x2x64xbf16>, vector<24x64x64xbf16>, vector<24x2x64xf32> -> vector<24x2x64xf32>
    "tpu.trace_stop"() : () -> ()
    %c0_5 = arith.constant 0 : index
    %c0_6 = arith.constant 0 : index
    %c0_7 = arith.constant 0 : index
    %4 = vector.load %arg3[%c0_5, %c0_6, %c0_7] : memref<24x2x64xf32, #tpu.memory_space<vmem>>, vector<24x2x64xf32>
    tpu.vector_store %arg3[%c0_5, %c0_6, %c0_7], %3 {strides = array<i32>} : memref<24x2x64xf32, #tpu.memory_space<vmem>>, vector<24x2x64xf32>,
    return
  }
  func.func @transform_0(%arg0: i32) -> (i32, i32, i32) {
    %c0_i32 = arith.constant 0 : i32
    %c0_i32_0 = arith.constant 0 : i32
    %c0_i32_1 = arith.constant 0 : i32
    return %arg0, %c0_i32, %c0_i32_0 : i32, i32, i32
  }
  func.func @transform_1(%arg0: i32) -> (i32, i32, i32) {
    %c0_i32 = arith.constant 0 : i32
    %c0_i32_0 = arith.constant 0 : i32
    %c0_i32_1 = arith.constant 0 : i32
    return %arg0, %c0_i32, %c0_i32_0 : i32, i32, i32
  }
  func.func @transform_2(%arg0: i32) -> (i32, i32, i32) {
    %c0_i32 = arith.constant 0 : i32
    %c0_i32_0 = arith.constant 0 : i32
    %c0_i32_1 = arith.constant 0 : i32
    return %arg0, %c0_i32, %c0_i32_0 : i32, i32, i32
  }
}

module attributes {stable_mosaic.version = 11 : i64} {
  func.func @_cf_linear_kernel(%arg0: i32, %arg1: i32, %arg2: memref<1x32x2304xf32, #tpu.memory_space<vmem>>, %arg3: memref<32x32xbf16, #tpu.memory_space<vmem>>, %arg4: memref<1x32x2304xf32, #tpu.memory_space<vmem>>) attributes {dimension_semantics = [#tpu.dimension_semantics<parallel>, #tpu.dimension_semantics<parallel>], iteration_bounds = array<i64: 2, 1>, scalar_prefetch = 0 : i64, scratch_operands = 0 : i64, tpu.core_type = #tpu.core_type<tc>, window_params = [{transform_indices = @transform_0, window_bounds = array<i64: 1, 32, 2304>}, {pipeline_mode = #tpu.pipeline_mode<synchronous>, transform_indices = @transform_1, window_bounds = array<i64: 32, 32>}, {transform_indices = @transform_2, window_bounds = array<i64: 1, 32, 2304>}]} {
    %c0 = arith.constant 0 : index
    %c0_0 = arith.constant 0 : index
    %c0_1 = arith.constant 0 : index
    %0 = vector.load %arg2[%c0, %c0_0, %c0_1] : memref<1x32x2304xf32, #tpu.memory_space<vmem>>, vector<1x32x2304xf32>
    %1 = vector.shape_cast %0 : vector<1x32x2304xf32> to vector<32x2304xf32>
    %2 = arith.truncf %1 : vector<32x2304xf32> to vector<32x2304xbf16>
    %c0_2 = arith.constant 0 : index
    %c0_3 = arith.constant 0 : index
    %3 = vector.load %arg3[%c0_2, %c0_3] : memref<32x32xbf16, #tpu.memory_space<vmem>>, vector<32x32xbf16>
    %cst = arith.constant dense<0.000000e+00> : vector<32x2304xf32>
    %4 = tpu.matmul %3, %2, %cst {dimension_numbers = #tpu.dot_dimension_numbers<[1], [0], [0], [1], [0, 0, 1, 1], [], []>} : vector<32x32xbf16>, vector<32x2304xbf16>, vector<32x2304xf32> -> vector<32x2304xf32>
    %c0_4 = arith.constant 0 : index
    %c0_5 = arith.constant 0 : index
    %c0_6 = arith.constant 0 : index
    %5 = vector.load %arg4[%c0_4, %c0_5, %c0_6] : memref<1x32x2304xf32, #tpu.memory_space<vmem>>, vector<1x32x2304xf32>
    %6 = vector.shape_cast %5 : vector<1x32x2304xf32> to vector<32x2304xf32>
    %7 = vector.shape_cast %4 : vector<32x2304xf32> to vector<1x32x2304xf32>
    tpu.vector_store %arg4[%c0_4, %c0_5, %c0_6], %7 {strides = array<i32>} : memref<1x32x2304xf32, #tpu.memory_space<vmem>>, vector<1x32x2304xf32>,
    return
  }
  func.func @transform_0(%arg0: i32, %arg1: i32) -> (i32, i32, i32) {
    %c0_i32 = arith.constant 0 : i32
    %c0_i32_0 = arith.constant 0 : i32
    return %arg0, %c0_i32, %arg1 : i32, i32, i32
  }
  func.func @transform_1(%arg0: i32, %arg1: i32) -> (i32, i32) {
    %c0_i32 = arith.constant 0 : i32
    %c0_i32_0 = arith.constant 0 : i32
    %c0_i32_1 = arith.constant 0 : i32
    return %c0_i32, %c0_i32_0 : i32, i32
  }
  func.func @transform_2(%arg0: i32, %arg1: i32) -> (i32, i32, i32) {
    %c0_i32 = arith.constant 0 : i32
    %c0_i32_0 = arith.constant 0 : i32
    return %arg0, %c0_i32, %arg1 : i32, i32, i32
  }
}

module attributes {stable_mosaic.version = 11 : i64} {
  func.func @_cf_gelu_kernel(%arg0: i32, %arg1: i32, %arg2: memref<1x32x2048xf32, #tpu.memory_space<vmem>>, %arg3: memref<1x32x2048xf32, #tpu.memory_space<vmem>>) attributes {dimension_semantics = [#tpu.dimension_semantics<parallel>, #tpu.dimension_semantics<parallel>], iteration_bounds = array<i64: 2, 1>, scalar_prefetch = 0 : i64, scratch_operands = 0 : i64, tpu.core_type = #tpu.core_type<tc>, window_params = [{transform_indices = @transform_0, window_bounds = array<i64: 1, 32, 2048>}, {transform_indices = @transform_1, window_bounds = array<i64: 1, 32, 2048>}]} {
    %c0 = arith.constant 0 : index
    %c0_0 = arith.constant 0 : index
    %c0_1 = arith.constant 0 : index
    %0 = vector.load %arg2[%c0, %c0_0, %c0_1] : memref<1x32x2048xf32, #tpu.memory_space<vmem>>, vector<1x32x2048xf32>
    %cst = arith.constant 5.000000e-01 : f32
    %1 = vector.broadcast %cst : f32 to vector<1x32x2048xf32>
    %2 = arith.mulf %1, %0 : vector<1x32x2048xf32>
    %cst_2 = arith.constant 0.707106769 : f32
    %3 = vector.broadcast %cst_2 : f32 to vector<1x32x2048xf32>
    %4 = arith.mulf %0, %3 : vector<1x32x2048xf32>
    %5 = math.erf %4 : vector<1x32x2048xf32>
    %cst_3 = arith.constant 1.000000e+00 : f32
    %6 = vector.broadcast %cst_3 : f32 to vector<1x32x2048xf32>
    %7 = arith.addf %6, %5 : vector<1x32x2048xf32>
    %8 = arith.mulf %2, %7 : vector<1x32x2048xf32>
    %c0_4 = arith.constant 0 : index
    %c0_5 = arith.constant 0 : index
    %c0_6 = arith.constant 0 : index
    %9 = vector.load %arg3[%c0_4, %c0_5, %c0_6] : memref<1x32x2048xf32, #tpu.memory_space<vmem>>, vector<1x32x2048xf32>
    tpu.vector_store %arg3[%c0_4, %c0_5, %c0_6], %8 {strides = array<i32>} : memref<1x32x2048xf32, #tpu.memory_space<vmem>>, vector<1x32x2048xf32>,
    return
  }
  func.func @transform_0(%arg0: i32, %arg1: i32) -> (i32, i32, i32) {
    %c0_i32 = arith.constant 0 : i32
    %c0_i32_0 = arith.constant 0 : i32
    return %arg0, %c0_i32, %arg1 : i32, i32, i32
  }
  func.func @transform_1(%arg0: i32, %arg1: i32) -> (i32, i32, i32) {
    %c0_i32 = arith.constant 0 : i32
    %c0_i32_0 = arith.constant 0 : i32
    return %arg0, %c0_i32, %arg1 : i32, i32, i32
  }
}

module attributes {stable_mosaic.version = 11 : i64} {
  func.func @_cf_mlp2_kernel(%arg0: i32, %arg1: i32, %arg2: memref<1x32x2048xf32, #tpu.memory_space<vmem>>, %arg3: memref<32x32xbf16, #tpu.memory_space<vmem>>, %arg4: memref<32x1xf32, #tpu.memory_space<vmem>>, %arg5: memref<4x32xbf16, #tpu.memory_space<vmem>>, %arg6: memref<4x1xf32, #tpu.memory_space<vmem>>, %arg7: memref<1x4x2048xf32, #tpu.memory_space<vmem>>) attributes {dimension_semantics = [#tpu.dimension_semantics<parallel>, #tpu.dimension_semantics<parallel>], iteration_bounds = array<i64: 2, 1>, scalar_prefetch = 0 : i64, scratch_operands = 0 : i64, tpu.core_type = #tpu.core_type<tc>, window_params = [{transform_indices = @transform_0, window_bounds = array<i64: 1, 32, 2048>}, {pipeline_mode = #tpu.pipeline_mode<synchronous>, transform_indices = @transform_1, window_bounds = array<i64: 32, 32>}, {pipeline_mode = #tpu.pipeline_mode<synchronous>, transform_indices = @transform_2, window_bounds = array<i64: 32, 1>}, {pipeline_mode = #tpu.pipeline_mode<synchronous>, transform_indices = @transform_3, window_bounds = array<i64: 4, 32>}, {pipeline_mode = #tpu.pipeline_mode<synchronous>, transform_indices = @transform_4, window_bounds = array<i64: 4, 1>}, {transform_indices = @transform_5, window_bounds = array<i64: 1, 4, 2048>}]} {
    %c0 = arith.constant 0 : index
    %c0_0 = arith.constant 0 : index
    %c0_1 = arith.constant 0 : index
    %0 = vector.load %arg2[%c0, %c0_0, %c0_1] : memref<1x32x2048xf32, #tpu.memory_space<vmem>>, vector<1x32x2048xf32>
    %1 = vector.shape_cast %0 : vector<1x32x2048xf32> to vector<32x2048xf32>
    %2 = arith.truncf %1 : vector<32x2048xf32> to vector<32x2048xbf16>
    %c0_2 = arith.constant 0 : index
    %c0_3 = arith.constant 0 : index
    %3 = vector.load %arg3[%c0_2, %c0_3] : memref<32x32xbf16, #tpu.memory_space<vmem>>, vector<32x32xbf16>
    %cst = arith.constant dense<0.000000e+00> : vector<32x2048xf32>
    %4 = tpu.matmul %3, %2, %cst {dimension_numbers = #tpu.dot_dimension_numbers<[1], [0], [0], [1], [0, 0, 1, 1], [], []>} : vector<32x32xbf16>, vector<32x2048xbf16>, vector<32x2048xf32> -> vector<32x2048xf32>
    %c0_4 = arith.constant 0 : index
    %c0_5 = arith.constant 0 : index
    %5 = vector.load %arg4[%c0_4, %c0_5] : memref<32x1xf32, #tpu.memory_space<vmem>>, vector<32x1xf32>
    %6 = vector.broadcast %5 : vector<32x1xf32> to vector<32x2048xf32>
    %7 = arith.addf %4, %6 : vector<32x2048xf32>
    %cst_6 = arith.constant 5.000000e-01 : f32
    %8 = vector.broadcast %cst_6 : f32 to vector<32x2048xf32>
    %9 = arith.mulf %8, %7 : vector<32x2048xf32>
    %cst_7 = arith.constant 0.707106769 : f32
    %10 = vector.broadcast %cst_7 : f32 to vector<32x2048xf32>
    %11 = arith.mulf %7, %10 : vector<32x2048xf32>
    %12 = math.erf %11 : vector<32x2048xf32>
    %cst_8 = arith.constant 1.000000e+00 : f32
    %13 = vector.broadcast %cst_8 : f32 to vector<32x2048xf32>
    %14 = arith.addf %13, %12 : vector<32x2048xf32>
    %15 = arith.mulf %9, %14 : vector<32x2048xf32>
    %16 = arith.truncf %15 : vector<32x2048xf32> to vector<32x2048xbf16>
    %c0_9 = arith.constant 0 : index
    %c0_10 = arith.constant 0 : index
    %17 = vector.load %arg5[%c0_9, %c0_10] : memref<4x32xbf16, #tpu.memory_space<vmem>>, vector<4x32xbf16>
    %cst_11 = arith.constant dense<0.000000e+00> : vector<4x2048xf32>
    %18 = tpu.matmul %17, %16, %cst_11 {dimension_numbers = #tpu.dot_dimension_numbers<[1], [0], [0], [1], [0, 0, 1, 1], [], []>} : vector<4x32xbf16>, vector<32x2048xbf16>, vector<4x2048xf32> -> vector<4x2048xf32>
    %c0_12 = arith.constant 0 : index
    %c0_13 = arith.constant 0 : index
    %19 = vector.load %arg6[%c0_12, %c0_13] : memref<4x1xf32, #tpu.memory_space<vmem>>, vector<4x1xf32>
    %20 = vector.broadcast %19 : vector<4x1xf32> to vector<4x2048xf32>
    %21 = arith.addf %18, %20 : vector<4x2048xf32>
    %c0_14 = arith.constant 0 : index
    %c0_15 = arith.constant 0 : index
    %c0_16 = arith.constant 0 : index
    %22 = vector.load %arg7[%c0_14, %c0_15, %c0_16] : memref<1x4x2048xf32, #tpu.memory_space<vmem>>, vector<1x4x2048xf32>
    %23 = vector.shape_cast %22 : vector<1x4x2048xf32> to vector<4x2048xf32>
    %24 = vector.shape_cast %21 : vector<4x2048xf32> to vector<1x4x2048xf32>
    tpu.vector_store %arg7[%c0_14, %c0_15, %c0_16], %24 {strides = array<i32>} : memref<1x4x2048xf32, #tpu.memory_space<vmem>>, vector<1x4x2048xf32>,
    return
  }
  func.func @transform_0(%arg0: i32, %arg1: i32) -> (i32, i32, i32) {
    %c0_i32 = arith.constant 0 : i32
    %c0_i32_0 = arith.constant 0 : i32
    return %arg0, %c0_i32, %arg1 : i32, i32, i32
  }
  func.func @transform_1(%arg0: i32, %arg1: i32) -> (i32, i32) {
    %c0_i32 = arith.constant 0 : i32
    %c0_i32_0 = arith.constant 0 : i32
    %c0_i32_1 = arith.constant 0 : i32
    return %c0_i32, %c0_i32_0 : i32, i32
  }
  func.func @transform_2(%arg0: i32, %arg1: i32) -> (i32, i32) {
    %c0_i32 = arith.constant 0 : i32
    %c0_i32_0 = arith.constant 0 : i32
    %c0_i32_1 = arith.constant 0 : i32
    return %c0_i32, %c0_i32_0 : i32, i32
  }
  func.func @transform_3(%arg0: i32, %arg1: i32) -> (i32, i32) {
    %c0_i32 = arith.constant 0 : i32
    %c0_i32_0 = arith.constant 0 : i32
    %c0_i32_1 = arith.constant 0 : i32
    return %c0_i32, %c0_i32_0 : i32, i32
  }
  func.func @transform_4(%arg0: i32, %arg1: i32) -> (i32, i32) {
    %c0_i32 = arith.constant 0 : i32
    %c0_i32_0 = arith.constant 0 : i32
    %c0_i32_1 = arith.constant 0 : i32
    return %c0_i32, %c0_i32_0 : i32, i32
  }
  func.func @transform_5(%arg0: i32, %arg1: i32) -> (i32, i32, i32) {
    %c0_i32 = arith.constant 0 : i32
    %c0_i32_0 = arith.constant 0 : i32
    return %arg0, %c0_i32, %arg1 : i32, i32, i32
  }
}

</mosaic_0001>

<bundles_post_ra>
// kernel: fno3d_forward.7
= control target key start
LH: loop header
LB: loop body
LE: loop exit
PB: predicated region body
PF: predicated region fallthrough
CT: control target
= control target key end

     0   :  { %s2464_s18 = smov 0   ;;  %s2466_s19 = smov 0   ;;  %s3557_s0 = inlined_call_operand.vmem [shape: f32[2,4,2560], index: 0, kind: input, shape index: {}]   ;;  %s3558_s1 = inlined_call_operand.vmem [shape: bf16[32,4], index: 1, kind: input, shape index: {}]   ;;  %s3559_s2 = inlined_call_operand.vmem [shape: f32[32,1], index: 2, kind: input, shape index: {}]   ;;  %s3560_s3 = inlined_call_operand.vmem [shape: bf16[32,32], index: 3, kind: input, shape index: {}]   ;;  %s3561_s4 = inlined_call_operand.vmem [shape: f32[32,1], index: 4, kind: input, shape index: {}]   ;;  %s3562_s5 = inlined_call_operand.vmem [shape: f32[2,32,2560], index: 5, kind: output, shape index: {}]  }
   0x1   :  { %s2468_s20 = smov 0  }
   0x2 LB: > { %s27_s21 = sadd.s32 1, %s2427_s19  ;;  %p2147_p0 = scmp.ge.s32.totalorder %s2431_s20, 1  ;;  %s2431_s20 = sphi %s2468_s20, %s15_s20   ;;  %s2427_s19 = sphi %s2466_s19, %s3607_s19   ;;  %s2423_s18 = sphi %s2464_s18, %s3606_s18  }
   0x3   : > { %p29_p1 = scmp.ge.s32.totalorder %s27_s21, 2  ;;  %p208_p2 = scmp.lt.s32.totalorder %s2431_s20, 3 }
   0x5   : > { %s3609_s21 = smov (%p29_p1, %s27_s21), 0  ;;  %p209_p3 = pnand %p2147_p0, %p208_p2 }
   0x7   : > { %212 = sbr.rel (%p209_p3) target bundleno = 613 (0x265), region = 40 }
   0xe   : > { %p245_p4 = scmp.lt.s32.totalorder %s2423_s18, 1  ;;  %v3563_v0 = vmov 0   ;;  %v329_v1 = vld [vmem:[%s3559_s2] sm:$0xff]  ;;  %v331_v2 = vld [vmem:[%s3559_s2 + $0x10] sm:$0xff]  ;;  %v330_v3 = vld [vmem:[%s3559_s2 + $0x8] sm:$0xff]  ;;  %vm370_vm0 = vcmask 1041408  }
   0xf   : > { %463 = vmatprep.mubr.bf16.mxu0 %v3563_v0  ;;  %516 = vmatprep.mubr.bf16.mxu1 %v3563_v0  ;;  %v332_v4 = vld [vmem:[%s3559_s2 + $0x18] sm:$0xff]  ;;  %v1405_v13 = vld [vmem:[%s3561_s4] sm:$0xff]  ;;  %v1407_v29 = vld [vmem:[%s3561_s4 + $0x10] sm:$0xff]  ;;  %vm363_vm1 = vcmask 31744   ;;  %vm1439_vm2 = vcmask 261120  }
  0x10   : > { %s3611_s18 = smov (!%p245_p4, %s2423_s18), 1  ;;  %2233 = vset.pattern.permute.xlu0 %v3563_v0  ;;  %2234 = vset.pattern.permute.xlu1 %v3563_v0  ;;  %v2522_v26 = vld [vmem:[%s3558_s1] sm:$0xff]   ;;  %v1406_v30 = vld [vmem:[%s3561_s4 + $0x8] sm:$0xff]  ;;  %v1408_v35 = vld [vmem:[%s3561_s4 + $0x18] sm:$0xff] }
  0x11   : > { %335 = vperm.xlu0 %2233, %v329_v1   ;;  %s2206_s26 = smul.u32 80, %s3611_s18  ;;  %345 = vperm.xlu1 %2234, %v331_v2   ;;  %v2548_v36 = vld [vmem:[%s3558_s1 + $0x8] sm:$0xff]  }
  0x12   : > { %s2207_s29 = smul.u32 640, %s3611_s18 }
  0x13   : > { %s2504_s8 = scalar_lea.vmem %s3557_s0, %s2206_s26 }
  0x14   : > { %v265_v5 = vld [vmem:[%s2504_s8] sm:$0xff]  ;;  %v266_v6 = vld [vmem:[%s2504_s8 + $0x8] sm:$0xff]  ;;  %v267_v7 = vld [vmem:[%s2504_s8 + $0x10] sm:$0xff]  ;;  %s3378_s7 = scalar_lea.vmem %s3562_s5, %s2207_s29 }
  0x15   : > { %340 = vperm.xlu0 %2233, %v330_v3   ;;  %v285_v8 = vcombine.high %v265_v5, %v265_v5  ;;  %v286_v9 = vcombine.high %v266_v6, %v266_v6  ;;  %v305_v10 = vpack.c.bf16 %v265_v5, %v265_v5  ;;  %v307_v11 = vpack.c.bf16 %v266_v6, %v266_v6  ;;  %v268_v12 = vld [vmem:[%s2504_s8 + $0x18] sm:$0xff]  ;;  %v269_v18 = vld [vmem:[%s2504_s8 + $0x20] sm:$0xff]  ;;  %v270_v19 = vld [vmem:[%s2504_s8 + $0x28] sm:$0xff] }
  0x16   : > { %350 = vperm.xlu1 %2234, %v332_v4   ;;  %v287_v14 = vcombine.high %v267_v7, %v267_v7  ;;  %v288_v15 = vcombine.high %v268_v12, %v268_v12  ;;  %v309_v16 = vpack.c.bf16 %v267_v7, %v267_v7  ;;  %v311_v17 = vpack.c.bf16 %v268_v12, %v268_v12  ;;  %v271_v37 = vld [vmem:[%s2504_s8 + $0x30] sm:$0xff]  ;;  %v272_v38 = vld [vmem:[%s2504_s8 + $0x38] sm:$0xff]  ;;  %v273_v47 = vld [vmem:[%s2504_s8 + $0x40] sm:$0xff] }
  0x17   : > { %v306_v20 = vpack.c.bf16 %v285_v8, %v285_v8  ;;  %v308_v21 = vpack.c.bf16 %v286_v9, %v286_v9  ;;  %v372_v22 = vsel %vm370_vm0, %v305_v10, 0  ;;  %v378_v23 = vsel %vm370_vm0, %v307_v11, 0  ;;  %v274_v48 = vld [vmem:[%s2504_s8 + $0x48] sm:$0xff] }
  0x18   : > { %v310_v24 = vpack.c.bf16 %v287_v14, %v287_v14  ;;  %v312_v25 = vpack.c.bf16 %v288_v15, %v288_v15  ;;  %v289_v27 = vcombine.high %v269_v18, %v269_v18  ;;  %v290_v28 = vcombine.high %v270_v19, %v270_v19 }
  0x19   : > { %1411 = vperm.xlu0 %2233, %v1405_v13   ;;  %2152 = vmatprep.subr.msk.bf16.mxu0 %vm370_vm0, %v306_v20  ;;  %v384_v31 = vsel %vm370_vm0, %v309_v16, 0  ;;  %v390_v32 = vsel %vm370_vm0, %v311_v17, 0  ;;  %v313_v39 = vpack.c.bf16 %v269_v18, %v269_v18  ;;  %v315_v40 = vpack.c.bf16 %v270_v19, %v270_v19 }
  0x1a   : > { %2155 = vmatprep.subr.msk.bf16.mxu1 %vm370_vm0, %v308_v21  ;;  %432 = vmatpush1.bf16.msra.mxu0 %v372_v22  ;;  %v314_v33 = vpack.c.bf16 %v289_v27, %v289_v27  ;;  %v316_v34 = vpack.c.bf16 %v290_v28, %v290_v28  ;;  %v291_v41 = vcombine.high %v271_v37, %v271_v37 }
  0x1b   : > { %485 = vmatpush1.bf16.msra.mxu1 %v378_v23  ;;  %2158 = vmatprep.subr.msk.bf16.mxu0 %vm370_vm0, %v310_v24  ;;  %v292_v42 = vcombine.high %v272_v38, %v272_v38  ;;  %v396_v43 = vsel %vm370_vm0, %v313_v39, 0  ;;  %v402_v44 = vsel %vm370_vm0, %v315_v40, 0  ;;  %v317_v49 = vpack.c.bf16 %v271_v37, %v271_v37 }
  0x1c   : > { %2161 = vmatprep.subr.msk.bf16.mxu1 %vm370_vm0, %v312_v25  ;;  %1416 = vperm.xlu1 %2234, %v1406_v30   ;;  %v318_v45 = vpack.c.bf16 %v291_v41, %v291_v41  ;;  %v319_v50 = vpack.c.bf16 %v272_v38, %v272_v38  ;;  %v293_v51 = vcombine.high %v273_v47, %v273_v47 }
  0x1d   : > { %1421 = vperm.xlu0 %2233, %v1407_v29   ;;  %2153 = vmatmul.mubr.msk.bf16.vlgmr.msra.gmra.mrb[0].mxu0 %vm363_vm1, %v2522_v26  ;;  %v320_v46 = vpack.c.bf16 %v292_v42, %v292_v42  ;;  %v294_v52 = vcombine.high %v274_v48, %v274_v48  ;;  %v408_v53 = vsel %vm370_vm0, %v317_v49, 0  ;;  %v321_v57 = vpack.c.bf16 %v273_v47, %v273_v47 }
  0x1e   : > { %2156 = vmatmul.mubr.msk.bf16.vlgmr.msra.gmra.mrb[0].mxu1 %vm363_vm1, %v2522_v26  ;;  %538 = vmatpush1.bf16.msra.mxu0 %v384_v31  ;;  %v414_v54 = vsel %vm370_vm0, %v319_v50, 0  ;;  %v322_v55 = vpack.c.bf16 %v293_v51, %v293_v51  ;;  %v323_v58 = vpack.c.bf16 %v274_v48, %v274_v48 }
  0x1f   : > { %591 = vmatpush1.bf16.msra.mxu1 %v390_v32  ;;  %473 = vmatprep.mubr.bf16.mxu0 %v3563_v0  ;;  %v324_v56 = vpack.c.bf16 %v294_v52, %v294_v52  ;;  %v420_v59 = vsel %vm370_vm0, %v321_v57, 0 }
  0x20   : > { %526 = vmatprep.mubr.bf16.mxu1 %v3563_v0  ;;  %2164 = vmatprep.subr.msk.bf16.mxu0 %vm370_vm0, %v314_v33  ;;  %v426_v60 = vsel %vm370_vm0, %v323_v58, 0 }
  0x21   : > { %2167 = vmatprep.subr.msk.bf16.mxu1 %vm370_vm0, %v316_v34  ;;  %1426 = vperm.xlu1 %2234, %v1408_v35  }
  0x25   : > { %2154 = vmatmul.mubr.msk.bf16.gmra.mrb[4].mxu0 %vm363_vm1, %v2548_v36 }
  0x26   : > { %2157 = vmatmul.mubr.msk.bf16.gmra.mrb[4].mxu1 %vm363_vm1, %v2548_v36  ;;  %569 = vmatprep.mubr.bf16.mxu0 %v3563_v0 }
  0x27   : > { %622 = vmatprep.mubr.bf16.mxu1 %v3563_v0 }
  0x2d   : > { %2159 = vmatmul.mubr.msk.bf16.vlgmr.msra.gmra.mrb[8].mxu0 %vm363_vm1, %v2522_v26 }
  0x2e   : > { %2162 = vmatmul.mubr.msk.bf16.vlgmr.msra.gmra.mrb[8].mxu1 %vm363_vm1, %v2522_v26  ;;  %644 = vmatpush1.bf16.msra.mxu0 %v396_v43 }
  0x2f   : > { %697 = vmatpush1.bf16.msra.mxu1 %v402_v44  ;;  %579 = vmatprep.mubr.bf16.mxu0 %v3563_v0 }
  0x30   : > { %632 = vmatprep.mubr.bf16.mxu1 %v3563_v0  ;;  %2170 = vmatprep.subr.msk.bf16.mxu0 %vm370_vm0, %v318_v45 }
  0x31   : > { %2173 = vmatprep.subr.msk.bf16.mxu1 %vm370_vm0, %v320_v46 }
  0x35   : > { %2160 = vmatmul.mubr.msk.bf16.gmra.mrb[12].mxu0 %vm363_vm1, %v2548_v36 }
  0x36   : > { %2163 = vmatmul.mubr.msk.bf16.gmra.mrb[12].mxu1 %vm363_vm1, %v2548_v36  ;;  %675 = vmatprep.mubr.bf16.mxu0 %v3563_v0 }
  0x37   : > { %728 = vmatprep.mubr.bf16.mxu1 %v3563_v0 }
  0x3d   : > { %2165 = vmatmul.mubr.msk.bf16.vlgmr.msra.gmra.mrb[16].mxu0 %vm363_vm1, %v2522_v26 }
  0x3e   : > { %2168 = vmatmul.mubr.msk.bf16.vlgmr.msra.gmra.mrb[16].mxu1 %vm363_vm1, %v2522_v26  ;;  %750 = vmatpush1.bf16.msra.mxu0 %v408_v53 }
  0x3f   : > { %803 = vmatpush1.bf16.msra.mxu1 %v414_v54  ;;  %685 = vmatprep.mubr.bf16.mxu0 %v3563_v0 }
  0x40   : > { %738 = vmatprep.mubr.bf16.mxu1 %v3563_v0  ;;  %2176 = vmatprep.subr.msk.bf16.mxu0 %vm370_vm0, %v322_v55 }
  0x41   : > { %2179 = vmatprep.subr.msk.bf16.mxu1 %vm370_vm0, %v324_v56 }
  0x45   : > { %2166 = vmatmul.mubr.msk.bf16.gmra.mrb[20].mxu0 %vm363_vm1, %v2548_v36 }
  0x46   : > { %2169 = vmatmul.mubr.msk.bf16.gmra.mrb[20].mxu1 %vm363_vm1, %v2548_v36  ;;  %781 = vmatprep.mubr.bf16.mxu0 %v3563_v0 }
  0x47   : > { %834 = vmatprep.mubr.bf16.mxu1 %v3563_v0 }
  0x4d   : > { %2171 = vmatmul.mubr.msk.bf16.vlgmr.msra.gmra.mrb[24].mxu0 %vm363_vm1, %v2522_v26 }
  0x4e   : > { %2174 = vmatmul.mubr.msk.bf16.vlgmr.msra.gmra.mrb[24].mxu1 %vm363_vm1, %v2522_v26  ;;  %856 = vmatpush1.bf16.msra.mxu0 %v420_v59 }
  0x4f   : > { %909 = vmatpush1.bf16.msra.mxu1 %v426_v60  ;;  %791 = vmatprep.mubr.bf16.mxu0 %v3563_v0 }
  0x50   : > { %844 = vmatprep.mubr.bf16.mxu1 %v3563_v0 }
  0x55   : > { %2172 = vmatmul.mubr.msk.bf16.gmra.mrb[28].mxu0 %vm363_vm1, %v2548_v36 }
  0x56   : > { %2175 = vmatmul.mubr.msk.bf16.gmra.mrb[28].mxu1 %vm363_vm1, %v2548_v36  ;;  %887 = vmatprep.mubr.bf16.mxu0 %v3563_v0 }
  0x57   : > { %940 = vmatprep.mubr.bf16.mxu1 %v3563_v0 }
  0x5d   : > { %2177 = vmatmul.mubr.msk.bf16.vlgmr.msra.gmra.mrb[32].mxu0 %vm363_vm1, %v2522_v26 }
  0x5e   : > { %2180 = vmatmul.mubr.msk.bf16.vlgmr.msra.gmra.mrb[32].mxu1 %vm363_vm1, %v2522_v26  ;;  %897 = vmatprep.mubr.bf16.mxu0 %v3563_v0 }
  0x5f   : > { %950 = vmatprep.mubr.bf16.mxu1 %v3563_v0 }
  0x65   : > { %2178 = vmatmul.mubr.msk.bf16.gmra.mrb[36].mxu0 %vm363_vm1, %v2548_v36 }
  0x66   : > { %2181 = vmatmul.mubr.msk.bf16.gmra.mrb[36].mxu1 %vm363_vm1, %v2548_v36  ;;  %1478 = vmatprep.mubr.bf16.mxu0 %v3563_v0 }
  0x67   : > { %1531 = vmatprep.mubr.bf16.mxu1 %v3563_v0 }
  0x90   : > { %v2618_v61 = vpop.permute.xlu0 %335  ;;  %v2630_v20 = vpop.permute.xlu1 %345 }
  0x94   : > { %v2624_v11 = vpop.permute.xlu0 %340 }
  0x95   : > { %v2636_v40 = vpop.permute.xlu1 %350 }
  0xf0   : > { %v465_v62 = vpop.f32.mrb[0].mxu0 }
  0xf1   : > { %v518_v63 = vpop.f32.mrb[0].mxu1  ;;  %v466_v1 = vadd.f32 %v465_v62, %v2618_v61  ;;  %v467_v3 = vpop.f32.mrb[1].mxu0 }
  0xf2   : > { %v519_v2 = vadd.f32 %v518_v63, %v2618_v61  ;;  %v520_v4 = vpop.f32.mrb[1].mxu1  ;;  %v468_v5 = vadd.f32 %v467_v3, %v2618_v61  ;;  %v469_v7 = vpop.f32.mrb[2].mxu0 }
  0xf3   : > { %v521_v6 = vadd.f32 %v520_v4, %v2618_v61  ;;  %v522_v8 = vpop.f32.mrb[2].mxu1  ;;  %v1041_v9 = vmul.f32 0.70710677, %v466_v1  ;;  %v470_v14 = vadd.f32 %v469_v7, %v2624_v11  ;;  %v471_v16 = vpop.f32.mrb[3].mxu0  ;;  %v961_v36 = vmul.f32 0.5, %v466_v1 }
  0xf4   : > { %v1043_v10 = vmul.f32 0.70710677, %v519_v2  ;;  %v1042_v12 = vmul.f32 0.70710677, %v468_v5  ;;  %v523_v15 = vadd.f32 %v522_v8, %v2624_v11  ;;  %v524_v17 = vpop.f32.mrb[3].mxu1  ;;  %v472_v18 = vadd.f32 %v471_v16, %v2624_v11 }
  0xf5   : > { %v1044_v13 = vmul.f32 0.70710677, %v521_v6  ;;  %2249 = verf.f32 %v1041_v9  ;;  %v525_v19 = vadd.f32 %v524_v17, %v2624_v11  ;;  %v1061_v21 = vmul.f32 0.70710677, %v470_v14 }
  0xf6   : > { %2251 = verf.f32 %v1043_v10  ;;  %v1063_v22 = vmul.f32 0.70710677, %v523_v15  ;;  %v1062_v23 = vmul.f32 0.70710677, %v472_v18  ;;  %v963_v41 = vmul.f32 0.5, %v519_v2 }
  0xf7   : > { %2253 = verf.f32 %v1042_v12  ;;  %v1064_v25 = vmul.f32 0.70710677, %v525_v19  ;;  %v2638_v42 = vmul.f32 0.5, %v468_v5  ;;  %v2645_v48 = vmul.f32 0.5, %v521_v6 }
  0xf8   : > { %2255 = verf.f32 %v1044_v13  ;;  %v475_v24 = vpop.f32.mrb[4].mxu0  ;;  %v981_v49 = vmul.f32 0.5, %v470_v14  ;;  %v983_v50 = vmul.f32 0.5, %v523_v15  ;;  %v2647_v51 = vmul.f32 0.5, %v472_v18 }
  0xf9   : > { %2257 = verf.f32 %v1061_v21  ;;  %v476_v26 = vadd.f32 %v475_v24, %v2630_v20  ;;  %v528_v27 = vpop.f32.mrb[4].mxu1  ;;  %v477_v28 = vpop.f32.mrb[5].mxu0  ;;  %v2650_v60 = vmul.f32 0.5, %v525_v19 }
  0xfa   : > { %2259 = verf.f32 %v1063_v22  ;;  %v529_v29 = vadd.f32 %v528_v27, %v2630_v20  ;;  %v478_v30 = vadd.f32 %v477_v28, %v2630_v20  ;;  %v530_v31 = vpop.f32.mrb[5].mxu1  ;;  %v479_v32 = vpop.f32.mrb[6].mxu0 }
  0xfb   : > { %2261 = verf.f32 %v1062_v23  ;;  %v1081_v33 = vmul.f32 0.70710677, %v476_v26  ;;  %v532_v34 = vpop.f32.mrb[6].mxu1  ;;  %v481_v35 = vpop.f32.mrb[7].mxu0  ;;  %v531_v38 = vadd.f32 %v530_v31, %v2630_v20  ;;  %v480_v44 = vadd.f32 %v479_v32, %v2636_v40 }
  0xfc   : > { %2263 = verf.f32 %v1064_v25  ;;  %v1083_v37 = vmul.f32 0.70710677, %v529_v29  ;;  %v534_v39 = vpop.f32.mrb[7].mxu1  ;;  %v1082_v43 = vmul.f32 0.70710677, %v478_v30  ;;  %v533_v45 = vadd.f32 %v532_v34, %v2636_v40 }
  0xfd   : > { %2265 = verf.f32 %v1081_v33  ;;  %v2643_v46 = vadd.f32 %v481_v35, %v2636_v40  ;;  %v1084_v53 = vmul.f32 0.70710677, %v531_v38  ;;  %v1101_v54 = vmul.f32 0.70710677, %v480_v44 }
  0xfe   : > { %2267 = verf.f32 %v1083_v37  ;;  %v535_v55 = vadd.f32 %v534_v39, %v2636_v40  ;;  %v1103_v62 = vmul.f32 0.70710677, %v533_v45  ;;  %v2652_v3 = vmul.f32 0.5, %v476_v26 }
  0xff   : > { %v2250_v47 = vpop.eup %2249  ;;  %2269 = verf.f32 %v1082_v43  ;;  %v1102_v4 = vmul.f32 0.70710677, %v2643_v46  ;;  %v2655_v8 = vmul.f32 0.5, %v529_v29  ;;  %v2657_v9 = vmul.f32 0.5, %v478_v30 }
 0x100   : > { %v2252_v52 = vpop.eup %2251  ;;  %v571_v56 = vpop.f32.mrb[8].mxu0  ;;  %v1201_v59 = vadd.f32 1.0, %v2250_v47  ;;  %2271 = verf.f32 %v1101_v54  ;;  %v2659_v10 = vmul.f32 0.5, %v531_v38  ;;  %v1021_v16 = vmul.f32 0.5, %v480_v44 }
 0x101   : > { %v624_v57 = vpop.f32.mrb[8].mxu1  ;;  %v2254_v58 = vpop.eup %2253  ;;  %v1203_v2 = vadd.f32 1.0, %v2252_v52  ;;  %2273 = verf.f32 %v1103_v62  ;;  %v1104_v17 = vmul.f32 0.70710677, %v535_v55  ;;  %v572_v24 = vadd.f32 %v571_v56, %v2618_v61 }
 0x102   : > { %v573_v63 = vpop.f32.mrb[9].mxu0  ;;  %v2256_v1 = vpop.eup %2255  ;;  %2275 = verf.f32 %v1084_v53  ;;  %v2665_v21 = vmul.f32 %v1201_v59, %v961_v36  ;;  %v1202_v22 = vadd.f32 1.0, %v2254_v58  ;;  %v625_v28 = vadd.f32 %v624_v57, %v2618_v61 }
 0x103   : > { %v626_v5 = vpop.f32.mrb[9].mxu1  ;;  %v575_v6 = vpop.f32.mrb[10].mxu0  ;;  %v2668_v26 = vmul.f32 %v1203_v2, %v963_v41  ;;  %2277 = verf.f32 %v1102_v4  ;;  %v1204_v30 = vadd.f32 1.0, %v2256_v1  ;;  %v1045_v32 = vmul.f32 0.70710677, %v572_v24 }
 0x104   : > { %v2258_v7 = vpop.eup %2257  ;;  %v628_v12 = vpop.f32.mrb[10].mxu1  ;;  %2279 = verf.f32 %v1104_v17  ;;  %v1023_v36 = vmul.f32 0.5, %v533_v45  ;;  %v574_v37 = vadd.f32 %v573_v63, %v2618_v61  ;;  %v2692_v45 = vmul.f32 0.5, %v2643_v46 }
 0x105   : > { %v2661_v13 = vpop.f32.mrb[11].mxu0  ;;  %v2260_v14 = vpop.eup %2259  ;;  %v1221_v15 = vadd.f32 1.0, %v2258_v7  ;;  %2281 = verf.f32 %v1045_v32  ;;  %v2694_v52 = vmul.f32 0.5, %v535_v55  ;;  %v1047_v53 = vmul.f32 0.70710677, %v625_v28 }
 0x106   : > { %v2663_v18 = vpop.f32.mrb[11].mxu1  ;;  %v2262_v19 = vpop.eup %2261  ;;  %v1223_v23 = vadd.f32 1.0, %v2260_v14  ;;  %v2701_v58 = vmul.f32 %v1204_v30, %v2645_v48  ;;  %v2703_v62 = vmul.f32 0.5, %v572_v24  ;;  %v1046_v2 = vmul.f32 0.70710677, %v574_v37 }
 0x107   : > { %v2264_v25 = vpop.eup %2263  ;;  %v2670_v27 = vmul.f32 %v1221_v15, %v981_v49  ;;  %v1222_v35 = vadd.f32 1.0, %v2262_v19  ;;  %v576_v4 = vadd.f32 %v575_v6, %v2624_v11  ;;  %v629_v7 = vadd.f32 %v628_v12, %v2624_v11 }
 0x108   : > { %v2266_v29 = vpop.eup %2265  ;;  %v2673_v31 = vmul.f32 %v1223_v23, %v983_v50  ;;  %v2678_v38 = vpop.f32.mrb[12].mxu0  ;;  %v1224_v43 = vadd.f32 1.0, %v2264_v25  ;;  %v2689_v50 = vmul.f32 %v1202_v22, %v2638_v42  ;;  %v627_v42 = vadd.f32 %v626_v5, %v2618_v61 }
 0x109   : > { %v2268_v33 = vpop.eup %2267  ;;  %v1361_v34 = vpack.c.bf16 %v2670_v27, %v2665_v21  ;;  %v2680_v39 = vpop.f32.mrb[12].mxu1  ;;  %v1241_v44 = vadd.f32 1.0, %v2266_v29  ;;  %v2711_v1 = vmul.f32 %v1222_v35, %v2647_v51  ;;  %v2721_v17 = vmul.f32 0.5, %v625_v28 }
 0x10a   : > { %v1363_v41 = vpack.c.bf16 %v2673_v31, %v2668_v26  ;;  %v2684_v47 = vpop.f32.mrb[13].mxu0  ;;  %v2686_v49 = vpop.f32.mrb[13].mxu1  ;;  %v1243_v59 = vadd.f32 1.0, %v2268_v33  ;;  %v2716_v14 = vmul.f32 %v1224_v43, %v2650_v60  ;;  %2283 = verf.f32 %v1047_v53 }
 0x10b   : > { %v2696_v54 = vpop.f32.mrb[14].mxu0  ;;  %v2698_v56 = vpop.f32.mrb[14].mxu1  ;;  %v2719_v15 = vmul.f32 %v1241_v44, %v2652_v3  ;;  %v1065_v51 = vmul.f32 0.70710677, %v576_v4  ;;  %v1048_v12 = vmul.f32 0.70710677, %v627_v42  ;;  %2285 = verf.f32 %v1046_v2 }
 0x10c   : > { %v2270_v57 = vpop.eup %2269  ;;  %v2706_v63 = vpop.f32.mrb[15].mxu0  ;;  %v2724_v24 = vmul.f32 %v1243_v59, %v2655_v8  ;;  %v1067_v25 = vmul.f32 0.70710677, %v629_v7  ;;  %v578_v3 = vadd.f32 %v2661_v13, %v2624_v11  ;;  %v631_v28 = vadd.f32 %v2663_v18, %v2624_v11 }
 0x10d   : > { %v2708_v46 = vpop.f32.mrb[15].mxu1  ;;  %v2272_v55 = vpop.eup %2271  ;;  %v1242_v22 = vadd.f32 1.0, %v2270_v57  ;;  %v2740_v35 = vmul.f32 0.5, %v574_v37  ;;  %2287 = verf.f32 %v1065_v51  ;;  %v582_v2 = vadd.f32 %v2678_v38, %v2630_v20 }
 0x10e   : > { %v2274_v48 = vpop.eup %2273  ;;  %v1261_v5 = vadd.f32 1.0, %v2272_v55  ;;  %2289 = verf.f32 %v1067_v25  ;;  %v1066_v44 = vmul.f32 0.70710677, %v578_v3  ;;  %v1068_v55 = vmul.f32 0.70710677, %v631_v28 }
 0x10f   : > { %v2276_v19 = vpop.eup %2275  ;;  %v1263_v23 = vadd.f32 1.0, %v2274_v48  ;;  %v2747_v13 = vmul.f32 %v1242_v22, %v2657_v9  ;;  %2291 = verf.f32 %v1048_v12  ;;  %v584_v22 = vadd.f32 %v2684_v47, %v2630_v20 }
 0x110   : > { %v2726_v6 = vmul.f32 %v1261_v5, %v1021_v16  ;;  %v2278_v60 = vpop.eup %2277  ;;  %v2734_v30 = vpop.f32.mrb[16].mxu0  ;;  %v1244_v33 = vadd.f32 1.0, %v2276_v19  ;;  %2293 = verf.f32 %v1066_v44  ;;  %v635_v19 = vadd.f32 %v2680_v39, %v2630_v20 }
 0x111   : > { %v2728_v29 = vmul.f32 %v1263_v23, %v1023_v36  ;;  %v2736_v32 = vpop.f32.mrb[16].mxu1  ;;  %v2280_v8 = vpop.eup %2279  ;;  %v1262_v37 = vadd.f32 1.0, %v2278_v60  ;;  %v2768_v51 = vmul.f32 0.5, %v627_v42  ;;  %v1085_v12 = vmul.f32 0.70710677, %v582_v2 }
 0x112   : > { %v2742_v36 = vpop.f32.mrb[17].mxu0  ;;  %v2744_v43 = vpop.f32.mrb[17].mxu1  ;;  %v1264_v5 = vadd.f32 1.0, %v2280_v8  ;;  %v2766_v23 = vmul.f32 %v1244_v33, %v2659_v10  ;;  %v637_v38 = vadd.f32 %v2686_v49, %v2630_v20  ;;  %v985_v60 = vmul.f32 0.5, %v576_v4 }
 0x113   : > { %v2751_v53 = vpop.f32.mrb[18].mxu0  ;;  %v2753_v57 = vpop.f32.mrb[18].mxu1  ;;  %2295 = verf.f32 %v1068_v55  ;;  %v1087_v8 = vmul.f32 0.70710677, %v635_v19  ;;  %v2773_v44 = vmul.f32 %v1262_v37, %v2692_v45  ;;  %v987_v39 = vmul.f32 0.5, %v629_v7 }
 0x114   : > { %v2282_v59 = vpop.eup %2281  ;;  %v2757_v48 = vpop.f32.mrb[19].mxu0  ;;  %2297 = verf.f32 %v1085_v12  ;;  %v1086_v0 = vmul.f32 0.70710677, %v584_v22  ;;  %v2776_v10 = vmul.f32 %v1264_v5, %v2694_v52  ;;  %v2778_v42 = vmul.f32 0.5, %v578_v3 }
 0x115   : > { %v2759_v9 = vpop.f32.mrb[19].mxu1  ;;  %v1205_v25 = vadd.f32 1.0, %v2282_v59  ;;  %v2284_v47 = vpop.eup %2283  ;;  %v1088_v33 = vmul.f32 0.70710677, %v637_v38  ;;  %v1362_v49 = vpack.c.bf16 %v2711_v1, %v2689_v50  ;;  %v2786_v55 = vmul.f32 0.5, %v631_v28 }
 0x116   : > { %2299 = verf.f32 %v1087_v8  ;;  %v1364_v45 = vpack.c.bf16 %v2716_v14, %v2701_v58  ;;  %v586_v52 = vadd.f32 %v2696_v54, %v2636_v40  ;;  %v2286_v37 = vpop.eup %2285  ;;  %v2799_v1 = vmul.f32 0.5, %v582_v2 }
 0x117   : > { %v2797_v50 = vmul.f32 %v1205_v25, %v2703_v62  ;;  %1446 = vmatprep.subr.bf16.mxu0 %v1362_v49  ;;  %v639_v28 = vadd.f32 %v2698_v56, %v2636_v40  ;;  %v588_v58 = vadd.f32 %v2706_v63, %v2636_v40  ;;  %v2288_v5 = vpop.eup %2287  ;;  %v1207_v12 = vadd.f32 1.0, %v2284_v47 }
 0x118   : > { %v2782_v59 = vpop.f32.mrb[20].mxu0  ;;  %2301 = verf.f32 %v1086_v0  ;;  %1499 = vmatprep.subr.bf16.mxu1 %v1364_v45  ;;  %v1105_v8 = vmul.f32 0.70710677, %v586_v52  ;;  %1447 = vmatpush1.bf16.msra.mxu0 %v1361_v34  ;;  %v641_v62 = vadd.f32 %v2708_v46, %v2636_v40  ;;  %v2290_v63 = vpop.eup %2289  ;;  %v1225_v25 = vadd.f32 1.0, %v2288_v5 }
 0x119   : > { %v2784_v4 = vpop.f32.mrb[20].mxu1  ;;  %v2792_v7 = vpop.f32.mrb[21].mxu0  ;;  %v2818_v49 = vmul.f32 0.5, %v635_v19  ;;  %2303 = verf.f32 %v1088_v33  ;;  %v1107_v47 = vmul.f32 0.70710677, %v639_v28  ;;  %1500 = vmatpush1.bf16.msra.mxu1 %v1363_v41  ;;  %v1227_v21 = vadd.f32 1.0, %v2290_v63 }
 0x11a   : > { %v2794_v3 = vpop.f32.mrb[21].mxu1  ;;  %v2805_v14 = vpop.f32.mrb[22].mxu0  ;;  %v2823_v27 = vmul.f32 0.5, %v584_v22  ;;  %2305 = verf.f32 %v1105_v8  ;;  %v1106_v34 = vmul.f32 0.70710677, %v588_v58  ;;  %v1206_v45 = vadd.f32 1.0, %v2286_v37 }
 0x11b   : > { %v2807_v54 = vpop.f32.mrb[22].mxu1  ;;  %v2814_v56 = vpop.f32.mrb[23].mxu0  ;;  %v2825_v18 = vmul.f32 %v1225_v25, %v985_v60  ;;  %2307 = verf.f32 %v1107_v47  ;;  %v1108_v5 = vmul.f32 0.70710677, %v641_v62  ;;  %v2828_v19 = vmul.f32 %v1207_v12, %v2721_v17 }
 0x11c   : > { %v2816_v2 = vpop.f32.mrb[23].mxu1  ;;  %v2292_v0 = vpop.eup %2291  ;;  %v2830_v33 = vmul.f32 %v1227_v21, %v987_v39  ;;  %v2832_v16 = vmul.f32 0.5, %v637_v38  ;;  %v678_v26 = vadd.f32 %v2734_v30, %v2618_v61  ;;  %2309 = verf.f32 %v1106_v34 }
 0x11d   : > { %v2294_v46 = vpop.eup %2293  ;;  %v1208_v41 = vadd.f32 1.0, %v2292_v0  ;;  %v731_v60 = vadd.f32 %v2736_v32, %v2618_v61  ;;  %2311 = verf.f32 %v1108_v5  ;;  %v2851_v25 = vmul.f32 %v1206_v45, %v2740_v35 }
 0x11e   : > { %v2296_v31 = vpop.eup %2295  ;;  %v1226_v12 = vadd.f32 1.0, %v2294_v46  ;;  %v1049_v30 = vmul.f32 0.70710677, %v678_v26  ;;  %v1025_v47 = vmul.f32 0.5, %v586_v52  ;;  %v1027_v32 = vmul.f32 0.5, %v639_v28 }
 0x11f   : > { %v2298_v39 = vpop.eup %2297  ;;  %v1051_v0 = vmul.f32 0.70710677, %v731_v60  ;;  %v680_v46 = vadd.f32 %v2742_v36, %v2618_v61  ;;  %v2861_v5 = vadd.f32 %v2744_v43, %v2618_v61  ;;  %v2867_v28 = vmul.f32 0.5, %v588_v58 }
 0x120   : > { %v2840_v37 = vpop.f32.mrb[24].mxu0  ;;  %v2300_v22 = vpop.eup %2299  ;;  %2313 = verf.f32 %v1049_v30  ;;  %v1245_v52 = vadd.f32 1.0, %v2298_v39  ;;  %v1382_v45 = vpack.c.bf16 %v2773_v44, %v2747_v13  ;;  %v2872_v30 = vmul.f32 %v1208_v41, %v2768_v51  ;;  %v2887_v51 = vld [vmem:[%s3560_s3] sm:$0xff]  }
 0x121   : > { %v2842_v17 = vpop.f32.mrb[24].mxu1  ;;  %v2846_v8 = vpop.f32.mrb[25].mxu0  ;;  %2315 = verf.f32 %v1051_v0  ;;  %v2875_v36 = vmul.f32 %v1226_v12, %v2778_v42  ;;  %v2877_v43 = vmul.f32 0.5, %v641_v62  ;;  %v1052_v58 = vmul.f32 0.70710677, %v2861_v5 }
 0x122   : > { %3565 = vst [vmem:[#allocation2_spill] sm:$0xff] %v2842_v17  ;;  %v2848_v63 = vpop.f32.mrb[25].mxu1  ;;  %v2853_v21 = vpop.f32.mrb[26].mxu0  ;;  %v1228_v17 = vadd.f32 1.0, %v2296_v31  ;;  %1448 = vmatprep.subr.bf16.mxu0 %v1382_v45  ;;  %v1384_v13 = vpack.c.bf16 %v2776_v10, %v2766_v23  ;;  %v2892_v62 = vmul.f32 0.5, %v731_v60  ;;  %v735_v41 = vadd.f32 %v2753_v57, %v2624_v11 }
 0x123   : > { %3566 = vst [vmem:[#allocation3_spill] sm:$0xff] %v2853_v21  ;;  %v2855_v34 = vpop.f32.mrb[26].mxu1  ;;  %v2863_v38 = vpop.f32.mrb[27].mxu0  ;;  %v1247_v21 = vadd.f32 1.0, %v2300_v22  ;;  %v3570_v23 = vpack.c.bf16 %v2726_v6, %v2719_v15  ;;  %v2902_v22 = vmul.f32 %v1245_v52, %v2799_v1  ;;  %v3571_v15 = vpack.c.bf16 %v2728_v29, %v2724_v24 }
 0x124   : > { %3567 = vst [vmem:[#allocation4_spill] sm:$0xff] %v2855_v34  ;;  %3568 = vst [vmem:[#allocation5_spill] sm:$0xff] %v2863_v38  ;;  %v2865_v35 = vpop.f32.mrb[27].mxu1  ;;  %v2302_v31 = vpop.eup %2301  ;;  %v1050_v34 = vmul.f32 0.70710677, %v680_v46  ;;  %v2890_v42 = vmul.f32 %v1228_v17, %v2786_v55  ;;  %1501 = vmatprep.subr.bf16.mxu1 %v1384_v13  ;;  %v684_v55 = vadd.f32 %v2757_v48, %v2624_v11 }
 0x125   : > { %3569 = vst [vmem:[#allocation6_spill] sm:$0xff] %v2865_v35  ;;  %v2304_v38 = vpop.eup %2303  ;;  %v2879_v35 = vmul.f32 0.5, %v678_v26  ;;  %v682_v26 = vadd.f32 %v2751_v53, %v2624_v11  ;;  %1449 = vmatpush1.bf16.msra.mxu0 %v3570_v23  ;;  %v1246_v39 = vadd.f32 1.0, %v2302_v31  ;;  %1502 = vmatpush1.bf16.msra.mxu1 %v3571_v15  ;;  %v737_v6 = vadd.f32 %v2759_v9, %v2624_v11 }
 0x126   : > { %v2306_v44 = vpop.eup %2305  ;;  %2317 = verf.f32 %v1050_v34  ;;  %v2918_v52 = vmul.f32 %v1247_v21, %v2818_v49  ;;  %v1071_v45 = vmul.f32 0.70710677, %v735_v41  ;;  %v1248_v31 = vadd.f32 1.0, %v2304_v38 }
 0x127   : > { %v2308_v10 = vpop.eup %2307  ;;  %v1265_v12 = vadd.f32 1.0, %v2306_v44  ;;  %v1069_v57 = vmul.f32 0.70710677, %v682_v26  ;;  %2319 = verf.f32 %v1052_v58  ;;  %v1070_v13 = vmul.f32 0.70710677, %v684_v55 }
 0x128   : > { %v2906_v60 = vpop.f32.mrb[28].mxu0  ;;  %v1267_v17 = vadd.f32 1.0, %v2308_v10  ;;  %v2310_v0 = vpop.eup %2309  ;;  %2184 = vmatmul.mubr.msk.bf16.vlgmr.msra.gmra.mrb[40].mxu0 %vm1439_vm2, %v2887_v51  ;;  %v3572_v44 = vmov 0   ;;  %v2936_v21 = vmul.f32 %v1246_v39, %v2823_v27  ;;  %v2940_v23 = vmul.f32 0.5, %v680_v46  ;;  %2186 = vmatmul.mubr.msk.bf16.vlgmr.msra.gmra.mrb[40].mxu1 %vm1439_vm2, %v2887_v51 }
 0x129   : > { %v2908_v53 = vpop.f32.mrb[28].mxu1  ;;  %v2915_v1 = vpop.f32.mrb[29].mxu0  ;;  %v2920_v48 = vmul.f32 %v1265_v12, %v1025_v47  ;;  %2321 = verf.f32 %v1069_v57  ;;  %1488 = vmatprep.mubr.bf16.mxu0 %v3572_v44  ;;  %v1266_v12 = vadd.f32 1.0, %v2310_v0  ;;  %1541 = vmatprep.mubr.bf16.mxu1 %v3572_v44  ;;  %v688_v46 = vadd.f32 %v2782_v59, %v2630_v20 }
 0x12a   : > { %v2924_v34 = vpop.f32.mrb[29].mxu1  ;;  %v2926_v24 = vpop.f32.mrb[30].mxu0  ;;  %v2928_v9 = vmul.f32 %v1267_v17, %v1027_v32  ;;  %2323 = verf.f32 %v1071_v45  ;;  %v1072_v17 = vmul.f32 0.70710677, %v737_v6  ;;  %v741_v57 = vadd.f32 %v2784_v4, %v2630_v20 }
 0x12b   : > { %v2312_v29 = vpop.eup %2311  ;;  %v2931_v49 = vpop.f32.mrb[30].mxu1  ;;  %2325 = verf.f32 %v1070_v13  ;;  %v690_v15 = vadd.f32 %v2792_v7, %v2630_v20  ;;  %v2956_v58 = vmul.f32 0.5, %v2861_v5  ;;  %v1366_v0 = vpack.c.bf16 %v2875_v36, %v2851_v25 }
 0x12c   : > { %v2933_v47 = vpop.f32.mrb[31].mxu0  ;;  %v2944_v38 = vpop.f32.mrb[31].mxu1  ;;  %v1268_v39 = vadd.f32 1.0, %v2312_v29  ;;  %2327 = verf.f32 %v1072_v17  ;;  %v2963_v29 = vld [vmem:[%s3560_s3 + $0x8] sm:$0xff]   ;;  %v2966_v59 = vmul.f32 %v1248_v31, %v2832_v16  ;;  %v989_v4 = vmul.f32 0.5, %v682_v26 }
 0x12d   : > { %3573 = vst [vmem:[#allocation7_spill] sm:$0xff] %v2944_v38  ;;  %v2314_v32 = vpop.eup %2313  ;;  %v991_v13 = vmul.f32 0.5, %v735_v41  ;;  %v1089_v10 = vmul.f32 0.70710677, %v688_v46  ;;  %v2972_v17 = vmul.f32 0.5, %v684_v55  ;;  %v2976_v25 = vadd.f32 %v2794_v3, %v2630_v20  ;;  %1552 = vmatprep.subr.bf16.mxu0 %v1366_v0 }
 0x12e   : > { %v2316_v27 = vpop.eup %2315  ;;  %v1209_v45 = vadd.f32 1.0, %v2314_v32  ;;  %v1091_v38 = vmul.f32 0.70710677, %v741_v57  ;;  %v2981_v16 = vmul.f32 %v1266_v12, %v2867_v28  ;;  %v2984_v26 = vmul.f32 %v1268_v39, %v2877_v43 }
 0x12f   : > { %v1211_v5 = vadd.f32 1.0, %v2316_v27  ;;  %v2986_v41 = vmul.f32 0.5, %v737_v6  ;;  %v1090_v31 = vmul.f32 0.70710677, %v690_v15  ;;  %v3575_v55 = vpack.c.bf16 %v2825_v18, %v2797_v50 }
 0x130   : > { %v2968_v7 = vpop.f32.mrb[32].mxu0  ;;  %v2318_v0 = vpop.eup %2317  ;;  %2329 = verf.f32 %v1089_v10  ;;  %v1368_v28 = vpack.c.bf16 %v2890_v42, %v2872_v30  ;;  %v3002_v43 = vadd.f32 %v2805_v14, %v2636_v40  ;;  %2185 = vmatmul.mubr.msk.bf16.gmra.mrb[44].mxu0 %vm1439_vm2, %v2963_v29  ;;  %v3010_v12 = vmul.f32 0.5, %v688_v46  ;;  %2187 = vmatmul.mubr.msk.bf16.gmra.mrb[44].mxu1 %vm1439_vm2, %v2963_v29 }
 0x131   : > { %v2970_v32 = vpop.f32.mrb[32].mxu1  ;;  %v2978_v36 = vpop.f32.mrb[33].mxu0  ;;  %1553 = vmatpush1.bf16.msra.mxu0 %v3575_v55  ;;  %2331 = verf.f32 %v1091_v38  ;;  %v694_v30 = vadd.f32 %v2814_v56, %v2636_v40  ;;  %1584 = vmatprep.mubr.bf16.mxu0 %v3572_v44  ;;  %v3022_v10 = vmul.f32 %v1211_v5, %v2892_v62  ;;  %v3024_v39 = vmul.f32 0.5, %v741_v57 }
 0x132   : > { %3574 = vst [vmem:[#allocation8_spill] sm:$0xff] %v2978_v36  ;;  %v2991_v27 = vpop.f32.mrb[33].mxu1  ;;  %v2993_v3 = vpop.f32.mrb[34].mxu0  ;;  %v2996_v36 = vmul.f32 %v1209_v45, %v2879_v35  ;;  %v745_v35 = vadd.f32 %v2807_v54, %v2636_v40  ;;  %v1092_v38 = vmul.f32 0.70710677, %v2976_v25  ;;  %1605 = vmatprep.subr.bf16.mxu1 %v1368_v28  ;;  %1637 = vmatprep.mubr.bf16.mxu1 %v3572_v44  ;;  %v3029_v45 = vmul.f32 0.5, %v690_v15 }
 0x133   : > { %v3006_v18 = vpop.f32.mrb[34].mxu1  ;;  %v3008_v50 = vpop.f32.mrb[35].mxu0  ;;  %v1109_v54 = vmul.f32 0.70710677, %v3002_v43  ;;  %2333 = verf.f32 %v1090_v31  ;;  %v1110_v5 = vmul.f32 0.70710677, %v694_v30  ;;  %v747_v28 = vadd.f32 %v2816_v2, %v2636_v40 }
 0x134   : > { %3576 = vst [vmem:[#allocation9_spill] sm:$0xff] %v3006_v18  ;;  %3577 = vst [vmem:[#allocation10_spill] sm:$0xff] %v3008_v50  ;;  %v2320_v6 = vpop.eup %2319  ;;  %v3019_v14 = vpop.f32.mrb[35].mxu1  ;;  %v1111_v55 = vmul.f32 0.70710677, %v745_v35  ;;  %v1210_v50 = vadd.f32 1.0, %v2318_v0  ;;  %v784_v15 = vadd.f32 %v2840_v37, %v2618_v61 }
 0x135   : > { %3578 = vst [vmem:[#allocation11_spill] sm:$0xff] %v3019_v14  ;;  %v2322_v42 = vpop.eup %2321  ;;  %v3579_v14 = vpack.c.bf16 %v2830_v33, %v2828_v19  ;;  %2335 = verf.f32 %v1109_v54  ;;  %v1212_v33 = vadd.f32 1.0, %v2320_v6  ;;  %v1112_v54 = vmul.f32 0.70710677, %v747_v28 }
 0x136   : > { %v2324_v56 = vpop.eup %2323  ;;  %v1229_v46 = vadd.f32 1.0, %v2322_v42  ;;  %2337 = verf.f32 %v1111_v55  ;;  %v1053_v6 = vmul.f32 0.70710677, %v784_v15 }
 0x137   : > { %1606 = vmatpush1.bf16.msra.mxu1 %v3579_v14  ;;  %v2326_v62 = vpop.eup %2325  ;;  %v1231_v57 = vadd.f32 1.0, %v2324_v56  ;;  %2339 = verf.f32 %v1092_v38  ;;  %v3584_v38 = vld [vmem:[#allocation2_spill] sm:$0xff] }
 0x138   : > { %v3036_v18 = vmul.f32 %v1229_v46, %v989_v4  ;;  %v3040_v31 = vpop.f32.mrb[36].mxu0  ;;  %v2328_v19 = vpop.eup %2327  ;;  %v1230_v0 = vadd.f32 1.0, %v2326_v62  ;;  %2341 = verf.f32 %v1110_v5  ;;  %v3065_v62 = vmul.f32 0.5, %v2976_v25 }
 0x139   : > { %v3042_v42 = vpop.f32.mrb[36].mxu1  ;;  %v3044_v14 = vmul.f32 %v1231_v57, %v991_v13  ;;  %v3046_v56 = vpop.f32.mrb[37].mxu0  ;;  %v1232_v46 = vadd.f32 1.0, %v2328_v19  ;;  %2343 = verf.f32 %v1112_v54  ;;  %v837_v57 = vadd.f32 %v3584_v38, %v2618_v61 }
 0x13a   : > { %3580 = vst [vmem:[#allocation12_spill] sm:$0xff] %v3046_v56  ;;  %v3048_v2 = vpop.f32.mrb[37].mxu1  ;;  %v3052_v37 = vpop.f32.mrb[38].mxu0  ;;  %v786_v5 = vadd.f32 %v2846_v8, %v2618_v61  ;;  %v839_v19 = vadd.f32 %v2848_v63, %v2618_v61  ;;  %v1386_v54 = vpack.c.bf16 %v2981_v16, %v2936_v21  ;;  %v3074_v4 = vmul.f32 %v1210_v50, %v2940_v23 }
 0x13b   : > { %3581 = vst [vmem:[#allocation13_spill] sm:$0xff] %v3048_v2  ;;  %3582 = vst [vmem:[#allocation14_spill] sm:$0xff] %v3052_v37  ;;  %v3054_v55 = vpop.f32.mrb[38].mxu1  ;;  %v3060_v56 = vpop.f32.mrb[39].mxu0  ;;  %v3077_v38 = vmul.f32 %v1212_v33, %v2956_v58  ;;  %2345 = verf.f32 %v1053_v6  ;;  %v3080_v8 = vmul.f32 0.5, %v694_v30  ;;  %v3082_v37 = vmul.f32 0.5, %v747_v28 }
 0x13c   : > { %3583 = vst [vmem:[#allocation15_spill] sm:$0xff] %v3054_v55  ;;  %3585 = vst [vmem:[#allocation2_spill] sm:$0xff] %v3060_v56  ;;  %v3062_v2 = vpop.f32.mrb[39].mxu1  ;;  %v2330_v13 = vpop.eup %2329  ;;  %v1029_v56 = vmul.f32 0.5, %v3002_v43  ;;  %v1031_v55 = vmul.f32 0.5, %v745_v35  ;;  %1554 = vmatprep.subr.bf16.mxu0 %v1386_v54  ;;  %v3085_v63 = vmul.f32 %v1230_v0, %v2972_v17  ;;  %v3088_v21 = vmul.f32 %v1232_v46, %v2986_v41  ;;  %v3588_v41 = vld [vmem:[#allocation3_spill] sm:$0xff] }
 0x13d   : > { %3586 = vst [vmem:[#allocation16_spill] sm:$0xff] %v3062_v2  ;;  %v1055_v2 = vmul.f32 0.70710677, %v837_v57  ;;  %v2332_v25 = vpop.eup %2331  ;;  %v3090_v23 = vmul.f32 0.5, %v784_v15  ;;  %v1054_v58 = vmul.f32 0.70710677, %v786_v5  ;;  %v3587_v16 = vpack.c.bf16 %v2920_v48, %v2902_v22 }
 0x13e   : > { %v2334_v43 = vpop.eup %2333  ;;  %v1249_v50 = vadd.f32 1.0, %v2330_v13  ;;  %v1056_v35 = vmul.f32 0.70710677, %v839_v19  ;;  %v1388_v30 = vpack.c.bf16 %v2984_v26, %v2966_v59  ;;  %v1251_v17 = vadd.f32 1.0, %v2332_v25  ;;  %v3589_v0 = vld [vmem:[#allocation4_spill] sm:$0xff] }
 0x13f   : > { %1555 = vmatpush1.bf16.msra.mxu0 %v3587_v16  ;;  %2347 = verf.f32 %v1055_v2  ;;  %v2336_v28 = vpop.eup %2335  ;;  %v3097_v33 = vmul.f32 0.5, %v837_v57  ;;  %v788_v15 = vadd.f32 %v3588_v41, %v2624_v11  ;;  %v841_v46 = vadd.f32 %v3589_v0, %v2624_v11  ;;  %v3590_v2 = vld [vmem:[#allocation5_spill] sm:$0xff] }
 0x140   : > { %v2338_v6 = vpop.eup %2337  ;;  %v1269_v22 = vadd.f32 1.0, %v2336_v28  ;;  %v3103_v48 = vmul.f32 0.5, %v786_v5  ;;  %v3105_v13 = vmul.f32 0.5, %v839_v19  ;;  %1607 = vmatprep.subr.bf16.mxu1 %v1388_v30  ;;  %v790_v59 = vadd.f32 %v3590_v2, %v2624_v11  ;;  %v3592_v5 = vld [vmem:[#allocation6_spill] sm:$0xff] }
 0x141   : > { %v2340_v26 = vpop.eup %2339  ;;  %v1271_v57 = vadd.f32 1.0, %v2338_v6  ;;  %2349 = verf.f32 %v1054_v58  ;;  %v1073_v54 = vmul.f32 0.70710677, %v788_v15  ;;  %v3591_v25 = vpack.c.bf16 %v2928_v9, %v2918_v52 }
 0x142   : > { %2188 = vmatmul.mubr.msk.bf16.vlgmr.msra.gmra.mrb[48].mxu0 %vm1439_vm2, %v2887_v51  ;;  %v843_v16 = vadd.f32 %v3592_v5, %v2624_v11  ;;  %v2342_v19 = vpop.eup %2341  ;;  %v3118_v30 = vmul.f32 %v1249_v50, %v3010_v12  ;;  %v3120_v28 = vmul.f32 %v1269_v22, %v1029_v56  ;;  %2351 = verf.f32 %v1056_v35 }
 0x143   : > { %1608 = vmatpush1.bf16.msra.mxu1 %v3591_v25  ;;  %1594 = vmatprep.mubr.bf16.mxu0 %v3572_v44  ;;  %v1075_v41 = vmul.f32 0.70710677, %v841_v46  ;;  %v2344_v0 = vpop.eup %2343  ;;  %v3123_v58 = vmul.f32 %v1251_v17, %v3024_v39  ;;  %v3125_v6 = vmul.f32 %v1271_v57, %v1031_v55  ;;  %2353 = verf.f32 %v1073_v54 }
 0x144   : > { %v1074_v52 = vmul.f32 0.70710677, %v790_v59  ;;  %v1250_v9 = vadd.f32 1.0, %v2334_v43  ;;  %v1252_v2 = vadd.f32 1.0, %v2340_v26  ;;  %v1389_v25 = vpack.c.bf16 %v3120_v28, %v3118_v30 }
 0x145   : > { %2355 = verf.f32 %v1075_v41  ;;  %v2346_v12 = vpop.eup %2345  ;;  %v1391_v56 = vpack.c.bf16 %v3125_v6, %v3123_v58  ;;  %v1270_v50 = vadd.f32 1.0, %v2342_v19  ;;  %v1076_v39 = vmul.f32 0.70710677, %v843_v16 }
 0x146   : > { %2190 = vmatmul.mubr.msk.bf16.vlgmr.msra.gmra.mrb[48].mxu1 %vm1439_vm2, %v2887_v51  ;;  %v794_v55 = vadd.f32 %v2906_v60, %v2630_v20  ;;  %v1272_v43 = vadd.f32 1.0, %v2344_v0  ;;  %2357 = verf.f32 %v1074_v52  ;;  %v847_v35 = vadd.f32 %v2908_v53, %v2630_v20 }
 0x147   : > { %1647 = vmatprep.mubr.bf16.mxu1 %v3572_v44  ;;  %v796_v17 = vadd.f32 %v2915_v1, %v2630_v20  ;;  %v1213_v22 = vadd.f32 1.0, %v2346_v12  ;;  %2359 = verf.f32 %v1076_v39  ;;  %v849_v57 = vadd.f32 %v2924_v34, %v2630_v20 }
 0x148   : > { %v1093_v26 = vmul.f32 0.70710677, %v794_v55  ;;  %v3143_v5 = vmul.f32 %v1250_v9, %v3029_v45  ;;  %v3146_v60 = vmul.f32 %v1252_v2, %v3065_v62  ;;  %v993_v19 = vmul.f32 0.5, %v788_v15 }
 0x149   : > { %v2348_v54 = vpop.eup %2347  ;;  %v1095_v41 = vmul.f32 0.70710677, %v847_v35  ;;  %v995_v53 = vmul.f32 0.5, %v841_v46  ;;  %v3150_v1 = vmul.f32 0.5, %v790_v59  ;;  %v1094_v0 = vmul.f32 0.70710677, %v796_v17 }
 0x14a   : > { %2189 = vmatmul.mubr.msk.bf16.gmra.mrb[52].mxu0 %vm1439_vm2, %v2963_v29  ;;  %2361 = verf.f32 %v1093_v26  ;;  %v3154_v34 = vmul.f32 %v1270_v50, %v3080_v8  ;;  %v3157_v45 = vmul.f32 %v1272_v43, %v3082_v37  ;;  %v3159_v62 = vmul.f32 0.5, %v843_v16 }
 0x14b   : > { %1690 = vmatprep.mubr.bf16.mxu0 %v3572_v44  ;;  %v3161_v15 = vmul.f32 0.5, %v794_v55  ;;  %v2350_v52 = vpop.eup %2349  ;;  %v3164_v9 = vmul.f32 %v1213_v22, %v3090_v23  ;;  %v1215_v46 = vadd.f32 1.0, %v2348_v54  ;;  %v1096_v59 = vmul.f32 0.70710677, %v849_v57 }
 0x14c   : > { %v1370_v2 = vpack.c.bf16 %v3085_v63, %v3074_v4  ;;  %v2352_v12 = vpop.eup %2351  ;;  %2363 = verf.f32 %v1095_v41  ;;  %v1372_v8 = vpack.c.bf16 %v3088_v21, %v3077_v38  ;;  %v798_v37 = vadd.f32 %v2926_v24, %v2636_v40  ;;  %v3593_v63 = vld [vmem:[#allocation7_spill] sm:$0xff] }
 0x14d   : > { %v851_v16 = vadd.f32 %v2931_v49, %v2636_v40  ;;  %v2354_v23 = vpop.eup %2353  ;;  %v3176_v50 = vmul.f32 0.5, %v847_v35  ;;  %2365 = verf.f32 %v1094_v0  ;;  %v800_v4 = vadd.f32 %v2933_v47, %v2636_v40 }
 0x14e   : > { %2191 = vmatmul.mubr.msk.bf16.gmra.mrb[52].mxu1 %vm1439_vm2, %v2963_v29  ;;  %1658 = vmatprep.subr.bf16.mxu0 %v1370_v2  ;;  %v853_v38 = vadd.f32 %v3593_v63, %v2636_v40  ;;  %v1214_v21 = vadd.f32 1.0, %v2350_v52  ;;  %v1233_v39 = vadd.f32 1.0, %v2354_v23  ;;  %2367 = verf.f32 %v1096_v59 }
 0x14f   : > { %1743 = vmatprep.mubr.bf16.mxu1 %v3572_v44  ;;  %v2356_v24 = vpop.eup %2355  ;;  %1711 = vmatprep.subr.bf16.mxu1 %v1372_v8  ;;  %v1113_v49 = vmul.f32 0.70710677, %v798_v37  ;;  %v3594_v55 = vpack.c.bf16 %v3036_v18, %v2996_v36  ;;  %v1115_v35 = vmul.f32 0.70710677, %v851_v16  ;;  %v3595_v47 = vpack.c.bf16 %v3044_v14, %v3022_v10 }
 0x150   : > { %v1235_v43 = vadd.f32 1.0, %v2356_v24  ;;  %v1114_v22 = vmul.f32 0.70710677, %v800_v4  ;;  %v890_v26 = vadd.f32 %v2968_v7, %v2618_v61  ;;  %v2358_v54 = vpop.eup %2357  ;;  %v3192_v41 = vmul.f32 %v1215_v46, %v3097_v33 }
 0x151   : > { %1659 = vmatpush1.bf16.msra.mxu0 %v3594_v55  ;;  %1712 = vmatpush1.bf16.msra.mxu1 %v3595_v47  ;;  %v3194_v0 = vmul.f32 %v1233_v39, %v993_v19  ;;  %v3196_v52 = vmul.f32 0.5, %v796_v17  ;;  %2369 = verf.f32 %v1113_v49  ;;  %v2360_v36 = vpop.eup %2359  ;;  %v1216_v18 = vadd.f32 1.0, %v2352_v12 }
 0x152   : > { %v3198_v59 = vmul.f32 %v1235_v43, %v995_v53  ;;  %2371 = verf.f32 %v1115_v35  ;;  %v1116_v10 = vmul.f32 0.70710677, %v853_v38  ;;  %v3201_v14 = vmul.f32 %v1214_v21, %v3103_v48  ;;  %v3596_v48 = vld [vmem:[#allocation8_spill] sm:$0xff] }
 0x153   : > { %v1373_v7 = vpack.c.bf16 %v3194_v0, %v3164_v9  ;;  %v3205_v2 = vmul.f32 0.5, %v849_v57  ;;  %2373 = verf.f32 %v1114_v22  ;;  %v1057_v19 = vmul.f32 0.70710677, %v890_v26  ;;  %v3604_v0 = vld [vmem:[#allocation2_spill] sm:$0xff] }
 0x154   : > { %v2362_v33 = vpop.eup %2361  ;;  %v1375_v17 = vpack.c.bf16 %v3198_v59, %v3192_v41  ;;  %2375 = verf.f32 %v1116_v10  ;;  %v943_v53 = vadd.f32 %v2970_v32, %v2618_v61  ;;  %v1234_v46 = vadd.f32 1.0, %v2358_v54  ;;  %v3605_v59 = vld [vmem:[#allocation16_spill] sm:$0xff] }
 0x155   : > { %v1236_v12 = vadd.f32 1.0, %v2360_v36  ;;  %v892_v8 = vadd.f32 %v3596_v48, %v2618_v61  ;;  %v945_v23 = vadd.f32 %v2991_v27, %v2618_v61  ;;  %v3216_v57 = vmul.f32 %v1216_v18, %v3105_v13  ;;  %v3598_v18 = vld [vmem:[#allocation10_spill] sm:$0xff] }
 0x156   : > { %v1033_v63 = vmul.f32 0.5, %v798_v37  ;;  %2377 = verf.f32 %v1057_v19  ;;  %v1059_v24 = vmul.f32 0.70710677, %v943_v53  ;;  %v2364_v21 = vpop.eup %2363  ;;  %v1253_v39 = vadd.f32 1.0, %v2362_v33 }
 0x157   : > { %v1035_v49 = vmul.f32 0.5, %v851_v16  ;;  %v3218_v55 = vmul.f32 0.5, %v800_v4  ;;  %v1058_v32 = vmul.f32 0.70710677, %v892_v8  ;;  %v2366_v43 = vpop.eup %2365  ;;  %v3220_v35 = vmul.f32 0.5, %v853_v38 }
 0x158   : > { %v3222_v47 = vmul.f32 0.5, %v890_v26  ;;  %2379 = verf.f32 %v1059_v24  ;;  %v1060_v22 = vmul.f32 0.70710677, %v945_v23  ;;  %v2368_v61 = vpop.eup %2367  ;;  %v3225_v27 = vmul.f32 %v1234_v46, %v3150_v1  ;;  %v3597_v26 = vld [vmem:[#allocation9_spill] sm:$0xff] }
 0x159   : > { %v3228_v13 = vmul.f32 %v1236_v12, %v3159_v62  ;;  %2381 = verf.f32 %v1058_v32  ;;  %v1390_v37 = vpack.c.bf16 %v3154_v34, %v3143_v5  ;;  %v1255_v16 = vadd.f32 1.0, %v2364_v21  ;;  %v3599_v34 = vld [vmem:[#allocation11_spill] sm:$0xff]  ;;  %v3600_v32 = vld [vmem:[#allocation12_spill] sm:$0xff] }
 0x15a   : > { %v1392_v4 = vpack.c.bf16 %v3157_v45, %v3146_v60  ;;  %v894_v38 = vadd.f32 %v2993_v3, %v2624_v11  ;;  %v947_v54 = vadd.f32 %v3597_v26, %v2624_v11  ;;  %v3239_v1 = vmul.f32 %v1253_v39, %v3161_v15 }
 0x15b   : > { %v2370_v36 = vpop.eup %2369  ;;  %v3241_v62 = vmul.f32 0.5, %v943_v53  ;;  %1660 = vmatprep.subr.bf16.mxu0 %v1390_v37  ;;  %v896_v5 = vadd.f32 %v3598_v18, %v2624_v11  ;;  %v949_v10 = vadd.f32 %v3599_v34, %v2624_v11  ;;  %v1254_v45 = vadd.f32 1.0, %v2366_v43 }
 0x15c   : > { %v2372_v60 = vpop.eup %2371  ;;  %v1273_v33 = vadd.f32 1.0, %v2370_v36  ;;  %2383 = verf.f32 %v1060_v22  ;;  %1713 = vmatprep.subr.bf16.mxu1 %v1392_v4  ;;  %v1077_v3 = vmul.f32 0.70710677, %v894_v38  ;;  %1661 = vmatpush1.bf16.msra.mxu0 %v1389_v25  ;;  %v3250_v53 = vmul.f32 0.5, %v892_v8  ;;  %v3601_v22 = vld [vmem:[#allocation13_spill] sm:$0xff] }
 0x15d   : > { %v2374_v15 = vpop.eup %2373  ;;  %v1275_v19 = vadd.f32 1.0, %v2372_v60  ;;  %v1079_v46 = vmul.f32 0.70710677, %v947_v54  ;;  %1714 = vmatpush1.bf16.msra.mxu1 %v1391_v56  ;;  %v1078_v11 = vmul.f32 0.70710677, %v896_v5  ;;  %v3256_v48 = vmul.f32 %v1255_v16, %v3176_v50 }
 0x15e   : > { %v2376_v12 = vpop.eup %2375  ;;  %v3258_v24 = vmul.f32 %v1273_v33, %v1033_v63  ;;  %v3260_v21 = vmul.f32 0.5, %v945_v23  ;;  %2385 = verf.f32 %v1077_v3  ;;  %v1080_v28 = vmul.f32 0.70710677, %v949_v10 }
 0x15f   : > { %v3262_v30 = vmul.f32 %v1275_v19, %v1035_v49  ;;  %2387 = verf.f32 %v1079_v46  ;;  %2192 = vmatmul.mubr.msk.bf16.vlgmr.msra.gmra.mrb[56].mxu0 %vm1439_vm2, %v2887_v51  ;;  %v3268_v58 = vadd.f32 %v3040_v31, %v2630_v20  ;;  %v1256_v25 = vadd.f32 1.0, %v2368_v61 }
 0x160   : > { %v2378_v6 = vpop.eup %2377  ;;  %v1393_v56 = vpack.c.bf16 %v3258_v24, %v3239_v1  ;;  %v1274_v50 = vadd.f32 1.0, %v2374_v15  ;;  %2389 = verf.f32 %v1078_v11  ;;  %2194 = vmatmul.mubr.msk.bf16.vlgmr.msra.gmra.mrb[56].mxu1 %vm1439_vm2, %v2887_v51  ;;  %1700 = vmatprep.mubr.bf16.mxu0 %v3572_v44  ;;  %v1334_v8 = vmul.f32 %v1254_v45, %v3196_v52 }
 0x161   : > { %v1395_v23 = vpack.c.bf16 %v3262_v30, %v3256_v48  ;;  %v1276_v63 = vadd.f32 1.0, %v2376_v12  ;;  %2391 = verf.f32 %v1080_v28  ;;  %1753 = vmatprep.mubr.bf16.mxu1 %v3572_v44  ;;  %v1217_v39 = vadd.f32 1.0, %v2378_v6 }
 0x162   : > { %v2380_v31 = vpop.eup %2379  ;;  %v3281_v49 = vadd.f32 %v3042_v42, %v2630_v20  ;;  %v3285_v43 = vadd.f32 %v3600_v32, %v2630_v20  ;;  %v3289_v52 = vadd.f32 %v3601_v22, %v2630_v20  ;;  %v1097_v16 = vmul.f32 0.70710677, %v3268_v58 }
 0x163   : > { %v2382_v61 = vpop.eup %2381  ;;  %v1219_v37 = vadd.f32 1.0, %v2380_v31  ;;  %v1374_v4 = vpack.c.bf16 %v3225_v27, %v3201_v14  ;;  %v1376_v26 = vpack.c.bf16 %v3228_v13, %v3216_v57  ;;  %v1336_v42 = vmul.f32 %v1256_v25, %v3205_v2  ;;  %v3602_v13 = vld [vmem:[#allocation14_spill] sm:$0xff] }
 0x164   : > { %v1354_v36 = vmul.f32 %v1274_v50, %v3218_v55  ;;  %v997_v18 = vmul.f32 0.5, %v894_v38  ;;  %v1099_v34 = vmul.f32 0.70710677, %v3281_v49  ;;  %v999_v60 = vmul.f32 0.5, %v947_v54 }
 0x165   : > { %v998_v20 = vmul.f32 0.5, %v896_v5  ;;  %v1000_v45 = vmul.f32 0.5, %v949_v10  ;;  %v1098_v33 = vmul.f32 0.70710677, %v3285_v43  ;;  %1764 = vmatprep.subr.bf16.mxu0 %v1374_v4  ;;  %1817 = vmatprep.subr.bf16.mxu1 %v1376_v26  ;;  %v1356_v14 = vmul.f32 %v1276_v63, %v3220_v35  ;;  %v3603_v35 = vld [vmem:[#allocation15_spill] sm:$0xff] }
 0x166   : > { %v2384_v3 = vpop.eup %2383  ;;  %v1297_v27 = vmul.f32 %v1217_v39, %v3222_v47  ;;  %v1218_v57 = vadd.f32 1.0, %v2382_v61  ;;  %v1100_v2 = vmul.f32 0.70710677, %v3289_v52  ;;  %1765 = vmatpush1.bf16.msra.mxu0 %v1373_v7  ;;  %1818 = vmatpush1.bf16.msra.mxu1 %v1375_v17  ;;  %v1299_v55 = vmul.f32 %v1219_v37, %v3241_v62 }
 0x167   : > { %2393 = verf.f32 %v1097_v16  ;;  %v3312_v38 = vadd.f32 %v3602_v13, %v2636_v40  ;;  %v3316_v47 = vadd.f32 %v3603_v35, %v2636_v40  ;;  %2193 = vmatmul.mubr.msk.bf16.gmra.mrb[60].mxu0 %vm1439_vm2, %v2963_v29  ;;  %v3322_v41 = vadd.f32 %v3604_v0, %v2636_v40 }
 0x168   : > { %v2386_v9 = vpop.eup %2385  ;;  %2395 = verf.f32 %v1099_v34  ;;  %v3326_v7 = vadd.f32 %v3605_v59, %v2636_v40  ;;  %2195 = vmatmul.mubr.msk.bf16.gmra.mrb[60].mxu1 %vm1439_vm2, %v2963_v29  ;;  %v1394_v17 = vpack.c.bf16 %v1354_v36, %v1334_v8  ;;  %1796 = vmatprep.mubr.bf16.mxu0 %v3572_v44  ;;  %v1220_v62 = vadd.f32 1.0, %v2384_v3 }
 0x169   : > { %v2388_v54 = vpop.eup %2387  ;;  %v1237_v5 = vadd.f32 1.0, %v2386_v9  ;;  %2397 = verf.f32 %v1098_v33  ;;  %v1117_v10 = vmul.f32 0.70710677, %v3312_v38  ;;  %1849 = vmatprep.mubr.bf16.mxu1 %v3572_v44  ;;  %v1119_v40 = vmul.f32 0.70710677, %v3316_v47 }
 0x16a   : > { %v2390_v15 = vpop.eup %2389  ;;  %v1239_v19 = vadd.f32 1.0, %v2388_v54  ;;  %2399 = verf.f32 %v1100_v2  ;;  %v1118_v46 = vmul.f32 0.70710677, %v3322_v41  ;;  %1766 = vmatprep.subr.bf16.mxu0 %v1394_v17  ;;  %v1298_v12 = vmul.f32 %v1218_v57, %v3250_v53  ;;  %v3382_v17 = vpop.permute.xlu1 %1416 }
 0x16b   : > { %v2392_v11 = vpop.eup %2391  ;;  %v1317_v28 = vmul.f32 %v1237_v5, %v997_v18  ;;  %v1238_v6 = vadd.f32 1.0, %v2390_v15  ;;  %2401 = verf.f32 %v1117_v10  ;;  %1767 = vmatpush1.bf16.msra.mxu0 %v1393_v56  ;;  %v1120_v8 = vmul.f32 0.70710677, %v3326_v7 }
 0x16c   : > { %v1319_v25 = vmul.f32 %v1239_v19, %v999_v60  ;;  %v1240_v50 = vadd.f32 1.0, %v2392_v11  ;;  %2403 = verf.f32 %v1119_v40  ;;  %v1396_v39 = vpack.c.bf16 %v1356_v14, %v1336_v42 }
 0x16d   : > { %v1377_v63 = vpack.c.bf16 %v1317_v28, %v1297_v27  ;;  %v1318_v31 = vmul.f32 %v1238_v6, %v998_v20  ;;  %2405 = verf.f32 %v1118_v46  ;;  %v1300_v32 = vmul.f32 %v1220_v62, %v3260_v21 }
 0x16e   : > { %v1379_v22 = vpack.c.bf16 %v1319_v25, %v1299_v55  ;;  %v1320_v53 = vmul.f32 %v1240_v50, %v1000_v45  ;;  %2407 = verf.f32 %v1120_v8  ;;  %1819 = vmatprep.subr.bf16.mxu1 %v1396_v39  ;;  %v1017_v48 = vmul.f32 0.5, %v3268_v58  ;;  %v3402_v8 = vpop.permute.xlu1 %1426 }
 0x16f   : > { %2196 = vmatmul.mubr.msk.bf16.vlgmr.msra.gmra.mrb[64].mxu0 %vm1439_vm2, %v2887_v51  ;;  %v1378_v1 = vpack.c.bf16 %v1318_v31, %v1298_v12  ;;  %1820 = vmatpush1.bf16.msra.mxu1 %v1395_v23  ;;  %v1019_v30 = vmul.f32 0.5, %v3281_v49  ;;  %v1018_v42 = vmul.f32 0.5, %v3285_v43  ;;  %v1037_v18 = vmul.f32 0.5, %v3312_v38 }
 0x170   : > { %v1380_v24 = vpack.c.bf16 %v1320_v53, %v1300_v32  ;;  %1806 = vmatprep.mubr.bf16.mxu0 %v3572_v44  ;;  %v1020_v20 = vmul.f32 0.5, %v3289_v52  ;;  %v1039_v33 = vmul.f32 0.5, %v3316_v47  ;;  %v1038_v27 = vmul.f32 0.5, %v3322_v41 }
 0x171   : > { %v2394_v56 = vpop.eup %2393  ;;  %1870 = vmatprep.subr.bf16.mxu0 %v1378_v1  ;;  %v1040_v55 = vmul.f32 0.5, %v3326_v7  ;;  %v3380_v7 = vpop.permute.xlu0 %1411 }
 0x172   : > { %v2396_v61 = vpop.eup %2395  ;;  %1923 = vmatprep.subr.bf16.mxu1 %v1380_v24  ;;  %1871 = vmatpush1.bf16.msra.mxu0 %v1377_v63  ;;  %v1257_v16 = vadd.f32 1.0, %v2394_v56 }
 0x173   : > { %v2398_v21 = vpop.eup %2397  ;;  %2198 = vmatmul.mubr.msk.bf16.vlgmr.msra.gmra.mrb[64].mxu1 %vm1439_vm2, %v2887_v51  ;;  %v1259_v23 = vadd.f32 1.0, %v2396_v61 }
 0x174   : > { %v2400_v37 = vpop.eup %2399  ;;  %1924 = vmatpush1.bf16.msra.mxu1 %v1379_v22  ;;  %1859 = vmatprep.mubr.bf16.mxu1 %v3572_v44  ;;  %v1258_v36 = vadd.f32 1.0, %v2398_v21  ;;  %v1337_v49 = vmul.f32 %v1257_v16, %v1017_v48 }
 0x175   : > { %v2402_v4 = vpop.eup %2401  ;;  %v1260_v45 = vadd.f32 1.0, %v2400_v37  ;;  %v1339_v57 = vmul.f32 %v1259_v23, %v1019_v30  ;;  %v3399_v50 = vpop.permute.xlu0 %1421 }
 0x176   : > { %v2404_v26 = vpop.eup %2403  ;;  %v1277_v34 = vadd.f32 1.0, %v2402_v4  ;;  %v1338_v13 = vmul.f32 %v1258_v36, %v1018_v42 }
 0x177   : > { %v2406_v60 = vpop.eup %2405  ;;  %v1279_v3 = vadd.f32 1.0, %v2404_v26  ;;  %2197 = vmatmul.mubr.msk.bf16.gmra.mrb[68].mxu0 %vm1439_vm2, %v2963_v29  ;;  %v1340_v47 = vmul.f32 %v1260_v45, %v1020_v20 }
 0x178   : > { %v2408_v58 = vpop.eup %2407  ;;  %v1357_v14 = vmul.f32 %v1277_v34, %v1037_v18  ;;  %v1278_v43 = vadd.f32 1.0, %v2406_v60  ;;  %1902 = vmatprep.mubr.bf16.mxu0 %v3572_v44 }
 0x179   : > { %v1359_v2 = vmul.f32 %v1279_v3, %v1039_v33  ;;  %v1280_v52 = vadd.f32 1.0, %v2408_v58 }
 0x17a   : > { %v1397_v38 = vpack.c.bf16 %v1357_v14, %v1337_v49  ;;  %v1358_v35 = vmul.f32 %v1278_v43, %v1038_v27 }
 0x17b   : > { %v1399_v9 = vpack.c.bf16 %v1359_v2, %v1339_v57  ;;  %v1360_v0 = vmul.f32 %v1280_v52, %v1040_v55  ;;  %2199 = vmatmul.mubr.msk.bf16.gmra.mrb[68].mxu1 %vm1439_vm2, %v2963_v29 }
 0x17c   : > { %v1398_v59 = vpack.c.bf16 %v1358_v35, %v1338_v13  ;;  %1955 = vmatprep.mubr.bf16.mxu1 %v3572_v44 }
 0x17d   : > { %v1400_v41 = vpack.c.bf16 %v1360_v0, %v1340_v47 }
 0x17e   : > { %1872 = vmatprep.subr.bf16.mxu0 %v1398_v59 }
 0x17f   : > { %1925 = vmatprep.subr.bf16.mxu1 %v1400_v41  ;;  %1873 = vmatpush1.bf16.msra.mxu0 %v1397_v38 }
 0x180   : > { %1926 = vmatpush1.bf16.msra.mxu1 %v1399_v9 }
 0x182   : > { %2200 = vmatmul.mubr.msk.bf16.vlgmr.msra.gmra.mrb[72].mxu0 %vm1439_vm2, %v2887_v51 }
 0x183   : > { %2202 = vmatmul.mubr.msk.bf16.vlgmr.msra.gmra.mrb[72].mxu1 %vm1439_vm2, %v2887_v51  ;;  %1912 = vmatprep.mubr.bf16.mxu0 %v3572_v44 }
 0x184   : > { %1965 = vmatprep.mubr.bf16.mxu1 %v3572_v44 }
 0x18a   : > { %2201 = vmatmul.mubr.msk.bf16.gmra.mrb[76].mxu0 %vm1439_vm2, %v2963_v29 }
 0x18b   : > { %2203 = vmatmul.mubr.msk.bf16.gmra.mrb[76].mxu1 %vm1439_vm2, %v2963_v29 }
 0x1fb   : > { %v1480_v51 = vpop.f32.mrb[40].mxu0  ;;  %v1533_v62 = vpop.f32.mrb[40].mxu1 }
 0x1fc   : > { %v1481_v44 = vadd.f32 %v1480_v51, %v3380_v7  ;;  %v1482_v54 = vpop.f32.mrb[41].mxu0  ;;  %v1534_v10 = vadd.f32 %v1533_v62, %v3380_v7  ;;  %v1535_v15 = vpop.f32.mrb[41].mxu1 }
 0x1fd   : > { %v1483_v29 = vadd.f32 %v1482_v54, %v3380_v7  ;;  %v1484_v5 = vpop.f32.mrb[42].mxu0  ;;  %v1536_v46 = vadd.f32 %v1535_v15, %v3380_v7  ;;  %v1537_v11 = vpop.f32.mrb[42].mxu1 }
 0x1fe   : > { %1976 = vst [vmem:[%s3378_s7] sm:$0xff] %v1481_v44  ;;  %v1485_v19 = vadd.f32 %v1484_v5, %v3382_v17  ;;  %v1486_v40 = vpop.f32.mrb[43].mxu0  ;;  %1978 = vst [vmem:[%s3378_s7 + $0x10] sm:$0xff] %v1534_v10  ;;  %v1538_v28 = vadd.f32 %v1537_v11, %v3382_v17  ;;  %v1539_v6 = vpop.f32.mrb[43].mxu1 }
 0x1ff   : > { %1977 = vst [vmem:[%s3378_s7 + $0x8] sm:$0xff] %v1483_v29  ;;  %v1487_v12 = vadd.f32 %v1486_v40, %v3382_v17  ;;  %1979 = vst [vmem:[%s3378_s7 + $0x18] sm:$0xff] %v1536_v46  ;;  %v1540_v25 = vadd.f32 %v1539_v6, %v3382_v17 }
 0x200   : > { %1996 = vst [vmem:[%s3378_s7 + $0xa0] sm:$0xff] %v1485_v19  ;;  %1998 = vst [vmem:[%s3378_s7 + $0xb0] sm:$0xff] %v1538_v28 }
 0x201   : > { %1997 = vst [vmem:[%s3378_s7 + $0xa8] sm:$0xff] %v1487_v12  ;;  %1999 = vst [vmem:[%s3378_s7 + $0xb8] sm:$0xff] %v1540_v25 }
 0x203   : > { %v1490_v63 = vpop.f32.mrb[44].mxu0  ;;  %v1543_v39 = vpop.f32.mrb[44].mxu1 }
 0x204   : > { %v1491_v31 = vadd.f32 %v1490_v63, %v3399_v50  ;;  %v1492_v32 = vpop.f32.mrb[45].mxu0  ;;  %v1544_v22 = vadd.f32 %v1543_v39, %v3399_v50  ;;  %v1545_v1 = vpop.f32.mrb[45].mxu1 }
 0x205   : > { %v1493_v53 = vadd.f32 %v1492_v32, %v3399_v50  ;;  %v1494_v24 = vpop.f32.mrb[46].mxu0  ;;  %v1546_v56 = vadd.f32 %v1545_v1, %v3399_v50  ;;  %v1547_v21 = vpop.f32.mrb[46].mxu1 }
 0x206   : > { %2016 = vst [vmem:[%s3378_s7 + $0x140] sm:$0xff] %v1491_v31  ;;  %v1495_v61 = vadd.f32 %v1494_v24, %v3402_v8  ;;  %v1496_v37 = vpop.f32.mrb[47].mxu0  ;;  %2018 = vst [vmem:[%s3378_s7 + $0x150] sm:$0xff] %v1544_v22  ;;  %v1548_v16 = vadd.f32 %v1547_v21, %v3402_v8  ;;  %v1549_v48 = vpop.f32.mrb[47].mxu1 }
 0x207   : > { %2017 = vst [vmem:[%s3378_s7 + $0x148] sm:$0xff] %v1493_v53  ;;  %v1497_v4 = vadd.f32 %v1496_v37, %v3402_v8  ;;  %2019 = vst [vmem:[%s3378_s7 + $0x158] sm:$0xff] %v1546_v56  ;;  %v1550_v30 = vadd.f32 %v1549_v48, %v3402_v8 }
 0x208   : > { %2036 = vst [vmem:[%s3378_s7 + $0x1e0] sm:$0xff] %v1495_v61  ;;  %2038 = vst [vmem:[%s3378_s7 + $0x1f0] sm:$0xff] %v1548_v16 }
 0x209   : > { %2037 = vst [vmem:[%s3378_s7 + $0x1e8] sm:$0xff] %v1497_v4  ;;  %2039 = vst [vmem:[%s3378_s7 + $0x1f8] sm:$0xff] %v1550_v30 }
 0x215   : > { %v1586_v23 = vpop.f32.mrb[48].mxu0 }
 0x216   : > { %v1587_v26 = vadd.f32 %v1586_v23, %v3380_v7  ;;  %v1588_v42 = vpop.f32.mrb[49].mxu0 }
 0x217   : > { %v1589_v36 = vadd.f32 %v1588_v42, %v3380_v7  ;;  %v1590_v18 = vpop.f32.mrb[50].mxu0 }
 0x218   : > { %1980 = vst [vmem:[%s3378_s7 + $0x20] sm:$0xff] %v1587_v26  ;;  %v1591_v34 = vadd.f32 %v1590_v18, %v3382_v17  ;;  %v1592_v60 = vpop.f32.mrb[51].mxu0 }
 0x219   : > { %v1639_v20 = vpop.f32.mrb[48].mxu1  ;;  %1981 = vst [vmem:[%s3378_s7 + $0x28] sm:$0xff] %v1589_v36  ;;  %v1593_v45 = vadd.f32 %v1592_v60, %v3382_v17 }
 0x21a   : > { %v1640_v33 = vadd.f32 %v1639_v20, %v3380_v7  ;;  %v1641_v3 = vpop.f32.mrb[49].mxu1  ;;  %2000 = vst [vmem:[%s3378_s7 + $0xc0] sm:$0xff] %v1591_v34 }
 0x21b   : > { %v1642_v58 = vadd.f32 %v1641_v3, %v3380_v7  ;;  %v1643_v49 = vpop.f32.mrb[50].mxu1  ;;  %2001 = vst [vmem:[%s3378_s7 + $0xc8] sm:$0xff] %v1593_v45 }
 0x21c   : > { %1982 = vst [vmem:[%s3378_s7 + $0x30] sm:$0xff] %v1640_v33  ;;  %v1644_v14 = vadd.f32 %v1643_v49, %v3382_v17  ;;  %v1645_v27 = vpop.f32.mrb[51].mxu1 }
 0x21d   : > { %1983 = vst [vmem:[%s3378_s7 + $0x38] sm:$0xff] %v1642_v58  ;;  %v1646_v43 = vadd.f32 %v1645_v27, %v3382_v17  ;;  %v1596_v57 = vpop.f32.mrb[52].mxu0 }
 0x21e   : > { %2002 = vst [vmem:[%s3378_s7 + $0xd0] sm:$0xff] %v1644_v14  ;;  %v1597_v2 = vadd.f32 %v1596_v57, %v3399_v50  ;;  %v1598_v55 = vpop.f32.mrb[53].mxu0 }
 0x21f   : > { %2003 = vst [vmem:[%s3378_s7 + $0xd8] sm:$0xff] %v1646_v43  ;;  %v1599_v52 = vadd.f32 %v1598_v55, %v3399_v50  ;;  %v1600_v13 = vpop.f32.mrb[54].mxu0 }
 0x220   : > { %2020 = vst [vmem:[%s3378_s7 + $0x160] sm:$0xff] %v1597_v2  ;;  %v1601_v38 = vadd.f32 %v1600_v13, %v3402_v8  ;;  %v1602_v35 = vpop.f32.mrb[55].mxu0 }
 0x221   : > { %v1649_v47 = vpop.f32.mrb[52].mxu1  ;;  %2021 = vst [vmem:[%s3378_s7 + $0x168] sm:$0xff] %v1599_v52  ;;  %v1603_v9 = vadd.f32 %v1602_v35, %v3402_v8 }
 0x222   : > { %v1650_v0 = vadd.f32 %v1649_v47, %v3399_v50  ;;  %v1651_v59 = vpop.f32.mrb[53].mxu1  ;;  %2040 = vst [vmem:[%s3378_s7 + $0x200] sm:$0xff] %v1601_v38 }
 0x223   : > { %v1652_v41 = vadd.f32 %v1651_v59, %v3399_v50  ;;  %v1653_v51 = vpop.f32.mrb[54].mxu1  ;;  %2041 = vst [vmem:[%s3378_s7 + $0x208] sm:$0xff] %v1603_v9 }
 0x224   : > { %2022 = vst [vmem:[%s3378_s7 + $0x170] sm:$0xff] %v1650_v0  ;;  %v1654_v44 = vadd.f32 %v1653_v51, %v3402_v8  ;;  %v1655_v54 = vpop.f32.mrb[55].mxu1 }
 0x225   : > { %2023 = vst [vmem:[%s3378_s7 + $0x178] sm:$0xff] %v1652_v41  ;;  %v1656_v62 = vadd.f32 %v1655_v54, %v3402_v8 }
 0x226   : > { %2042 = vst [vmem:[%s3378_s7 + $0x210] sm:$0xff] %v1654_v44 }
 0x227   : > { %2043 = vst [vmem:[%s3378_s7 + $0x218] sm:$0xff] %v1656_v62 }
 0x232   : > { %v1692_v29 = vpop.f32.mrb[56].mxu0 }
 0x233   : > { %v1693_v5 = vadd.f32 %v1692_v29, %v3380_v7  ;;  %v1745_v10 = vpop.f32.mrb[56].mxu1  ;;  %v1694_v15 = vpop.f32.mrb[57].mxu0 }
 0x234   : > { %v1746_v19 = vadd.f32 %v1745_v10, %v3380_v7  ;;  %v1695_v40 = vadd.f32 %v1694_v15, %v3380_v7  ;;  %v1747_v46 = vpop.f32.mrb[57].mxu1  ;;  %v1696_v11 = vpop.f32.mrb[58].mxu0 }
 0x235   : > { %1984 = vst [vmem:[%s3378_s7 + $0x40] sm:$0xff] %v1693_v5  ;;  %v1748_v12 = vadd.f32 %v1747_v46, %v3380_v7  ;;  %v1697_v28 = vadd.f32 %v1696_v11, %v3382_v17  ;;  %v1749_v6 = vpop.f32.mrb[58].mxu1  ;;  %v1698_v25 = vpop.f32.mrb[59].mxu0 }
 0x236   : > { %1986 = vst [vmem:[%s3378_s7 + $0x50] sm:$0xff] %v1746_v19  ;;  %1985 = vst [vmem:[%s3378_s7 + $0x48] sm:$0xff] %v1695_v40  ;;  %v1750_v63 = vadd.f32 %v1749_v6, %v3382_v17  ;;  %v1699_v31 = vadd.f32 %v1698_v25, %v3382_v17  ;;  %v1751_v39 = vpop.f32.mrb[59].mxu1 }
 0x237   : > { %1987 = vst [vmem:[%s3378_s7 + $0x58] sm:$0xff] %v1748_v12  ;;  %2004 = vst [vmem:[%s3378_s7 + $0xe0] sm:$0xff] %v1697_v28  ;;  %v1752_v32 = vadd.f32 %v1751_v39, %v3382_v17 }
 0x238   : > { %2006 = vst [vmem:[%s3378_s7 + $0xf0] sm:$0xff] %v1750_v63  ;;  %2005 = vst [vmem:[%s3378_s7 + $0xe8] sm:$0xff] %v1699_v31 }
 0x239   : > { %2007 = vst [vmem:[%s3378_s7 + $0xf8] sm:$0xff] %v1752_v32 }
 0x23a   : > { %v1702_v22 = vpop.f32.mrb[60].mxu0 }
 0x23b   : > { %v1703_v53 = vadd.f32 %v1702_v22, %v3399_v50  ;;  %v1755_v1 = vpop.f32.mrb[60].mxu1  ;;  %v1704_v24 = vpop.f32.mrb[61].mxu0 }
 0x23c   : > { %v1756_v56 = vadd.f32 %v1755_v1, %v3399_v50  ;;  %v1705_v61 = vadd.f32 %v1704_v24, %v3399_v50  ;;  %v1757_v21 = vpop.f32.mrb[61].mxu1  ;;  %v1706_v37 = vpop.f32.mrb[62].mxu0 }
 0x23d   : > { %2024 = vst [vmem:[%s3378_s7 + $0x180] sm:$0xff] %v1703_v53  ;;  %v1758_v16 = vadd.f32 %v1757_v21, %v3399_v50  ;;  %v1707_v4 = vadd.f32 %v1706_v37, %v3402_v8  ;;  %v1759_v48 = vpop.f32.mrb[62].mxu1  ;;  %v1708_v30 = vpop.f32.mrb[63].mxu0 }
 0x23e   : > { %2026 = vst [vmem:[%s3378_s7 + $0x190] sm:$0xff] %v1756_v56  ;;  %2025 = vst [vmem:[%s3378_s7 + $0x188] sm:$0xff] %v1705_v61  ;;  %v1760_v23 = vadd.f32 %v1759_v48, %v3402_v8  ;;  %v1709_v26 = vadd.f32 %v1708_v30, %v3402_v8  ;;  %v1761_v42 = vpop.f32.mrb[63].mxu1 }
 0x23f   : > { %2027 = vst [vmem:[%s3378_s7 + $0x198] sm:$0xff] %v1758_v16  ;;  %2044 = vst [vmem:[%s3378_s7 + $0x220] sm:$0xff] %v1707_v4  ;;  %v1762_v36 = vadd.f32 %v1761_v42, %v3402_v8 }
 0x240   : > { %2046 = vst [vmem:[%s3378_s7 + $0x230] sm:$0xff] %v1760_v23  ;;  %2045 = vst [vmem:[%s3378_s7 + $0x228] sm:$0xff] %v1709_v26 }
 0x241   : > { %2047 = vst [vmem:[%s3378_s7 + $0x238] sm:$0xff] %v1762_v36 }
 0x242   : > { %v1798_v18 = vpop.f32.mrb[64].mxu0 }
 0x243   : > { %v1799_v34 = vadd.f32 %v1798_v18, %v3380_v7  ;;  %v1800_v60 = vpop.f32.mrb[65].mxu0 }
 0x244   : > { %v1801_v20 = vadd.f32 %v1800_v60, %v3380_v7  ;;  %v1802_v45 = vpop.f32.mrb[66].mxu0 }
 0x245   : > { %1988 = vst [vmem:[%s3378_s7 + $0x60] sm:$0xff] %v1799_v34  ;;  %v1803_v33 = vadd.f32 %v1802_v45, %v3382_v17  ;;  %v1804_v3 = vpop.f32.mrb[67].mxu0 }
 0x246   : > { %v1851_v58 = vpop.f32.mrb[64].mxu1  ;;  %1989 = vst [vmem:[%s3378_s7 + $0x68] sm:$0xff] %v1801_v20  ;;  %v1805_v49 = vadd.f32 %v1804_v3, %v3382_v17 }
 0x247   : > { %v1852_v14 = vadd.f32 %v1851_v58, %v3380_v7  ;;  %v1853_v27 = vpop.f32.mrb[65].mxu1  ;;  %2008 = vst [vmem:[%s3378_s7 + $0x100] sm:$0xff] %v1803_v33 }
 0x248   : > { %v1854_v43 = vadd.f32 %v1853_v27, %v3380_v7  ;;  %v1855_v57 = vpop.f32.mrb[66].mxu1  ;;  %2009 = vst [vmem:[%s3378_s7 + $0x108] sm:$0xff] %v1805_v49 }
 0x249   : > { %1990 = vst [vmem:[%s3378_s7 + $0x70] sm:$0xff] %v1852_v14  ;;  %v1856_v2 = vadd.f32 %v1855_v57, %v3382_v17  ;;  %v1857_v55 = vpop.f32.mrb[67].mxu1 }
 0x24a   : > { %1991 = vst [vmem:[%s3378_s7 + $0x78] sm:$0xff] %v1854_v43  ;;  %v1858_v52 = vadd.f32 %v1857_v55, %v3382_v17  ;;  %v1808_v13 = vpop.f32.mrb[68].mxu0 }
 0x24b   : > { %2010 = vst [vmem:[%s3378_s7 + $0x110] sm:$0xff] %v1856_v2  ;;  %v1809_v38 = vadd.f32 %v1808_v13, %v3399_v50  ;;  %v1810_v35 = vpop.f32.mrb[69].mxu0 }
 0x24c   : > { %2011 = vst [vmem:[%s3378_s7 + $0x118] sm:$0xff] %v1858_v52  ;;  %v1811_v47 = vadd.f32 %v1810_v35, %v3399_v50  ;;  %v1812_v9 = vpop.f32.mrb[70].mxu0 }
 0x24d   : > { %2028 = vst [vmem:[%s3378_s7 + $0x1a0] sm:$0xff] %v1809_v38  ;;  %v1813_v0 = vadd.f32 %v1812_v9, %v3402_v8  ;;  %v1814_v59 = vpop.f32.mrb[71].mxu0 }
 0x24e   : > { %v1861_v41 = vpop.f32.mrb[68].mxu1  ;;  %2029 = vst [vmem:[%s3378_s7 + $0x1a8] sm:$0xff] %v1811_v47  ;;  %v1815_v51 = vadd.f32 %v1814_v59, %v3402_v8 }
 0x24f   : > { %v1862_v44 = vadd.f32 %v1861_v41, %v3399_v50  ;;  %v1863_v54 = vpop.f32.mrb[69].mxu1  ;;  %2048 = vst [vmem:[%s3378_s7 + $0x240] sm:$0xff] %v1813_v0 }
 0x250   : > { %v1864_v62 = vadd.f32 %v1863_v54, %v3399_v50  ;;  %v1865_v29 = vpop.f32.mrb[70].mxu1  ;;  %2049 = vst [vmem:[%s3378_s7 + $0x248] sm:$0xff] %v1815_v51 }
 0x251   : > { %2030 = vst [vmem:[%s3378_s7 + $0x1b0] sm:$0xff] %v1862_v44  ;;  %v1866_v5 = vadd.f32 %v1865_v29, %v3402_v8  ;;  %v1867_v10 = vpop.f32.mrb[71].mxu1 }
 0x252   : > { %2031 = vst [vmem:[%s3378_s7 + $0x1b8] sm:$0xff] %v1864_v62  ;;  %v1868_v15 = vadd.f32 %v1867_v10, %v3402_v8 }
 0x253   : > { %2050 = vst [vmem:[%s3378_s7 + $0x250] sm:$0xff] %v1866_v5 }
 0x254   : > { %2051 = vst [vmem:[%s3378_s7 + $0x258] sm:$0xff] %v1868_v15 }
 0x255   : > { %v1904_v19 = vpop.f32.mrb[72].mxu0 }
 0x256   : > { %v1905_v40 = vadd.f32 %v1904_v19, %v3380_v7  ;;  %v1957_v46 = vpop.f32.mrb[72].mxu1  ;;  %v1906_v11 = vpop.f32.mrb[73].mxu0 }
 0x257   : > { %v1958_v12 = vadd.f32 %v1957_v46, %v3380_v7  ;;  %v1907_v28 = vadd.f32 %v1906_v11, %v3380_v7  ;;  %v1959_v6 = vpop.f32.mrb[73].mxu1  ;;  %v1908_v25 = vpop.f32.mrb[74].mxu0 }
 0x258   : > { %1992 = vst [vmem:[%s3378_s7 + $0x80] sm:$0xff] %v1905_v40  ;;  %v1960_v63 = vadd.f32 %v1959_v6, %v3380_v7  ;;  %v1909_v31 = vadd.f32 %v1908_v25, %v3382_v17  ;;  %v1961_v39 = vpop.f32.mrb[74].mxu1  ;;  %v1910_v32 = vpop.f32.mrb[75].mxu0 }
 0x259   : > { %1994 = vst [vmem:[%s3378_s7 + $0x90] sm:$0xff] %v1958_v12  ;;  %1993 = vst [vmem:[%s3378_s7 + $0x88] sm:$0xff] %v1907_v28  ;;  %v1962_v22 = vadd.f32 %v1961_v39, %v3382_v17  ;;  %v1911_v53 = vadd.f32 %v1910_v32, %v3382_v17  ;;  %v1963_v1 = vpop.f32.mrb[75].mxu1 }
 0x25a   : > { %1995 = vst [vmem:[%s3378_s7 + $0x98] sm:$0xff] %v1960_v63  ;;  %2012 = vst [vmem:[%s3378_s7 + $0x120] sm:$0xff] %v1909_v31  ;;  %v1964_v24 = vadd.f32 %v1963_v1, %v3382_v17 }
 0x25b   : > { %2014 = vst [vmem:[%s3378_s7 + $0x130] sm:$0xff] %v1962_v22  ;;  %2013 = vst [vmem:[%s3378_s7 + $0x128] sm:$0xff] %v1911_v53 }
 0x25c   : > { %2015 = vst [vmem:[%s3378_s7 + $0x138] sm:$0xff] %v1964_v24 }
 0x25d   : > { %v1914_v7 = vpop.f32.mrb[76].mxu0 }
 0x25e   : > { %v1915_v56 = vadd.f32 %v1914_v7, %v3399_v50  ;;  %v1967_v61 = vpop.f32.mrb[76].mxu1  ;;  %v1916_v21 = vpop.f32.mrb[77].mxu0 }
 0x25f   : > { %v1968_v37 = vadd.f32 %v1967_v61, %v3399_v50  ;;  %v1917_v16 = vadd.f32 %v1916_v21, %v3399_v50  ;;  %v1969_v4 = vpop.f32.mrb[77].mxu1  ;;  %v1918_v17 = vpop.f32.mrb[78].mxu0 }
 0x260   : > { %2032 = vst [vmem:[%s3378_s7 + $0x1c0] sm:$0xff] %v1915_v56  ;;  %v1970_v48 = vadd.f32 %v1969_v4, %v3399_v50  ;;  %v1919_v30 = vadd.f32 %v1918_v17, %v3402_v8  ;;  %v1971_v23 = vpop.f32.mrb[78].mxu1  ;;  %v1920_v26 = vpop.f32.mrb[79].mxu0 }
 0x261   : > { %2034 = vst [vmem:[%s3378_s7 + $0x1d0] sm:$0xff] %v1968_v37  ;;  %2033 = vst [vmem:[%s3378_s7 + $0x1c8] sm:$0xff] %v1917_v16  ;;  %v1972_v42 = vadd.f32 %v1971_v23, %v3402_v8  ;;  %v1921_v36 = vadd.f32 %v1920_v26, %v3402_v8  ;;  %v1973_v18 = vpop.f32.mrb[79].mxu1 }
 0x262   : > { %2035 = vst [vmem:[%s3378_s7 + $0x1d8] sm:$0xff] %v1970_v48  ;;  %2052 = vst [vmem:[%s3378_s7 + $0x260] sm:$0xff] %v1919_v30  ;;  %v1974_v34 = vadd.f32 %v1973_v18, %v3402_v8 }
 0x263   : > { %2054 = vst [vmem:[%s3378_s7 + $0x270] sm:$0xff] %v1972_v42  ;;  %2053 = vst [vmem:[%s3378_s7 + $0x268] sm:$0xff] %v1921_v36 }
 0x264   : > { %2055 = vst [vmem:[%s3378_s7 + $0x278] sm:$0xff] %v1974_v34 }
 0x265 PF: > { %s15_s20 = sadd.s32 1, %s2431_s20   ;;  %s3606_s18 = smov %s2427_s19 }
 0x266   : > { %p12_p5 = scmp.ge.s32.totalorder %s15_s20, 4   ;;  %s3607_s19 = smov %s3609_s21 }
 0x268   :  { %14 = sbr.rel (!%p12_p5) target bundleno = 2 (0x2), region = 70 }

// kernel: fno3d_forward.9
= control target key start
LH: loop header
LB: loop body
LE: loop exit
PB: predicated region body
PF: predicated region fallthrough
CT: control target
= control target key end

     0   :  { %s2786_s9 = smov 0   ;;  %s3156_s0 = inlined_call_operand.vmem [shape: f32[48,2,64], index: 0, kind: input, shape index: {}]   ;;  %s3157_s1 = inlined_call_operand.vmem [shape: bf16[48,64,64], index: 1, kind: input, shape index: {}]   ;;  %s3158_s2 = inlined_call_operand.vmem [shape: f32[48,2,64], index: 2, kind: output, shape index: {}]  }
   0x1 LB: > { %s2115_s10 = sadd.s32 4294967295, %s2767_s9   ;;  %p2119_p0 = scmp.ge.s32.totalorder %s2767_s9, 1  ;;  %s2767_s9 = sphi %s2786_s9, %s12_s9  }
   0x2   : > { %p125_p1 = scmp.lt.s32.totalorder %s2767_s9, 3 }
   0x4   : > { %p126_p2 = pnand %p2119_p0, %p125_p1 }
   0x5   : > { %s153_s11 = smul.u32 (!%p126_p2), 24, %s2115_s10  ;;  %v2769_v0 = vmov (!%p126_p2), 0.0   ;;  %vm2770_vm0 = vmmov (!%p126_p2), 0   ;;  %vm437_vm1 = vcmask (!%p126_p2), 523264   ;;  %vm2022_vm2 = vcmask (!%p126_p2), 517120  }
   0x6   : > { %129 = sbr.rel (%p126_p2) target bundleno = 424 (0x1a8), region = 28  ;;  %2367 = vmatprep.subr.bf16.mxu0 (!%p126_p2), %v2769_v0  ;;  %2379 = vmatprep.subr.bf16.mxu1 (!%p126_p2), %v2769_v0 }
   0x7   : > { %p154_p3 = scmp.lt.s32.totalorder (!%p126_p2), %s153_s11, 47  ;;  %2375 = vmatprep.mubr.msk.bf16.mxu0 (!%p126_p2), %vm2770_vm0, %v2769_v0  ;;  %2387 = vmatprep.mubr.msk.bf16.mxu1 (!%p126_p2), %vm2770_vm0, %v2769_v0 }
   0xd   : > { %s3160_s11 = smov (!%p154_p3, %s153_s11), 47 }
   0xe   : > { %s2246_s12 = sshll.u32 %s3160_s11, 5  ;;  %s2120_s16 = sshll.u32 %s3160_s11, 1 }
   0xf   : > { %s2806_s15 = scalar_lea.vmem %s3157_s1, %s2246_s12  ;;  %s2823_s19 = scalar_lea.vmem %s3156_s0, %s2120_s16 }
  0x10   : > { %v2665_v1 = vld [vmem:[%s2806_s15] sm:$0xff]   ;;  %v2667_v3 = vld [vmem:[%s2806_s15 + $0x8] sm:$0xff]   ;;  %v2669_v5 = vld [vmem:[%s2806_s15 + $0x10] sm:$0xff]   ;;  %s3103_s22 = scalar_lea.vmem %s3158_s2, %s2120_s16 }
  0x11   : > { %v2666_v2 = vld [vmem:[%s2806_s15 + $0x20] sm:$0xff]   ;;  %2368 = vmatpush3.bf16.msra.mxu0 %v2665_v1  ;;  %v2668_v4 = vld [vmem:[%s2806_s15 + $0x28] sm:$0xff]   ;;  %v2670_v6 = vld [vmem:[%s2806_s15 + $0x30] sm:$0xff]  }
  0x12   : > { %2380 = vmatpush3.bf16.msra.mxu1 %v2666_v2  ;;  %2369 = vmatprep.subr.bf16.mxu0 %v2769_v0  ;;  %v2671_v7 = vld [vmem:[%s2806_s15 + $0x18] sm:$0xff]   ;;  %v173_v9 = vld [vmem:[%s2823_s19] sm:$0x3]  ;;  %v174_v10 = vld [vmem:[%s2823_s19 + $0x2] sm:$0x3] }
  0x13   : > { %2381 = vmatprep.subr.bf16.mxu1 %v2769_v0  ;;  %v2672_v8 = vld [vmem:[%s2806_s15 + $0x38] sm:$0xff]   ;;  %v197_v11 = vpack.c.bf16 %v173_v9, %v173_v9  ;;  %v198_v12 = vpack.c.bf16 %v174_v10, %v174_v10  ;;  %v2673_v13 = vld [vmem:[%s2806_s15 + $0x40] sm:$0xff]   ;;  %v2675_v15 = vld [vmem:[%s2806_s15 + $0x48] sm:$0xff]  }
  0x14   : > { %v2674_v14 = vld [vmem:[%s2806_s15 + $0x60] sm:$0xff]   ;;  %v2676_v16 = vld [vmem:[%s2806_s15 + $0x68] sm:$0xff]   ;;  %v2677_v17 = vld [vmem:[%s2806_s15 + $0x50] sm:$0xff]  }
  0x15   : > { %2370 = vmatpush3.bf16.msra.mxu0 %v2667_v3  ;;  %v2678_v18 = vld [vmem:[%s2806_s15 + $0x70] sm:$0xff]   ;;  %v2679_v19 = vld [vmem:[%s2806_s15 + $0x58] sm:$0xff]   ;;  %v175_v21 = vld [vmem:[%s2823_s19 + $0x4] sm:$0x3] }
  0x16   : > { %2382 = vmatpush3.bf16.msra.mxu1 %v2668_v4  ;;  %2371 = vmatprep.subr.bf16.mxu0 %v2769_v0  ;;  %v2680_v20 = vld [vmem:[%s2806_s15 + $0x78] sm:$0xff]   ;;  %v176_v22 = vld [vmem:[%s2823_s19 + $0x6] sm:$0x3]  ;;  %v199_v23 = vpack.c.bf16 %v175_v21, %v175_v21  ;;  %v2683_v27 = vld [vmem:[%s2806_s15 + $0x88] sm:$0xff]  }
  0x17   : > { %2383 = vmatprep.subr.bf16.mxu1 %v2769_v0  ;;  %v200_v24 = vpack.c.bf16 %v176_v22, %v176_v22  ;;  %v2681_v25 = vld [vmem:[%s2806_s15 + $0x80] sm:$0xff]   ;;  %v2684_v28 = vld [vmem:[%s2806_s15 + $0xa8] sm:$0xff]   ;;  %v2685_v29 = vld [vmem:[%s2806_s15 + $0x90] sm:$0xff]  }
  0x18   : > { %v2682_v26 = vld [vmem:[%s2806_s15 + $0xa0] sm:$0xff]   ;;  %v2686_v30 = vld [vmem:[%s2806_s15 + $0xb0] sm:$0xff]   ;;  %v2687_v31 = vld [vmem:[%s2806_s15 + $0x98] sm:$0xff]  }
  0x19   : > { %2372 = vmatpush3.bf16.msra.mxu0 %v2669_v5  ;;  %v2688_v32 = vld [vmem:[%s2806_s15 + $0xb8] sm:$0xff]   ;;  %v177_v33 = vld [vmem:[%s2823_s19 + $0x8] sm:$0x3]  ;;  %v178_v34 = vld [vmem:[%s2823_s19 + $0xa] sm:$0x3] }
  0x1a   : > { %2384 = vmatpush3.bf16.msra.mxu1 %v2670_v6  ;;  %2373 = vmatprep.subr.bf16.mxu0 %v2769_v0  ;;  %v201_v35 = vpack.c.bf16 %v177_v33, %v177_v33  ;;  %v202_v36 = vpack.c.bf16 %v178_v34, %v178_v34  ;;  %v2689_v37 = vld [vmem:[%s2806_s15 + $0xc0] sm:$0xff]   ;;  %v2691_v39 = vld [vmem:[%s2806_s15 + $0xc8] sm:$0xff]   ;;  %v2693_v41 = vld [vmem:[%s2806_s15 + $0xd0] sm:$0xff]  }
  0x1b   : > { %2385 = vmatprep.subr.bf16.mxu1 %v2769_v0  ;;  %v2690_v38 = vld [vmem:[%s2806_s15 + $0xe0] sm:$0xff]   ;;  %v2692_v40 = vld [vmem:[%s2806_s15 + $0xe8] sm:$0xff]   ;;  %v2694_v42 = vld [vmem:[%s2806_s15 + $0xf0] sm:$0xff]  }
  0x1c   : > { %v2695_v43 = vld [vmem:[%s2806_s15 + $0xd8] sm:$0xff]   ;;  %v179_v45 = vld [vmem:[%s2823_s19 + $0xc] sm:$0x3]  ;;  %v180_v46 = vld [vmem:[%s2823_s19 + $0xe] sm:$0x3] }
  0x1d   : > { %2374 = vmatpush3.bf16.msra.mxu0 %v2671_v7  ;;  %v2696_v44 = vld [vmem:[%s2806_s15 + $0xf8] sm:$0xff]   ;;  %v203_v47 = vpack.c.bf16 %v179_v45, %v179_v45  ;;  %v204_v48 = vpack.c.bf16 %v180_v46, %v180_v46  ;;  %v2697_v49 = vld [vmem:[%s2806_s15 + $0x100] sm:$0xff]   ;;  %v2699_v51 = vld [vmem:[%s2806_s15 + $0x108] sm:$0xff]  }
  0x1e   : > { %2386 = vmatpush3.bf16.msra.mxu1 %v2672_v8  ;;  %2391 = vmatprep.subr.bf16.mxu0 %v2769_v0  ;;  %v2698_v50 = vld [vmem:[%s2806_s15 + $0x120] sm:$0xff]   ;;  %v2700_v52 = vld [vmem:[%s2806_s15 + $0x128] sm:$0xff]   ;;  %v2701_v53 = vld [vmem:[%s2806_s15 + $0x110] sm:$0xff]  }
  0x1f   : > { %2403 = vmatprep.subr.bf16.mxu1 %v2769_v0  ;;  %v2702_v54 = vld [vmem:[%s2806_s15 + $0x130] sm:$0xff]   ;;  %v2703_v55 = vld [vmem:[%s2806_s15 + $0x118] sm:$0xff]   ;;  %v2705_v61 = vld [vmem:[%s2806_s15 + $0x140] sm:$0xff]  }
  0x20   : > { %2376 = vmatmul.mubr.msk.bf16.vlgmr.msra.gmra.mrb[0].mxu0 %vm437_vm1, %v197_v11  ;;  %v2704_v56 = vld [vmem:[%s2806_s15 + $0x138] sm:$0xff]   ;;  %v181_v57 = vld [vmem:[%s2823_s19 + $0x10] sm:$0x3]  ;;  %v182_v58 = vld [vmem:[%s2823_s19 + $0x12] sm:$0x3] }
  0x21   : > { %2388 = vmatmul.mubr.msk.bf16.vlgmr.msra.gmra.mrb[0].mxu1 %vm437_vm1, %v198_v12  ;;  %2392 = vmatpush3.bf16.msra.mxu0 %v2673_v13  ;;  %v205_v59 = vpack.c.bf16 %v181_v57, %v181_v57  ;;  %v206_v60 = vpack.c.bf16 %v182_v58, %v182_v58  ;;  %v2706_v62 = vld [vmem:[%s2806_s15 + $0x160] sm:$0xff]   ;;  %v2707_v63 = vld [vmem:[%s2806_s15 + $0x148] sm:$0xff]   ;;  %v2709_v2 = vld [vmem:[%s2806_s15 + $0x150] sm:$0xff]  }
  0x22   : > { %2404 = vmatpush3.bf16.msra.mxu1 %v2674_v14  ;;  %2393 = vmatprep.subr.bf16.mxu0 %v2769_v0  ;;  %v2708_v1 = vld [vmem:[%s2806_s15 + $0x168] sm:$0xff]   ;;  %v2710_v3 = vld [vmem:[%s2806_s15 + $0x170] sm:$0xff]   ;;  %v2711_v4 = vld [vmem:[%s2806_s15 + $0x158] sm:$0xff]  }
  0x23   : > { %2405 = vmatprep.subr.bf16.mxu1 %v2769_v0  ;;  %2399 = vmatprep.mubr.msk.bf16.mxu0 %vm2770_vm0, %v2769_v0  ;;  %v2712_v5 = vld [vmem:[%s2806_s15 + $0x178] sm:$0xff]   ;;  %v183_v6 = vld [vmem:[%s2823_s19 + $0x14] sm:$0x3]  ;;  %v184_v7 = vld [vmem:[%s2823_s19 + $0x16] sm:$0x3] }
  0x24   : > { %2411 = vmatprep.mubr.msk.bf16.mxu1 %vm2770_vm0, %v2769_v0  ;;  %v207_v8 = vpack.c.bf16 %v183_v6, %v183_v6  ;;  %v208_v9 = vpack.c.bf16 %v184_v7, %v184_v7  ;;  %v2713_v10 = vld [vmem:[%s2806_s15 + $0x180] sm:$0xff]   ;;  %v2715_v12 = vld [vmem:[%s2806_s15 + $0x188] sm:$0xff]   ;;  %v2717_v14 = vld [vmem:[%s2806_s15 + $0x190] sm:$0xff]  }
  0x25   : > { %2394 = vmatpush3.bf16.msra.mxu0 %v2675_v15  ;;  %v2714_v11 = vld [vmem:[%s2806_s15 + $0x1a0] sm:$0xff]   ;;  %v2716_v13 = vld [vmem:[%s2806_s15 + $0x1a8] sm:$0xff]   ;;  %v2718_v15 = vld [vmem:[%s2806_s15 + $0x1b0] sm:$0xff]  }
  0x26   : > { %2406 = vmatpush3.bf16.msra.mxu1 %v2676_v16  ;;  %2395 = vmatprep.subr.bf16.mxu0 %v2769_v0  ;;  %v2719_v16 = vld [vmem:[%s2806_s15 + $0x198] sm:$0xff]   ;;  %v2721_v22 = vld [vmem:[%s2806_s15 + $0x1c0] sm:$0xff]  }
  0x27   : > { %2407 = vmatprep.subr.bf16.mxu1 %v2769_v0  ;;  %v2729_v34 = vld [vmem:[%s2806_s15 + $0x200] sm:$0xff]  }
  0x28   : > { %v2737_v46 = vld [vmem:[%s2806_s15 + $0x240] sm:$0xff]  }
  0x29   : > { %2396 = vmatpush3.bf16.msra.mxu0 %v2677_v17  ;;  %v185_v17 = vld [vmem:[%s2823_s19 + $0x18] sm:$0x3]  ;;  %v2745_v58 = vld [vmem:[%s2806_s15 + $0x280] sm:$0xff]  }
  0x2a   : > { %2408 = vmatpush3.bf16.msra.mxu1 %v2678_v18  ;;  %2397 = vmatprep.subr.bf16.mxu0 %v2769_v0  ;;  %v2720_v18 = vld [vmem:[%s2806_s15 + $0x1b8] sm:$0xff]   ;;  %v2753_v7 = vld [vmem:[%s2806_s15 + $0x2c0] sm:$0xff]  }
  0x2b   : > { %2409 = vmatprep.subr.bf16.mxu1 %v2769_v0 }
  0x2d   : > { %2398 = vmatpush3.bf16.msra.mxu0 %v2679_v19  ;;  %v186_v19 = vld [vmem:[%s2823_s19 + $0x1a] sm:$0x3] }
  0x2e   : > { %2410 = vmatpush3.bf16.msra.mxu1 %v2680_v20  ;;  %2415 = vmatprep.subr.bf16.mxu0 %v2769_v0  ;;  %v209_v20 = vpack.c.bf16 %v185_v17, %v185_v17  ;;  %v210_v21 = vpack.c.bf16 %v186_v19, %v186_v19 }
  0x2f   : > { %2427 = vmatprep.subr.bf16.mxu1 %v2769_v0 }
  0x30   : > { %2400 = vmatmul.mubr.msk.bf16.vlgmr.msra.gmra.mrb[4].mxu0 %vm437_vm1, %v199_v23  ;;  %v2722_v23 = vld [vmem:[%s2806_s15 + $0x1e0] sm:$0xff]  }
  0x31   : > { %2412 = vmatmul.mubr.msk.bf16.vlgmr.msra.gmra.mrb[4].mxu1 %vm437_vm1, %v200_v24  ;;  %2416 = vmatpush3.bf16.msra.mxu0 %v2681_v25  ;;  %v2723_v24 = vld [vmem:[%s2806_s15 + $0x1c8] sm:$0xff]  }
  0x32   : > { %2428 = vmatpush3.bf16.msra.mxu1 %v2682_v26  ;;  %2417 = vmatprep.subr.bf16.mxu0 %v2769_v0  ;;  %v2724_v25 = vld [vmem:[%s2806_s15 + $0x1e8] sm:$0xff]   ;;  %v2725_v26 = vld [vmem:[%s2806_s15 + $0x1d0] sm:$0xff]  }
  0x33   : > { %2429 = vmatprep.subr.bf16.mxu1 %v2769_v0  ;;  %2423 = vmatprep.mubr.msk.bf16.mxu0 %vm2770_vm0, %v2769_v0 }
  0x34   : > { %2435 = vmatprep.mubr.msk.bf16.mxu1 %vm2770_vm0, %v2769_v0 }
  0x35   : > { %2418 = vmatpush3.bf16.msra.mxu0 %v2683_v27  ;;  %v2726_v27 = vld [vmem:[%s2806_s15 + $0x1f0] sm:$0xff]  }
  0x36   : > { %2430 = vmatpush3.bf16.msra.mxu1 %v2684_v28  ;;  %2419 = vmatprep.subr.bf16.mxu0 %v2769_v0  ;;  %v2727_v28 = vld [vmem:[%s2806_s15 + $0x1d8] sm:$0xff]  }
  0x37   : > { %2431 = vmatprep.subr.bf16.mxu1 %v2769_v0 }
  0x39   : > { %2420 = vmatpush3.bf16.msra.mxu0 %v2685_v29  ;;  %v187_v29 = vld [vmem:[%s2823_s19 + $0x1c] sm:$0x3] }
  0x3a   : > { %2432 = vmatpush3.bf16.msra.mxu1 %v2686_v30  ;;  %2421 = vmatprep.subr.bf16.mxu0 %v2769_v0  ;;  %v2728_v30 = vld [vmem:[%s2806_s15 + $0x1f8] sm:$0xff]  }
  0x3b   : > { %2433 = vmatprep.subr.bf16.mxu1 %v2769_v0 }
  0x3d   : > { %2422 = vmatpush3.bf16.msra.mxu0 %v2687_v31  ;;  %v188_v31 = vld [vmem:[%s2823_s19 + $0x1e] sm:$0x3] }
  0x3e   : > { %2434 = vmatpush3.bf16.msra.mxu1 %v2688_v32  ;;  %2439 = vmatprep.subr.bf16.mxu0 %v2769_v0  ;;  %v211_v32 = vpack.c.bf16 %v187_v29, %v187_v29  ;;  %v212_v33 = vpack.c.bf16 %v188_v31, %v188_v31 }
  0x3f   : > { %2451 = vmatprep.subr.bf16.mxu1 %v2769_v0 }
  0x40   : > { %2424 = vmatmul.mubr.msk.bf16.vlgmr.msra.gmra.mrb[8].mxu0 %vm437_vm1, %v201_v35  ;;  %v2730_v35 = vld [vmem:[%s2806_s15 + $0x220] sm:$0xff]  }
  0x41   : > { %2436 = vmatmul.mubr.msk.bf16.vlgmr.msra.gmra.mrb[8].mxu1 %vm437_vm1, %v202_v36  ;;  %2440 = vmatpush3.bf16.msra.mxu0 %v2689_v37  ;;  %v2731_v36 = vld [vmem:[%s2806_s15 + $0x208] sm:$0xff]  }
  0x42   : > { %2452 = vmatpush3.bf16.msra.mxu1 %v2690_v38  ;;  %2441 = vmatprep.subr.bf16.mxu0 %v2769_v0  ;;  %v2732_v37 = vld [vmem:[%s2806_s15 + $0x228] sm:$0xff]   ;;  %v2733_v38 = vld [vmem:[%s2806_s15 + $0x210] sm:$0xff]  }
  0x43   : > { %2453 = vmatprep.subr.bf16.mxu1 %v2769_v0  ;;  %2447 = vmatprep.mubr.msk.bf16.mxu0 %vm2770_vm0, %v2769_v0 }
  0x44   : > { %2459 = vmatprep.mubr.msk.bf16.mxu1 %vm2770_vm0, %v2769_v0 }
  0x45   : > { %2442 = vmatpush3.bf16.msra.mxu0 %v2691_v39  ;;  %v2734_v39 = vld [vmem:[%s2806_s15 + $0x230] sm:$0xff]  }
  0x46   : > { %2454 = vmatpush3.bf16.msra.mxu1 %v2692_v40  ;;  %2443 = vmatprep.subr.bf16.mxu0 %v2769_v0  ;;  %v2735_v40 = vld [vmem:[%s2806_s15 + $0x218] sm:$0xff]  }
  0x47   : > { %2455 = vmatprep.subr.bf16.mxu1 %v2769_v0 }
  0x49   : > { %2444 = vmatpush3.bf16.msra.mxu0 %v2693_v41  ;;  %v189_v41 = vld [vmem:[%s2823_s19 + $0x20] sm:$0x3] }
  0x4a   : > { %2456 = vmatpush3.bf16.msra.mxu1 %v2694_v42  ;;  %2445 = vmatprep.subr.bf16.mxu0 %v2769_v0  ;;  %v2736_v42 = vld [vmem:[%s2806_s15 + $0x238] sm:$0xff]  }
  0x4b   : > { %2457 = vmatprep.subr.bf16.mxu1 %v2769_v0 }
  0x4d   : > { %2446 = vmatpush3.bf16.msra.mxu0 %v2695_v43  ;;  %v190_v43 = vld [vmem:[%s2823_s19 + $0x22] sm:$0x3] }
  0x4e   : > { %2458 = vmatpush3.bf16.msra.mxu1 %v2696_v44  ;;  %2463 = vmatprep.subr.bf16.mxu0 %v2769_v0  ;;  %v213_v44 = vpack.c.bf16 %v189_v41, %v189_v41  ;;  %v214_v45 = vpack.c.bf16 %v190_v43, %v190_v43 }
  0x4f   : > { %2475 = vmatprep.subr.bf16.mxu1 %v2769_v0 }
  0x50   : > { %2448 = vmatmul.mubr.msk.bf16.vlgmr.msra.gmra.mrb[12].mxu0 %vm437_vm1, %v203_v47  ;;  %v2738_v47 = vld [vmem:[%s2806_s15 + $0x260] sm:$0xff]  }
  0x51   : > { %2460 = vmatmul.mubr.msk.bf16.vlgmr.msra.gmra.mrb[12].mxu1 %vm437_vm1, %v204_v48  ;;  %2464 = vmatpush3.bf16.msra.mxu0 %v2697_v49  ;;  %v2739_v48 = vld [vmem:[%s2806_s15 + $0x248] sm:$0xff]  }
  0x52   : > { %2476 = vmatpush3.bf16.msra.mxu1 %v2698_v50  ;;  %2465 = vmatprep.subr.bf16.mxu0 %v2769_v0  ;;  %v2740_v49 = vld [vmem:[%s2806_s15 + $0x268] sm:$0xff]   ;;  %v2741_v50 = vld [vmem:[%s2806_s15 + $0x250] sm:$0xff]  }
  0x53   : > { %2477 = vmatprep.subr.bf16.mxu1 %v2769_v0  ;;  %2471 = vmatprep.mubr.msk.bf16.mxu0 %vm2770_vm0, %v2769_v0 }
  0x54   : > { %2483 = vmatprep.mubr.msk.bf16.mxu1 %vm2770_vm0, %v2769_v0 }
  0x55   : > { %2466 = vmatpush3.bf16.msra.mxu0 %v2699_v51  ;;  %v2742_v51 = vld [vmem:[%s2806_s15 + $0x270] sm:$0xff]  }
  0x56   : > { %2478 = vmatpush3.bf16.msra.mxu1 %v2700_v52  ;;  %2467 = vmatprep.subr.bf16.mxu0 %v2769_v0  ;;  %v2743_v52 = vld [vmem:[%s2806_s15 + $0x258] sm:$0xff]  }
  0x57   : > { %2479 = vmatprep.subr.bf16.mxu1 %v2769_v0 }
  0x59   : > { %2468 = vmatpush3.bf16.msra.mxu0 %v2701_v53  ;;  %v191_v53 = vld [vmem:[%s2823_s19 + $0x24] sm:$0x3] }
  0x5a   : > { %2480 = vmatpush3.bf16.msra.mxu1 %v2702_v54  ;;  %2469 = vmatprep.subr.bf16.mxu0 %v2769_v0  ;;  %v2744_v54 = vld [vmem:[%s2806_s15 + $0x278] sm:$0xff]  }
  0x5b   : > { %2481 = vmatprep.subr.bf16.mxu1 %v2769_v0 }
  0x5d   : > { %2470 = vmatpush3.bf16.msra.mxu0 %v2703_v55  ;;  %v192_v55 = vld [vmem:[%s2823_s19 + $0x26] sm:$0x3] }
  0x5e   : > { %2482 = vmatpush3.bf16.msra.mxu1 %v2704_v56  ;;  %2487 = vmatprep.subr.bf16.mxu0 %v2769_v0  ;;  %v215_v56 = vpack.c.bf16 %v191_v53, %v191_v53  ;;  %v216_v57 = vpack.c.bf16 %v192_v55, %v192_v55 }
  0x5f   : > { %2499 = vmatprep.subr.bf16.mxu1 %v2769_v0 }
  0x60   : > { %2472 = vmatmul.mubr.msk.bf16.vlgmr.msra.gmra.mrb[16].mxu0 %vm437_vm1, %v205_v59  ;;  %v2746_v59 = vld [vmem:[%s2806_s15 + $0x2a0] sm:$0xff]  }
  0x61   : > { %2484 = vmatmul.mubr.msk.bf16.vlgmr.msra.gmra.mrb[16].mxu1 %vm437_vm1, %v206_v60  ;;  %2488 = vmatpush3.bf16.msra.mxu0 %v2705_v61  ;;  %v2747_v60 = vld [vmem:[%s2806_s15 + $0x288] sm:$0xff]  }
  0x62   : > { %2500 = vmatpush3.bf16.msra.mxu1 %v2706_v62  ;;  %2489 = vmatprep.subr.bf16.mxu0 %v2769_v0  ;;  %v2748_v61 = vld [vmem:[%s2806_s15 + $0x2a8] sm:$0xff]   ;;  %v2749_v62 = vld [vmem:[%s2806_s15 + $0x290] sm:$0xff]  }
  0x63   : > { %2501 = vmatprep.subr.bf16.mxu1 %v2769_v0  ;;  %2495 = vmatprep.mubr.msk.bf16.mxu0 %vm2770_vm0, %v2769_v0 }
  0x64   : > { %2507 = vmatprep.mubr.msk.bf16.mxu1 %vm2770_vm0, %v2769_v0 }
  0x65   : > { %2490 = vmatpush3.bf16.msra.mxu0 %v2707_v63  ;;  %v2750_v63 = vld [vmem:[%s2806_s15 + $0x2b0] sm:$0xff]  }
  0x66   : > { %2502 = vmatpush3.bf16.msra.mxu1 %v2708_v1  ;;  %2491 = vmatprep.subr.bf16.mxu0 %v2769_v0  ;;  %v2751_v1 = vld [vmem:[%s2806_s15 + $0x298] sm:$0xff]  }
  0x67   : > { %2503 = vmatprep.subr.bf16.mxu1 %v2769_v0 }
  0x69   : > { %2492 = vmatpush3.bf16.msra.mxu0 %v2709_v2  ;;  %v193_v2 = vld [vmem:[%s2823_s19 + $0x28] sm:$0x3] }
  0x6a   : > { %2504 = vmatpush3.bf16.msra.mxu1 %v2710_v3  ;;  %2493 = vmatprep.subr.bf16.mxu0 %v2769_v0  ;;  %v2752_v3 = vld [vmem:[%s2806_s15 + $0x2b8] sm:$0xff]  }
  0x6b   : > { %2505 = vmatprep.subr.bf16.mxu1 %v2769_v0 }
  0x6d   : > { %2494 = vmatpush3.bf16.msra.mxu0 %v2711_v4  ;;  %v194_v4 = vld [vmem:[%s2823_s19 + $0x2a] sm:$0x3] }
  0x6e   : > { %2506 = vmatpush3.bf16.msra.mxu1 %v2712_v5  ;;  %2511 = vmatprep.subr.bf16.mxu0 %v2769_v0  ;;  %v217_v5 = vpack.c.bf16 %v193_v2, %v193_v2  ;;  %v218_v6 = vpack.c.bf16 %v194_v4, %v194_v4 }
  0x6f   : > { %2523 = vmatprep.subr.bf16.mxu1 %v2769_v0 }
  0x70   : > { %2496 = vmatmul.mubr.msk.bf16.vlgmr.msra.gmra.mrb[20].mxu0 %vm437_vm1, %v207_v8  ;;  %v2754_v8 = vld [vmem:[%s2806_s15 + $0x2e0] sm:$0xff]  }
  0x71   : > { %2508 = vmatmul.mubr.msk.bf16.vlgmr.msra.gmra.mrb[20].mxu1 %vm437_vm1, %v208_v9  ;;  %2512 = vmatpush3.bf16.msra.mxu0 %v2713_v10  ;;  %v2755_v9 = vld [vmem:[%s2806_s15 + $0x2c8] sm:$0xff]  }
  0x72   : > { %2524 = vmatpush3.bf16.msra.mxu1 %v2714_v11  ;;  %2513 = vmatprep.subr.bf16.mxu0 %v2769_v0  ;;  %v2756_v10 = vld [vmem:[%s2806_s15 + $0x2e8] sm:$0xff]   ;;  %v2757_v11 = vld [vmem:[%s2806_s15 + $0x2d0] sm:$0xff]  }
  0x73   : > { %2525 = vmatprep.subr.bf16.mxu1 %v2769_v0  ;;  %2519 = vmatprep.mubr.msk.bf16.mxu0 %vm2770_vm0, %v2769_v0 }
  0x74   : > { %2531 = vmatprep.mubr.msk.bf16.mxu1 %vm2770_vm0, %v2769_v0 }
  0x75   : > { %2514 = vmatpush3.bf16.msra.mxu0 %v2715_v12  ;;  %v2758_v12 = vld [vmem:[%s2806_s15 + $0x2f0] sm:$0xff]  }
  0x76   : > { %2526 = vmatpush3.bf16.msra.mxu1 %v2716_v13  ;;  %2515 = vmatprep.subr.bf16.mxu0 %v2769_v0  ;;  %v2759_v13 = vld [vmem:[%s2806_s15 + $0x2d8] sm:$0xff]  }
  0x77   : > { %2527 = vmatprep.subr.bf16.mxu1 %v2769_v0 }
  0x79   : > { %2516 = vmatpush3.bf16.msra.mxu0 %v2717_v14  ;;  %v195_v14 = vld [vmem:[%s2823_s19 + $0x2c] sm:$0x3] }
  0x7a   : > { %2528 = vmatpush3.bf16.msra.mxu1 %v2718_v15  ;;  %2517 = vmatprep.subr.bf16.mxu0 %v2769_v0  ;;  %v2760_v15 = vld [vmem:[%s2806_s15 + $0x2f8] sm:$0xff]   ;;  %v219_v17 = vpack.c.bf16 %v195_v14, %v195_v14 }
  0x7b   : > { %2529 = vmatprep.subr.bf16.mxu1 %v2769_v0 }
  0x7d   : > { %2518 = vmatpush3.bf16.msra.mxu0 %v2719_v16  ;;  %v196_v16 = vld [vmem:[%s2823_s19 + $0x2e] sm:$0x3] }
  0x7e   : > { %2530 = vmatpush3.bf16.msra.mxu1 %v2720_v18  ;;  %2535 = vmatprep.subr.bf16.mxu0 %v2769_v0  ;;  %v220_v18 = vpack.c.bf16 %v196_v16, %v196_v16 }
  0x7f   : > { %2547 = vmatprep.subr.bf16.mxu1 %v2769_v0 }
  0x80   : > { %2520 = vmatmul.mubr.msk.bf16.vlgmr.msra.gmra.mrb[24].mxu0 %vm437_vm1, %v209_v20 }
  0x81   : > { %2532 = vmatmul.mubr.msk.bf16.vlgmr.msra.gmra.mrb[24].mxu1 %vm437_vm1, %v210_v21  ;;  %2536 = vmatpush3.bf16.msra.mxu0 %v2721_v22 }
  0x82   : > { %2548 = vmatpush3.bf16.msra.mxu1 %v2722_v23  ;;  %2537 = vmatprep.subr.bf16.mxu0 %v2769_v0 }
  0x83   : > { %2549 = vmatprep.subr.bf16.mxu1 %v2769_v0  ;;  %2543 = vmatprep.mubr.msk.bf16.mxu0 %vm2770_vm0, %v2769_v0 }
  0x84   : > { %2555 = vmatprep.mubr.msk.bf16.mxu1 %vm2770_vm0, %v2769_v0 }
  0x85   : > { %2538 = vmatpush3.bf16.msra.mxu0 %v2723_v24 }
  0x86   : > { %2550 = vmatpush3.bf16.msra.mxu1 %v2724_v25  ;;  %2539 = vmatprep.subr.bf16.mxu0 %v2769_v0 }
  0x87   : > { %2551 = vmatprep.subr.bf16.mxu1 %v2769_v0 }
  0x89   : > { %2540 = vmatpush3.bf16.msra.mxu0 %v2725_v26 }
  0x8a   : > { %2552 = vmatpush3.bf16.msra.mxu1 %v2726_v27  ;;  %2541 = vmatprep.subr.bf16.mxu0 %v2769_v0 }
  0x8b   : > { %2553 = vmatprep.subr.bf16.mxu1 %v2769_v0 }
  0x8d   : > { %2542 = vmatpush3.bf16.msra.mxu0 %v2727_v28 }
  0x8e   : > { %2554 = vmatpush3.bf16.msra.mxu1 %v2728_v30  ;;  %2559 = vmatprep.subr.bf16.mxu0 %v2769_v0 }
  0x8f   : > { %2571 = vmatprep.subr.bf16.mxu1 %v2769_v0 }
  0x90   : > { %2544 = vmatmul.mubr.msk.bf16.vlgmr.msra.gmra.mrb[28].mxu0 %vm437_vm1, %v211_v32 }
  0x91   : > { %2556 = vmatmul.mubr.msk.bf16.vlgmr.msra.gmra.mrb[28].mxu1 %vm437_vm1, %v212_v33  ;;  %2560 = vmatpush3.bf16.msra.mxu0 %v2729_v34 }
  0x92   : > { %2572 = vmatpush3.bf16.msra.mxu1 %v2730_v35  ;;  %2561 = vmatprep.subr.bf16.mxu0 %v2769_v0 }
  0x93   : > { %2573 = vmatprep.subr.bf16.mxu1 %v2769_v0  ;;  %2567 = vmatprep.mubr.msk.bf16.mxu0 %vm2770_vm0, %v2769_v0 }
  0x94   : > { %2579 = vmatprep.mubr.msk.bf16.mxu1 %vm2770_vm0, %v2769_v0 }
  0x95   : > { %2562 = vmatpush3.bf16.msra.mxu0 %v2731_v36 }
  0x96   : > { %2574 = vmatpush3.bf16.msra.mxu1 %v2732_v37  ;;  %2563 = vmatprep.subr.bf16.mxu0 %v2769_v0 }
  0x97   : > { %2575 = vmatprep.subr.bf16.mxu1 %v2769_v0 }
  0x99   : > { %2564 = vmatpush3.bf16.msra.mxu0 %v2733_v38 }
  0x9a   : > { %2576 = vmatpush3.bf16.msra.mxu1 %v2734_v39  ;;  %2565 = vmatprep.subr.bf16.mxu0 %v2769_v0 }
  0x9b   : > { %2577 = vmatprep.subr.bf16.mxu1 %v2769_v0 }
  0x9d   : > { %2566 = vmatpush3.bf16.msra.mxu0 %v2735_v40 }
  0x9e   : > { %2578 = vmatpush3.bf16.msra.mxu1 %v2736_v42  ;;  %2583 = vmatprep.subr.bf16.mxu0 %v2769_v0 }
  0x9f   : > { %2595 = vmatprep.subr.bf16.mxu1 %v2769_v0 }
  0xa0   : > { %2568 = vmatmul.mubr.msk.bf16.vlgmr.msra.gmra.mrb[32].mxu0 %vm437_vm1, %v213_v44 }
  0xa1   : > { %2580 = vmatmul.mubr.msk.bf16.vlgmr.msra.gmra.mrb[32].mxu1 %vm437_vm1, %v214_v45  ;;  %2584 = vmatpush3.bf16.msra.mxu0 %v2737_v46 }
  0xa2   : > { %2596 = vmatpush3.bf16.msra.mxu1 %v2738_v47  ;;  %2585 = vmatprep.subr.bf16.mxu0 %v2769_v0 }
  0xa3   : > { %2597 = vmatprep.subr.bf16.mxu1 %v2769_v0  ;;  %2591 = vmatprep.mubr.msk.bf16.mxu0 %vm2770_vm0, %v2769_v0 }
  0xa4   : > { %2603 = vmatprep.mubr.msk.bf16.mxu1 %vm2770_vm0, %v2769_v0 }
  0xa5   : > { %2586 = vmatpush3.bf16.msra.mxu0 %v2739_v48 }
  0xa6   : > { %2598 = vmatpush3.bf16.msra.mxu1 %v2740_v49  ;;  %2587 = vmatprep.subr.bf16.mxu0 %v2769_v0 }
  0xa7   : > { %2599 = vmatprep.subr.bf16.mxu1 %v2769_v0 }
  0xa9   : > { %2588 = vmatpush3.bf16.msra.mxu0 %v2741_v50 }
  0xaa   : > { %2600 = vmatpush3.bf16.msra.mxu1 %v2742_v51  ;;  %2589 = vmatprep.subr.bf16.mxu0 %v2769_v0 }
  0xab   : > { %2601 = vmatprep.subr.bf16.mxu1 %v2769_v0 }
  0xad   : > { %2590 = vmatpush3.bf16.msra.mxu0 %v2743_v52 }
  0xae   : > { %2602 = vmatpush3.bf16.msra.mxu1 %v2744_v54  ;;  %2607 = vmatprep.subr.bf16.mxu0 %v2769_v0 }
  0xaf   : > { %2619 = vmatprep.subr.bf16.mxu1 %v2769_v0 }
  0xb0   : > { %2592 = vmatmul.mubr.msk.bf16.vlgmr.msra.gmra.mrb[36].mxu0 %vm437_vm1, %v215_v56 }
  0xb1   : > { %2604 = vmatmul.mubr.msk.bf16.vlgmr.msra.gmra.mrb[36].mxu1 %vm437_vm1, %v216_v57  ;;  %2608 = vmatpush3.bf16.msra.mxu0 %v2745_v58 }
  0xb2   : > { %2620 = vmatpush3.bf16.msra.mxu1 %v2746_v59  ;;  %2609 = vmatprep.subr.bf16.mxu0 %v2769_v0 }
  0xb3   : > { %2621 = vmatprep.subr.bf16.mxu1 %v2769_v0  ;;  %2615 = vmatprep.mubr.msk.bf16.mxu0 %vm2770_vm0, %v2769_v0 }
  0xb4   : > { %2627 = vmatprep.mubr.msk.bf16.mxu1 %vm2770_vm0, %v2769_v0 }
  0xb5   : > { %2610 = vmatpush3.bf16.msra.mxu0 %v2747_v60 }
  0xb6   : > { %2622 = vmatpush3.bf16.msra.mxu1 %v2748_v61  ;;  %2611 = vmatprep.subr.bf16.mxu0 %v2769_v0 }
  0xb7   : > { %2623 = vmatprep.subr.bf16.mxu1 %v2769_v0 }
  0xb9   : > { %2612 = vmatpush3.bf16.msra.mxu0 %v2749_v62 }
  0xba   : > { %2624 = vmatpush3.bf16.msra.mxu1 %v2750_v63  ;;  %2613 = vmatprep.subr.bf16.mxu0 %v2769_v0 }
  0xbb   : > { %2625 = vmatprep.subr.bf16.mxu1 %v2769_v0 }
  0xbd   : > { %2614 = vmatpush3.bf16.msra.mxu0 %v2751_v1 }
  0xbe   : > { %2626 = vmatpush3.bf16.msra.mxu1 %v2752_v3  ;;  %2631 = vmatprep.subr.bf16.mxu0 %v2769_v0 }
  0xbf   : > { %2643 = vmatprep.subr.bf16.mxu1 %v2769_v0 }
  0xc0   : > { %2616 = vmatmul.mubr.msk.bf16.vlgmr.msra.gmra.mrb[40].mxu0 %vm437_vm1, %v217_v5 }
  0xc1   : > { %2628 = vmatmul.mubr.msk.bf16.vlgmr.msra.gmra.mrb[40].mxu1 %vm437_vm1, %v218_v6  ;;  %2632 = vmatpush3.bf16.msra.mxu0 %v2753_v7 }
  0xc2   : > { %2644 = vmatpush3.bf16.msra.mxu1 %v2754_v8  ;;  %2633 = vmatprep.subr.bf16.mxu0 %v2769_v0 }
  0xc3   : > { %2645 = vmatprep.subr.bf16.mxu1 %v2769_v0  ;;  %2639 = vmatprep.mubr.msk.bf16.mxu0 %vm2770_vm0, %v2769_v0 }
  0xc4   : > { %2651 = vmatprep.mubr.msk.bf16.mxu1 %vm2770_vm0, %v2769_v0 }
  0xc5   : > { %2634 = vmatpush3.bf16.msra.mxu0 %v2755_v9 }
  0xc6   : > { %2646 = vmatpush3.bf16.msra.mxu1 %v2756_v10  ;;  %2635 = vmatprep.subr.bf16.mxu0 %v2769_v0 }
  0xc7   : > { %2647 = vmatprep.subr.bf16.mxu1 %v2769_v0 }
  0xc9   : > { %2636 = vmatpush3.bf16.msra.mxu0 %v2757_v11 }
  0xca   : > { %2648 = vmatpush3.bf16.msra.mxu1 %v2758_v12  ;;  %2637 = vmatprep.subr.bf16.mxu0 %v2769_v0 }
  0xcb   : > { %2649 = vmatprep.subr.bf16.mxu1 %v2769_v0 }
  0xcd   : > { %2638 = vmatpush3.bf16.msra.mxu0 %v2759_v13 }
  0xce   : > { %2650 = vmatpush3.bf16.msra.mxu1 %v2760_v15 }
  0xd0   : > { %2640 = vmatmul.mubr.msk.bf16.vlgmr.msra.gmra.mrb[44].mxu0 %vm437_vm1, %v219_v17 }
  0xd1   : > { %2652 = vmatmul.mubr.msk.bf16.vlgmr.msra.gmra.mrb[44].mxu1 %vm437_vm1, %v220_v18 }
  0xf3   : > { %v475_v0 = vpop.f32.mrb[0].mxu0 }
  0xf4   : > { %2023 = vst.msk [vmem:[%s3103_s22] sm:$0x3] %vm2022_vm2, %v475_v0  ;;  %v542_v19 = vpop.f32.mrb[0].mxu1  ;;  %v2377_v20 = vpop.f32.mrb[1].mxu0 }
  0xf5   : > { %2024 = vst.msk [vmem:[%s3103_s22 + $0x2] sm:$0x3] %vm2022_vm2, %v542_v19  ;;  %v2389_v21 = vpop.f32.mrb[1].mxu1  ;;  %v478_v22 = vpop.f32.mrb[2].mxu0 }
  0xf6   : > { %v545_v23 = vpop.f32.mrb[2].mxu1  ;;  %v2378_v24 = vpop.f32.mrb[3].mxu0 }
  0xf7   : > { %v2390_v25 = vpop.f32.mrb[3].mxu1 }
 0x103   : > { %v609_v26 = vpop.f32.mrb[4].mxu0 }
 0x104   : > { %2025 = vst.msk [vmem:[%s3103_s22 + $0x4] sm:$0x3] %vm2022_vm2, %v609_v26  ;;  %v676_v27 = vpop.f32.mrb[4].mxu1  ;;  %v2401_v28 = vpop.f32.mrb[5].mxu0 }
 0x105   : > { %2026 = vst.msk [vmem:[%s3103_s22 + $0x6] sm:$0x3] %vm2022_vm2, %v676_v27  ;;  %v2413_v29 = vpop.f32.mrb[5].mxu1  ;;  %v612_v30 = vpop.f32.mrb[6].mxu0 }
 0x106   : > { %v679_v31 = vpop.f32.mrb[6].mxu1  ;;  %v2402_v32 = vpop.f32.mrb[7].mxu0 }
 0x107   : > { %v2414_v33 = vpop.f32.mrb[7].mxu1 }
 0x113   : > { %v743_v34 = vpop.f32.mrb[8].mxu0 }
 0x114   : > { %2027 = vst.msk [vmem:[%s3103_s22 + $0x8] sm:$0x3] %vm2022_vm2, %v743_v34  ;;  %v810_v35 = vpop.f32.mrb[8].mxu1  ;;  %v2425_v36 = vpop.f32.mrb[9].mxu0 }
 0x115   : > { %2028 = vst.msk [vmem:[%s3103_s22 + $0xa] sm:$0x3] %vm2022_vm2, %v810_v35  ;;  %v2437_v37 = vpop.f32.mrb[9].mxu1  ;;  %v746_v38 = vpop.f32.mrb[10].mxu0 }
 0x116   : > { %v813_v39 = vpop.f32.mrb[10].mxu1  ;;  %v2426_v40 = vpop.f32.mrb[11].mxu0 }
 0x117   : > { %v2438_v41 = vpop.f32.mrb[11].mxu1 }
 0x123   : > { %v877_v42 = vpop.f32.mrb[12].mxu0 }
 0x124   : > { %2029 = vst.msk [vmem:[%s3103_s22 + $0xc] sm:$0x3] %vm2022_vm2, %v877_v42  ;;  %v944_v43 = vpop.f32.mrb[12].mxu1  ;;  %v2449_v44 = vpop.f32.mrb[13].mxu0 }
 0x125   : > { %2030 = vst.msk [vmem:[%s3103_s22 + $0xe] sm:$0x3] %vm2022_vm2, %v944_v43  ;;  %v2461_v45 = vpop.f32.mrb[13].mxu1  ;;  %v880_v46 = vpop.f32.mrb[14].mxu0 }
 0x126   : > { %v947_v47 = vpop.f32.mrb[14].mxu1  ;;  %v2450_v48 = vpop.f32.mrb[15].mxu0 }
 0x127   : > { %v2462_v49 = vpop.f32.mrb[15].mxu1 }
 0x133   : > { %v1011_v50 = vpop.f32.mrb[16].mxu0 }
 0x134   : > { %2031 = vst.msk [vmem:[%s3103_s22 + $0x10] sm:$0x3] %vm2022_vm2, %v1011_v50  ;;  %v1078_v51 = vpop.f32.mrb[16].mxu1  ;;  %v2473_v52 = vpop.f32.mrb[17].mxu0 }
 0x135   : > { %2032 = vst.msk [vmem:[%s3103_s22 + $0x12] sm:$0x3] %vm2022_vm2, %v1078_v51  ;;  %v2485_v53 = vpop.f32.mrb[17].mxu1  ;;  %v1014_v54 = vpop.f32.mrb[18].mxu0 }
 0x136   : > { %v1081_v55 = vpop.f32.mrb[18].mxu1  ;;  %v2474_v56 = vpop.f32.mrb[19].mxu0 }
 0x137   : > { %v2486_v57 = vpop.f32.mrb[19].mxu1 }
 0x143   : > { %v1145_v58 = vpop.f32.mrb[20].mxu0 }
 0x144   : > { %2033 = vst.msk [vmem:[%s3103_s22 + $0x14] sm:$0x3] %vm2022_vm2, %v1145_v58  ;;  %v1212_v59 = vpop.f32.mrb[20].mxu1  ;;  %v2497_v60 = vpop.f32.mrb[21].mxu0 }
 0x145   : > { %2034 = vst.msk [vmem:[%s3103_s22 + $0x16] sm:$0x3] %vm2022_vm2, %v1212_v59  ;;  %v2509_v61 = vpop.f32.mrb[21].mxu1  ;;  %v1148_v62 = vpop.f32.mrb[22].mxu0 }
 0x146   : > { %v1215_v63 = vpop.f32.mrb[22].mxu1  ;;  %v2498_v1 = vpop.f32.mrb[23].mxu0 }
 0x147   : > { %v2510_v2 = vpop.f32.mrb[23].mxu1 }
 0x153   : > { %v1279_v3 = vpop.f32.mrb[24].mxu0 }
 0x154   : > { %2035 = vst.msk [vmem:[%s3103_s22 + $0x18] sm:$0x3] %vm2022_vm2, %v1279_v3  ;;  %v1346_v4 = vpop.f32.mrb[24].mxu1  ;;  %v2521_v5 = vpop.f32.mrb[25].mxu0 }
 0x155   : > { %2036 = vst.msk [vmem:[%s3103_s22 + $0x1a] sm:$0x3] %vm2022_vm2, %v1346_v4  ;;  %v2533_v6 = vpop.f32.mrb[25].mxu1  ;;  %v1282_v7 = vpop.f32.mrb[26].mxu0 }
 0x156   : > { %v1349_v8 = vpop.f32.mrb[26].mxu1  ;;  %v2522_v9 = vpop.f32.mrb[27].mxu0 }
 0x157   : > { %v2534_v10 = vpop.f32.mrb[27].mxu1 }
 0x163   : > { %v1413_v11 = vpop.f32.mrb[28].mxu0 }
 0x164   : > { %2037 = vst.msk [vmem:[%s3103_s22 + $0x1c] sm:$0x3] %vm2022_vm2, %v1413_v11  ;;  %v1480_v12 = vpop.f32.mrb[28].mxu1  ;;  %v2545_v13 = vpop.f32.mrb[29].mxu0 }
 0x165   : > { %2038 = vst.msk [vmem:[%s3103_s22 + $0x1e] sm:$0x3] %vm2022_vm2, %v1480_v12  ;;  %v2557_v14 = vpop.f32.mrb[29].mxu1  ;;  %v1416_v15 = vpop.f32.mrb[30].mxu0 }
 0x166   : > { %v1483_v16 = vpop.f32.mrb[30].mxu1  ;;  %v2546_v17 = vpop.f32.mrb[31].mxu0 }
 0x167   : > { %v2558_v18 = vpop.f32.mrb[31].mxu1 }
 0x173   : > { %v1547_v0 = vpop.f32.mrb[32].mxu0 }
 0x174   : > { %2039 = vst.msk [vmem:[%s3103_s22 + $0x20] sm:$0x3] %vm2022_vm2, %v1547_v0  ;;  %v1614_v19 = vpop.f32.mrb[32].mxu1  ;;  %v2569_v20 = vpop.f32.mrb[33].mxu0 }
 0x175   : > { %2040 = vst.msk [vmem:[%s3103_s22 + $0x22] sm:$0x3] %vm2022_vm2, %v1614_v19  ;;  %v2581_v21 = vpop.f32.mrb[33].mxu1  ;;  %v1550_v22 = vpop.f32.mrb[34].mxu0 }
 0x176   : > { %v1617_v23 = vpop.f32.mrb[34].mxu1  ;;  %v2570_v24 = vpop.f32.mrb[35].mxu0 }
 0x177   : > { %v2582_v25 = vpop.f32.mrb[35].mxu1 }
 0x183   : > { %v1681_v26 = vpop.f32.mrb[36].mxu0 }
 0x184   : > { %2041 = vst.msk [vmem:[%s3103_s22 + $0x24] sm:$0x3] %vm2022_vm2, %v1681_v26  ;;  %v1748_v27 = vpop.f32.mrb[36].mxu1  ;;  %v2593_v28 = vpop.f32.mrb[37].mxu0 }
 0x185   : > { %2042 = vst.msk [vmem:[%s3103_s22 + $0x26] sm:$0x3] %vm2022_vm2, %v1748_v27  ;;  %v2605_v29 = vpop.f32.mrb[37].mxu1  ;;  %v1684_v30 = vpop.f32.mrb[38].mxu0 }
 0x186   : > { %v1751_v31 = vpop.f32.mrb[38].mxu1  ;;  %v2594_v32 = vpop.f32.mrb[39].mxu0 }
 0x187   : > { %v2606_v33 = vpop.f32.mrb[39].mxu1 }
 0x193   : > { %v1815_v34 = vpop.f32.mrb[40].mxu0 }
 0x194   : > { %2043 = vst.msk [vmem:[%s3103_s22 + $0x28] sm:$0x3] %vm2022_vm2, %v1815_v34  ;;  %v1882_v35 = vpop.f32.mrb[40].mxu1  ;;  %v2617_v36 = vpop.f32.mrb[41].mxu0 }
 0x195   : > { %2044 = vst.msk [vmem:[%s3103_s22 + $0x2a] sm:$0x3] %vm2022_vm2, %v1882_v35  ;;  %v2629_v37 = vpop.f32.mrb[41].mxu1  ;;  %v1818_v38 = vpop.f32.mrb[42].mxu0 }
 0x196   : > { %v1885_v39 = vpop.f32.mrb[42].mxu1  ;;  %v2618_v40 = vpop.f32.mrb[43].mxu0 }
 0x197   : > { %v2630_v41 = vpop.f32.mrb[43].mxu1 }
 0x1a3   : > { %v1949_v42 = vpop.f32.mrb[44].mxu0 }
 0x1a4   : > { %2045 = vst.msk [vmem:[%s3103_s22 + $0x2c] sm:$0x3] %vm2022_vm2, %v1949_v42  ;;  %v2016_v43 = vpop.f32.mrb[44].mxu1  ;;  %v2641_v44 = vpop.f32.mrb[45].mxu0 }
 0x1a5   : > { %2046 = vst.msk [vmem:[%s3103_s22 + $0x2e] sm:$0x3] %vm2022_vm2, %v2016_v43  ;;  %v2653_v45 = vpop.f32.mrb[45].mxu1  ;;  %v1952_v46 = vpop.f32.mrb[46].mxu0 }
 0x1a6   : > { %v2019_v47 = vpop.f32.mrb[46].mxu1  ;;  %v2642_v48 = vpop.f32.mrb[47].mxu0 }
 0x1a7   : > { %v2654_v49 = vpop.f32.mrb[47].mxu1 }
 0x1a8 PF: > { %s12_s9 = sadd.s32 1, %s2767_s9  }
 0x1a9   : > { %p9_p4 = scmp.ge.s32.totalorder %s12_s9, 4  }
 0x1ab   :  { %11 = sbr.rel (!%p9_p4) target bundleno = 1 (0x1), region = 61 }

// kernel: fno3d_forward.8
= control target key start
LH: loop header
LB: loop body
LE: loop exit
PB: predicated region body
PF: predicated region fallthrough
CT: control target
= control target key end

     0   :  { %s1050_s9 = smov 0   ;;  %s1052_s10 = smov 0   ;;  %s1302_s0 = inlined_call_operand.vmem [shape: f32[2,32,2304], index: 0, kind: input, shape index: {}]   ;;  %s1303_s1 = inlined_call_operand.vmem [shape: bf16[32,32], index: 1, kind: input, shape index: {}]   ;;  %s1304_s2 = inlined_call_operand.vmem [shape: f32[2,32,2304], index: 2, kind: output, shape index: {}]  }
   0x1   :  { %s1054_s11 = smov 0  }
   0x2 LB: > { %s24_s12 = sadd.s32 1, %s1028_s10  ;;  %p953_p0 = scmp.ge.s32.totalorder %s1032_s11, 1  ;;  %s1032_s11 = sphi %s1054_s11, %s12_s11   ;;  %s1028_s10 = sphi %s1052_s10, %s1306_s10   ;;  %s1024_s9 = sphi %s1050_s9, %s1305_s9  }
   0x3   : > { %p26_p1 = scmp.ge.s32.totalorder %s24_s12, 2  ;;  %p133_p2 = scmp.lt.s32.totalorder %s1032_s11, 3 }
   0x5   : > { %s1308_s12 = smov (%p26_p1, %s24_s12), 0  ;;  %p134_p3 = pnand %p953_p0, %p133_p2 }
   0x6   : > { %p164_p4 = scmp.lt.s32.totalorder (!%p134_p3), %s1024_s9, 1  ;;  %v1034_v0 = vmov (!%p134_p3), 0   ;;  %v1103_v27 = vld [vmem:[%s1303_s1] sm:$0xff] (!%p134_p3)   ;;  %v1108_v28 = vld [vmem:[%s1303_s1 + $0x8] sm:$0xff] (!%p134_p3)   ;;  %vm306_vm0 = vcmask (!%p134_p3), 261120  }
   0x7   : > { %137 = sbr.rel (%p134_p3) target bundleno = 309 (0x135), region = 28  ;;  %345 = vmatprep.mubr.bf16.mxu0 (!%p134_p3), %v1034_v0  ;;  %355 = vmatprep.mubr.bf16.mxu1 (!%p134_p3), %v1034_v0 }
   0xe   : > { %s1310_s9 = smov (!%p164_p4, %s1024_s9), 1 }
   0xf   : > { %s982_s13 = smul.u32 576, %s1310_s9 }
  0x11   : > { %s1078_s16 = scalar_lea.vmem %s1302_s0, %s982_s13  ;;  %s1219_s23 = scalar_lea.vmem %s1304_s2, %s982_s13 }
  0x12   : > { %v185_v1 = vld [vmem:[%s1078_s16 + $0x8] sm:$0xff]  ;;  %v203_v2 = vld [vmem:[%s1078_s16 + $0x98] sm:$0xff]  ;;  %v184_v3 = vld [vmem:[%s1078_s16] sm:$0xff] }
  0x13   : > { %v257_v4 = vpack.c.bf16 %v203_v2, %v185_v1  ;;  %v202_v5 = vld [vmem:[%s1078_s16 + $0x90] sm:$0xff]  ;;  %v221_v6 = vld [vmem:[%s1078_s16 + $0x128] sm:$0xff]  ;;  %v239_v7 = vld [vmem:[%s1078_s16 + $0x1b8] sm:$0xff] }
  0x14   : > { %v256_v8 = vpack.c.bf16 %v202_v5, %v184_v3  ;;  %v275_v9 = vpack.c.bf16 %v239_v7, %v221_v6  ;;  %v220_v10 = vld [vmem:[%s1078_s16 + $0x120] sm:$0xff]  ;;  %v238_v11 = vld [vmem:[%s1078_s16 + $0x1b0] sm:$0xff]  ;;  %v187_v12 = vld [vmem:[%s1078_s16 + $0x18] sm:$0xff] }
  0x15   : > { %313 = vmatprep.subr.bf16.mxu0 %v257_v4  ;;  %978 = vmatprep.subr.bf16.mxu1 %v257_v4  ;;  %v205_v13 = vld [vmem:[%s1078_s16 + $0xa8] sm:$0xff]  ;;  %v207_v15 = vld [vmem:[%s1078_s16 + $0xb8] sm:$0xff]  ;;  %v274_v16 = vpack.c.bf16 %v238_v11, %v220_v10  ;;  %v186_v17 = vld [vmem:[%s1078_s16 + $0x10] sm:$0xff] }
  0x16   : > { %v189_v14 = vld [vmem:[%s1078_s16 + $0x28] sm:$0xff]  ;;  %314 = vmatpush1.bf16.msra.mxu0 %v256_v8  ;;  %980 = vmatpush1.bf16.msra.mxu1 %v256_v8  ;;  %v204_v18 = vld [vmem:[%s1078_s16 + $0xa0] sm:$0xff]  ;;  %v259_v19 = vpack.c.bf16 %v205_v13, %v187_v12  ;;  %v206_v22 = vld [vmem:[%s1078_s16 + $0xb0] sm:$0xff] }
  0x17   : > { %315 = vmatprep.subr.bf16.mxu0 %v275_v9  ;;  %979 = vmatprep.subr.bf16.mxu1 %v275_v9  ;;  %v261_v20 = vpack.c.bf16 %v207_v15, %v189_v14  ;;  %v188_v21 = vld [vmem:[%s1078_s16 + $0x20] sm:$0xff]  ;;  %v223_v23 = vld [vmem:[%s1078_s16 + $0x138] sm:$0xff]  ;;  %v241_v24 = vld [vmem:[%s1078_s16 + $0x1c8] sm:$0xff]  ;;  %v258_v29 = vpack.c.bf16 %v204_v18, %v186_v17 }
  0x18   : > { %v225_v25 = vld [vmem:[%s1078_s16 + $0x148] sm:$0xff]  ;;  %v243_v26 = vld [vmem:[%s1078_s16 + $0x1d8] sm:$0xff]  ;;  %v260_v30 = vpack.c.bf16 %v206_v22, %v188_v21  ;;  %v222_v31 = vld [vmem:[%s1078_s16 + $0x130] sm:$0xff]  ;;  %v277_v33 = vpack.c.bf16 %v241_v24, %v223_v23 }
  0x19   : > { %v240_v32 = vld [vmem:[%s1078_s16 + $0x1c0] sm:$0xff]  ;;  %v279_v34 = vpack.c.bf16 %v243_v26, %v225_v25  ;;  %v242_v36 = vld [vmem:[%s1078_s16 + $0x1d0] sm:$0xff]  ;;  %v191_v37 = vld [vmem:[%s1078_s16 + $0x38] sm:$0xff] }
  0x1a   : > { %316 = vmatpush1.bf16.msra.mxu0 %v274_v16  ;;  %981 = vmatpush1.bf16.msra.mxu1 %v274_v16  ;;  %v224_v35 = vld [vmem:[%s1078_s16 + $0x140] sm:$0xff]  ;;  %v209_v38 = vld [vmem:[%s1078_s16 + $0xc8] sm:$0xff]  ;;  %v211_v40 = vld [vmem:[%s1078_s16 + $0xd8] sm:$0xff]  ;;  %v276_v41 = vpack.c.bf16 %v240_v32, %v222_v31 }
  0x1b   : > { %366 = vmatprep.subr.bf16.mxu1 %v259_v19  ;;  %419 = vmatprep.subr.bf16.mxu0 %v261_v20  ;;  %v193_v39 = vld [vmem:[%s1078_s16 + $0x48] sm:$0xff]  ;;  %v278_v42 = vpack.c.bf16 %v242_v36, %v224_v35  ;;  %v190_v43 = vld [vmem:[%s1078_s16 + $0x30] sm:$0xff]  ;;  %v263_v44 = vpack.c.bf16 %v209_v38, %v191_v37  ;;  %v208_v46 = vld [vmem:[%s1078_s16 + $0xc0] sm:$0xff] }
  0x1c   : > { %v265_v45 = vpack.c.bf16 %v211_v40, %v193_v39  ;;  %v192_v47 = vld [vmem:[%s1078_s16 + $0x40] sm:$0xff]  ;;  %v210_v48 = vld [vmem:[%s1078_s16 + $0xd0] sm:$0xff]  ;;  %v227_v49 = vld [vmem:[%s1078_s16 + $0x158] sm:$0xff]  ;;  %v262_v53 = vpack.c.bf16 %v208_v46, %v190_v43 }
  0x1d   : > { %958 = vmatmul.mubr.msk.bf16.vlgmr.msra.gmra.mrb[0].mxu0 %vm306_vm0, %v1103_v27  ;;  %959 = vmatmul.mubr.msk.bf16.vlgmr.msra.gmra.mrb[0].mxu1 %vm306_vm0, %v1108_v28  ;;  %v245_v50 = vld [vmem:[%s1078_s16 + $0x1e8] sm:$0xff]  ;;  %v247_v52 = vld [vmem:[%s1078_s16 + $0x1f8] sm:$0xff]  ;;  %v264_v54 = vpack.c.bf16 %v210_v48, %v192_v47  ;;  %v226_v55 = vld [vmem:[%s1078_s16 + $0x150] sm:$0xff] }
  0x1e   : > { %367 = vmatpush1.bf16.msra.mxu1 %v258_v29  ;;  %420 = vmatpush1.bf16.msra.mxu0 %v260_v30  ;;  %v229_v51 = vld [vmem:[%s1078_s16 + $0x168] sm:$0xff]  ;;  %v244_v56 = vld [vmem:[%s1078_s16 + $0x1e0] sm:$0xff]  ;;  %v246_v58 = vld [vmem:[%s1078_s16 + $0x1f0] sm:$0xff]  ;;  %v281_v60 = vpack.c.bf16 %v245_v50, %v227_v49 }
  0x1f   : > { %368 = vmatprep.subr.bf16.mxu1 %v277_v33  ;;  %421 = vmatprep.subr.bf16.mxu0 %v279_v34  ;;  %v228_v57 = vld [vmem:[%s1078_s16 + $0x160] sm:$0xff]  ;;  %v195_v59 = vld [vmem:[%s1078_s16 + $0x58] sm:$0xff]  ;;  %v283_v61 = vpack.c.bf16 %v247_v52, %v229_v51  ;;  %v213_v62 = vld [vmem:[%s1078_s16 + $0xe8] sm:$0xff]  ;;  %v280_v2 = vpack.c.bf16 %v244_v56, %v226_v55 }
  0x20   : > { %398 = vmatprep.mubr.bf16.mxu1 %v1034_v0  ;;  %451 = vmatprep.mubr.bf16.mxu0 %v1034_v0  ;;  %v197_v63 = vld [vmem:[%s1078_s16 + $0x68] sm:$0xff]  ;;  %v215_v1 = vld [vmem:[%s1078_s16 + $0xf8] sm:$0xff]  ;;  %v282_v3 = vpack.c.bf16 %v246_v58, %v228_v57  ;;  %v267_v4 = vpack.c.bf16 %v213_v62, %v195_v59  ;;  %v194_v6 = vld [vmem:[%s1078_s16 + $0x50] sm:$0xff] }
  0x21   : > { %v269_v5 = vpack.c.bf16 %v215_v1, %v197_v63  ;;  %v212_v7 = vld [vmem:[%s1078_s16 + $0xe0] sm:$0xff]  ;;  %v214_v9 = vld [vmem:[%s1078_s16 + $0xf0] sm:$0xff]  ;;  %v231_v10 = vld [vmem:[%s1078_s16 + $0x178] sm:$0xff] }
  0x22   : > { %369 = vmatpush1.bf16.msra.mxu1 %v276_v41  ;;  %422 = vmatpush1.bf16.msra.mxu0 %v278_v42  ;;  %v196_v8 = vld [vmem:[%s1078_s16 + $0x60] sm:$0xff]  ;;  %v249_v11 = vld [vmem:[%s1078_s16 + $0x208] sm:$0xff]  ;;  %v251_v13 = vld [vmem:[%s1078_s16 + $0x218] sm:$0xff]  ;;  %v266_v14 = vpack.c.bf16 %v212_v7, %v194_v6 }
  0x23   : > { %472 = vmatprep.subr.bf16.mxu1 %v263_v44  ;;  %525 = vmatprep.subr.bf16.mxu0 %v265_v45  ;;  %v233_v12 = vld [vmem:[%s1078_s16 + $0x188] sm:$0xff]  ;;  %v268_v15 = vpack.c.bf16 %v214_v9, %v196_v8  ;;  %v230_v16 = vld [vmem:[%s1078_s16 + $0x170] sm:$0xff]  ;;  %v248_v17 = vld [vmem:[%s1078_s16 + $0x200] sm:$0xff]  ;;  %v285_v21 = vpack.c.bf16 %v249_v11, %v231_v10 }
  0x24   : > { %v232_v18 = vld [vmem:[%s1078_s16 + $0x180] sm:$0xff]  ;;  %v250_v19 = vld [vmem:[%s1078_s16 + $0x210] sm:$0xff]  ;;  %v199_v20 = vld [vmem:[%s1078_s16 + $0x78] sm:$0xff]  ;;  %v287_v22 = vpack.c.bf16 %v251_v13, %v233_v12  ;;  %v284_v26 = vpack.c.bf16 %v248_v17, %v230_v16 }
  0x25   : > { %960 = vmatmul.mubr.msk.bf16.vlgmr.msra.gmra.mrb[4].mxu1 %vm306_vm0, %v1103_v27  ;;  %962 = vmatmul.mubr.msk.bf16.vlgmr.msra.gmra.mrb[4].mxu0 %vm306_vm0, %v1103_v27  ;;  %v217_v23 = vld [vmem:[%s1078_s16 + $0x108] sm:$0xff]  ;;  %v219_v25 = vld [vmem:[%s1078_s16 + $0x118] sm:$0xff]  ;;  %v286_v29 = vpack.c.bf16 %v250_v19, %v232_v18  ;;  %v198_v32 = vld [vmem:[%s1078_s16 + $0x70] sm:$0xff] }
  0x26   : > { %473 = vmatpush1.bf16.msra.mxu1 %v262_v53  ;;  %526 = vmatpush1.bf16.msra.mxu0 %v264_v54  ;;  %v201_v24 = vld [vmem:[%s1078_s16 + $0x88] sm:$0xff]  ;;  %v271_v30 = vpack.c.bf16 %v217_v23, %v199_v20  ;;  %v216_v33 = vld [vmem:[%s1078_s16 + $0x100] sm:$0xff]  ;;  %v218_v35 = vld [vmem:[%s1078_s16 + $0x110] sm:$0xff] }
  0x27   : > { %408 = vmatprep.mubr.bf16.mxu1 %v1034_v0  ;;  %461 = vmatprep.mubr.bf16.mxu0 %v1034_v0  ;;  %v273_v31 = vpack.c.bf16 %v219_v25, %v201_v24  ;;  %v200_v34 = vld [vmem:[%s1078_s16 + $0x80] sm:$0xff]  ;;  %v235_v36 = vld [vmem:[%s1078_s16 + $0x198] sm:$0xff]  ;;  %v253_v37 = vld [vmem:[%s1078_s16 + $0x228] sm:$0xff]  ;;  %v270_v40 = vpack.c.bf16 %v216_v33, %v198_v32 }
  0x28   : > { %474 = vmatprep.subr.bf16.mxu1 %v281_v60  ;;  %527 = vmatprep.subr.bf16.mxu0 %v283_v61  ;;  %v237_v38 = vld [vmem:[%s1078_s16 + $0x1a8] sm:$0xff]  ;;  %v255_v39 = vld [vmem:[%s1078_s16 + $0x238] sm:$0xff]  ;;  %v272_v41 = vpack.c.bf16 %v218_v35, %v200_v34  ;;  %v234_v42 = vld [vmem:[%s1078_s16 + $0x190] sm:$0xff]  ;;  %v289_v46 = vpack.c.bf16 %v253_v37, %v235_v36 }
  0x29   : > { %v252_v43 = vld [vmem:[%s1078_s16 + $0x220] sm:$0xff]  ;;  %v254_v45 = vld [vmem:[%s1078_s16 + $0x230] sm:$0xff]  ;;  %v291_v47 = vpack.c.bf16 %v255_v39, %v237_v38 }
  0x2a   : > { %475 = vmatpush1.bf16.msra.mxu1 %v280_v2  ;;  %528 = vmatpush1.bf16.msra.mxu0 %v282_v3  ;;  %v236_v44 = vld [vmem:[%s1078_s16 + $0x1a0] sm:$0xff]  ;;  %v288_v48 = vpack.c.bf16 %v252_v43, %v234_v42 }
  0x2b   : > { %578 = vmatprep.subr.bf16.mxu1 %v267_v4  ;;  %631 = vmatprep.subr.bf16.mxu0 %v269_v5  ;;  %v290_v49 = vpack.c.bf16 %v254_v45, %v236_v44 }
  0x2d   : > { %961 = vmatmul.mubr.msk.bf16.gmra.mrb[8].mxu1 %vm306_vm0, %v1108_v28  ;;  %963 = vmatmul.mubr.msk.bf16.gmra.mrb[8].mxu0 %vm306_vm0, %v1108_v28 }
  0x2e   : > { %504 = vmatprep.mubr.bf16.mxu1 %v1034_v0  ;;  %557 = vmatprep.mubr.bf16.mxu0 %v1034_v0 }
  0x35   : > { %964 = vmatmul.mubr.msk.bf16.vlgmr.msra.gmra.mrb[12].mxu1 %vm306_vm0, %v1103_v27  ;;  %966 = vmatmul.mubr.msk.bf16.vlgmr.msra.gmra.mrb[12].mxu0 %vm306_vm0, %v1103_v27 }
  0x36   : > { %579 = vmatpush1.bf16.msra.mxu1 %v266_v14  ;;  %632 = vmatpush1.bf16.msra.mxu0 %v268_v15 }
  0x37   : > { %514 = vmatprep.mubr.bf16.mxu1 %v1034_v0  ;;  %567 = vmatprep.mubr.bf16.mxu0 %v1034_v0 }
  0x38   : > { %580 = vmatprep.subr.bf16.mxu1 %v285_v21  ;;  %633 = vmatprep.subr.bf16.mxu0 %v287_v22 }
  0x3a   : > { %581 = vmatpush1.bf16.msra.mxu1 %v284_v26  ;;  %634 = vmatpush1.bf16.msra.mxu0 %v286_v29 }
  0x3b   : > { %684 = vmatprep.subr.bf16.mxu1 %v271_v30  ;;  %737 = vmatprep.subr.bf16.mxu0 %v273_v31 }
  0x3d   : > { %965 = vmatmul.mubr.msk.bf16.gmra.mrb[16].mxu1 %vm306_vm0, %v1108_v28  ;;  %967 = vmatmul.mubr.msk.bf16.gmra.mrb[16].mxu0 %vm306_vm0, %v1108_v28 }
  0x3e   : > { %610 = vmatprep.mubr.bf16.mxu1 %v1034_v0  ;;  %663 = vmatprep.mubr.bf16.mxu0 %v1034_v0 }
  0x45   : > { %968 = vmatmul.mubr.msk.bf16.vlgmr.msra.gmra.mrb[20].mxu1 %vm306_vm0, %v1103_v27  ;;  %970 = vmatmul.mubr.msk.bf16.vlgmr.msra.gmra.mrb[20].mxu0 %vm306_vm0, %v1103_v27 }
  0x46   : > { %685 = vmatpush1.bf16.msra.mxu1 %v270_v40  ;;  %738 = vmatpush1.bf16.msra.mxu0 %v272_v41 }
  0x47   : > { %620 = vmatprep.mubr.bf16.mxu1 %v1034_v0  ;;  %673 = vmatprep.mubr.bf16.mxu0 %v1034_v0 }
  0x48   : > { %686 = vmatprep.subr.bf16.mxu1 %v289_v46  ;;  %739 = vmatprep.subr.bf16.mxu0 %v291_v47 }
  0x4a   : > { %687 = vmatpush1.bf16.msra.mxu1 %v288_v48  ;;  %740 = vmatpush1.bf16.msra.mxu0 %v290_v49 }
  0x4d   : > { %969 = vmatmul.mubr.msk.bf16.gmra.mrb[24].mxu1 %vm306_vm0, %v1108_v28  ;;  %971 = vmatmul.mubr.msk.bf16.gmra.mrb[24].mxu0 %vm306_vm0, %v1108_v28 }
  0x4e   : > { %716 = vmatprep.mubr.bf16.mxu1 %v1034_v0  ;;  %769 = vmatprep.mubr.bf16.mxu0 %v1034_v0 }
  0x55   : > { %972 = vmatmul.mubr.msk.bf16.vlgmr.msra.gmra.mrb[28].mxu1 %vm306_vm0, %v1103_v27  ;;  %974 = vmatmul.mubr.msk.bf16.vlgmr.msra.gmra.mrb[28].mxu0 %vm306_vm0, %v1103_v27 }
  0x56   : > { %726 = vmatprep.mubr.bf16.mxu1 %v1034_v0  ;;  %779 = vmatprep.mubr.bf16.mxu0 %v1034_v0 }
  0x5d   : > { %973 = vmatmul.mubr.msk.bf16.gmra.mrb[32].mxu1 %vm306_vm0, %v1108_v28  ;;  %975 = vmatmul.mubr.msk.bf16.gmra.mrb[32].mxu0 %vm306_vm0, %v1108_v28 }
  0xf0   : > { %v347_v0 = vpop.f32.mrb[0].mxu0  ;;  %v357_v27 = vpop.f32.mrb[0].mxu1 }
  0xf1   : > { %790 = vst [vmem:[%s1219_s23] sm:$0xff] %v347_v0  ;;  %826 = vst [vmem:[%s1219_s23 + $0x120] sm:$0xff] %v357_v27  ;;  %v349_v28 = vpop.f32.mrb[1].mxu0  ;;  %v359_v50 = vpop.f32.mrb[1].mxu1 }
  0xf2   : > { %791 = vst [vmem:[%s1219_s23 + $0x8] sm:$0xff] %v349_v28  ;;  %827 = vst [vmem:[%s1219_s23 + $0x128] sm:$0xff] %v359_v50  ;;  %v351_v51 = vpop.f32.mrb[2].mxu0  ;;  %v361_v52 = vpop.f32.mrb[2].mxu1 }
  0xf3   : > { %808 = vst [vmem:[%s1219_s23 + $0x90] sm:$0xff] %v351_v51  ;;  %844 = vst [vmem:[%s1219_s23 + $0x1b0] sm:$0xff] %v361_v52  ;;  %v353_v53 = vpop.f32.mrb[3].mxu0  ;;  %v363_v54 = vpop.f32.mrb[3].mxu1 }
  0xf4   : > { %809 = vst [vmem:[%s1219_s23 + $0x98] sm:$0xff] %v353_v53  ;;  %845 = vst [vmem:[%s1219_s23 + $0x1b8] sm:$0xff] %v363_v54 }
  0xf8   : > { %v400_v55 = vpop.f32.mrb[4].mxu1  ;;  %v453_v56 = vpop.f32.mrb[4].mxu0 }
  0xf9   : > { %792 = vst [vmem:[%s1219_s23 + $0x10] sm:$0xff] %v400_v55  ;;  %794 = vst [vmem:[%s1219_s23 + $0x20] sm:$0xff] %v453_v56  ;;  %v402_v57 = vpop.f32.mrb[5].mxu1  ;;  %v455_v58 = vpop.f32.mrb[5].mxu0 }
  0xfa   : > { %793 = vst [vmem:[%s1219_s23 + $0x18] sm:$0xff] %v402_v57  ;;  %795 = vst [vmem:[%s1219_s23 + $0x28] sm:$0xff] %v455_v58  ;;  %v404_v59 = vpop.f32.mrb[6].mxu1  ;;  %v457_v60 = vpop.f32.mrb[6].mxu0 }
  0xfb   : > { %810 = vst [vmem:[%s1219_s23 + $0xa0] sm:$0xff] %v404_v59  ;;  %812 = vst [vmem:[%s1219_s23 + $0xb0] sm:$0xff] %v457_v60  ;;  %v406_v61 = vpop.f32.mrb[7].mxu1  ;;  %v459_v62 = vpop.f32.mrb[7].mxu0 }
  0xfc   : > { %811 = vst [vmem:[%s1219_s23 + $0xa8] sm:$0xff] %v406_v61  ;;  %813 = vst [vmem:[%s1219_s23 + $0xb8] sm:$0xff] %v459_v62 }
 0x100   : > { %v410_v63 = vpop.f32.mrb[8].mxu1  ;;  %v463_v1 = vpop.f32.mrb[8].mxu0 }
 0x101   : > { %828 = vst [vmem:[%s1219_s23 + $0x130] sm:$0xff] %v410_v63  ;;  %830 = vst [vmem:[%s1219_s23 + $0x140] sm:$0xff] %v463_v1  ;;  %v412_v2 = vpop.f32.mrb[9].mxu1  ;;  %v465_v3 = vpop.f32.mrb[9].mxu0 }
 0x102   : > { %829 = vst [vmem:[%s1219_s23 + $0x138] sm:$0xff] %v412_v2  ;;  %831 = vst [vmem:[%s1219_s23 + $0x148] sm:$0xff] %v465_v3  ;;  %v414_v4 = vpop.f32.mrb[10].mxu1  ;;  %v467_v5 = vpop.f32.mrb[10].mxu0 }
 0x103   : > { %846 = vst [vmem:[%s1219_s23 + $0x1c0] sm:$0xff] %v414_v4  ;;  %848 = vst [vmem:[%s1219_s23 + $0x1d0] sm:$0xff] %v467_v5  ;;  %v416_v6 = vpop.f32.mrb[11].mxu1  ;;  %v469_v7 = vpop.f32.mrb[11].mxu0 }
 0x104   : > { %847 = vst [vmem:[%s1219_s23 + $0x1c8] sm:$0xff] %v416_v6  ;;  %849 = vst [vmem:[%s1219_s23 + $0x1d8] sm:$0xff] %v469_v7 }
 0x108   : > { %v506_v8 = vpop.f32.mrb[12].mxu1  ;;  %v559_v9 = vpop.f32.mrb[12].mxu0 }
 0x109   : > { %796 = vst [vmem:[%s1219_s23 + $0x30] sm:$0xff] %v506_v8  ;;  %798 = vst [vmem:[%s1219_s23 + $0x40] sm:$0xff] %v559_v9  ;;  %v508_v10 = vpop.f32.mrb[13].mxu1  ;;  %v561_v11 = vpop.f32.mrb[13].mxu0 }
 0x10a   : > { %797 = vst [vmem:[%s1219_s23 + $0x38] sm:$0xff] %v508_v10  ;;  %799 = vst [vmem:[%s1219_s23 + $0x48] sm:$0xff] %v561_v11  ;;  %v510_v12 = vpop.f32.mrb[14].mxu1  ;;  %v563_v13 = vpop.f32.mrb[14].mxu0 }
 0x10b   : > { %814 = vst [vmem:[%s1219_s23 + $0xc0] sm:$0xff] %v510_v12  ;;  %816 = vst [vmem:[%s1219_s23 + $0xd0] sm:$0xff] %v563_v13  ;;  %v512_v14 = vpop.f32.mrb[15].mxu1  ;;  %v565_v15 = vpop.f32.mrb[15].mxu0 }
 0x10c   : > { %815 = vst [vmem:[%s1219_s23 + $0xc8] sm:$0xff] %v512_v14  ;;  %817 = vst [vmem:[%s1219_s23 + $0xd8] sm:$0xff] %v565_v15 }
 0x110   : > { %v516_v16 = vpop.f32.mrb[16].mxu1  ;;  %v569_v17 = vpop.f32.mrb[16].mxu0 }
 0x111   : > { %832 = vst [vmem:[%s1219_s23 + $0x150] sm:$0xff] %v516_v16  ;;  %834 = vst [vmem:[%s1219_s23 + $0x160] sm:$0xff] %v569_v17  ;;  %v518_v18 = vpop.f32.mrb[17].mxu1  ;;  %v571_v19 = vpop.f32.mrb[17].mxu0 }
 0x112   : > { %833 = vst [vmem:[%s1219_s23 + $0x158] sm:$0xff] %v518_v18  ;;  %835 = vst [vmem:[%s1219_s23 + $0x168] sm:$0xff] %v571_v19  ;;  %v520_v20 = vpop.f32.mrb[18].mxu1  ;;  %v573_v21 = vpop.f32.mrb[18].mxu0 }
 0x113   : > { %850 = vst [vmem:[%s1219_s23 + $0x1e0] sm:$0xff] %v520_v20  ;;  %852 = vst [vmem:[%s1219_s23 + $0x1f0] sm:$0xff] %v573_v21  ;;  %v522_v22 = vpop.f32.mrb[19].mxu1  ;;  %v575_v23 = vpop.f32.mrb[19].mxu0 }
 0x114   : > { %851 = vst [vmem:[%s1219_s23 + $0x1e8] sm:$0xff] %v522_v22  ;;  %853 = vst [vmem:[%s1219_s23 + $0x1f8] sm:$0xff] %v575_v23 }
 0x118   : > { %v612_v24 = vpop.f32.mrb[20].mxu1  ;;  %v665_v25 = vpop.f32.mrb[20].mxu0 }
 0x119   : > { %800 = vst [vmem:[%s1219_s23 + $0x50] sm:$0xff] %v612_v24  ;;  %802 = vst [vmem:[%s1219_s23 + $0x60] sm:$0xff] %v665_v25  ;;  %v614_v26 = vpop.f32.mrb[21].mxu1  ;;  %v667_v29 = vpop.f32.mrb[21].mxu0 }
 0x11a   : > { %801 = vst [vmem:[%s1219_s23 + $0x58] sm:$0xff] %v614_v26  ;;  %803 = vst [vmem:[%s1219_s23 + $0x68] sm:$0xff] %v667_v29  ;;  %v616_v30 = vpop.f32.mrb[22].mxu1  ;;  %v669_v31 = vpop.f32.mrb[22].mxu0 }
 0x11b   : > { %818 = vst [vmem:[%s1219_s23 + $0xe0] sm:$0xff] %v616_v30  ;;  %820 = vst [vmem:[%s1219_s23 + $0xf0] sm:$0xff] %v669_v31  ;;  %v618_v32 = vpop.f32.mrb[23].mxu1  ;;  %v671_v33 = vpop.f32.mrb[23].mxu0 }
 0x11c   : > { %819 = vst [vmem:[%s1219_s23 + $0xe8] sm:$0xff] %v618_v32  ;;  %821 = vst [vmem:[%s1219_s23 + $0xf8] sm:$0xff] %v671_v33 }
 0x120   : > { %v622_v34 = vpop.f32.mrb[24].mxu1  ;;  %v675_v35 = vpop.f32.mrb[24].mxu0 }
 0x121   : > { %836 = vst [vmem:[%s1219_s23 + $0x170] sm:$0xff] %v622_v34  ;;  %838 = vst [vmem:[%s1219_s23 + $0x180] sm:$0xff] %v675_v35  ;;  %v624_v36 = vpop.f32.mrb[25].mxu1  ;;  %v677_v37 = vpop.f32.mrb[25].mxu0 }
 0x122   : > { %837 = vst [vmem:[%s1219_s23 + $0x178] sm:$0xff] %v624_v36  ;;  %839 = vst [vmem:[%s1219_s23 + $0x188] sm:$0xff] %v677_v37  ;;  %v626_v38 = vpop.f32.mrb[26].mxu1  ;;  %v679_v39 = vpop.f32.mrb[26].mxu0 }
 0x123   : > { %854 = vst [vmem:[%s1219_s23 + $0x200] sm:$0xff] %v626_v38  ;;  %856 = vst [vmem:[%s1219_s23 + $0x210] sm:$0xff] %v679_v39  ;;  %v628_v40 = vpop.f32.mrb[27].mxu1  ;;  %v681_v41 = vpop.f32.mrb[27].mxu0 }
 0x124   : > { %855 = vst [vmem:[%s1219_s23 + $0x208] sm:$0xff] %v628_v40  ;;  %857 = vst [vmem:[%s1219_s23 + $0x218] sm:$0xff] %v681_v41 }
 0x128   : > { %v718_v42 = vpop.f32.mrb[28].mxu1  ;;  %v771_v43 = vpop.f32.mrb[28].mxu0 }
 0x129   : > { %804 = vst [vmem:[%s1219_s23 + $0x70] sm:$0xff] %v718_v42  ;;  %806 = vst [vmem:[%s1219_s23 + $0x80] sm:$0xff] %v771_v43  ;;  %v720_v44 = vpop.f32.mrb[29].mxu1  ;;  %v773_v45 = vpop.f32.mrb[29].mxu0 }
 0x12a   : > { %805 = vst [vmem:[%s1219_s23 + $0x78] sm:$0xff] %v720_v44  ;;  %807 = vst [vmem:[%s1219_s23 + $0x88] sm:$0xff] %v773_v45  ;;  %v722_v46 = vpop.f32.mrb[30].mxu1  ;;  %v775_v47 = vpop.f32.mrb[30].mxu0 }
 0x12b   : > { %822 = vst [vmem:[%s1219_s23 + $0x100] sm:$0xff] %v722_v46  ;;  %824 = vst [vmem:[%s1219_s23 + $0x110] sm:$0xff] %v775_v47  ;;  %v724_v48 = vpop.f32.mrb[31].mxu1  ;;  %v777_v49 = vpop.f32.mrb[31].mxu0 }
 0x12c   : > { %823 = vst [vmem:[%s1219_s23 + $0x108] sm:$0xff] %v724_v48  ;;  %825 = vst [vmem:[%s1219_s23 + $0x118] sm:$0xff] %v777_v49 }
 0x130   : > { %v728_v0 = vpop.f32.mrb[32].mxu1  ;;  %v781_v27 = vpop.f32.mrb[32].mxu0 }
 0x131   : > { %840 = vst [vmem:[%s1219_s23 + $0x190] sm:$0xff] %v728_v0  ;;  %842 = vst [vmem:[%s1219_s23 + $0x1a0] sm:$0xff] %v781_v27  ;;  %v730_v28 = vpop.f32.mrb[33].mxu1  ;;  %v783_v50 = vpop.f32.mrb[33].mxu0 }
 0x132   : > { %841 = vst [vmem:[%s1219_s23 + $0x198] sm:$0xff] %v730_v28  ;;  %843 = vst [vmem:[%s1219_s23 + $0x1a8] sm:$0xff] %v783_v50  ;;  %v732_v51 = vpop.f32.mrb[34].mxu1  ;;  %v785_v52 = vpop.f32.mrb[34].mxu0 }
 0x133   : > { %858 = vst [vmem:[%s1219_s23 + $0x220] sm:$0xff] %v732_v51  ;;  %860 = vst [vmem:[%s1219_s23 + $0x230] sm:$0xff] %v785_v52  ;;  %v734_v53 = vpop.f32.mrb[35].mxu1  ;;  %v787_v54 = vpop.f32.mrb[35].mxu0 }
 0x134   : > { %859 = vst [vmem:[%s1219_s23 + $0x228] sm:$0xff] %v734_v53  ;;  %861 = vst [vmem:[%s1219_s23 + $0x238] sm:$0xff] %v787_v54 }
 0x135 PF: > { %s12_s11 = sadd.s32 1, %s1032_s11   ;;  %s1305_s9 = smov %s1028_s10 }
 0x136   : > { %p9_p5 = scmp.ge.s32.totalorder %s12_s11, 4   ;;  %s1306_s10 = smov %s1308_s12 }
 0x138   :  { %11 = sbr.rel (!%p9_p5) target bundleno = 2 (0x2), region = 58 }

// kernel: reverse.4
= control target key start
LH: loop header
LB: loop body
LE: loop exit
PB: predicated region body
PF: predicated region fallthrough
CT: control target
= control target key end

     0   :  { %s2696_s0 = inlined_call_operand.vmem [shape: f32[2,32,8,16,7], index: 0, kind: input, shape index: {}]   ;;  %s2697_s1 = inlined_call_operand.vmem [shape: f32[2,32,8,16,7], index: 1, kind: output, shape index: {}]  }
   0x1   :  { %v896_v0 = vld [vmem:[%s2696_s0 + $0x300] sm:$0xff]  ;;  %v922_v14 = vld [vmem:[%s2696_s0 + $0x310] sm:$0xff] }
   0x2   :  { %v897_v1 = vld [vmem:[%s2696_s0 + $0x680] sm:$0xff]  ;;  %4 = vst [vmem:[%s2697_s1] sm:$0xff] %v896_v0  ;;  %923 = vst [vmem:[%s2697_s1 + $0x10] sm:$0xff] %v922_v14  ;;  %v924_v15 = vld [vmem:[%s2696_s0 + $0x690] sm:$0xff] }
   0x3   :  { %v899_v2 = vld [vmem:[%s2696_s0 + $0x280] sm:$0xff]  ;;  %898 = vst [vmem:[%s2697_s1 + $0x380] sm:$0xff] %v897_v1  ;;  %v926_v16 = vld [vmem:[%s2696_s0 + $0x290] sm:$0xff]  ;;  %925 = vst [vmem:[%s2697_s1 + $0x390] sm:$0xff] %v924_v15 }
   0x4   :  { %900 = vst [vmem:[%s2697_s1 + $0x80] sm:$0xff] %v899_v2  ;;  %v901_v3 = vld [vmem:[%s2696_s0 + $0x600] sm:$0xff]  ;;  %v928_v17 = vld [vmem:[%s2696_s0 + $0x610] sm:$0xff]  ;;  %927 = vst [vmem:[%s2697_s1 + $0x90] sm:$0xff] %v926_v16 }
   0x5   :  { %v903_v4 = vld [vmem:[%s2696_s0 + $0x200] sm:$0xff]  ;;  %902 = vst [vmem:[%s2697_s1 + $0x400] sm:$0xff] %v901_v3  ;;  %929 = vst [vmem:[%s2697_s1 + $0x410] sm:$0xff] %v928_v17  ;;  %v930_v18 = vld [vmem:[%s2696_s0 + $0x210] sm:$0xff] }
   0x6   :  { %v905_v5 = vld [vmem:[%s2696_s0 + $0x580] sm:$0xff]  ;;  %904 = vst [vmem:[%s2697_s1 + $0x100] sm:$0xff] %v903_v4  ;;  %v932_v19 = vld [vmem:[%s2696_s0 + $0x590] sm:$0xff]  ;;  %931 = vst [vmem:[%s2697_s1 + $0x110] sm:$0xff] %v930_v18 }
   0x7   :  { %906 = vst [vmem:[%s2697_s1 + $0x480] sm:$0xff] %v905_v5  ;;  %v907_v6 = vld [vmem:[%s2696_s0 + $0x180] sm:$0xff]  ;;  %v934_v20 = vld [vmem:[%s2696_s0 + $0x190] sm:$0xff]  ;;  %933 = vst [vmem:[%s2697_s1 + $0x490] sm:$0xff] %v932_v19 }
   0x8   :  { %v909_v7 = vld [vmem:[%s2696_s0 + $0x500] sm:$0xff]  ;;  %908 = vst [vmem:[%s2697_s1 + $0x180] sm:$0xff] %v907_v6  ;;  %935 = vst [vmem:[%s2697_s1 + $0x190] sm:$0xff] %v934_v20  ;;  %v936_v21 = vld [vmem:[%s2696_s0 + $0x510] sm:$0xff] }
   0x9   :  { %v911_v8 = vld [vmem:[%s2696_s0 + $0x100] sm:$0xff]  ;;  %910 = vst [vmem:[%s2697_s1 + $0x500] sm:$0xff] %v909_v7  ;;  %v938_v22 = vld [vmem:[%s2696_s0 + $0x110] sm:$0xff]  ;;  %937 = vst [vmem:[%s2697_s1 + $0x510] sm:$0xff] %v936_v21 }
   0xa   :  { %912 = vst [vmem:[%s2697_s1 + $0x200] sm:$0xff] %v911_v8  ;;  %v913_v9 = vld [vmem:[%s2696_s0 + $0x480] sm:$0xff]  ;;  %v940_v23 = vld [vmem:[%s2696_s0 + $0x490] sm:$0xff]  ;;  %939 = vst [vmem:[%s2697_s1 + $0x210] sm:$0xff] %v938_v22 }
   0xb   :  { %v915_v10 = vld [vmem:[%s2696_s0 + $0x80] sm:$0xff]  ;;  %914 = vst [vmem:[%s2697_s1 + $0x580] sm:$0xff] %v913_v9  ;;  %941 = vst [vmem:[%s2697_s1 + $0x590] sm:$0xff] %v940_v23  ;;  %v942_v24 = vld [vmem:[%s2696_s0 + $0x90] sm:$0xff] }
   0xc   :  { %v917_v11 = vld [vmem:[%s2696_s0 + $0x400] sm:$0xff]  ;;  %916 = vst [vmem:[%s2697_s1 + $0x280] sm:$0xff] %v915_v10  ;;  %v944_v25 = vld [vmem:[%s2696_s0 + $0x410] sm:$0xff]  ;;  %943 = vst [vmem:[%s2697_s1 + $0x290] sm:$0xff] %v942_v24 }
   0xd   :  { %918 = vst [vmem:[%s2697_s1 + $0x600] sm:$0xff] %v917_v11  ;;  %v49_v12 = vld [vmem:[%s2696_s0] sm:$0xff]  ;;  %v946_v26 = vld [vmem:[%s2696_s0 + $0x10] sm:$0xff]  ;;  %945 = vst [vmem:[%s2697_s1 + $0x610] sm:$0xff] %v944_v25 }
   0xe   :  { %v920_v13 = vld [vmem:[%s2696_s0 + $0x380] sm:$0xff]  ;;  %919 = vst [vmem:[%s2697_s1 + $0x300] sm:$0xff] %v49_v12  ;;  %947 = vst [vmem:[%s2697_s1 + $0x310] sm:$0xff] %v946_v26  ;;  %v948_v27 = vld [vmem:[%s2696_s0 + $0x390] sm:$0xff] }
   0xf   :  { %921 = vst [vmem:[%s2697_s1 + $0x680] sm:$0xff] %v920_v13  ;;  %v950_v28 = vld [vmem:[%s2696_s0 + $0x320] sm:$0xff]  ;;  %949 = vst [vmem:[%s2697_s1 + $0x690] sm:$0xff] %v948_v27  ;;  %v978_v42 = vld [vmem:[%s2696_s0 + $0x330] sm:$0xff] }
  0x10   :  { %v952_v29 = vld [vmem:[%s2696_s0 + $0x6a0] sm:$0xff]  ;;  %951 = vst [vmem:[%s2697_s1 + $0x20] sm:$0xff] %v950_v28  ;;  %v980_v43 = vld [vmem:[%s2696_s0 + $0x6b0] sm:$0xff]  ;;  %979 = vst [vmem:[%s2697_s1 + $0x30] sm:$0xff] %v978_v42 }
  0x11   :  { %953 = vst [vmem:[%s2697_s1 + $0x3a0] sm:$0xff] %v952_v29  ;;  %v954_v30 = vld [vmem:[%s2696_s0 + $0x2a0] sm:$0xff]  ;;  %v982_v44 = vld [vmem:[%s2696_s0 + $0x2b0] sm:$0xff]  ;;  %981 = vst [vmem:[%s2697_s1 + $0x3b0] sm:$0xff] %v980_v43 }
  0x12   :  { %v956_v31 = vld [vmem:[%s2696_s0 + $0x620] sm:$0xff]  ;;  %955 = vst [vmem:[%s2697_s1 + $0xa0] sm:$0xff] %v954_v30  ;;  %983 = vst [vmem:[%s2697_s1 + $0xb0] sm:$0xff] %v982_v44  ;;  %v984_v45 = vld [vmem:[%s2696_s0 + $0x630] sm:$0xff] }
  0x13   :  { %v958_v32 = vld [vmem:[%s2696_s0 + $0x220] sm:$0xff]  ;;  %957 = vst [vmem:[%s2697_s1 + $0x420] sm:$0xff] %v956_v31  ;;  %v986_v46 = vld [vmem:[%s2696_s0 + $0x230] sm:$0xff]  ;;  %985 = vst [vmem:[%s2697_s1 + $0x430] sm:$0xff] %v984_v45 }
  0x14   :  { %959 = vst [vmem:[%s2697_s1 + $0x120] sm:$0xff] %v958_v32  ;;  %v960_v33 = vld [vmem:[%s2696_s0 + $0x5a0] sm:$0xff]  ;;  %v988_v47 = vld [vmem:[%s2696_s0 + $0x5b0] sm:$0xff]  ;;  %987 = vst [vmem:[%s2697_s1 + $0x130] sm:$0xff] %v986_v46 }
  0x15   :  { %v962_v34 = vld [vmem:[%s2696_s0 + $0x1a0] sm:$0xff]  ;;  %961 = vst [vmem:[%s2697_s1 + $0x4a0] sm:$0xff] %v960_v33  ;;  %989 = vst [vmem:[%s2697_s1 + $0x4b0] sm:$0xff] %v988_v47  ;;  %v990_v48 = vld [vmem:[%s2696_s0 + $0x1b0] sm:$0xff] }
  0x16   :  { %v964_v35 = vld [vmem:[%s2696_s0 + $0x520] sm:$0xff]  ;;  %963 = vst [vmem:[%s2697_s1 + $0x1a0] sm:$0xff] %v962_v34  ;;  %v992_v49 = vld [vmem:[%s2696_s0 + $0x530] sm:$0xff]  ;;  %991 = vst [vmem:[%s2697_s1 + $0x1b0] sm:$0xff] %v990_v48 }
  0x17   :  { %965 = vst [vmem:[%s2697_s1 + $0x520] sm:$0xff] %v964_v35  ;;  %v966_v36 = vld [vmem:[%s2696_s0 + $0x120] sm:$0xff]  ;;  %v994_v50 = vld [vmem:[%s2696_s0 + $0x130] sm:$0xff]  ;;  %993 = vst [vmem:[%s2697_s1 + $0x530] sm:$0xff] %v992_v49 }
  0x18   :  { %v968_v37 = vld [vmem:[%s2696_s0 + $0x4a0] sm:$0xff]  ;;  %967 = vst [vmem:[%s2697_s1 + $0x220] sm:$0xff] %v966_v36  ;;  %995 = vst [vmem:[%s2697_s1 + $0x230] sm:$0xff] %v994_v50  ;;  %v996_v51 = vld [vmem:[%s2696_s0 + $0x4b0] sm:$0xff] }
  0x19   :  { %v970_v38 = vld [vmem:[%s2696_s0 + $0xa0] sm:$0xff]  ;;  %969 = vst [vmem:[%s2697_s1 + $0x5a0] sm:$0xff] %v968_v37  ;;  %v998_v52 = vld [vmem:[%s2696_s0 + $0xb0] sm:$0xff]  ;;  %997 = vst [vmem:[%s2697_s1 + $0x5b0] sm:$0xff] %v996_v51 }
  0x1a   :  { %971 = vst [vmem:[%s2697_s1 + $0x2a0] sm:$0xff] %v970_v38  ;;  %v972_v39 = vld [vmem:[%s2696_s0 + $0x420] sm:$0xff]  ;;  %v1000_v53 = vld [vmem:[%s2696_s0 + $0x430] sm:$0xff]  ;;  %999 = vst [vmem:[%s2697_s1 + $0x2b0] sm:$0xff] %v998_v52 }
  0x1b   :  { %v974_v40 = vld [vmem:[%s2696_s0 + $0x20] sm:$0xff]  ;;  %973 = vst [vmem:[%s2697_s1 + $0x620] sm:$0xff] %v972_v39  ;;  %1001 = vst [vmem:[%s2697_s1 + $0x630] sm:$0xff] %v1000_v53  ;;  %v1002_v54 = vld [vmem:[%s2696_s0 + $0x30] sm:$0xff] }
  0x1c   :  { %v976_v41 = vld [vmem:[%s2696_s0 + $0x3a0] sm:$0xff]  ;;  %975 = vst [vmem:[%s2697_s1 + $0x320] sm:$0xff] %v974_v40  ;;  %v1004_v55 = vld [vmem:[%s2696_s0 + $0x3b0] sm:$0xff]  ;;  %1003 = vst [vmem:[%s2697_s1 + $0x330] sm:$0xff] %v1002_v54 }
  0x1d   :  { %977 = vst [vmem:[%s2697_s1 + $0x6a0] sm:$0xff] %v976_v41  ;;  %v1006_v56 = vld [vmem:[%s2696_s0 + $0x340] sm:$0xff]  ;;  %1005 = vst [vmem:[%s2697_s1 + $0x6b0] sm:$0xff] %v1004_v55  ;;  %v1034_v6 = vld [vmem:[%s2696_s0 + $0x350] sm:$0xff] }
  0x1e   :  { %1007 = vst [vmem:[%s2697_s1 + $0x40] sm:$0xff] %v1006_v56  ;;  %v1008_v57 = vld [vmem:[%s2696_s0 + $0x6c0] sm:$0xff]  ;;  %v1036_v7 = vld [vmem:[%s2696_s0 + $0x6d0] sm:$0xff]  ;;  %1035 = vst [vmem:[%s2697_s1 + $0x50] sm:$0xff] %v1034_v6 }
  0x1f   :  { %v1010_v58 = vld [vmem:[%s2696_s0 + $0x2c0] sm:$0xff]  ;;  %1009 = vst [vmem:[%s2697_s1 + $0x3c0] sm:$0xff] %v1008_v57  ;;  %1037 = vst [vmem:[%s2697_s1 + $0x3d0] sm:$0xff] %v1036_v7  ;;  %v1038_v8 = vld [vmem:[%s2696_s0 + $0x2d0] sm:$0xff] }
  0x20   :  { %v1012_v59 = vld [vmem:[%s2696_s0 + $0x640] sm:$0xff]  ;;  %1011 = vst [vmem:[%s2697_s1 + $0xc0] sm:$0xff] %v1010_v58  ;;  %v1040_v9 = vld [vmem:[%s2696_s0 + $0x650] sm:$0xff]  ;;  %1039 = vst [vmem:[%s2697_s1 + $0xd0] sm:$0xff] %v1038_v8 }
  0x21   :  { %1013 = vst [vmem:[%s2697_s1 + $0x440] sm:$0xff] %v1012_v59  ;;  %v1014_v60 = vld [vmem:[%s2696_s0 + $0x240] sm:$0xff]  ;;  %v1042_v10 = vld [vmem:[%s2696_s0 + $0x250] sm:$0xff]  ;;  %1041 = vst [vmem:[%s2697_s1 + $0x450] sm:$0xff] %v1040_v9 }
  0x22   :  { %v1016_v61 = vld [vmem:[%s2696_s0 + $0x5c0] sm:$0xff]  ;;  %1015 = vst [vmem:[%s2697_s1 + $0x140] sm:$0xff] %v1014_v60  ;;  %1043 = vst [vmem:[%s2697_s1 + $0x150] sm:$0xff] %v1042_v10  ;;  %v1044_v11 = vld [vmem:[%s2696_s0 + $0x5d0] sm:$0xff] }
  0x23   :  { %v1018_v62 = vld [vmem:[%s2696_s0 + $0x1c0] sm:$0xff]  ;;  %1017 = vst [vmem:[%s2697_s1 + $0x4c0] sm:$0xff] %v1016_v61  ;;  %v1046_v12 = vld [vmem:[%s2696_s0 + $0x1d0] sm:$0xff]  ;;  %1045 = vst [vmem:[%s2697_s1 + $0x4d0] sm:$0xff] %v1044_v11 }
  0x24   :  { %1019 = vst [vmem:[%s2697_s1 + $0x1c0] sm:$0xff] %v1018_v62  ;;  %v1020_v63 = vld [vmem:[%s2696_s0 + $0x540] sm:$0xff]  ;;  %v1048_v13 = vld [vmem:[%s2696_s0 + $0x550] sm:$0xff]  ;;  %1047 = vst [vmem:[%s2697_s1 + $0x1d0] sm:$0xff] %v1046_v12 }
  0x25   :  { %v1022_v0 = vld [vmem:[%s2696_s0 + $0x140] sm:$0xff]  ;;  %1021 = vst [vmem:[%s2697_s1 + $0x540] sm:$0xff] %v1020_v63  ;;  %1049 = vst [vmem:[%s2697_s1 + $0x550] sm:$0xff] %v1048_v13  ;;  %v1050_v14 = vld [vmem:[%s2696_s0 + $0x150] sm:$0xff] }
  0x26   :  { %v1024_v1 = vld [vmem:[%s2696_s0 + $0x4c0] sm:$0xff]  ;;  %1023 = vst [vmem:[%s2697_s1 + $0x240] sm:$0xff] %v1022_v0  ;;  %v1052_v15 = vld [vmem:[%s2696_s0 + $0x4d0] sm:$0xff]  ;;  %1051 = vst [vmem:[%s2697_s1 + $0x250] sm:$0xff] %v1050_v14 }
  0x27   :  { %1025 = vst [vmem:[%s2697_s1 + $0x5c0] sm:$0xff] %v1024_v1  ;;  %v1026_v2 = vld [vmem:[%s2696_s0 + $0xc0] sm:$0xff]  ;;  %v1054_v16 = vld [vmem:[%s2696_s0 + $0xd0] sm:$0xff]  ;;  %1053 = vst [vmem:[%s2697_s1 + $0x5d0] sm:$0xff] %v1052_v15 }
  0x28   :  { %v1028_v3 = vld [vmem:[%s2696_s0 + $0x440] sm:$0xff]  ;;  %1027 = vst [vmem:[%s2697_s1 + $0x2c0] sm:$0xff] %v1026_v2  ;;  %1055 = vst [vmem:[%s2697_s1 + $0x2d0] sm:$0xff] %v1054_v16  ;;  %v1056_v17 = vld [vmem:[%s2696_s0 + $0x450] sm:$0xff] }
  0x29   :  { %v1030_v4 = vld [vmem:[%s2696_s0 + $0x40] sm:$0xff]  ;;  %1029 = vst [vmem:[%s2697_s1 + $0x640] sm:$0xff] %v1028_v3  ;;  %v1058_v18 = vld [vmem:[%s2696_s0 + $0x50] sm:$0xff]  ;;  %1057 = vst [vmem:[%s2697_s1 + $0x650] sm:$0xff] %v1056_v17 }
  0x2a   :  { %1031 = vst [vmem:[%s2697_s1 + $0x340] sm:$0xff] %v1030_v4  ;;  %v1032_v5 = vld [vmem:[%s2696_s0 + $0x3c0] sm:$0xff]  ;;  %v1060_v19 = vld [vmem:[%s2696_s0 + $0x3d0] sm:$0xff]  ;;  %1059 = vst [vmem:[%s2697_s1 + $0x350] sm:$0xff] %v1058_v18 }
  0x2b   :  { %1033 = vst [vmem:[%s2697_s1 + $0x6c0] sm:$0xff] %v1032_v5  ;;  %1061 = vst [vmem:[%s2697_s1 + $0x6d0] sm:$0xff] %v1060_v19  ;;  %v1062_v20 = vld [vmem:[%s2696_s0 + $0x360] sm:$0xff]  ;;  %v1090_v34 = vld [vmem:[%s2696_s0 + $0x370] sm:$0xff] }
  0x2c   :  { %v1064_v21 = vld [vmem:[%s2696_s0 + $0x6e0] sm:$0xff]  ;;  %1063 = vst [vmem:[%s2697_s1 + $0x60] sm:$0xff] %v1062_v20  ;;  %1091 = vst [vmem:[%s2697_s1 + $0x70] sm:$0xff] %v1090_v34  ;;  %v1092_v35 = vld [vmem:[%s2696_s0 + $0x6f0] sm:$0xff] }
  0x2d   :  { %v1066_v22 = vld [vmem:[%s2696_s0 + $0x2e0] sm:$0xff]  ;;  %1065 = vst [vmem:[%s2697_s1 + $0x3e0] sm:$0xff] %v1064_v21  ;;  %v1094_v36 = vld [vmem:[%s2696_s0 + $0x2f0] sm:$0xff]  ;;  %1093 = vst [vmem:[%s2697_s1 + $0x3f0] sm:$0xff] %v1092_v35 }
  0x2e   :  { %1067 = vst [vmem:[%s2697_s1 + $0xe0] sm:$0xff] %v1066_v22  ;;  %v1068_v23 = vld [vmem:[%s2696_s0 + $0x660] sm:$0xff]  ;;  %v1096_v37 = vld [vmem:[%s2696_s0 + $0x670] sm:$0xff]  ;;  %1095 = vst [vmem:[%s2697_s1 + $0xf0] sm:$0xff] %v1094_v36 }
  0x2f   :  { %v1070_v24 = vld [vmem:[%s2696_s0 + $0x260] sm:$0xff]  ;;  %1069 = vst [vmem:[%s2697_s1 + $0x460] sm:$0xff] %v1068_v23  ;;  %1097 = vst [vmem:[%s2697_s1 + $0x470] sm:$0xff] %v1096_v37  ;;  %v1098_v38 = vld [vmem:[%s2696_s0 + $0x270] sm:$0xff] }
  0x30   :  { %v1072_v25 = vld [vmem:[%s2696_s0 + $0x5e0] sm:$0xff]  ;;  %1071 = vst [vmem:[%s2697_s1 + $0x160] sm:$0xff] %v1070_v24  ;;  %v1100_v39 = vld [vmem:[%s2696_s0 + $0x5f0] sm:$0xff]  ;;  %1099 = vst [vmem:[%s2697_s1 + $0x170] sm:$0xff] %v1098_v38 }
  0x31   :  { %1073 = vst [vmem:[%s2697_s1 + $0x4e0] sm:$0xff] %v1072_v25  ;;  %v1074_v26 = vld [vmem:[%s2696_s0 + $0x1e0] sm:$0xff]  ;;  %v1102_v40 = vld [vmem:[%s2696_s0 + $0x1f0] sm:$0xff]  ;;  %1101 = vst [vmem:[%s2697_s1 + $0x4f0] sm:$0xff] %v1100_v39 }
  0x32   :  { %v1076_v27 = vld [vmem:[%s2696_s0 + $0x560] sm:$0xff]  ;;  %1075 = vst [vmem:[%s2697_s1 + $0x1e0] sm:$0xff] %v1074_v26  ;;  %1103 = vst [vmem:[%s2697_s1 + $0x1f0] sm:$0xff] %v1102_v40  ;;  %v1104_v41 = vld [vmem:[%s2696_s0 + $0x570] sm:$0xff] }
  0x33   :  { %v1078_v28 = vld [vmem:[%s2696_s0 + $0x160] sm:$0xff]  ;;  %1077 = vst [vmem:[%s2697_s1 + $0x560] sm:$0xff] %v1076_v27  ;;  %v1106_v42 = vld [vmem:[%s2696_s0 + $0x170] sm:$0xff]  ;;  %1105 = vst [vmem:[%s2697_s1 + $0x570] sm:$0xff] %v1104_v41 }
  0x34   :  { %1079 = vst [vmem:[%s2697_s1 + $0x260] sm:$0xff] %v1078_v28  ;;  %v1080_v29 = vld [vmem:[%s2696_s0 + $0x4e0] sm:$0xff]  ;;  %v1108_v43 = vld [vmem:[%s2696_s0 + $0x4f0] sm:$0xff]  ;;  %1107 = vst [vmem:[%s2697_s1 + $0x270] sm:$0xff] %v1106_v42 }
  0x35   :  { %v1082_v30 = vld [vmem:[%s2696_s0 + $0xe0] sm:$0xff]  ;;  %1081 = vst [vmem:[%s2697_s1 + $0x5e0] sm:$0xff] %v1080_v29  ;;  %1109 = vst [vmem:[%s2697_s1 + $0x5f0] sm:$0xff] %v1108_v43  ;;  %v1110_v44 = vld [vmem:[%s2696_s0 + $0xf0] sm:$0xff] }
  0x36   :  { %v1084_v31 = vld [vmem:[%s2696_s0 + $0x460] sm:$0xff]  ;;  %1083 = vst [vmem:[%s2697_s1 + $0x2e0] sm:$0xff] %v1082_v30  ;;  %v1112_v45 = vld [vmem:[%s2696_s0 + $0x470] sm:$0xff]  ;;  %1111 = vst [vmem:[%s2697_s1 + $0x2f0] sm:$0xff] %v1110_v44 }
  0x37   :  { %1085 = vst [vmem:[%s2697_s1 + $0x660] sm:$0xff] %v1084_v31  ;;  %v1086_v32 = vld [vmem:[%s2696_s0 + $0x60] sm:$0xff]  ;;  %v1114_v46 = vld [vmem:[%s2696_s0 + $0x70] sm:$0xff]  ;;  %1113 = vst [vmem:[%s2697_s1 + $0x670] sm:$0xff] %v1112_v45 }
  0x38   :  { %v1088_v33 = vld [vmem:[%s2696_s0 + $0x3e0] sm:$0xff]  ;;  %1087 = vst [vmem:[%s2697_s1 + $0x360] sm:$0xff] %v1086_v32  ;;  %1115 = vst [vmem:[%s2697_s1 + $0x370] sm:$0xff] %v1114_v46  ;;  %v1116_v47 = vld [vmem:[%s2696_s0 + $0x3f0] sm:$0xff] }
  0x39   :  { %1089 = vst [vmem:[%s2697_s1 + $0x6e0] sm:$0xff] %v1088_v33  ;;  %v1118_v48 = vld [vmem:[%s2696_s0 + $0x308] sm:$0xff]  ;;  %1117 = vst [vmem:[%s2697_s1 + $0x6f0] sm:$0xff] %v1116_v47  ;;  %v1146_v62 = vld [vmem:[%s2696_s0 + $0x318] sm:$0xff] }
  0x3a   :  { %v1120_v49 = vld [vmem:[%s2696_s0 + $0x688] sm:$0xff]  ;;  %1119 = vst [vmem:[%s2697_s1 + $0x8] sm:$0xff] %v1118_v48  ;;  %v1148_v63 = vld [vmem:[%s2696_s0 + $0x698] sm:$0xff]  ;;  %1147 = vst [vmem:[%s2697_s1 + $0x18] sm:$0xff] %v1146_v62 }
  0x3b   :  { %1121 = vst [vmem:[%s2697_s1 + $0x388] sm:$0xff] %v1120_v49  ;;  %v1122_v50 = vld [vmem:[%s2696_s0 + $0x288] sm:$0xff]  ;;  %v1150_v0 = vld [vmem:[%s2696_s0 + $0x298] sm:$0xff]  ;;  %1149 = vst [vmem:[%s2697_s1 + $0x398] sm:$0xff] %v1148_v63 }
  0x3c   :  { %v1124_v51 = vld [vmem:[%s2696_s0 + $0x608] sm:$0xff]  ;;  %1123 = vst [vmem:[%s2697_s1 + $0x88] sm:$0xff] %v1122_v50  ;;  %1151 = vst [vmem:[%s2697_s1 + $0x98] sm:$0xff] %v1150_v0  ;;  %v1152_v1 = vld [vmem:[%s2696_s0 + $0x618] sm:$0xff] }
  0x3d   :  { %v1126_v52 = vld [vmem:[%s2696_s0 + $0x208] sm:$0xff]  ;;  %1125 = vst [vmem:[%s2697_s1 + $0x408] sm:$0xff] %v1124_v51  ;;  %v1154_v2 = vld [vmem:[%s2696_s0 + $0x218] sm:$0xff]  ;;  %1153 = vst [vmem:[%s2697_s1 + $0x418] sm:$0xff] %v1152_v1 }
  0x3e   :  { %1127 = vst [vmem:[%s2697_s1 + $0x108] sm:$0xff] %v1126_v52  ;;  %v1128_v53 = vld [vmem:[%s2696_s0 + $0x588] sm:$0xff]  ;;  %v1156_v3 = vld [vmem:[%s2696_s0 + $0x598] sm:$0xff]  ;;  %1155 = vst [vmem:[%s2697_s1 + $0x118] sm:$0xff] %v1154_v2 }
  0x3f   :  { %v1130_v54 = vld [vmem:[%s2696_s0 + $0x188] sm:$0xff]  ;;  %1129 = vst [vmem:[%s2697_s1 + $0x488] sm:$0xff] %v1128_v53  ;;  %1157 = vst [vmem:[%s2697_s1 + $0x498] sm:$0xff] %v1156_v3  ;;  %v1158_v4 = vld [vmem:[%s2696_s0 + $0x198] sm:$0xff] }
  0x40   :  { %v1132_v55 = vld [vmem:[%s2696_s0 + $0x508] sm:$0xff]  ;;  %1131 = vst [vmem:[%s2697_s1 + $0x188] sm:$0xff] %v1130_v54  ;;  %v1160_v5 = vld [vmem:[%s2696_s0 + $0x518] sm:$0xff]  ;;  %1159 = vst [vmem:[%s2697_s1 + $0x198] sm:$0xff] %v1158_v4 }
  0x41   :  { %1133 = vst [vmem:[%s2697_s1 + $0x508] sm:$0xff] %v1132_v55  ;;  %v1134_v56 = vld [vmem:[%s2696_s0 + $0x108] sm:$0xff]  ;;  %v1162_v6 = vld [vmem:[%s2696_s0 + $0x118] sm:$0xff]  ;;  %1161 = vst [vmem:[%s2697_s1 + $0x518] sm:$0xff] %v1160_v5 }
  0x42   :  { %v1136_v57 = vld [vmem:[%s2696_s0 + $0x488] sm:$0xff]  ;;  %1135 = vst [vmem:[%s2697_s1 + $0x208] sm:$0xff] %v1134_v56  ;;  %1163 = vst [vmem:[%s2697_s1 + $0x218] sm:$0xff] %v1162_v6  ;;  %v1164_v7 = vld [vmem:[%s2696_s0 + $0x498] sm:$0xff] }
  0x43   :  { %v1138_v58 = vld [vmem:[%s2696_s0 + $0x88] sm:$0xff]  ;;  %1137 = vst [vmem:[%s2697_s1 + $0x588] sm:$0xff] %v1136_v57  ;;  %v1166_v8 = vld [vmem:[%s2696_s0 + $0x98] sm:$0xff]  ;;  %1165 = vst [vmem:[%s2697_s1 + $0x598] sm:$0xff] %v1164_v7 }
  0x44   :  { %1139 = vst [vmem:[%s2697_s1 + $0x288] sm:$0xff] %v1138_v58  ;;  %v1140_v59 = vld [vmem:[%s2696_s0 + $0x408] sm:$0xff]  ;;  %v1168_v9 = vld [vmem:[%s2696_s0 + $0x418] sm:$0xff]  ;;  %1167 = vst [vmem:[%s2697_s1 + $0x298] sm:$0xff] %v1166_v8 }
  0x45   :  { %v1142_v60 = vld [vmem:[%s2696_s0 + $0x8] sm:$0xff]  ;;  %1141 = vst [vmem:[%s2697_s1 + $0x608] sm:$0xff] %v1140_v59  ;;  %1169 = vst [vmem:[%s2697_s1 + $0x618] sm:$0xff] %v1168_v9  ;;  %v1170_v10 = vld [vmem:[%s2696_s0 + $0x18] sm:$0xff] }
  0x46   :  { %v1144_v61 = vld [vmem:[%s2696_s0 + $0x388] sm:$0xff]  ;;  %1143 = vst [vmem:[%s2697_s1 + $0x308] sm:$0xff] %v1142_v60  ;;  %v1172_v11 = vld [vmem:[%s2696_s0 + $0x398] sm:$0xff]  ;;  %1171 = vst [vmem:[%s2697_s1 + $0x318] sm:$0xff] %v1170_v10 }
  0x47   :  { %1145 = vst [vmem:[%s2697_s1 + $0x688] sm:$0xff] %v1144_v61  ;;  %v1174_v12 = vld [vmem:[%s2696_s0 + $0x328] sm:$0xff]  ;;  %1173 = vst [vmem:[%s2697_s1 + $0x698] sm:$0xff] %v1172_v11  ;;  %v1202_v26 = vld [vmem:[%s2696_s0 + $0x338] sm:$0xff] }
  0x48   :  { %1175 = vst [vmem:[%s2697_s1 + $0x28] sm:$0xff] %v1174_v12  ;;  %v1176_v13 = vld [vmem:[%s2696_s0 + $0x6a8] sm:$0xff]  ;;  %v1204_v27 = vld [vmem:[%s2696_s0 + $0x6b8] sm:$0xff]  ;;  %1203 = vst [vmem:[%s2697_s1 + $0x38] sm:$0xff] %v1202_v26 }
  0x49   :  { %v1178_v14 = vld [vmem:[%s2696_s0 + $0x2a8] sm:$0xff]  ;;  %1177 = vst [vmem:[%s2697_s1 + $0x3a8] sm:$0xff] %v1176_v13  ;;  %1205 = vst [vmem:[%s2697_s1 + $0x3b8] sm:$0xff] %v1204_v27  ;;  %v1206_v28 = vld [vmem:[%s2696_s0 + $0x2b8] sm:$0xff] }
  0x4a   :  { %v1180_v15 = vld [vmem:[%s2696_s0 + $0x628] sm:$0xff]  ;;  %1179 = vst [vmem:[%s2697_s1 + $0xa8] sm:$0xff] %v1178_v14  ;;  %v1208_v29 = vld [vmem:[%s2696_s0 + $0x638] sm:$0xff]  ;;  %1207 = vst [vmem:[%s2697_s1 + $0xb8] sm:$0xff] %v1206_v28 }
  0x4b   :  { %1181 = vst [vmem:[%s2697_s1 + $0x428] sm:$0xff] %v1180_v15  ;;  %v1182_v16 = vld [vmem:[%s2696_s0 + $0x228] sm:$0xff]  ;;  %v1210_v30 = vld [vmem:[%s2696_s0 + $0x238] sm:$0xff]  ;;  %1209 = vst [vmem:[%s2697_s1 + $0x438] sm:$0xff] %v1208_v29 }
  0x4c   :  { %v1184_v17 = vld [vmem:[%s2696_s0 + $0x5a8] sm:$0xff]  ;;  %1183 = vst [vmem:[%s2697_s1 + $0x128] sm:$0xff] %v1182_v16  ;;  %1211 = vst [vmem:[%s2697_s1 + $0x138] sm:$0xff] %v1210_v30  ;;  %v1212_v31 = vld [vmem:[%s2696_s0 + $0x5b8] sm:$0xff] }
  0x4d   :  { %v1186_v18 = vld [vmem:[%s2696_s0 + $0x1a8] sm:$0xff]  ;;  %1185 = vst [vmem:[%s2697_s1 + $0x4a8] sm:$0xff] %v1184_v17  ;;  %v1214_v32 = vld [vmem:[%s2696_s0 + $0x1b8] sm:$0xff]  ;;  %1213 = vst [vmem:[%s2697_s1 + $0x4b8] sm:$0xff] %v1212_v31 }
  0x4e   :  { %1187 = vst [vmem:[%s2697_s1 + $0x1a8] sm:$0xff] %v1186_v18  ;;  %v1188_v19 = vld [vmem:[%s2696_s0 + $0x528] sm:$0xff]  ;;  %v1216_v33 = vld [vmem:[%s2696_s0 + $0x538] sm:$0xff]  ;;  %1215 = vst [vmem:[%s2697_s1 + $0x1b8] sm:$0xff] %v1214_v32 }
  0x4f   :  { %v1190_v20 = vld [vmem:[%s2696_s0 + $0x128] sm:$0xff]  ;;  %1189 = vst [vmem:[%s2697_s1 + $0x528] sm:$0xff] %v1188_v19  ;;  %1217 = vst [vmem:[%s2697_s1 + $0x538] sm:$0xff] %v1216_v33  ;;  %v1218_v34 = vld [vmem:[%s2696_s0 + $0x138] sm:$0xff] }
  0x50   :  { %v1192_v21 = vld [vmem:[%s2696_s0 + $0x4a8] sm:$0xff]  ;;  %1191 = vst [vmem:[%s2697_s1 + $0x228] sm:$0xff] %v1190_v20  ;;  %v1220_v35 = vld [vmem:[%s2696_s0 + $0x4b8] sm:$0xff]  ;;  %1219 = vst [vmem:[%s2697_s1 + $0x238] sm:$0xff] %v1218_v34 }
  0x51   :  { %1193 = vst [vmem:[%s2697_s1 + $0x5a8] sm:$0xff] %v1192_v21  ;;  %v1194_v22 = vld [vmem:[%s2696_s0 + $0xa8] sm:$0xff]  ;;  %v1222_v36 = vld [vmem:[%s2696_s0 + $0xb8] sm:$0xff]  ;;  %1221 = vst [vmem:[%s2697_s1 + $0x5b8] sm:$0xff] %v1220_v35 }
  0x52   :  { %v1196_v23 = vld [vmem:[%s2696_s0 + $0x428] sm:$0xff]  ;;  %1195 = vst [vmem:[%s2697_s1 + $0x2a8] sm:$0xff] %v1194_v22  ;;  %1223 = vst [vmem:[%s2697_s1 + $0x2b8] sm:$0xff] %v1222_v36  ;;  %v1224_v37 = vld [vmem:[%s2696_s0 + $0x438] sm:$0xff] }
  0x53   :  { %v1198_v24 = vld [vmem:[%s2696_s0 + $0x28] sm:$0xff]  ;;  %1197 = vst [vmem:[%s2697_s1 + $0x628] sm:$0xff] %v1196_v23  ;;  %v1226_v38 = vld [vmem:[%s2696_s0 + $0x38] sm:$0xff]  ;;  %1225 = vst [vmem:[%s2697_s1 + $0x638] sm:$0xff] %v1224_v37 }
  0x54   :  { %1199 = vst [vmem:[%s2697_s1 + $0x328] sm:$0xff] %v1198_v24  ;;  %v1200_v25 = vld [vmem:[%s2696_s0 + $0x3a8] sm:$0xff]  ;;  %v1228_v39 = vld [vmem:[%s2696_s0 + $0x3b8] sm:$0xff]  ;;  %1227 = vst [vmem:[%s2697_s1 + $0x338] sm:$0xff] %v1226_v38 }
  0x55   :  { %1201 = vst [vmem:[%s2697_s1 + $0x6a8] sm:$0xff] %v1200_v25  ;;  %1229 = vst [vmem:[%s2697_s1 + $0x6b8] sm:$0xff] %v1228_v39  ;;  %v1230_v40 = vld [vmem:[%s2696_s0 + $0x348] sm:$0xff]  ;;  %v1258_v54 = vld [vmem:[%s2696_s0 + $0x358] sm:$0xff] }
  0x56   :  { %v1232_v41 = vld [vmem:[%s2696_s0 + $0x6c8] sm:$0xff]  ;;  %1231 = vst [vmem:[%s2697_s1 + $0x48] sm:$0xff] %v1230_v40  ;;  %1259 = vst [vmem:[%s2697_s1 + $0x58] sm:$0xff] %v1258_v54  ;;  %v1260_v55 = vld [vmem:[%s2696_s0 + $0x6d8] sm:$0xff] }
  0x57   :  { %v1234_v42 = vld [vmem:[%s2696_s0 + $0x2c8] sm:$0xff]  ;;  %1233 = vst [vmem:[%s2697_s1 + $0x3c8] sm:$0xff] %v1232_v41  ;;  %v1262_v56 = vld [vmem:[%s2696_s0 + $0x2d8] sm:$0xff]  ;;  %1261 = vst [vmem:[%s2697_s1 + $0x3d8] sm:$0xff] %v1260_v55 }
  0x58   :  { %1235 = vst [vmem:[%s2697_s1 + $0xc8] sm:$0xff] %v1234_v42  ;;  %v1236_v43 = vld [vmem:[%s2696_s0 + $0x648] sm:$0xff]  ;;  %v1264_v57 = vld [vmem:[%s2696_s0 + $0x658] sm:$0xff]  ;;  %1263 = vst [vmem:[%s2697_s1 + $0xd8] sm:$0xff] %v1262_v56 }
  0x59   :  { %v1238_v44 = vld [vmem:[%s2696_s0 + $0x248] sm:$0xff]  ;;  %1237 = vst [vmem:[%s2697_s1 + $0x448] sm:$0xff] %v1236_v43  ;;  %1265 = vst [vmem:[%s2697_s1 + $0x458] sm:$0xff] %v1264_v57  ;;  %v1266_v58 = vld [vmem:[%s2696_s0 + $0x258] sm:$0xff] }
  0x5a   :  { %v1240_v45 = vld [vmem:[%s2696_s0 + $0x5c8] sm:$0xff]  ;;  %1239 = vst [vmem:[%s2697_s1 + $0x148] sm:$0xff] %v1238_v44  ;;  %v1268_v59 = vld [vmem:[%s2696_s0 + $0x5d8] sm:$0xff]  ;;  %1267 = vst [vmem:[%s2697_s1 + $0x158] sm:$0xff] %v1266_v58 }
  0x5b   :  { %1241 = vst [vmem:[%s2697_s1 + $0x4c8] sm:$0xff] %v1240_v45  ;;  %v1242_v46 = vld [vmem:[%s2696_s0 + $0x1c8] sm:$0xff]  ;;  %v1270_v60 = vld [vmem:[%s2696_s0 + $0x1d8] sm:$0xff]  ;;  %1269 = vst [vmem:[%s2697_s1 + $0x4d8] sm:$0xff] %v1268_v59 }
  0x5c   :  { %v1244_v47 = vld [vmem:[%s2696_s0 + $0x548] sm:$0xff]  ;;  %1243 = vst [vmem:[%s2697_s1 + $0x1c8] sm:$0xff] %v1242_v46  ;;  %1271 = vst [vmem:[%s2697_s1 + $0x1d8] sm:$0xff] %v1270_v60  ;;  %v1272_v61 = vld [vmem:[%s2696_s0 + $0x558] sm:$0xff] }
  0x5d   :  { %v1246_v48 = vld [vmem:[%s2696_s0 + $0x148] sm:$0xff]  ;;  %1245 = vst [vmem:[%s2697_s1 + $0x548] sm:$0xff] %v1244_v47  ;;  %v1274_v62 = vld [vmem:[%s2696_s0 + $0x158] sm:$0xff]  ;;  %1273 = vst [vmem:[%s2697_s1 + $0x558] sm:$0xff] %v1272_v61 }
  0x5e   :  { %1247 = vst [vmem:[%s2697_s1 + $0x248] sm:$0xff] %v1246_v48  ;;  %v1248_v49 = vld [vmem:[%s2696_s0 + $0x4c8] sm:$0xff]  ;;  %v1276_v63 = vld [vmem:[%s2696_s0 + $0x4d8] sm:$0xff]  ;;  %1275 = vst [vmem:[%s2697_s1 + $0x258] sm:$0xff] %v1274_v62 }
  0x5f   :  { %v1250_v50 = vld [vmem:[%s2696_s0 + $0xc8] sm:$0xff]  ;;  %1249 = vst [vmem:[%s2697_s1 + $0x5c8] sm:$0xff] %v1248_v49  ;;  %1277 = vst [vmem:[%s2697_s1 + $0x5d8] sm:$0xff] %v1276_v63  ;;  %v1278_v0 = vld [vmem:[%s2696_s0 + $0xd8] sm:$0xff] }
  0x60   :  { %v1252_v51 = vld [vmem:[%s2696_s0 + $0x448] sm:$0xff]  ;;  %1251 = vst [vmem:[%s2697_s1 + $0x2c8] sm:$0xff] %v1250_v50  ;;  %v1280_v1 = vld [vmem:[%s2696_s0 + $0x458] sm:$0xff]  ;;  %1279 = vst [vmem:[%s2697_s1 + $0x2d8] sm:$0xff] %v1278_v0 }
  0x61   :  { %1253 = vst [vmem:[%s2697_s1 + $0x648] sm:$0xff] %v1252_v51  ;;  %v1254_v52 = vld [vmem:[%s2696_s0 + $0x48] sm:$0xff]  ;;  %v1282_v2 = vld [vmem:[%s2696_s0 + $0x58] sm:$0xff]  ;;  %1281 = vst [vmem:[%s2697_s1 + $0x658] sm:$0xff] %v1280_v1 }
  0x62   :  { %v1256_v53 = vld [vmem:[%s2696_s0 + $0x3c8] sm:$0xff]  ;;  %1255 = vst [vmem:[%s2697_s1 + $0x348] sm:$0xff] %v1254_v52  ;;  %1283 = vst [vmem:[%s2697_s1 + $0x358] sm:$0xff] %v1282_v2  ;;  %v1284_v3 = vld [vmem:[%s2696_s0 + $0x3d8] sm:$0xff] }
  0x63   :  { %1257 = vst [vmem:[%s2697_s1 + $0x6c8] sm:$0xff] %v1256_v53  ;;  %v1286_v4 = vld [vmem:[%s2696_s0 + $0x368] sm:$0xff]  ;;  %1285 = vst [vmem:[%s2697_s1 + $0x6d8] sm:$0xff] %v1284_v3  ;;  %v1314_v18 = vld [vmem:[%s2696_s0 + $0x378] sm:$0xff] }
  0x64   :  { %v1288_v5 = vld [vmem:[%s2696_s0 + $0x6e8] sm:$0xff]  ;;  %1287 = vst [vmem:[%s2697_s1 + $0x68] sm:$0xff] %v1286_v4  ;;  %v1316_v19 = vld [vmem:[%s2696_s0 + $0x6f8] sm:$0xff]  ;;  %1315 = vst [vmem:[%s2697_s1 + $0x78] sm:$0xff] %v1314_v18 }
  0x65   :  { %1289 = vst [vmem:[%s2697_s1 + $0x3e8] sm:$0xff] %v1288_v5  ;;  %v1290_v6 = vld [vmem:[%s2696_s0 + $0x2e8] sm:$0xff]  ;;  %v1318_v20 = vld [vmem:[%s2696_s0 + $0x2f8] sm:$0xff]  ;;  %1317 = vst [vmem:[%s2697_s1 + $0x3f8] sm:$0xff] %v1316_v19 }
  0x66   :  { %v1292_v7 = vld [vmem:[%s2696_s0 + $0x668] sm:$0xff]  ;;  %1291 = vst [vmem:[%s2697_s1 + $0xe8] sm:$0xff] %v1290_v6  ;;  %1319 = vst [vmem:[%s2697_s1 + $0xf8] sm:$0xff] %v1318_v20  ;;  %v1320_v21 = vld [vmem:[%s2696_s0 + $0x678] sm:$0xff] }
  0x67   :  { %v1294_v8 = vld [vmem:[%s2696_s0 + $0x268] sm:$0xff]  ;;  %1293 = vst [vmem:[%s2697_s1 + $0x468] sm:$0xff] %v1292_v7  ;;  %v1322_v22 = vld [vmem:[%s2696_s0 + $0x278] sm:$0xff]  ;;  %1321 = vst [vmem:[%s2697_s1 + $0x478] sm:$0xff] %v1320_v21 }
  0x68   :  { %1295 = vst [vmem:[%s2697_s1 + $0x168] sm:$0xff] %v1294_v8  ;;  %v1296_v9 = vld [vmem:[%s2696_s0 + $0x5e8] sm:$0xff]  ;;  %v1324_v23 = vld [vmem:[%s2696_s0 + $0x5f8] sm:$0xff]  ;;  %1323 = vst [vmem:[%s2697_s1 + $0x178] sm:$0xff] %v1322_v22 }
  0x69   :  { %v1298_v10 = vld [vmem:[%s2696_s0 + $0x1e8] sm:$0xff]  ;;  %1297 = vst [vmem:[%s2697_s1 + $0x4e8] sm:$0xff] %v1296_v9  ;;  %1325 = vst [vmem:[%s2697_s1 + $0x4f8] sm:$0xff] %v1324_v23  ;;  %v1326_v24 = vld [vmem:[%s2696_s0 + $0x1f8] sm:$0xff] }
  0x6a   :  { %v1300_v11 = vld [vmem:[%s2696_s0 + $0x568] sm:$0xff]  ;;  %1299 = vst [vmem:[%s2697_s1 + $0x1e8] sm:$0xff] %v1298_v10  ;;  %v1328_v25 = vld [vmem:[%s2696_s0 + $0x578] sm:$0xff]  ;;  %1327 = vst [vmem:[%s2697_s1 + $0x1f8] sm:$0xff] %v1326_v24 }
  0x6b   :  { %1301 = vst [vmem:[%s2697_s1 + $0x568] sm:$0xff] %v1300_v11  ;;  %v1302_v12 = vld [vmem:[%s2696_s0 + $0x168] sm:$0xff]  ;;  %v1330_v26 = vld [vmem:[%s2696_s0 + $0x178] sm:$0xff]  ;;  %1329 = vst [vmem:[%s2697_s1 + $0x578] sm:$0xff] %v1328_v25 }
  0x6c   :  { %v1304_v13 = vld [vmem:[%s2696_s0 + $0x4e8] sm:$0xff]  ;;  %1303 = vst [vmem:[%s2697_s1 + $0x268] sm:$0xff] %v1302_v12  ;;  %1331 = vst [vmem:[%s2697_s1 + $0x278] sm:$0xff] %v1330_v26  ;;  %v1332_v27 = vld [vmem:[%s2696_s0 + $0x4f8] sm:$0xff] }
  0x6d   :  { %v1306_v14 = vld [vmem:[%s2696_s0 + $0xe8] sm:$0xff]  ;;  %1305 = vst [vmem:[%s2697_s1 + $0x5e8] sm:$0xff] %v1304_v13  ;;  %v1334_v28 = vld [vmem:[%s2696_s0 + $0xf8] sm:$0xff]  ;;  %1333 = vst [vmem:[%s2697_s1 + $0x5f8] sm:$0xff] %v1332_v27 }
  0x6e   :  { %1307 = vst [vmem:[%s2697_s1 + $0x2e8] sm:$0xff] %v1306_v14  ;;  %v1308_v15 = vld [vmem:[%s2696_s0 + $0x468] sm:$0xff]  ;;  %v1336_v29 = vld [vmem:[%s2696_s0 + $0x478] sm:$0xff]  ;;  %1335 = vst [vmem:[%s2697_s1 + $0x2f8] sm:$0xff] %v1334_v28 }
  0x6f   :  { %v1310_v16 = vld [vmem:[%s2696_s0 + $0x68] sm:$0xff]  ;;  %1309 = vst [vmem:[%s2697_s1 + $0x668] sm:$0xff] %v1308_v15  ;;  %1337 = vst [vmem:[%s2697_s1 + $0x678] sm:$0xff] %v1336_v29  ;;  %v1338_v30 = vld [vmem:[%s2696_s0 + $0x78] sm:$0xff] }
  0x70   :  { %v1312_v17 = vld [vmem:[%s2696_s0 + $0x3e8] sm:$0xff]  ;;  %1311 = vst [vmem:[%s2697_s1 + $0x368] sm:$0xff] %v1310_v16  ;;  %v1340_v31 = vld [vmem:[%s2696_s0 + $0x3f8] sm:$0xff]  ;;  %1339 = vst [vmem:[%s2697_s1 + $0x378] sm:$0xff] %v1338_v30 }
  0x71   :  { %1313 = vst [vmem:[%s2697_s1 + $0x6e8] sm:$0xff] %v1312_v17  ;;  %1341 = vst [vmem:[%s2697_s1 + $0x6f8] sm:$0xff] %v1340_v31 }

// kernel: fno3d_forward.10
= control target key start
LH: loop header
LB: loop body
LE: loop exit
PB: predicated region body
PF: predicated region fallthrough
CT: control target
= control target key end

     0   :  { %s890_s6 = smov 0   ;;  %s892_s7 = smov 0   ;;  %s1292_s0 = inlined_call_operand.vmem [shape: f32[2,32,2048], index: 0, kind: input, shape index: {}]   ;;  %s1293_s1 = inlined_call_operand.vmem [shape: f32[2,32,2048], index: 1, kind: output, shape index: {}]  }
   0x1   :  { %s894_s8 = smov 0  }
   0x2 LB: > { %s23_s9 = sadd.s32 1, %s874_s7  ;;  %p695_p0 = scmp.ge.s32.totalorder %s878_s8, 1  ;;  %s878_s8 = sphi %s894_s8, %s11_s8   ;;  %s874_s7 = sphi %s892_s7, %s1295_s7   ;;  %s870_s6 = sphi %s890_s6, %s1294_s6  }
   0x3   : > { %p25_p1 = scmp.ge.s32.totalorder %s23_s9, 2  ;;  %p108_p2 = scmp.lt.s32.totalorder %s878_s8, 3 }
   0x5   : > { %s1297_s9 = smov (%p25_p1, %s23_s9), 0  ;;  %p109_p3 = pnand %p695_p0, %p108_p2 }
   0x6   : > { %p137_p4 = scmp.lt.s32.totalorder (!%p109_p3), %s870_s6, 1 }
   0x7   : > { %112 = sbr.rel (%p109_p3) target bundleno = 108 (0x6c), region = 24 }
   0xe   : > { %s1299_s6 = smov (!%p137_p4, %s870_s6), 1 }
   0xf   : > { %s702_s10 = sshll.u32 %s1299_s6, 9 }
  0x10   : > { %s916_s13 = scalar_lea.vmem %s1292_s0, %s702_s10  ;;  %s972_s16 = scalar_lea.vmem %s1293_s1, %s702_s10 }
  0x11   : > { %v156_v0 = vld [vmem:[%s916_s13] sm:$0xff]  ;;  %v157_v1 = vld [vmem:[%s916_s13 + $0x8] sm:$0xff]  ;;  %v158_v2 = vld [vmem:[%s916_s13 + $0x10] sm:$0xff] }
  0x12   : > { %v284_v3 = vmul.f32 0.70710677, %v156_v0  ;;  %v285_v4 = vmul.f32 0.70710677, %v157_v1  ;;  %v286_v5 = vmul.f32 0.70710677, %v158_v2 }
  0x13   : > { %v159_v6 = vld [vmem:[%s916_s13 + $0x18] sm:$0xff]  ;;  %v160_v7 = vld [vmem:[%s916_s13 + $0x20] sm:$0xff]  ;;  %v161_v8 = vld [vmem:[%s916_s13 + $0x28] sm:$0xff]  ;;  %v220_v15 = vmul.f32 0.5, %v156_v0  ;;  %v221_v18 = vmul.f32 0.5, %v157_v1  ;;  %v928_v19 = vmul.f32 0.5, %v158_v2 }
  0x14   : > { %728 = verf.f32 %v284_v3  ;;  %v287_v9 = vmul.f32 0.70710677, %v159_v6  ;;  %v162_v10 = vld [vmem:[%s916_s13 + $0x30] sm:$0xff]  ;;  %v163_v11 = vld [vmem:[%s916_s13 + $0x38] sm:$0xff]  ;;  %v288_v12 = vmul.f32 0.70710677, %v160_v7 }
  0x15   : > { %730 = verf.f32 %v285_v4  ;;  %v289_v13 = vmul.f32 0.70710677, %v161_v8  ;;  %v164_v14 = vld [vmem:[%s916_s13 + $0x40] sm:$0xff]  ;;  %v290_v16 = vmul.f32 0.70710677, %v162_v10  ;;  %v165_v17 = vld [vmem:[%s916_s13 + $0x48] sm:$0xff] }
  0x16   : > { %732 = verf.f32 %v286_v5  ;;  %v291_v20 = vmul.f32 0.70710677, %v163_v11  ;;  %v166_v21 = vld [vmem:[%s916_s13 + $0x50] sm:$0xff]  ;;  %v931_v22 = vmul.f32 0.5, %v159_v6  ;;  %v933_v23 = vmul.f32 0.5, %v160_v7  ;;  %v167_v25 = vld [vmem:[%s916_s13 + $0x58] sm:$0xff] }
  0x17   : > { %734 = verf.f32 %v287_v9  ;;  %v292_v24 = vmul.f32 0.70710677, %v164_v14  ;;  %v936_v26 = vmul.f32 0.5, %v161_v8  ;;  %v938_v27 = vmul.f32 0.5, %v162_v10  ;;  %v168_v29 = vld [vmem:[%s916_s13 + $0x60] sm:$0xff]  ;;  %v169_v33 = vld [vmem:[%s916_s13 + $0x68] sm:$0xff] }
  0x18   : > { %736 = verf.f32 %v288_v12  ;;  %v293_v28 = vmul.f32 0.70710677, %v165_v17  ;;  %v941_v30 = vmul.f32 0.5, %v163_v11  ;;  %v943_v31 = vmul.f32 0.5, %v164_v14  ;;  %v170_v37 = vld [vmem:[%s916_s13 + $0x70] sm:$0xff]  ;;  %v171_v38 = vld [vmem:[%s916_s13 + $0x78] sm:$0xff] }
  0x19   : > { %738 = verf.f32 %v289_v13  ;;  %v294_v32 = vmul.f32 0.70710677, %v166_v21  ;;  %v946_v34 = vmul.f32 0.5, %v165_v17  ;;  %v948_v35 = vmul.f32 0.5, %v166_v21  ;;  %v172_v42 = vld [vmem:[%s916_s13 + $0x80] sm:$0xff]  ;;  %v173_v46 = vld [vmem:[%s916_s13 + $0x88] sm:$0xff] }
  0x1a   : > { %740 = verf.f32 %v290_v16  ;;  %v295_v36 = vmul.f32 0.70710677, %v167_v25  ;;  %v952_v39 = vmul.f32 0.5, %v167_v25  ;;  %v954_v40 = vmul.f32 0.5, %v168_v29  ;;  %v174_v55 = vld [vmem:[%s916_s13 + $0x90] sm:$0xff]  ;;  %v977_v60 = vld [vmem:[%s916_s13 + $0x98] sm:$0xff] }
  0x1b   : > { %742 = verf.f32 %v291_v20  ;;  %v296_v41 = vmul.f32 0.70710677, %v168_v29  ;;  %v957_v43 = vmul.f32 0.5, %v169_v33  ;;  %v297_v44 = vmul.f32 0.70710677, %v169_v33  ;;  %v982_v1 = vld [vmem:[%s916_s13 + $0xa0] sm:$0xff] }
  0x1c   : > { %744 = verf.f32 %v292_v24  ;;  %v959_v45 = vmul.f32 0.5, %v170_v37  ;;  %v298_v48 = vmul.f32 0.70710677, %v170_v37  ;;  %v962_v49 = vmul.f32 0.5, %v171_v38  ;;  %v985_v6 = vld [vmem:[%s916_s13 + $0xa8] sm:$0xff]  ;;  %v991_v11 = vld [vmem:[%s916_s13 + $0xb0] sm:$0xff] }
  0x1d   : > { %746 = verf.f32 %v293_v28  ;;  %v299_v50 = vmul.f32 0.70710677, %v171_v38  ;;  %v964_v53 = vmul.f32 0.5, %v172_v42  ;;  %v300_v54 = vmul.f32 0.70710677, %v172_v42  ;;  %v997_v16 = vld [vmem:[%s916_s13 + $0xb8] sm:$0xff] }
  0x1e   : > { %v729_v47 = vpop.eup %728  ;;  %748 = verf.f32 %v294_v32  ;;  %v974_v58 = vmul.f32 0.5, %v173_v46  ;;  %v301_v59 = vmul.f32 0.70710677, %v173_v46  ;;  %v979_v0 = vmul.f32 0.5, %v174_v55  ;;  %v1003_v21 = vld [vmem:[%s916_s13 + $0xc0] sm:$0xff]  ;;  %v1009_v29 = vld [vmem:[%s916_s13 + $0xc8] sm:$0xff] }
  0x1f   : > { %v731_v51 = vpop.eup %730  ;;  %v412_v52 = vadd.f32 1.0, %v729_v47  ;;  %750 = verf.f32 %v295_v36  ;;  %v302_v5 = vmul.f32 0.70710677, %v174_v55  ;;  %v303_v10 = vmul.f32 0.70710677, %v977_v60  ;;  %v1018_v42 = vld [vmem:[%s916_s13 + $0xd0] sm:$0xff] }
  0x20   : > { %v733_v56 = vpop.eup %732  ;;  %v413_v57 = vadd.f32 1.0, %v731_v51  ;;  %752 = verf.f32 %v296_v41  ;;  %v305_v20 = vmul.f32 0.70710677, %v985_v6  ;;  %v306_v28 = vmul.f32 0.70710677, %v991_v11 }
  0x21   : > { %v735_v61 = vpop.eup %734  ;;  %v476_v62 = vmul.f32 %v412_v52, %v220_v15  ;;  %v414_v63 = vadd.f32 1.0, %v733_v56  ;;  %754 = verf.f32 %v297_v44  ;;  %v304_v15 = vmul.f32 0.70710677, %v982_v1  ;;  %v1029_v52 = vld [vmem:[%s916_s13 + $0xd8] sm:$0xff] }
  0x22   : > { %v737_v2 = vpop.eup %736  ;;  %v477_v3 = vmul.f32 %v413_v57, %v221_v18  ;;  %v415_v4 = vadd.f32 1.0, %v735_v61  ;;  %756 = verf.f32 %v298_v48  ;;  %v307_v36 = vmul.f32 0.70710677, %v997_v16  ;;  %v1038_v61 = vld [vmem:[%s916_s13 + $0xe0] sm:$0xff] }
  0x23   : > { %v739_v7 = vpop.eup %738  ;;  %540 = vst [vmem:[%s972_s16] sm:$0xff] %v476_v62  ;;  %v478_v8 = vmul.f32 %v414_v63, %v928_v19  ;;  %v416_v9 = vadd.f32 1.0, %v737_v2  ;;  %758 = verf.f32 %v299_v50  ;;  %v308_v41 = vmul.f32 0.70710677, %v1003_v21 }
  0x24   : > { %v741_v12 = vpop.eup %740  ;;  %541 = vst [vmem:[%s972_s16 + $0x8] sm:$0xff] %v477_v3  ;;  %v479_v13 = vmul.f32 %v415_v4, %v931_v22  ;;  %v417_v14 = vadd.f32 1.0, %v739_v7  ;;  %760 = verf.f32 %v300_v54  ;;  %v309_v47 = vmul.f32 0.70710677, %v1009_v29  ;;  %v1044_v3 = vld [vmem:[%s916_s13 + $0xe8] sm:$0xff] }
  0x25   : > { %v743_v17 = vpop.eup %742  ;;  %542 = vst [vmem:[%s972_s16 + $0x10] sm:$0xff] %v478_v8  ;;  %v480_v18 = vmul.f32 %v416_v9, %v933_v23  ;;  %v418_v19 = vadd.f32 1.0, %v741_v12  ;;  %762 = verf.f32 %v301_v59  ;;  %v1026_v51 = vmul.f32 0.5, %v977_v60 }
  0x26   : > { %v745_v22 = vpop.eup %744  ;;  %543 = vst [vmem:[%s972_s16 + $0x18] sm:$0xff] %v479_v13  ;;  %v481_v24 = vmul.f32 %v417_v14, %v936_v26  ;;  %v419_v25 = vadd.f32 1.0, %v743_v17  ;;  %764 = verf.f32 %v302_v5  ;;  %v310_v56 = vmul.f32 0.70710677, %v1018_v42 }
  0x27   : > { %v747_v23 = vpop.eup %746  ;;  %544 = vst [vmem:[%s972_s16 + $0x20] sm:$0xff] %v480_v18  ;;  %v482_v32 = vmul.f32 %v418_v19, %v938_v27  ;;  %v420_v33 = vadd.f32 1.0, %v745_v22  ;;  %766 = verf.f32 %v303_v10  ;;  %v240_v60 = vmul.f32 0.5, %v982_v1  ;;  %v1053_v10 = vld [vmem:[%s916_s13 + $0xf0] sm:$0xff] }
  0x28   : > { %v749_v37 = vpop.eup %748  ;;  %545 = vst [vmem:[%s972_s16 + $0x28] sm:$0xff] %v481_v24  ;;  %v483_v26 = vmul.f32 %v419_v25, %v941_v30  ;;  %v421_v38 = vadd.f32 1.0, %v747_v23  ;;  %768 = verf.f32 %v304_v15  ;;  %v311_v2 = vmul.f32 0.70710677, %v1029_v52  ;;  %v1060_v15 = vld [vmem:[%s916_s13 + $0xf8] sm:$0xff]  ;;  %v1069_v24 = vld [vmem:[%s916_s13 + $0x100] sm:$0xff] }
  0x29   : > { %v751_v44 = vpop.eup %750  ;;  %546 = vst [vmem:[%s972_s16 + $0x30] sm:$0xff] %v482_v32  ;;  %v484_v27 = vmul.f32 %v420_v33, %v943_v31  ;;  %v422_v46 = vadd.f32 1.0, %v749_v37  ;;  %770 = verf.f32 %v305_v20  ;;  %v241_v5 = vmul.f32 0.5, %v985_v6  ;;  %v1076_v32 = vld [vmem:[%s916_s13 + $0x108] sm:$0xff] }
  0x2a   : > { %v753_v48 = vpop.eup %752  ;;  %547 = vst [vmem:[%s972_s16 + $0x38] sm:$0xff] %v483_v26  ;;  %v485_v30 = vmul.f32 %v421_v38, %v946_v34  ;;  %v423_v50 = vadd.f32 1.0, %v751_v44  ;;  %772 = verf.f32 %v306_v28  ;;  %v312_v9 = vmul.f32 0.70710677, %v1038_v61 }
  0x2b   : > { %v755_v54 = vpop.eup %754  ;;  %548 = vst [vmem:[%s972_s16 + $0x40] sm:$0xff] %v484_v27  ;;  %v486_v31 = vmul.f32 %v422_v46, %v948_v35  ;;  %v424_v55 = vadd.f32 1.0, %v753_v48  ;;  %774 = verf.f32 %v307_v36  ;;  %v242_v6 = vmul.f32 0.5, %v991_v11  ;;  %v1090_v48 = vld [vmem:[%s916_s13 + $0x118] sm:$0xff] }
  0x2c   : > { %v757_v34 = vpop.eup %756  ;;  %549 = vst [vmem:[%s972_s16 + $0x48] sm:$0xff] %v485_v30  ;;  %v487_v57 = vmul.f32 %v423_v50, %v952_v39  ;;  %v425_v59 = vadd.f32 1.0, %v755_v54  ;;  %776 = verf.f32 %v308_v41  ;;  %v313_v14 = vmul.f32 0.70710677, %v1044_v3  ;;  %v1084_v41 = vld [vmem:[%s916_s13 + $0x110] sm:$0xff] }
  0x2d   : > { %v759_v62 = vpop.eup %758  ;;  %550 = vst [vmem:[%s972_s16 + $0x50] sm:$0xff] %v486_v31  ;;  %v488_v35 = vmul.f32 %v424_v55, %v954_v40  ;;  %v426_v63 = vadd.f32 1.0, %v757_v34  ;;  %778 = verf.f32 %v309_v47  ;;  %v243_v19 = vmul.f32 0.5, %v997_v16  ;;  %v1097_v34 = vld [vmem:[%s916_s13 + $0x120] sm:$0xff] }
  0x2e   : > { %v761_v39 = vpop.eup %760  ;;  %551 = vst [vmem:[%s972_s16 + $0x58] sm:$0xff] %v487_v57  ;;  %v489_v1 = vmul.f32 %v425_v59, %v957_v43  ;;  %v427_v4 = vadd.f32 1.0, %v759_v62  ;;  %780 = verf.f32 %v310_v56  ;;  %v314_v22 = vmul.f32 0.70710677, %v1053_v10 }
  0x2f   : > { %v763_v7 = vpop.eup %762  ;;  %552 = vst [vmem:[%s972_s16 + $0x60] sm:$0xff] %v488_v35  ;;  %v490_v40 = vmul.f32 %v426_v63, %v959_v45  ;;  %v428_v8 = vadd.f32 1.0, %v761_v39  ;;  %782 = verf.f32 %v311_v2  ;;  %v244_v16 = vmul.f32 0.5, %v1003_v21  ;;  %v1107_v39 = vld [vmem:[%s916_s13 + $0x130] sm:$0xff] }
  0x30   : > { %v765_v12 = vpop.eup %764  ;;  %553 = vst [vmem:[%s972_s16 + $0x68] sm:$0xff] %v489_v1  ;;  %v491_v43 = vmul.f32 %v427_v4, %v962_v49  ;;  %v429_v13 = vadd.f32 1.0, %v763_v7  ;;  %784 = verf.f32 %v312_v9  ;;  %v315_v23 = vmul.f32 0.70710677, %v1060_v15 }
  0x31   : > { %v767_v45 = vpop.eup %766  ;;  %554 = vst [vmem:[%s972_s16 + $0x70] sm:$0xff] %v490_v40  ;;  %v492_v17 = vmul.f32 %v428_v8, %v964_v53  ;;  %v430_v18 = vadd.f32 1.0, %v765_v12  ;;  %786 = verf.f32 %v313_v14  ;;  %v245_v37 = vmul.f32 0.5, %v1009_v29  ;;  %v1113_v40 = vld [vmem:[%s916_s13 + $0x138] sm:$0xff] }
  0x32   : > { %v769_v49 = vpop.eup %768  ;;  %555 = vst [vmem:[%s972_s16 + $0x78] sm:$0xff] %v491_v43  ;;  %v493_v20 = vmul.f32 %v429_v13, %v974_v58  ;;  %v431_v11 = vadd.f32 1.0, %v767_v45  ;;  %788 = verf.f32 %v314_v22  ;;  %v316_v21 = vmul.f32 0.70710677, %v1069_v24  ;;  %v1119_v13 = vld [vmem:[%s916_s13 + $0x140] sm:$0xff]  ;;  %v1125_v45 = vld [vmem:[%s916_s13 + $0x148] sm:$0xff] }
  0x33   : > { %v771_v25 = vpop.eup %770  ;;  %556 = vst [vmem:[%s972_s16 + $0x80] sm:$0xff] %v492_v17  ;;  %v494_v53 = vmul.f32 %v430_v18, %v979_v0  ;;  %v432_v28 = vadd.f32 1.0, %v769_v49  ;;  %790 = verf.f32 %v315_v23  ;;  %v246_v47 = vmul.f32 0.5, %v1018_v42  ;;  %v1131_v49 = vld [vmem:[%s916_s13 + $0x150] sm:$0xff] }
  0x34   : > { %v773_v58 = vpop.eup %772  ;;  %557 = vst [vmem:[%s972_s16 + $0x88] sm:$0xff] %v493_v20  ;;  %v495_v33 = vmul.f32 %v431_v11, %v1026_v51  ;;  %v433_v36 = vadd.f32 1.0, %v771_v25  ;;  %v317_v29 = vmul.f32 0.70710677, %v1076_v32  ;;  %v247_v54 = vmul.f32 0.5, %v1029_v52  ;;  %v1102_v52 = vld [vmem:[%s916_s13 + $0x128] sm:$0xff] }
  0x35   : > { %v775_v0 = vpop.eup %774  ;;  %558 = vst [vmem:[%s972_s16 + $0x90] sm:$0xff] %v494_v53  ;;  %v496_v26 = vmul.f32 %v432_v28, %v240_v60  ;;  %v434_v38 = vadd.f32 1.0, %v773_v58  ;;  %792 = verf.f32 %v316_v21  ;;  %v318_v42 = vmul.f32 0.70710677, %v1084_v41  ;;  %v1138_v28 = vld [vmem:[%s916_s13 + $0x158] sm:$0xff] }
  0x36   : > { %v777_v44 = vpop.eup %776  ;;  %559 = vst [vmem:[%s972_s16 + $0x98] sm:$0xff] %v495_v33  ;;  %v497_v27 = vmul.f32 %v433_v36, %v241_v5  ;;  %v435_v46 = vadd.f32 1.0, %v775_v0  ;;  %794 = verf.f32 %v317_v29  ;;  %v319_v62 = vmul.f32 0.70710677, %v1090_v48  ;;  %v1144_v36 = vld [vmem:[%s916_s13 + $0x160] sm:$0xff] }
  0x37   : > { %v779_v30 = vpop.eup %778  ;;  %560 = vst [vmem:[%s972_s16 + $0xa0] sm:$0xff] %v496_v26  ;;  %v498_v50 = vmul.f32 %v434_v38, %v242_v6  ;;  %v436_v51 = vadd.f32 1.0, %v777_v44  ;;  %v248_v2 = vmul.f32 0.5, %v1038_v61  ;;  %796 = verf.f32 %v318_v42 }
  0x38   : > { %v781_v31 = vpop.eup %780  ;;  %561 = vst [vmem:[%s972_s16 + $0xa8] sm:$0xff] %v497_v27  ;;  %v499_v55 = vmul.f32 %v435_v46, %v243_v19  ;;  %v437_v56 = vadd.f32 1.0, %v779_v30  ;;  %v249_v5 = vmul.f32 0.5, %v1044_v3  ;;  %798 = verf.f32 %v319_v62  ;;  %v1154_v27 = vld [vmem:[%s916_s13 + $0x170] sm:$0xff] }
  0x39   : > { %v783_v57 = vpop.eup %782  ;;  %562 = vst [vmem:[%s972_s16 + $0xb0] sm:$0xff] %v498_v50  ;;  %v500_v59 = vmul.f32 %v436_v51, %v244_v16  ;;  %v438_v60 = vadd.f32 1.0, %v781_v31  ;;  %v320_v7 = vmul.f32 0.70710677, %v1097_v34  ;;  %v250_v12 = vmul.f32 0.5, %v1053_v10  ;;  %v1161_v50 = vld [vmem:[%s916_s13 + $0x178] sm:$0xff] }
  0x3a   : > { %563 = vst [vmem:[%s972_s16 + $0xb8] sm:$0xff] %v499_v55  ;;  %v501_v35 = vmul.f32 %v437_v56, %v245_v37  ;;  %v439_v63 = vadd.f32 1.0, %v783_v57  ;;  %v785_v1 = vpop.eup %784  ;;  %v321_v43 = vmul.f32 0.70710677, %v1102_v52  ;;  %v251_v6 = vmul.f32 0.5, %v1060_v15  ;;  %v1147_v37 = vld [vmem:[%s916_s13 + $0x168] sm:$0xff] }
  0x3b   : > { %564 = vst [vmem:[%s972_s16 + $0xc0] sm:$0xff] %v500_v59  ;;  %v502_v4 = vmul.f32 %v438_v60, %v246_v47  ;;  %v787_v8 = vpop.eup %786  ;;  %v440_v9 = vadd.f32 1.0, %v785_v1  ;;  %800 = verf.f32 %v320_v7  ;;  %v322_v14 = vmul.f32 0.70710677, %v1107_v39  ;;  %v1165_v56 = vld [vmem:[%s916_s13 + $0x180] sm:$0xff]  ;;  %v1171_v59 = vld [vmem:[%s916_s13 + $0x188] sm:$0xff] }
  0x3c   : > { %565 = vst [vmem:[%s972_s16 + $0xc8] sm:$0xff] %v501_v35  ;;  %v503_v61 = vmul.f32 %v439_v63, %v247_v54  ;;  %v441_v3 = vadd.f32 1.0, %v787_v8  ;;  %v789_v17 = vpop.eup %788  ;;  %v252_v10 = vmul.f32 0.5, %v1069_v24  ;;  %802 = verf.f32 %v321_v43 }
  0x3d   : > { %566 = vst [vmem:[%s972_s16 + $0xd0] sm:$0xff] %v502_v4  ;;  %v504_v18 = vmul.f32 %v440_v9, %v248_v2  ;;  %v323_v19 = vmul.f32 0.70710677, %v1113_v40  ;;  %v791_v20 = vpop.eup %790  ;;  %v442_v11 = vadd.f32 1.0, %v789_v17  ;;  %804 = verf.f32 %v322_v14  ;;  %v1178_v4 = vld [vmem:[%s916_s13 + $0x190] sm:$0xff]  ;;  %v1190_v17 = vld [vmem:[%s916_s13 + $0x1a0] sm:$0xff] }
  0x3e   : > { %567 = vst [vmem:[%s972_s16 + $0xd8] sm:$0xff] %v503_v61  ;;  %v505_v15 = vmul.f32 %v441_v3, %v249_v5  ;;  %v324_v22 = vmul.f32 0.70710677, %v1119_v13  ;;  %v443_v25 = vadd.f32 1.0, %v791_v20  ;;  %v253_v53 = vmul.f32 0.5, %v1076_v32  ;;  %v1184_v61 = vld [vmem:[%s916_s13 + $0x198] sm:$0xff] }
  0x3f   : > { %568 = vst [vmem:[%s972_s16 + $0xe0] sm:$0xff] %v504_v18  ;;  %806 = verf.f32 %v323_v19  ;;  %v325_v24 = vmul.f32 0.70710677, %v1125_v45  ;;  %v793_v16 = vpop.eup %792  ;;  %v506_v23 = vmul.f32 %v442_v11, %v250_v12  ;;  %v254_v58 = vmul.f32 0.5, %v1084_v41 }
  0x40   : > { %569 = vst [vmem:[%s972_s16 + $0xe8] sm:$0xff] %v505_v15  ;;  %808 = verf.f32 %v324_v22  ;;  %v326_v33 = vmul.f32 0.70710677, %v1131_v49  ;;  %v795_v32 = vpop.eup %794  ;;  %v507_v0 = vmul.f32 %v443_v25, %v251_v6  ;;  %v444_v26 = vadd.f32 1.0, %v793_v16  ;;  %v1196_v15 = vld [vmem:[%s916_s13 + $0x1a8] sm:$0xff] }
  0x41   : > { %v255_v38 = vmul.f32 0.5, %v1090_v48  ;;  %810 = verf.f32 %v325_v24  ;;  %570 = vst [vmem:[%s972_s16 + $0xf0] sm:$0xff] %v506_v23  ;;  %v445_v21 = vadd.f32 1.0, %v795_v32  ;;  %v256_v44 = vmul.f32 0.5, %v1097_v34  ;;  %v797_v46 = vpop.eup %796  ;;  %v1201_v24 = vld [vmem:[%s916_s13 + $0x1b0] sm:$0xff] }
  0x42   : > { %812 = verf.f32 %v326_v33  ;;  %v327_v41 = vmul.f32 0.70710677, %v1138_v28  ;;  %571 = vst [vmem:[%s972_s16 + $0xf8] sm:$0xff] %v507_v0  ;;  %v508_v47 = vmul.f32 %v444_v26, %v252_v10  ;;  %v257_v29 = vmul.f32 0.5, %v1102_v52  ;;  %v799_v51 = vpop.eup %798 }
  0x43   : > { %v328_v48 = vmul.f32 0.70710677, %v1144_v36  ;;  %v329_v30 = vmul.f32 0.70710677, %v1147_v37  ;;  %v509_v54 = vmul.f32 %v445_v21, %v253_v53  ;;  %v446_v31 = vadd.f32 1.0, %v797_v46  ;;  %v1215_v46 = vld [vmem:[%s916_s13 + $0x1c0] sm:$0xff] }
  0x44   : > { %v258_v55 = vmul.f32 0.5, %v1107_v39  ;;  %814 = verf.f32 %v327_v41  ;;  %572 = vst [vmem:[%s972_s16 + $0x100] sm:$0xff] %v508_v47  ;;  %v447_v42 = vadd.f32 1.0, %v799_v51  ;;  %v259_v34 = vmul.f32 0.5, %v1113_v40 }
  0x45   : > { %816 = verf.f32 %v328_v48  ;;  %v330_v57 = vmul.f32 0.70710677, %v1154_v27  ;;  %v801_v60 = vpop.eup %800  ;;  %573 = vst [vmem:[%s972_s16 + $0x108] sm:$0xff] %v509_v54  ;;  %v510_v62 = vmul.f32 %v446_v31, %v254_v58  ;;  %v260_v52 = vmul.f32 0.5, %v1119_v13  ;;  %v1206_v58 = vld [vmem:[%s916_s13 + $0x1b8] sm:$0xff]  ;;  %v1221_v48 = vld [vmem:[%s916_s13 + $0x1c8] sm:$0xff] }
  0x46   : > { %818 = verf.f32 %v329_v30  ;;  %v331_v35 = vmul.f32 0.70710677, %v1161_v50  ;;  %v803_v63 = vpop.eup %802  ;;  %v511_v2 = vmul.f32 %v447_v42, %v255_v38  ;;  %v448_v39 = vadd.f32 1.0, %v801_v60 }
  0x47   : > { %820 = verf.f32 %v330_v57  ;;  %v332_v1 = vmul.f32 0.70710677, %v1165_v56  ;;  %v805_v5 = vpop.eup %804  ;;  %574 = vst [vmem:[%s972_s16 + $0x110] sm:$0xff] %v510_v62  ;;  %v449_v7 = vadd.f32 1.0, %v803_v63  ;;  %v261_v40 = vmul.f32 0.5, %v1125_v45  ;;  %v1227_v57 = vld [vmem:[%s916_s13 + $0x1d0] sm:$0xff] }
  0x48   : > { %822 = verf.f32 %v331_v35  ;;  %v333_v8 = vmul.f32 0.70710677, %v1171_v59  ;;  %575 = vst [vmem:[%s972_s16 + $0x118] sm:$0xff] %v511_v2  ;;  %v512_v12 = vmul.f32 %v448_v39, %v256_v44  ;;  %v450_v43 = vadd.f32 1.0, %v805_v5  ;;  %v1233_v63 = vld [vmem:[%s916_s13 + $0x1d8] sm:$0xff] }
  0x49   : > { %v807_v9 = vpop.eup %806  ;;  %v262_v13 = vmul.f32 0.5, %v1131_v49  ;;  %824 = verf.f32 %v332_v1  ;;  %v513_v6 = vmul.f32 %v449_v7, %v257_v29  ;;  %v334_v45 = vmul.f32 0.70710677, %v1178_v4  ;;  %v1238_v7 = vld [vmem:[%s916_s13 + $0x1e0] sm:$0xff] }
  0x4a   : > { %v809_v3 = vpop.eup %808  ;;  %v451_v14 = vadd.f32 1.0, %v807_v9  ;;  %826 = verf.f32 %v333_v8  ;;  %576 = vst [vmem:[%s972_s16 + $0x120] sm:$0xff] %v512_v12  ;;  %v514_v10 = vmul.f32 %v450_v43, %v258_v55  ;;  %v263_v20 = vmul.f32 0.5, %v1138_v28  ;;  %v1243_v9 = vld [vmem:[%s916_s13 + $0x1e8] sm:$0xff] }
  0x4b   : > { %v811_v18 = vpop.eup %810  ;;  %v452_v19 = vadd.f32 1.0, %v809_v3  ;;  %v335_v49 = vmul.f32 0.70710677, %v1184_v61  ;;  %577 = vst [vmem:[%s972_s16 + $0x128] sm:$0xff] %v513_v6  ;;  %v264_v53 = vmul.f32 0.5, %v1144_v36  ;;  %828 = verf.f32 %v334_v45  ;;  %v1249_v3 = vld [vmem:[%s916_s13 + $0x1f0] sm:$0xff] }
  0x4c   : > { %v813_v11 = vpop.eup %812  ;;  %v515_v22 = vmul.f32 %v451_v14, %v259_v34  ;;  %v453_v25 = vadd.f32 1.0, %v811_v18  ;;  %578 = vst [vmem:[%s972_s16 + $0x130] sm:$0xff] %v514_v10  ;;  %v336_v28 = vmul.f32 0.70710677, %v1190_v17  ;;  %v265_v0 = vmul.f32 0.5, %v1147_v37 }
  0x4d   : > { %v516_v16 = vmul.f32 %v452_v19, %v260_v52  ;;  %v454_v23 = vadd.f32 1.0, %v813_v11  ;;  %830 = verf.f32 %v335_v49  ;;  %v266_v36 = vmul.f32 0.5, %v1154_v27 }
  0x4e   : > { %v815_v33 = vpop.eup %814  ;;  %579 = vst [vmem:[%s972_s16 + $0x138] sm:$0xff] %v515_v22  ;;  %v517_v32 = vmul.f32 %v453_v25, %v261_v40  ;;  %v337_v26 = vmul.f32 0.70710677, %v1196_v15  ;;  %832 = verf.f32 %v336_v28  ;;  %v338_v41 = vmul.f32 0.70710677, %v1201_v24 }
  0x4f   : > { %v817_v38 = vpop.eup %816  ;;  %580 = vst [vmem:[%s972_s16 + $0x140] sm:$0xff] %v516_v16  ;;  %v518_v21 = vmul.f32 %v454_v23, %v262_v13  ;;  %v455_v44 = vadd.f32 1.0, %v815_v33  ;;  %v267_v37 = vmul.f32 0.5, %v1161_v50  ;;  %v339_v27 = vmul.f32 0.70710677, %v1206_v58 }
  0x50   : > { %v819_v47 = vpop.eup %818  ;;  %581 = vst [vmem:[%s972_s16 + $0x148] sm:$0xff] %v517_v32  ;;  %v456_v29 = vadd.f32 1.0, %v817_v38  ;;  %834 = verf.f32 %v337_v26  ;;  %v268_v31 = vmul.f32 0.5, %v1165_v56  ;;  %v340_v50 = vmul.f32 0.70710677, %v1215_v46 }
  0x51   : > { %v821_v30 = vpop.eup %820  ;;  %582 = vst [vmem:[%s972_s16 + $0x150] sm:$0xff] %v518_v21  ;;  %v519_v51 = vmul.f32 %v455_v44, %v263_v20  ;;  %v457_v54 = vadd.f32 1.0, %v819_v47  ;;  %836 = verf.f32 %v338_v41  ;;  %v269_v35 = vmul.f32 0.5, %v1171_v59  ;;  %v219_v20 = vld [vmem:[%s916_s13 + $0x1f8] sm:$0xff] }
  0x52   : > { %v823_v55 = vpop.eup %822  ;;  %v520_v42 = vmul.f32 %v456_v29, %v264_v53  ;;  %v458_v34 = vadd.f32 1.0, %v821_v30  ;;  %838 = verf.f32 %v339_v27  ;;  %v341_v56 = vmul.f32 0.70710677, %v1221_v48 }
  0x53   : > { %v825_v60 = vpop.eup %824  ;;  %583 = vst [vmem:[%s972_s16 + $0x158] sm:$0xff] %v519_v51  ;;  %v521_v62 = vmul.f32 %v457_v54, %v265_v0  ;;  %v459_v52 = vadd.f32 1.0, %v823_v55  ;;  %v270_v5 = vmul.f32 0.5, %v1178_v4  ;;  %840 = verf.f32 %v340_v50 }
  0x54   : > { %v827_v2 = vpop.eup %826  ;;  %584 = vst [vmem:[%s972_s16 + $0x160] sm:$0xff] %v520_v42  ;;  %v522_v39 = vmul.f32 %v458_v34, %v266_v36  ;;  %v460_v1 = vadd.f32 1.0, %v825_v60  ;;  %842 = verf.f32 %v341_v56  ;;  %v342_v59 = vmul.f32 0.70710677, %v1227_v57 }
  0x55   : > { %585 = vst [vmem:[%s972_s16 + $0x168] sm:$0xff] %v521_v62  ;;  %v523_v40 = vmul.f32 %v459_v52, %v267_v37  ;;  %v461_v8 = vadd.f32 1.0, %v827_v2  ;;  %v829_v12 = vpop.eup %828  ;;  %v271_v13 = vmul.f32 0.5, %v1184_v61  ;;  %v343_v4 = vmul.f32 0.70710677, %v1233_v63 }
  0x56   : > { %586 = vst [vmem:[%s972_s16 + $0x170] sm:$0xff] %v522_v39  ;;  %v524_v43 = vmul.f32 %v460_v1, %v268_v31  ;;  %v462_v45 = vadd.f32 1.0, %v829_v12  ;;  %844 = verf.f32 %v342_v59  ;;  %v344_v18 = vmul.f32 0.70710677, %v1238_v7 }
  0x57   : > { %v831_v6 = vpop.eup %830  ;;  %587 = vst [vmem:[%s972_s16 + $0x178] sm:$0xff] %v523_v40  ;;  %v525_v14 = vmul.f32 %v461_v8, %v269_v35  ;;  %v272_v19 = vmul.f32 0.5, %v1190_v17  ;;  %846 = verf.f32 %v343_v4  ;;  %v345_v61 = vmul.f32 0.70710677, %v1243_v9 }
  0x58   : > { %588 = vst [vmem:[%s972_s16 + $0x180] sm:$0xff] %v524_v43  ;;  %v463_v10 = vadd.f32 1.0, %v831_v6  ;;  %v833_v49 = vpop.eup %832  ;;  %v526_v11 = vmul.f32 %v462_v45, %v270_v5  ;;  %v273_v22 = vmul.f32 0.5, %v1196_v15  ;;  %848 = verf.f32 %v344_v18 }
  0x59   : > { %589 = vst [vmem:[%s972_s16 + $0x188] sm:$0xff] %v525_v14  ;;  %v346_v25 = vmul.f32 0.70710677, %v1249_v3  ;;  %v464_v23 = vadd.f32 1.0, %v833_v49  ;;  %v274_v28 = vmul.f32 0.5, %v1201_v24  ;;  %850 = verf.f32 %v345_v61 }
  0x5a   : > { %v835_v53 = vpop.eup %834  ;;  %v527_v16 = vmul.f32 %v463_v10, %v271_v13  ;;  %590 = vst [vmem:[%s972_s16 + $0x190] sm:$0xff] %v526_v11  ;;  %v275_v32 = vmul.f32 0.5, %v1206_v58  ;;  %v347_v0 = vmul.f32 0.70710677, %v219_v20  ;;  %v276_v24 = vmul.f32 0.5, %v1215_v46 }
  0x5b   : > { %v837_v17 = vpop.eup %836  ;;  %v465_v33 = vadd.f32 1.0, %v835_v53  ;;  %852 = verf.f32 %v346_v25  ;;  %v528_v15 = vmul.f32 %v464_v23, %v272_v19  ;;  %v277_v47 = vmul.f32 0.5, %v1221_v48 }
  0x5c   : > { %v839_v36 = vpop.eup %838  ;;  %591 = vst [vmem:[%s972_s16 + $0x198] sm:$0xff] %v527_v16  ;;  %v466_v26 = vadd.f32 1.0, %v837_v17  ;;  %854 = verf.f32 %v347_v0  ;;  %v278_v30 = vmul.f32 0.5, %v1227_v57  ;;  %v279_v46 = vmul.f32 0.5, %v1233_v63 }
  0x5d   : > { %v529_v38 = vmul.f32 %v465_v33, %v273_v22  ;;  %v467_v21 = vadd.f32 1.0, %v839_v36  ;;  %v841_v44 = vpop.eup %840  ;;  %592 = vst [vmem:[%s972_s16 + $0x1a0] sm:$0xff] %v528_v15  ;;  %v280_v48 = vmul.f32 0.5, %v1238_v7  ;;  %v281_v60 = vmul.f32 0.5, %v1243_v9 }
  0x5e   : > { %v530_v41 = vmul.f32 %v466_v26, %v274_v28  ;;  %v843_v58 = vpop.eup %842  ;;  %v468_v37 = vadd.f32 1.0, %v841_v44  ;;  %v282_v35 = vmul.f32 0.5, %v1249_v3  ;;  %v283_v5 = vmul.f32 0.5, %v219_v20 }
  0x5f   : > { %593 = vst [vmem:[%s972_s16 + $0x1a8] sm:$0xff] %v529_v38  ;;  %v531_v29 = vmul.f32 %v467_v21, %v275_v32  ;;  %v469_v27 = vadd.f32 1.0, %v843_v58 }
  0x60   : > { %594 = vst [vmem:[%s972_s16 + $0x1b0] sm:$0xff] %v530_v41  ;;  %v845_v51 = vpop.eup %844  ;;  %v532_v54 = vmul.f32 %v468_v37, %v276_v24 }
  0x61   : > { %595 = vst [vmem:[%s972_s16 + $0x1b8] sm:$0xff] %v531_v29  ;;  %v847_v31 = vpop.eup %846  ;;  %v533_v55 = vmul.f32 %v469_v27, %v277_v47  ;;  %v470_v42 = vadd.f32 1.0, %v845_v51 }
  0x62   : > { %v849_v34 = vpop.eup %848  ;;  %596 = vst [vmem:[%s972_s16 + $0x1c0] sm:$0xff] %v532_v54  ;;  %v471_v50 = vadd.f32 1.0, %v847_v31 }
  0x63   : > { %v851_v62 = vpop.eup %850  ;;  %597 = vst [vmem:[%s972_s16 + $0x1c8] sm:$0xff] %v533_v55  ;;  %v534_v57 = vmul.f32 %v470_v42, %v278_v30  ;;  %v472_v52 = vadd.f32 1.0, %v849_v34 }
  0x64   : > { %v535_v63 = vmul.f32 %v471_v50, %v279_v46  ;;  %v473_v2 = vadd.f32 1.0, %v851_v62 }
  0x65   : > { %v853_v56 = vpop.eup %852  ;;  %598 = vst [vmem:[%s972_s16 + $0x1d0] sm:$0xff] %v534_v57  ;;  %v536_v39 = vmul.f32 %v472_v52, %v280_v48 }
  0x66   : > { %v474_v1 = vadd.f32 1.0, %v853_v56  ;;  %v855_v7 = vpop.eup %854  ;;  %599 = vst [vmem:[%s972_s16 + $0x1d8] sm:$0xff] %v535_v63  ;;  %v537_v40 = vmul.f32 %v473_v2, %v281_v60 }
  0x67   : > { %600 = vst [vmem:[%s972_s16 + $0x1e0] sm:$0xff] %v536_v39  ;;  %v475_v59 = vadd.f32 1.0, %v855_v7 }
  0x68   : > { %v538_v8 = vmul.f32 %v474_v1, %v282_v35  ;;  %601 = vst [vmem:[%s972_s16 + $0x1e8] sm:$0xff] %v537_v40 }
  0x69   : > { %v539_v9 = vmul.f32 %v475_v59, %v283_v5 }
  0x6a   : > { %602 = vst [vmem:[%s972_s16 + $0x1f0] sm:$0xff] %v538_v8 }
  0x6b   : > { %603 = vst [vmem:[%s972_s16 + $0x1f8] sm:$0xff] %v539_v9 }
  0x6c PF: > { %s11_s8 = sadd.s32 1, %s878_s8   ;;  %s1294_s6 = smov %s874_s7 }
  0x6d   : > { %p8_p5 = scmp.ge.s32.totalorder %s11_s8, 4   ;;  %s1295_s7 = smov %s1297_s9 }
  0x6f   :  { %10 = sbr.rel (!%p8_p5) target bundleno = 2 (0x2), region = 54 }

// kernel: fno3d_forward.13
= control target key start
LH: loop header
LB: loop body
LE: loop exit
PB: predicated region body
PF: predicated region fallthrough
CT: control target
= control target key end

     0   :  { %s1898_s18 = smov 0   ;;  %s1900_s19 = smov 0   ;;  %s2635_s0 = inlined_call_operand.vmem [shape: f32[2,32,2048], index: 0, kind: input, shape index: {}]   ;;  %s2636_s1 = inlined_call_operand.vmem [shape: bf16[32,32], index: 1, kind: input, shape index: {}]   ;;  %s2637_s2 = inlined_call_operand.vmem [shape: f32[32,1], index: 2, kind: input, shape index: {}]   ;;  %s2638_s3 = inlined_call_operand.vmem [shape: bf16[4,32], index: 3, kind: input, shape index: {}]   ;;  %s2639_s4 = inlined_call_operand.vmem [shape: f32[4,1], index: 4, kind: input, shape index: {}]   ;;  %s2640_s5 = inlined_call_operand.vmem [shape: f32[2,4,2048], index: 5, kind: output, shape index: {}]  }
   0x1   :  { %s1902_s20 = smov 0  }
   0x2 LB: > { %s27_s21 = sadd.s32 1, %s1861_s19  ;;  %p1651_p0 = scmp.ge.s32.totalorder %s1865_s20, 1  ;;  %s1865_s20 = sphi %s1902_s20, %s15_s20   ;;  %s1861_s19 = sphi %s1900_s19, %s2665_s19   ;;  %s1857_s18 = sphi %s1898_s18, %s2664_s18  }
   0x3   : > { %p29_p1 = scmp.ge.s32.totalorder %s27_s21, 2  ;;  %p208_p2 = scmp.lt.s32.totalorder %s1865_s20, 3 }
   0x5   : > { %s2667_s21 = smov (%p29_p1, %s27_s21), 0  ;;  %p209_p3 = pnand %p1651_p0, %p208_p2 }
   0x7   : > { %212 = sbr.rel (%p209_p3) target bundleno = 580 (0x244), region = 40 }
   0xe   : > { %p245_p4 = scmp.lt.s32.totalorder %s1857_s18, 1  ;;  %v2641_v0 = vmov 0   ;;  %v365_v1 = vld [vmem:[%s2637_s2] sm:$0xff]  ;;  %v367_v2 = vld [vmem:[%s2637_s2 + $0x10] sm:$0xff]  ;;  %v366_v3 = vld [vmem:[%s2637_s2 + $0x8] sm:$0xff]  ;;  %vm399_vm0 = vcmask 261120  }
   0xf   : > { %438 = vmatprep.mubr.bf16.mxu0 %v2641_v0  ;;  %491 = vmatprep.mubr.bf16.mxu1 %v2641_v0  ;;  %v368_v4 = vld [vmem:[%s2637_s2 + $0x18] sm:$0xff]  ;;  %v1183_v8 = vld [vmem:[%s2639_s4] sm:$0xf]  ;;  %v1993_v61 = vld [vmem:[%s2636_s1 + $0x8] sm:$0xff]  }
  0x10   : > { %s2669_s18 = smov (!%p245_p4, %s1857_s18), 1  ;;  %1711 = vset.pattern.permute.xlu0 %v2641_v0  ;;  %1712 = vset.pattern.permute.xlu1 %v2641_v0  ;;  %v1962_v29 = vld [vmem:[%s2636_s1] sm:$0xff]  }
  0x11   : > { %371 = vperm.xlu0 %1711, %v365_v1   ;;  %s1684_s26 = sshll.u32 %s2669_s18, 9  ;;  %381 = vperm.xlu1 %1712, %v367_v2   ;;  %s1685_s17 = sshll.u32 %s2669_s18, 6 }
  0x12   : > { %s1935_s6 = scalar_lea.vmem %s2635_s0, %s1684_s26  ;;  %s2616_s24 = scalar_lea.vmem %s2640_s5, %s1685_s17 }
  0x13   : > { %v266_v5 = vld [vmem:[%s1935_s6 + $0x8] sm:$0xff]  ;;  %v268_v7 = vld [vmem:[%s1935_s6 + $0x18] sm:$0xff]  ;;  %v265_v11 = vld [vmem:[%s1935_s6] sm:$0xff] }
  0x14   : > { %v282_v6 = vld [vmem:[%s1935_s6 + $0x88] sm:$0xff]  ;;  %v284_v10 = vld [vmem:[%s1935_s6 + $0x98] sm:$0xff]  ;;  %v281_v12 = vld [vmem:[%s1935_s6 + $0x80] sm:$0xff] }
  0x15   : > { %v330_v9 = vpack.c.bf16 %v282_v6, %v266_v5  ;;  %376 = vperm.xlu0 %1711, %v366_v3   ;;  %v332_v13 = vpack.c.bf16 %v284_v10, %v268_v7  ;;  %v329_v14 = vpack.c.bf16 %v281_v12, %v265_v11  ;;  %v267_v15 = vld [vmem:[%s1935_s6 + $0x10] sm:$0xff]  ;;  %v298_v17 = vld [vmem:[%s1935_s6 + $0x108] sm:$0xff]  ;;  %386 = vperm.xlu1 %1712, %v368_v4   ;;  %v300_v20 = vld [vmem:[%s1935_s6 + $0x118] sm:$0xff] }
  0x16   : > { %v283_v16 = vld [vmem:[%s1935_s6 + $0x90] sm:$0xff]  ;;  %v314_v19 = vld [vmem:[%s1935_s6 + $0x188] sm:$0xff]  ;;  %v316_v21 = vld [vmem:[%s1935_s6 + $0x198] sm:$0xff] }
  0x17   : > { %406 = vmatprep.subr.bf16.mxu0 %v330_v9  ;;  %v331_v18 = vpack.c.bf16 %v283_v16, %v267_v15  ;;  %459 = vmatprep.subr.bf16.mxu1 %v332_v13  ;;  %v346_v22 = vpack.c.bf16 %v314_v19, %v298_v17  ;;  %v348_v23 = vpack.c.bf16 %v316_v21, %v300_v20  ;;  %v297_v24 = vld [vmem:[%s1935_s6 + $0x100] sm:$0xff]  ;;  %v299_v26 = vld [vmem:[%s1935_s6 + $0x110] sm:$0xff]  ;;  %v270_v30 = vld [vmem:[%s1935_s6 + $0x28] sm:$0xff] }
  0x18   : > { %407 = vmatpush1.bf16.msra.mxu0 %v329_v14  ;;  %v313_v25 = vld [vmem:[%s1935_s6 + $0x180] sm:$0xff]  ;;  %v315_v28 = vld [vmem:[%s1935_s6 + $0x190] sm:$0xff]  ;;  %v286_v31 = vld [vmem:[%s1935_s6 + $0xa8] sm:$0xff] }
  0x19   : > { %460 = vmatpush1.bf16.msra.mxu1 %v331_v18  ;;  %v345_v27 = vpack.c.bf16 %v313_v25, %v297_v24  ;;  %1186 = vperm.xlu0 %1711, %v1183_v8   ;;  %v347_v32 = vpack.c.bf16 %v315_v28, %v299_v26  ;;  %v334_v33 = vpack.c.bf16 %v286_v31, %v270_v30  ;;  %v272_v34 = vld [vmem:[%s1935_s6 + $0x38] sm:$0xff]  ;;  %v269_v36 = vld [vmem:[%s1935_s6 + $0x20] sm:$0xff]  ;;  %v271_v39 = vld [vmem:[%s1935_s6 + $0x30] sm:$0xff] }
  0x1a   : > { %408 = vmatprep.subr.bf16.mxu0 %v346_v22  ;;  %461 = vmatprep.subr.bf16.mxu1 %v348_v23  ;;  %v288_v35 = vld [vmem:[%s1935_s6 + $0xb8] sm:$0xff]  ;;  %v285_v38 = vld [vmem:[%s1935_s6 + $0xa0] sm:$0xff]  ;;  %v287_v40 = vld [vmem:[%s1935_s6 + $0xb0] sm:$0xff] }
  0x1b   : > { %v336_v37 = vpack.c.bf16 %v288_v35, %v272_v34  ;;  %v333_v41 = vpack.c.bf16 %v285_v38, %v269_v36  ;;  %v302_v42 = vld [vmem:[%s1935_s6 + $0x128] sm:$0xff]  ;;  %v304_v44 = vld [vmem:[%s1935_s6 + $0x138] sm:$0xff]  ;;  %v335_v45 = vpack.c.bf16 %v287_v40, %v271_v39  ;;  %v301_v47 = vld [vmem:[%s1935_s6 + $0x120] sm:$0xff] }
  0x1c   : > { %409 = vmatpush1.bf16.msra.mxu0 %v345_v27  ;;  %v318_v43 = vld [vmem:[%s1935_s6 + $0x1a8] sm:$0xff]  ;;  %v320_v46 = vld [vmem:[%s1935_s6 + $0x1b8] sm:$0xff]  ;;  %v317_v48 = vld [vmem:[%s1935_s6 + $0x1a0] sm:$0xff] }
  0x1d   : > { %462 = vmatpush1.bf16.msra.mxu1 %v347_v32  ;;  %512 = vmatprep.subr.bf16.mxu0 %v334_v33  ;;  %v350_v49 = vpack.c.bf16 %v318_v43, %v302_v42  ;;  %v303_v50 = vld [vmem:[%s1935_s6 + $0x130] sm:$0xff]  ;;  %v274_v52 = vld [vmem:[%s1935_s6 + $0x48] sm:$0xff]  ;;  %v352_v53 = vpack.c.bf16 %v320_v46, %v304_v44  ;;  %v276_v55 = vld [vmem:[%s1935_s6 + $0x58] sm:$0xff]  ;;  %v349_v57 = vpack.c.bf16 %v317_v48, %v301_v47 }
  0x1e   : > { %565 = vmatprep.subr.bf16.mxu1 %v336_v37  ;;  %v319_v51 = vld [vmem:[%s1935_s6 + $0x1b0] sm:$0xff]  ;;  %v290_v54 = vld [vmem:[%s1935_s6 + $0xc8] sm:$0xff]  ;;  %v292_v56 = vld [vmem:[%s1935_s6 + $0xd8] sm:$0xff] }
  0x1f   : > { %1658 = vmatmul.mubr.msk.bf16.vlgmr.msra.gmra.mrb[0].mxu0 %vm399_vm0, %v1962_v29  ;;  %v351_v58 = vpack.c.bf16 %v319_v51, %v303_v50  ;;  %v338_v59 = vpack.c.bf16 %v290_v54, %v274_v52  ;;  %v340_v60 = vpack.c.bf16 %v292_v56, %v276_v55  ;;  %v273_v62 = vld [vmem:[%s1935_s6 + $0x40] sm:$0xff]  ;;  %v275_v1 = vld [vmem:[%s1935_s6 + $0x50] sm:$0xff]  ;;  %v306_v3 = vld [vmem:[%s1935_s6 + $0x148] sm:$0xff] }
  0x20   : > { %1660 = vmatmul.mubr.msk.bf16.vlgmr.msra.gmra.mrb[0].mxu1 %vm399_vm0, %v1962_v29  ;;  %513 = vmatpush1.bf16.msra.mxu0 %v333_v41  ;;  %v289_v63 = vld [vmem:[%s1935_s6 + $0xc0] sm:$0xff]  ;;  %v291_v2 = vld [vmem:[%s1935_s6 + $0xd0] sm:$0xff]  ;;  %v322_v4 = vld [vmem:[%s1935_s6 + $0x1c8] sm:$0xff] }
  0x21   : > { %566 = vmatpush1.bf16.msra.mxu1 %v335_v45  ;;  %448 = vmatprep.mubr.bf16.mxu0 %v2641_v0  ;;  %v337_v5 = vpack.c.bf16 %v289_v63, %v273_v62  ;;  %v308_v6 = vld [vmem:[%s1935_s6 + $0x158] sm:$0xff]  ;;  %v339_v8 = vpack.c.bf16 %v291_v2, %v275_v1  ;;  %v305_v9 = vld [vmem:[%s1935_s6 + $0x140] sm:$0xff]  ;;  %v307_v11 = vld [vmem:[%s1935_s6 + $0x150] sm:$0xff]  ;;  %v354_v12 = vpack.c.bf16 %v322_v4, %v306_v3 }
  0x22   : > { %501 = vmatprep.mubr.bf16.mxu1 %v2641_v0  ;;  %514 = vmatprep.subr.bf16.mxu0 %v350_v49  ;;  %v324_v7 = vld [vmem:[%s1935_s6 + $0x1d8] sm:$0xff]  ;;  %v321_v10 = vld [vmem:[%s1935_s6 + $0x1c0] sm:$0xff]  ;;  %v323_v13 = vld [vmem:[%s1935_s6 + $0x1d0] sm:$0xff] }
  0x23   : > { %567 = vmatprep.subr.bf16.mxu1 %v352_v53  ;;  %v278_v14 = vld [vmem:[%s1935_s6 + $0x68] sm:$0xff]  ;;  %v356_v16 = vpack.c.bf16 %v324_v7, %v308_v6  ;;  %v280_v17 = vld [vmem:[%s1935_s6 + $0x78] sm:$0xff]  ;;  %v353_v19 = vpack.c.bf16 %v321_v10, %v305_v9  ;;  %v355_v20 = vpack.c.bf16 %v323_v13, %v307_v11  ;;  %v277_v23 = vld [vmem:[%s1935_s6 + $0x60] sm:$0xff] }
  0x24   : > { %515 = vmatpush1.bf16.msra.mxu0 %v349_v57  ;;  %v294_v15 = vld [vmem:[%s1935_s6 + $0xe8] sm:$0xff]  ;;  %v296_v18 = vld [vmem:[%s1935_s6 + $0xf8] sm:$0xff]  ;;  %v293_v24 = vld [vmem:[%s1935_s6 + $0xe0] sm:$0xff] }
  0x25   : > { %568 = vmatpush1.bf16.msra.mxu1 %v351_v58  ;;  %618 = vmatprep.subr.bf16.mxu0 %v338_v59  ;;  %v342_v21 = vpack.c.bf16 %v294_v15, %v278_v14  ;;  %v344_v22 = vpack.c.bf16 %v296_v18, %v280_v17  ;;  %v279_v25 = vld [vmem:[%s1935_s6 + $0x70] sm:$0xff]  ;;  %v310_v27 = vld [vmem:[%s1935_s6 + $0x168] sm:$0xff]  ;;  %v341_v30 = vpack.c.bf16 %v293_v24, %v277_v23  ;;  %v312_v31 = vld [vmem:[%s1935_s6 + $0x178] sm:$0xff] }
  0x26   : > { %671 = vmatprep.subr.bf16.mxu1 %v340_v60  ;;  %v295_v26 = vld [vmem:[%s1935_s6 + $0xf0] sm:$0xff]  ;;  %v326_v28 = vld [vmem:[%s1935_s6 + $0x1e8] sm:$0xff]  ;;  %v328_v32 = vld [vmem:[%s1935_s6 + $0x1f8] sm:$0xff] }
  0x27   : > { %1659 = vmatmul.mubr.msk.bf16.gmra.mrb[4].mxu0 %vm399_vm0, %v1993_v61  ;;  %v343_v33 = vpack.c.bf16 %v295_v26, %v279_v25  ;;  %v309_v34 = vld [vmem:[%s1935_s6 + $0x160] sm:$0xff]  ;;  %v358_v36 = vpack.c.bf16 %v326_v28, %v310_v27  ;;  %v311_v37 = vld [vmem:[%s1935_s6 + $0x170] sm:$0xff]  ;;  %v360_v39 = vpack.c.bf16 %v328_v32, %v312_v31 }
  0x28   : > { %1661 = vmatmul.mubr.msk.bf16.gmra.mrb[4].mxu1 %vm399_vm0, %v1993_v61  ;;  %544 = vmatprep.mubr.bf16.mxu0 %v2641_v0  ;;  %v325_v35 = vld [vmem:[%s1935_s6 + $0x1e0] sm:$0xff]  ;;  %v327_v38 = vld [vmem:[%s1935_s6 + $0x1f0] sm:$0xff] }
  0x29   : > { %597 = vmatprep.mubr.bf16.mxu1 %v2641_v0  ;;  %v357_v40 = vpack.c.bf16 %v325_v35, %v309_v34  ;;  %v359_v41 = vpack.c.bf16 %v327_v38, %v311_v37 }
  0x2f   : > { %1662 = vmatmul.mubr.msk.bf16.vlgmr.msra.gmra.mrb[8].mxu0 %vm399_vm0, %v1962_v29 }
  0x30   : > { %1664 = vmatmul.mubr.msk.bf16.vlgmr.msra.gmra.mrb[8].mxu1 %vm399_vm0, %v1962_v29  ;;  %619 = vmatpush1.bf16.msra.mxu0 %v337_v5 }
  0x31   : > { %672 = vmatpush1.bf16.msra.mxu1 %v339_v8  ;;  %554 = vmatprep.mubr.bf16.mxu0 %v2641_v0 }
  0x32   : > { %607 = vmatprep.mubr.bf16.mxu1 %v2641_v0  ;;  %620 = vmatprep.subr.bf16.mxu0 %v354_v12 }
  0x33   : > { %673 = vmatprep.subr.bf16.mxu1 %v356_v16 }
  0x34   : > { %621 = vmatpush1.bf16.msra.mxu0 %v353_v19 }
  0x35   : > { %674 = vmatpush1.bf16.msra.mxu1 %v355_v20  ;;  %724 = vmatprep.subr.bf16.mxu0 %v342_v21 }
  0x36   : > { %777 = vmatprep.subr.bf16.mxu1 %v344_v22 }
  0x37   : > { %1663 = vmatmul.mubr.msk.bf16.gmra.mrb[12].mxu0 %vm399_vm0, %v1993_v61 }
  0x38   : > { %1665 = vmatmul.mubr.msk.bf16.gmra.mrb[12].mxu1 %vm399_vm0, %v1993_v61  ;;  %650 = vmatprep.mubr.bf16.mxu0 %v2641_v0 }
  0x39   : > { %703 = vmatprep.mubr.bf16.mxu1 %v2641_v0 }
  0x3f   : > { %1666 = vmatmul.mubr.msk.bf16.vlgmr.msra.gmra.mrb[16].mxu0 %vm399_vm0, %v1962_v29 }
  0x40   : > { %1668 = vmatmul.mubr.msk.bf16.vlgmr.msra.gmra.mrb[16].mxu1 %vm399_vm0, %v1962_v29  ;;  %725 = vmatpush1.bf16.msra.mxu0 %v341_v30 }
  0x41   : > { %778 = vmatpush1.bf16.msra.mxu1 %v343_v33  ;;  %660 = vmatprep.mubr.bf16.mxu0 %v2641_v0 }
  0x42   : > { %713 = vmatprep.mubr.bf16.mxu1 %v2641_v0  ;;  %726 = vmatprep.subr.bf16.mxu0 %v358_v36 }
  0x43   : > { %779 = vmatprep.subr.bf16.mxu1 %v360_v39 }
  0x44   : > { %727 = vmatpush1.bf16.msra.mxu0 %v357_v40 }
  0x45   : > { %780 = vmatpush1.bf16.msra.mxu1 %v359_v41 }
  0x47   : > { %1667 = vmatmul.mubr.msk.bf16.gmra.mrb[20].mxu0 %vm399_vm0, %v1993_v61 }
  0x48   : > { %1669 = vmatmul.mubr.msk.bf16.gmra.mrb[20].mxu1 %vm399_vm0, %v1993_v61  ;;  %756 = vmatprep.mubr.bf16.mxu0 %v2641_v0 }
  0x49   : > { %809 = vmatprep.mubr.bf16.mxu1 %v2641_v0 }
  0x4f   : > { %1670 = vmatmul.mubr.msk.bf16.vlgmr.msra.gmra.mrb[24].mxu0 %vm399_vm0, %v1962_v29 }
  0x50   : > { %1672 = vmatmul.mubr.msk.bf16.vlgmr.msra.gmra.mrb[24].mxu1 %vm399_vm0, %v1962_v29  ;;  %766 = vmatprep.mubr.bf16.mxu0 %v2641_v0 }
  0x51   : > { %819 = vmatprep.mubr.bf16.mxu1 %v2641_v0 }
  0x57   : > { %1671 = vmatmul.mubr.msk.bf16.gmra.mrb[28].mxu0 %vm399_vm0, %v1993_v61 }
  0x58   : > { %1673 = vmatmul.mubr.msk.bf16.gmra.mrb[28].mxu1 %vm399_vm0, %v1993_v61  ;;  %1224 = vmatprep.mubr.bf16.mxu0 %v2641_v0 }
  0x59   : > { %1265 = vmatprep.mubr.bf16.mxu1 %v2641_v0 }
  0x90   : > { %v2065_v42 = vpop.permute.xlu0 %371  ;;  %v2067_v43 = vpop.permute.xlu1 %381 }
  0x94   : > { %v2069_v29 = vpop.permute.xlu0 %376  ;;  %v2079_v7 = vpop.permute.xlu1 %386 }
  0xf2   : > { %v440_v44 = vpop.f32.mrb[0].mxu0 }
  0xf3   : > { %v441_v45 = vadd.f32 %v440_v44, %v2065_v42  ;;  %v493_v46 = vpop.f32.mrb[0].mxu1  ;;  %v442_v47 = vpop.f32.mrb[1].mxu0 }
  0xf4   : > { %v494_v48 = vadd.f32 %v493_v46, %v2065_v42  ;;  %v443_v49 = vadd.f32 %v442_v47, %v2065_v42  ;;  %v495_v50 = vpop.f32.mrb[1].mxu1  ;;  %v444_v51 = vpop.f32.mrb[2].mxu0 }
  0xf5   : > { %v894_v52 = vmul.f32 0.70710677, %v441_v45  ;;  %v496_v53 = vadd.f32 %v495_v50, %v2065_v42  ;;  %v445_v54 = vadd.f32 %v444_v51, %v2069_v29  ;;  %v497_v55 = vpop.f32.mrb[2].mxu1  ;;  %v446_v56 = vpop.f32.mrb[3].mxu0  ;;  %v830_v16 = vmul.f32 0.5, %v441_v45 }
  0xf6   : > { %v896_v57 = vmul.f32 0.70710677, %v494_v48  ;;  %v895_v58 = vmul.f32 0.70710677, %v443_v49  ;;  %v499_v60 = vpop.f32.mrb[3].mxu1  ;;  %v498_v62 = vadd.f32 %v497_v55, %v2069_v29  ;;  %v447_v63 = vadd.f32 %v446_v56, %v2069_v29 }
  0xf7   : > { %1715 = verf.f32 %v894_v52  ;;  %v897_v59 = vmul.f32 0.70710677, %v496_v53  ;;  %v910_v61 = vmul.f32 0.70710677, %v445_v54  ;;  %v500_v1 = vadd.f32 %v499_v60, %v2069_v29 }
  0xf8   : > { %1717 = verf.f32 %v896_v57  ;;  %v912_v2 = vmul.f32 0.70710677, %v498_v62  ;;  %v911_v4 = vmul.f32 0.70710677, %v447_v63  ;;  %v832_v17 = vmul.f32 0.5, %v494_v48 }
  0xf9   : > { %1719 = verf.f32 %v895_v58  ;;  %v913_v5 = vmul.f32 0.70710677, %v500_v1  ;;  %v2085_v21 = vmul.f32 0.5, %v443_v49  ;;  %v2089_v28 = vmul.f32 0.5, %v496_v53 }
  0xfa   : > { %1721 = verf.f32 %v897_v59  ;;  %v450_v3 = vpop.f32.mrb[4].mxu0  ;;  %v846_v30 = vmul.f32 0.5, %v445_v54  ;;  %v848_v33 = vmul.f32 0.5, %v498_v62  ;;  %v2095_v39 = vmul.f32 0.5, %v447_v63 }
  0xfb   : > { %1723 = verf.f32 %v910_v61  ;;  %v503_v6 = vpop.f32.mrb[4].mxu1  ;;  %v451_v8 = vadd.f32 %v450_v3, %v2067_v43  ;;  %v452_v10 = vpop.f32.mrb[5].mxu0  ;;  %v2097_v46 = vmul.f32 0.5, %v500_v1 }
  0xfc   : > { %1725 = verf.f32 %v912_v2  ;;  %v504_v9 = vadd.f32 %v503_v6, %v2067_v43  ;;  %v505_v11 = vpop.f32.mrb[5].mxu1  ;;  %v453_v12 = vadd.f32 %v452_v10, %v2067_v43  ;;  %v454_v14 = vpop.f32.mrb[6].mxu0 }
  0xfd   : > { %v506_v13 = vadd.f32 %v505_v11, %v2067_v43  ;;  %v507_v15 = vpop.f32.mrb[6].mxu1  ;;  %1727 = verf.f32 %v911_v4  ;;  %v926_v18 = vmul.f32 0.70710677, %v451_v8  ;;  %v456_v19 = vpop.f32.mrb[7].mxu0  ;;  %v455_v25 = vadd.f32 %v454_v14, %v2079_v7 }
  0xfe   : > { %v509_v20 = vpop.f32.mrb[7].mxu1  ;;  %1729 = verf.f32 %v913_v5  ;;  %v928_v22 = vmul.f32 0.70710677, %v504_v9  ;;  %v927_v23 = vmul.f32 0.70710677, %v453_v12  ;;  %v508_v26 = vadd.f32 %v507_v15, %v2079_v7 }
  0xff   : > { %1731 = verf.f32 %v926_v18  ;;  %v929_v24 = vmul.f32 0.70710677, %v506_v13  ;;  %v457_v31 = vadd.f32 %v456_v19, %v2079_v7  ;;  %v942_v34 = vmul.f32 0.70710677, %v455_v25 }
 0x100   : > { %1733 = verf.f32 %v928_v22  ;;  %v2093_v35 = vadd.f32 %v509_v20, %v2079_v7  ;;  %v944_v40 = vmul.f32 0.70710677, %v508_v26  ;;  %v2099_v47 = vmul.f32 0.5, %v451_v8 }
 0x101   : > { %v1716_v27 = vpop.eup %1715  ;;  %1735 = verf.f32 %v927_v23  ;;  %v2101_v48 = vmul.f32 0.5, %v504_v9  ;;  %v2103_v53 = vmul.f32 0.5, %v453_v12  ;;  %v943_v54 = vmul.f32 0.70710677, %v457_v31 }
 0x102   : > { %v1718_v32 = vpop.eup %1717  ;;  %v546_v36 = vpop.f32.mrb[8].mxu0  ;;  %v1022_v38 = vadd.f32 1.0, %v1716_v27  ;;  %1737 = verf.f32 %v929_v24  ;;  %v2107_v59 = vmul.f32 0.5, %v506_v13  ;;  %v878_v60 = vmul.f32 0.5, %v455_v25 }
 0x103   : > { %v1720_v37 = vpop.eup %1719  ;;  %v599_v41 = vpop.f32.mrb[8].mxu1  ;;  %1739 = verf.f32 %v942_v34  ;;  %v1024_v52 = vadd.f32 1.0, %v1718_v32  ;;  %v945_v61 = vmul.f32 0.70710677, %v2093_v35  ;;  %v880_v2 = vmul.f32 0.5, %v508_v26 }
 0x104   : > { %v548_v44 = vpop.f32.mrb[9].mxu0  ;;  %v1722_v45 = vpop.eup %1721  ;;  %1741 = verf.f32 %v944_v40  ;;  %v2112_v63 = vmul.f32 %v1022_v38, %v830_v16  ;;  %v547_v3 = vadd.f32 %v546_v36, %v2065_v42  ;;  %v1023_v5 = vadd.f32 1.0, %v1720_v37 }
 0x105   : > { %v601_v49 = vpop.f32.mrb[9].mxu1  ;;  %v550_v50 = vpop.f32.mrb[10].mxu0  ;;  %1743 = verf.f32 %v943_v54  ;;  %v600_v8 = vadd.f32 %v599_v41, %v2065_v42  ;;  %v2118_v10 = vmul.f32 %v1024_v52, %v832_v17  ;;  %v1025_v11 = vadd.f32 1.0, %v1722_v45 }
 0x106   : > { %v1724_v51 = vpop.eup %1723  ;;  %v603_v55 = vpop.f32.mrb[10].mxu1  ;;  %v898_v13 = vmul.f32 0.70710677, %v547_v3  ;;  %v2124_v16 = vmul.f32 0.5, %v457_v31  ;;  %1745 = verf.f32 %v945_v61  ;;  %v602_v31 = vadd.f32 %v601_v49, %v2065_v42 }
 0x107   : > { %v2105_v56 = vpop.f32.mrb[11].mxu0  ;;  %v1726_v57 = vpop.eup %1725  ;;  %v1038_v58 = vadd.f32 1.0, %v1724_v51  ;;  %v900_v18 = vmul.f32 0.70710677, %v600_v8  ;;  %v2139_v36 = vmul.f32 %v1023_v5, %v2085_v21  ;;  %v2142_v37 = vmul.f32 %v1025_v11, %v2089_v28 }
 0x108   : > { %v2110_v62 = vpop.f32.mrb[11].mxu1  ;;  %v1040_v1 = vadd.f32 1.0, %v1726_v57  ;;  %v1728_v4 = vpop.eup %1727  ;;  %1747 = verf.f32 %v898_v13  ;;  %v2145_v38 = vmul.f32 0.5, %v2093_v35  ;;  %v551_v40 = vadd.f32 %v550_v50, %v2069_v29 }
 0x109   : > { %v2115_v6 = vmul.f32 %v1038_v58, %v846_v30  ;;  %v1730_v9 = vpop.eup %1729  ;;  %v1039_v17 = vadd.f32 1.0, %v1728_v4  ;;  %1749 = verf.f32 %v900_v18  ;;  %v549_v30 = vadd.f32 %v548_v44, %v2065_v42 }
 0x10a   : > { %v2120_v12 = vmul.f32 %v1040_v1, %v848_v33  ;;  %v1732_v14 = vpop.eup %1731  ;;  %v2126_v19 = vpop.f32.mrb[12].mxu0  ;;  %v1041_v49 = vadd.f32 1.0, %v1730_v9  ;;  %v2152_v51 = vmul.f32 0.5, %v547_v3  ;;  %v604_v21 = vadd.f32 %v603_v55, %v2069_v29 }
 0x10b   : > { %v1150_v15 = vpack.c.bf16 %v2115_v6, %v2112_v63  ;;  %v1734_v20 = vpop.eup %1733  ;;  %v1054_v23 = vadd.f32 1.0, %v1732_v14  ;;  %v2130_v24 = vpop.f32.mrb[12].mxu1  ;;  %v899_v52 = vmul.f32 0.70710677, %v549_v30  ;;  %v1103_v57 = vmul.f32 %v1039_v17, %v2095_v39 }
 0x10c   : > { %v1152_v22 = vpack.c.bf16 %v2120_v12, %v2118_v10  ;;  %v2132_v25 = vpop.f32.mrb[13].mxu0  ;;  %v1736_v26 = vpop.eup %1735  ;;  %v1056_v27 = vadd.f32 1.0, %v1734_v20  ;;  %v2158_v58 = vmul.f32 0.5, %v600_v8  ;;  %v901_v50 = vmul.f32 0.70710677, %v602_v31 }
 0x10d   : > { %v611_v32 = vpop.f32.mrb[13].mxu1  ;;  %v2136_v33 = vpop.f32.mrb[14].mxu0  ;;  %v2161_v61 = vmul.f32 %v1054_v23, %v2099_v47  ;;  %v1055_v3 = vadd.f32 1.0, %v1736_v26  ;;  %1751 = verf.f32 %v899_v52  ;;  %v914_v55 = vmul.f32 0.70710677, %v551_v40 }
 0x10e   : > { %v1738_v34 = vpop.eup %1737  ;;  %v2148_v41 = vpop.f32.mrb[14].mxu1  ;;  %v2164_v1 = vmul.f32 %v1056_v27, %v2101_v48  ;;  %1753 = verf.f32 %v901_v50  ;;  %v916_v39 = vmul.f32 0.70710677, %v604_v21  ;;  %v553_v8 = vadd.f32 %v2105_v56, %v2069_v29 }
 0x10f   : > { %v2150_v44 = vpop.f32.mrb[15].mxu0  ;;  %v1740_v45 = vpop.eup %1739  ;;  %v1057_v5 = vadd.f32 1.0, %v1738_v34  ;;  %v2175_v48 = vmul.f32 %v1041_v49, %v2097_v46  ;;  %1755 = verf.f32 %v914_v55  ;;  %v2187_v17 = vmul.f32 0.5, %v549_v30 }
 0x110   : > { %v2155_v54 = vpop.f32.mrb[15].mxu1  ;;  %v1742_v28 = vpop.eup %1741  ;;  %v1070_v35 = vadd.f32 1.0, %v1740_v45  ;;  %v2189_v23 = vmul.f32 0.5, %v602_v31  ;;  %1757 = verf.f32 %v916_v39  ;;  %v915_v45 = vmul.f32 0.70710677, %v553_v8 }
 0x111   : > { %v1072_v4 = vadd.f32 1.0, %v1742_v28  ;;  %v1744_v11 = vpop.eup %1743  ;;  %v2201_v30 = vmul.f32 %v1057_v5, %v2107_v59  ;;  %v557_v31 = vadd.f32 %v2126_v19, %v2067_v43  ;;  %v2209_v50 = vadd.f32 %v2132_v25, %v2067_v43 }
 0x112   : > { %v2166_v9 = vmul.f32 %v1070_v35, %v878_v60  ;;  %v2172_v47 = vpop.f32.mrb[16].mxu0  ;;  %v606_v60 = vadd.f32 %v2110_v62, %v2069_v29  ;;  %v1746_v20 = vpop.eup %1745  ;;  %v2196_v62 = vmul.f32 %v1055_v3, %v2103_v53  ;;  %v1071_v34 = vadd.f32 1.0, %v1744_v11 }
 0x113   : > { %v2168_v13 = vmul.f32 %v1072_v4, %v880_v2  ;;  %v2181_v18 = vpop.f32.mrb[16].mxu1  ;;  %v2183_v2 = vpop.f32.mrb[17].mxu0  ;;  %v610_v35 = vadd.f32 %v2130_v24, %v2067_v43  ;;  %v1073_v4 = vadd.f32 1.0, %v1746_v20  ;;  %1759 = verf.f32 %v915_v45 }
 0x114   : > { %v2191_v46 = vpop.f32.mrb[17].mxu1  ;;  %v2193_v26 = vpop.f32.mrb[18].mxu0  ;;  %v917_v49 = vmul.f32 0.70710677, %v606_v60  ;;  %v612_v55 = vadd.f32 %v611_v32, %v2067_v43  ;;  %v1151_v59 = vpack.c.bf16 %v1103_v57, %v2139_v36  ;;  %v850_v11 = vmul.f32 0.5, %v551_v40 }
 0x115   : > { %v1748_v27 = vpop.eup %1747  ;;  %v2198_v52 = vpop.f32.mrb[18].mxu1  ;;  %v930_v19 = vmul.f32 0.70710677, %v557_v31  ;;  %v2218_v24 = vmul.f32 %v1071_v34, %v2124_v16  ;;  %v852_v25 = vmul.f32 0.5, %v604_v21  ;;  %v932_v0 = vmul.f32 0.70710677, %v610_v35 }
 0x116   : > { %v1750_v28 = vpop.eup %1749  ;;  %v2211_v53 = vpop.f32.mrb[19].mxu0  ;;  %v1026_v5 = vadd.f32 1.0, %v1748_v27  ;;  %1761 = verf.f32 %v917_v49  ;;  %1192 = vmatprep.subr.bf16.mxu0 %v1151_v59  ;;  %v2220_v56 = vmul.f32 0.5, %v553_v8  ;;  %v931_v20 = vmul.f32 0.70710677, %v2209_v50 }
 0x117   : > { %v2213_v3 = vpop.f32.mrb[19].mxu1  ;;  %v1028_v39 = vadd.f32 1.0, %v1750_v28  ;;  %1763 = verf.f32 %v930_v19  ;;  %v933_v45 = vmul.f32 0.70710677, %v612_v55  ;;  %1193 = vmatpush1.bf16.msra.mxu0 %v1150_v15  ;;  %v1752_v36 = vpop.eup %1751  ;;  %v2229_v16 = vmul.f32 %v1073_v4, %v2145_v38 }
 0x118   : > { %v2231_v40 = vmul.f32 0.5, %v606_v60  ;;  %v1153_v21 = vpack.c.bf16 %v2175_v48, %v2142_v37  ;;  %v561_v57 = vadd.f32 %v2136_v33, %v2079_v7  ;;  %v1754_v63 = vpop.eup %1753  ;;  %v2242_v6 = vmul.f32 %v1026_v5, %v2152_v51 }
 0x119   : > { %1765 = verf.f32 %v932_v0  ;;  %v614_v15 = vadd.f32 %v2148_v41, %v2079_v7  ;;  %v563_v38 = vadd.f32 %v2150_v44, %v2079_v7  ;;  %v1756_v33 = vpop.eup %1755  ;;  %v2253_v48 = vmul.f32 %v1028_v39, %v2158_v58 }
 0x11a   : > { %v2226_v32 = vpop.f32.mrb[20].mxu0  ;;  %v2255_v34 = vmul.f32 0.5, %v557_v31  ;;  %1767 = verf.f32 %v931_v20  ;;  %1233 = vmatprep.subr.bf16.mxu1 %v1153_v21  ;;  %v946_v51 = vmul.f32 0.70710677, %v561_v57  ;;  %v1758_v41 = vpop.eup %1757  ;;  %v1042_v28 = vadd.f32 1.0, %v1756_v33 }
 0x11b   : > { %v2237_v8 = vpop.f32.mrb[20].mxu1  ;;  %v2239_v27 = vpop.f32.mrb[21].mxu0  ;;  %v2261_v44 = vmul.f32 0.5, %v610_v35  ;;  %1769 = verf.f32 %v933_v45  ;;  %v948_v4 = vmul.f32 0.70710677, %v614_v15  ;;  %1234 = vmatpush1.bf16.msra.mxu1 %v1152_v22  ;;  %v1027_v31 = vadd.f32 1.0, %v1752_v36 }
 0x11c   : > { %v2248_v60 = vpop.f32.mrb[21].mxu1  ;;  %v2250_v37 = vpop.f32.mrb[22].mxu0  ;;  %v1044_v59 = vadd.f32 1.0, %v1758_v41  ;;  %1771 = verf.f32 %v946_v51  ;;  %v947_v5 = vmul.f32 0.70710677, %v563_v38  ;;  %v2268_v19 = vmul.f32 %v1042_v28, %v850_v11 }
 0x11d   : > { %v2257_v0 = vpop.f32.mrb[22].mxu1  ;;  %v2259_v49 = vpop.f32.mrb[23].mxu0  ;;  %1773 = verf.f32 %v948_v4  ;;  %v616_v39 = vadd.f32 %v2155_v54, %v2079_v7  ;;  %v653_v35 = vadd.f32 %v2172_v47, %v2065_v42  ;;  %v1029_v45 = vadd.f32 1.0, %v1754_v63 }
 0x11e   : > { %v2266_v58 = vpop.f32.mrb[23].mxu1  ;;  %v1760_v20 = vpop.eup %1759  ;;  %v2274_v21 = vmul.f32 %v1044_v59, %v852_v25  ;;  %1775 = verf.f32 %v947_v5  ;;  %v706_v10 = vadd.f32 %v2181_v18, %v2065_v42  ;;  %v2281_v11 = vmul.f32 0.5, %v2209_v50 }
 0x11f   : > { %v2283_v36 = vmul.f32 0.5, %v612_v55  ;;  %v949_v54 = vmul.f32 0.70710677, %v616_v39  ;;  %v2288_v47 = vmul.f32 %v1027_v31, %v2187_v17  ;;  %v902_v63 = vmul.f32 0.70710677, %v653_v35 }
 0x120   : > { %v1762_v12 = vpop.eup %1761  ;;  %v655_v18 = vadd.f32 %v2183_v2, %v2065_v42  ;;  %v1043_v55 = vadd.f32 1.0, %v1760_v20  ;;  %v904_v4 = vmul.f32 0.70710677, %v706_v10  ;;  %v2303_v31 = vmul.f32 %v1029_v45, %v2189_v23 }
 0x121   : > { %v1764_v50 = vpop.eup %1763  ;;  %v1045_v28 = vadd.f32 1.0, %v1762_v12  ;;  %1777 = verf.f32 %v949_v54  ;;  %v882_v5 = vmul.f32 0.5, %v561_v57  ;;  %v884_v25 = vmul.f32 0.5, %v614_v15 }
 0x122   : > { %v2285_v33 = vpop.f32.mrb[24].mxu0  ;;  %1779 = verf.f32 %v902_v63  ;;  %v2309_v20 = vmul.f32 0.5, %v563_v38  ;;  %v2313_v12 = vadd.f32 %v2191_v46, %v2065_v42  ;;  %v2317_v45 = vmul.f32 0.5, %v616_v39 }
 0x123   : > { %v2294_v51 = vpop.f32.mrb[24].mxu1  ;;  %v2296_v41 = vpop.f32.mrb[25].mxu0  ;;  %1781 = verf.f32 %v904_v4  ;;  %v903_v57 = vmul.f32 0.70710677, %v655_v18  ;;  %v1167_v15 = vpack.c.bf16 %v2218_v24, %v2196_v62  ;;  %v1169_v63 = vpack.c.bf16 %v2229_v16, %v2201_v30 }
 0x124   : > { %2643 = vst [vmem:[#allocation2_spill] sm:$0xff] %v2296_v41  ;;  %v2298_v59 = vpop.f32.mrb[25].mxu1  ;;  %v2300_v17 = vpop.f32.mrb[26].mxu0  ;;  %v1058_v41 = vadd.f32 1.0, %v1764_v50  ;;  %v2324_v38 = vmul.f32 %v1043_v55, %v2220_v56  ;;  %v2327_v4 = vmul.f32 %v1045_v28, %v2231_v40  ;;  %v2329_v46 = vmul.f32 0.5, %v653_v35 }
 0x125   : > { %v2305_v2 = vpop.f32.mrb[26].mxu1  ;;  %v2307_v22 = vpop.f32.mrb[27].mxu0  ;;  %1194 = vmatprep.subr.bf16.mxu0 %v1167_v15  ;;  %1235 = vmatprep.subr.bf16.mxu1 %v1169_v63  ;;  %v657_v62 = vadd.f32 %v2193_v26, %v2069_v29  ;;  %v710_v56 = vadd.f32 %v2198_v52, %v2069_v29  ;;  %v2341_v40 = vmul.f32 0.5, %v655_v18  ;;  %v2648_v35 = vpack.c.bf16 %v2168_v13, %v2164_v1  ;;  %v2354_v52 = vld [vmem:[%s2638_s3] sm:$0x3] }
 0x126   : > { %2644 = vst [vmem:[#allocation3_spill] sm:$0xff] %v2305_v2  ;;  %2645 = vst [vmem:[#allocation4_spill] sm:$0xff] %v2307_v22  ;;  %v1766_v14 = vpop.eup %1765  ;;  %v2315_v54 = vpop.f32.mrb[27].mxu1  ;;  %v905_v2 = vmul.f32 0.70710677, %v2313_v12  ;;  %v2339_v24 = vmul.f32 %v1058_v41, %v2255_v34  ;;  %v659_v26 = vadd.f32 %v2211_v53, %v2069_v29  ;;  %1783 = verf.f32 %v903_v57 }
 0x127   : > { %2646 = vst [vmem:[#allocation5_spill] sm:$0xff] %v2315_v54  ;;  %v1768_v23 = vpop.eup %1767  ;;  %v2331_v54 = vmul.f32 0.5, %v706_v10  ;;  %v1060_v22 = vadd.f32 1.0, %v1766_v14  ;;  %v2647_v14 = vpack.c.bf16 %v2166_v9, %v2161_v61  ;;  %1236 = vmatpush1.bf16.msra.mxu1 %v2648_v35  ;;  %v918_v41 = vmul.f32 0.70710677, %v657_v62 }
 0x128   : > { %v1770_v50 = vpop.eup %1769  ;;  %v712_v61 = vadd.f32 %v2213_v3, %v2069_v29  ;;  %v1059_v13 = vadd.f32 1.0, %v1768_v23  ;;  %1785 = verf.f32 %v905_v2  ;;  %v920_v55 = vmul.f32 0.70710677, %v710_v56 }
 0x129   : > { %v1772_v39 = vpop.eup %1771  ;;  %1195 = vmatpush1.bf16.msra.mxu0 %v2647_v14  ;;  %v2371_v63 = vmul.f32 %v1060_v22, %v2261_v44  ;;  %1787 = verf.f32 %v918_v41  ;;  %v919_v3 = vmul.f32 0.70710677, %v659_v26  ;;  %v663_v44 = vadd.f32 %v2226_v32, %v2067_v43 }
 0x12a   : > { %v1774_v30 = vpop.eup %1773  ;;  %v1074_v16 = vadd.f32 1.0, %v1772_v39  ;;  %v2356_v34 = vpop.f32.mrb[28].mxu0  ;;  %1675 = vmatmul.mubr.msk.bf16.vlgmr.msra.gmra.mrb[32].mxu1 %vm399_vm0, %v2354_v52  ;;  %v1061_v39 = vadd.f32 1.0, %v1770_v50  ;;  %1789 = verf.f32 %v920_v55  ;;  %v665_v55 = vadd.f32 %v2239_v27, %v2067_v43 }
 0x12b   : > { %v1776_v10 = vpop.eup %1775  ;;  %v1076_v18 = vadd.f32 1.0, %v1774_v30  ;;  %v2360_v9 = vpop.f32.mrb[28].mxu1  ;;  %1791 = verf.f32 %v919_v3  ;;  %v718_v3 = vadd.f32 %v2248_v60, %v2067_v43  ;;  %v854_v32 = vmul.f32 0.5, %v657_v62 }
 0x12c   : > { %v2362_v1 = vpop.f32.mrb[29].mxu0  ;;  %v2364_v53 = vmul.f32 %v1074_v16, %v882_v5  ;;  %v2366_v28 = vpop.f32.mrb[29].mxu1  ;;  %1674 = vmatmul.mubr.msk.bf16.vlgmr.msra.gmra.mrb[32].mxu0 %vm399_vm0, %v2354_v52  ;;  %v1075_v22 = vadd.f32 1.0, %v1776_v10  ;;  %v716_v10 = vadd.f32 %v2237_v8, %v2067_v43  ;;  %v934_v14 = vmul.f32 0.70710677, %v663_v44 }
 0x12d   : > { %v2368_v15 = vpop.f32.mrb[30].mxu0  ;;  %v2373_v57 = vmul.f32 %v1076_v18, %v884_v25  ;;  %v2379_v5 = vpop.f32.mrb[30].mxu1  ;;  %v2651_v25 = vmov 0   ;;  %v921_v18 = vmul.f32 0.70710677, %v712_v61  ;;  %v2419_v60 = vmul.f32 0.5, %v712_v61 }
 0x12e   : > { %2649 = vst [vmem:[#allocation6_spill] sm:$0xff] %v2379_v5  ;;  %v2381_v2 = vpop.f32.mrb[31].mxu0  ;;  %v1778_v23 = vpop.eup %1777  ;;  %1306 = vmatprep.mubr.bf16.mxu0 %v2651_v25  ;;  %1347 = vmatprep.mubr.bf16.mxu1 %v2651_v25  ;;  %v2409_v8 = vmul.f32 %v1075_v22, %v2309_v20  ;;  %v2411_v5 = vmul.f32 0.5, %v659_v26  ;;  %v937_v62 = vmul.f32 0.70710677, %v718_v3  ;;  %v1155_v20 = vpack.c.bf16 %v2324_v38, %v2288_v47 }
 0x12f   : > { %2650 = vst [vmem:[#allocation7_spill] sm:$0xff] %v2381_v2  ;;  %v2387_v30 = vpop.f32.mrb[31].mxu1  ;;  %v1780_v16 = vpop.eup %1779  ;;  %v1077_v35 = vadd.f32 1.0, %v1778_v23  ;;  %v2401_v2 = vmul.f32 0.5, %v2313_v12  ;;  %1793 = verf.f32 %v921_v18  ;;  %v2406_v23 = vmul.f32 %v1061_v39, %v2283_v36 }
 0x130   : > { %2652 = vst [vmem:[#allocation8_spill] sm:$0xff] %v2387_v30  ;;  %v1782_v41 = vpop.eup %1781  ;;  %v1030_v50 = vadd.f32 1.0, %v1780_v16  ;;  %v2398_v30 = vmul.f32 %v1059_v13, %v2281_v11  ;;  %v856_v16 = vmul.f32 0.5, %v710_v56  ;;  %v936_v11 = vmul.f32 0.70710677, %v716_v10  ;;  %1274 = vmatprep.subr.bf16.mxu0 %v1155_v20  ;;  %v2655_v20 = vld [vmem:[#allocation2_spill] sm:$0xff] }
 0x131   : > { %v1032_v27 = vadd.f32 1.0, %v1782_v41  ;;  %v2414_v12 = vmul.f32 %v1077_v35, %v2317_v45  ;;  %v935_v36 = vmul.f32 0.70710677, %v665_v55  ;;  %v1784_v39 = vpop.eup %1783  ;;  %1795 = verf.f32 %v934_v14 }
 0x132   : > { %v2417_v13 = vmul.f32 %v1030_v50, %v2329_v46  ;;  %v1157_v56 = vpack.c.bf16 %v2327_v4, %v2303_v31  ;;  %v1786_v26 = vpop.eup %1785  ;;  %v2425_v22 = vmul.f32 0.5, %v663_v44  ;;  %1797 = verf.f32 %v936_v11 }
 0x133   : > { %v667_v45 = vadd.f32 %v2250_v37, %v2079_v7  ;;  %v720_v46 = vadd.f32 %v2257_v0, %v2079_v7  ;;  %v1788_v61 = vpop.eup %1787  ;;  %v2432_v14 = vmul.f32 %v1032_v27, %v2331_v54  ;;  %v2434_v35 = vmul.f32 0.5, %v716_v10 }
 0x134   : > { %1315 = vmatprep.subr.bf16.mxu1 %v1157_v56  ;;  %v669_v47 = vadd.f32 %v2259_v49, %v2079_v7  ;;  %v722_v31 = vadd.f32 %v2266_v58, %v2079_v7  ;;  %v1790_v38 = vpop.eup %1789  ;;  %v1031_v4 = vadd.f32 1.0, %v1784_v39  ;;  %v1046_v37 = vadd.f32 1.0, %v1788_v61 }
 0x135   : > { %1799 = verf.f32 %v935_v36  ;;  %v950_v44 = vmul.f32 0.70710677, %v667_v45  ;;  %v2653_v0 = vpack.c.bf16 %v2268_v19, %v2242_v6  ;;  %v2654_v54 = vpack.c.bf16 %v2274_v21, %v2253_v48  ;;  %v1792_v18 = vpop.eup %1791 }
 0x136   : > { %v1048_v41 = vadd.f32 1.0, %v1790_v38  ;;  %1801 = verf.f32 %v937_v62  ;;  %v952_v49 = vmul.f32 0.70710677, %v720_v46  ;;  %v759_v58 = vadd.f32 %v2285_v33, %v2065_v42 }
 0x137   : > { %1275 = vmatpush1.bf16.msra.mxu0 %v2653_v0  ;;  %1316 = vmatpush1.bf16.msra.mxu1 %v2654_v54  ;;  %v2448_v50 = vmul.f32 %v1046_v37, %v854_v32  ;;  %v2450_v10 = vmul.f32 0.5, %v665_v55  ;;  %1803 = verf.f32 %v950_v44  ;;  %v951_v27 = vmul.f32 0.70710677, %v669_v47 }
 0x138   : > { %v1033_v6 = vadd.f32 1.0, %v1786_v26  ;;  %v2452_v19 = vmul.f32 %v1048_v41, %v856_v16  ;;  %1805 = verf.f32 %v952_v49  ;;  %v953_v48 = vmul.f32 0.70710677, %v722_v31 }
 0x139   : > { %v1794_v11 = vpop.eup %1793  ;;  %v2455_v21 = vmul.f32 %v1031_v4, %v2341_v40  ;;  %v1158_v36 = vpack.c.bf16 %v2448_v50, %v2417_v13  ;;  %v1047_v39 = vadd.f32 1.0, %v1792_v18  ;;  %v2459_v33 = vmul.f32 0.5, %v718_v3  ;;  %v2662_v13 = vld [vmem:[#allocation7_spill] sm:$0xff] }
 0x13a   : > { %v1160_v55 = vpack.c.bf16 %v2452_v19, %v2432_v14  ;;  %v1049_v32 = vadd.f32 1.0, %v1794_v11  ;;  %1807 = verf.f32 %v951_v27  ;;  %v906_v62 = vmul.f32 0.70710677, %v759_v58  ;;  %v2663_v14 = vld [vmem:[#allocation8_spill] sm:$0xff] }
 0x13b   : > { %1809 = verf.f32 %v953_v48  ;;  %v812_v16 = vadd.f32 %v2294_v51, %v2065_v42  ;;  %v761_v40 = vadd.f32 %v2655_v20, %v2065_v42  ;;  %v814_v56 = vadd.f32 %v2298_v59, %v2065_v42  ;;  %v1796_v26 = vpop.eup %1795 }
 0x13c   : > { %v2470_v3 = vmul.f32 %v1033_v6, %v2401_v2  ;;  %1811 = verf.f32 %v906_v62  ;;  %v1171_v61 = vpack.c.bf16 %v2409_v8, %v2398_v30  ;;  %v1173_v38 = vpack.c.bf16 %v2414_v12, %v2406_v23  ;;  %v1798_v4 = vpop.eup %1797 }
 0x13d   : > { %v886_v37 = vmul.f32 0.5, %v667_v45  ;;  %v888_v51 = vmul.f32 0.5, %v720_v46  ;;  %v2476_v44 = vmul.f32 0.5, %v669_v47  ;;  %v908_v0 = vmul.f32 0.70710677, %v812_v16 }
 0x13e   : > { %v2479_v54 = vmul.f32 %v1047_v39, %v2411_v5  ;;  %v2481_v42 = vmul.f32 0.5, %v722_v31  ;;  %v2483_v59 = vmul.f32 0.5, %v759_v58  ;;  %v907_v2 = vmul.f32 0.70710677, %v761_v40  ;;  %1276 = vmatprep.subr.bf16.mxu0 %v1171_v61  ;;  %1317 = vmatprep.subr.bf16.mxu1 %v1173_v38  ;;  %v2660_v58 = vld [vmem:[#allocation5_spill] sm:$0xff] }
 0x13f   : > { %v1800_v30 = vpop.eup %1799  ;;  %v2486_v8 = vmul.f32 %v1049_v32, %v2419_v60  ;;  %v1062_v23 = vadd.f32 1.0, %v1796_v26  ;;  %1813 = verf.f32 %v908_v0  ;;  %v909_v12 = vmul.f32 0.70710677, %v814_v56  ;;  %v2658_v60 = vld [vmem:[#allocation3_spill] sm:$0xff] }
 0x140   : > { %v2656_v45 = vpack.c.bf16 %v2364_v53, %v2339_v24  ;;  %v2657_v5 = vpack.c.bf16 %v2373_v57, %v2371_v63  ;;  %v1802_v46 = vpop.eup %1801  ;;  %v1064_v47 = vadd.f32 1.0, %v1798_v4  ;;  %1815 = verf.f32 %v907_v2  ;;  %v2659_v24 = vld [vmem:[#allocation4_spill] sm:$0xff] }
 0x141   : > { %v763_v31 = vadd.f32 %v2300_v17, %v2069_v29  ;;  %v816_v18 = vadd.f32 %v2658_v60, %v2069_v29  ;;  %v1804_v41 = vpop.eup %1803  ;;  %v2498_v49 = vmul.f32 0.5, %v812_v16  ;;  %1817 = verf.f32 %v909_v12 }
 0x142   : > { %1277 = vmatpush1.bf16.msra.mxu0 %v2656_v45  ;;  %1318 = vmatpush1.bf16.msra.mxu1 %v2657_v5  ;;  %v765_v53 = vadd.f32 %v2659_v24, %v2069_v29  ;;  %v818_v63 = vadd.f32 %v2660_v58, %v2069_v29  ;;  %v1806_v57 = vpop.eup %1805  ;;  %v1063_v27 = vadd.f32 1.0, %v1800_v30  ;;  %v1078_v11 = vadd.f32 1.0, %v1804_v41 }
 0x143   : > { %v2504_v6 = vmul.f32 0.5, %v761_v40  ;;  %v922_v48 = vmul.f32 0.70710677, %v763_v31  ;;  %v1065_v17 = vadd.f32 1.0, %v1802_v46  ;;  %v1080_v39 = vadd.f32 1.0, %v1806_v57 }
 0x144   : > { %v924_v32 = vmul.f32 0.70710677, %v816_v18  ;;  %v923_v62 = vmul.f32 0.70710677, %v765_v53  ;;  %v1808_v29 = vpop.eup %1807  ;;  %v2513_v16 = vmul.f32 %v1062_v23, %v2425_v22  ;;  %v2515_v20 = vmul.f32 %v1078_v11, %v886_v37 }
 0x145   : > { %1676 = vmatmul.mubr.msk.bf16.vlgmr.msra.gmra.mrb[36].mxu0 %vm399_vm0, %v2354_v52  ;;  %1677 = vmatmul.mubr.msk.bf16.vlgmr.msra.gmra.mrb[36].mxu1 %vm399_vm0, %v2354_v52  ;;  %v2517_v40 = vmul.f32 0.5, %v814_v56  ;;  %1819 = verf.f32 %v922_v48  ;;  %v1810_v26 = vpop.eup %1809  ;;  %v2520_v61 = vmul.f32 %v1064_v47, %v2434_v35  ;;  %v2522_v38 = vmul.f32 %v1080_v39, %v888_v51 }
 0x146   : > { %1388 = vmatprep.mubr.bf16.mxu0 %v2651_v25  ;;  %1429 = vmatprep.mubr.bf16.mxu1 %v2651_v25  ;;  %1821 = verf.f32 %v924_v32  ;;  %v925_v4 = vmul.f32 0.70710677, %v818_v63  ;;  %v1812_v0 = vpop.eup %1811  ;;  %v2525_v2 = vmul.f32 %v1063_v27, %v2450_v10  ;;  %v1174_v22 = vpack.c.bf16 %v2515_v20, %v2513_v16 }
 0x147   : > { %1823 = verf.f32 %v923_v62  ;;  %v2531_v56 = vadd.f32 %v2356_v34, %v2067_v43  ;;  %v2534_v37 = vmul.f32 %v1065_v17, %v2459_v33  ;;  %v1176_v35 = vpack.c.bf16 %v2522_v38, %v2520_v61 }
 0x148   : > { %v1079_v51 = vadd.f32 1.0, %v1808_v29  ;;  %1825 = verf.f32 %v925_v4  ;;  %v1081_v30 = vadd.f32 1.0, %v1810_v26  ;;  %v1034_v23 = vadd.f32 1.0, %v1812_v0 }
 0x149   : > { %v2540_v10 = vadd.f32 %v2360_v9, %v2067_v43  ;;  %v2544_v12 = vadd.f32 %v2362_v1, %v2067_v43  ;;  %v1814_v34 = vpop.eup %1813  ;;  %v938_v45 = vmul.f32 0.70710677, %v2531_v56  ;;  %v2549_v33 = vadd.f32 %v2366_v28, %v2067_v43 }
 0x14a   : > { %v1159_v5 = vpack.c.bf16 %v2479_v54, %v2455_v21  ;;  %v1161_v46 = vpack.c.bf16 %v2486_v8, %v2470_v3  ;;  %v1816_v47 = vpop.eup %1815  ;;  %v1036_v9 = vadd.f32 1.0, %v1814_v34  ;;  %v858_v60 = vmul.f32 0.5, %v763_v31 }
 0x14b   : > { %v860_v41 = vmul.f32 0.5, %v816_v18  ;;  %v940_v1 = vmul.f32 0.70710677, %v2540_v10  ;;  %v1818_v24 = vpop.eup %1817  ;;  %v1035_v58 = vadd.f32 1.0, %v1816_v47  ;;  %v859_v57 = vmul.f32 0.5, %v765_v53 }
 0x14c   : > { %v861_v27 = vmul.f32 0.5, %v818_v63  ;;  %v939_v11 = vmul.f32 0.70710677, %v2544_v12  ;;  %1356 = vmatprep.subr.bf16.mxu0 %v1159_v5  ;;  %1397 = vmatprep.subr.bf16.mxu1 %v1161_v46  ;;  %v1143_v43 = vmul.f32 %v1079_v51, %v2476_v44  ;;  %v1145_v28 = vmul.f32 %v1081_v30, %v2481_v42  ;;  %v2661_v44 = vld [vmem:[#allocation6_spill] sm:$0xff] }
 0x14d   : > { %v1098_v21 = vmul.f32 %v1034_v23, %v2483_v59  ;;  %v941_v3 = vmul.f32 0.70710677, %v2549_v33  ;;  %1357 = vmatpush1.bf16.msra.mxu0 %v1158_v36  ;;  %1398 = vmatpush1.bf16.msra.mxu1 %v1160_v55  ;;  %v1037_v54 = vadd.f32 1.0, %v1818_v24  ;;  %1827 = verf.f32 %v938_v45 }
 0x14e   : > { %v773_v8 = vadd.f32 %v2368_v15, %v2079_v7  ;;  %v2571_v42 = vadd.f32 %v2661_v44, %v2079_v7  ;;  %v1100_v31 = vmul.f32 %v1036_v9, %v2498_v49  ;;  %1829 = verf.f32 %v940_v1 }
 0x14f   : > { %v1820_v59 = vpop.eup %1819  ;;  %v2576_v50 = vadd.f32 %v2662_v13, %v2079_v7  ;;  %v2580_v19 = vadd.f32 %v2663_v14, %v2079_v7  ;;  %v1099_v55 = vmul.f32 %v1035_v58, %v2504_v6  ;;  %1831 = verf.f32 %v939_v11  ;;  %v1187_v13 = vpop.permute.xlu0 %1186 }
 0x150   : > { %v1822_v36 = vpop.eup %1821  ;;  %v1050_v15 = vadd.f32 1.0, %v1820_v59  ;;  %v954_v18 = vmul.f32 0.70710677, %v773_v8  ;;  %1833 = verf.f32 %v941_v3  ;;  %v956_v49 = vmul.f32 0.70710677, %v2571_v42 }
 0x151   : > { %v1824_v53 = vpop.eup %1823  ;;  %v1052_v63 = vadd.f32 1.0, %v1822_v36  ;;  %v955_v48 = vmul.f32 0.70710677, %v2576_v50  ;;  %v1101_v39 = vmul.f32 %v1037_v54, %v2517_v40  ;;  %v957_v6 = vmul.f32 0.70710677, %v2580_v19 }
 0x152   : > { %v1826_v17 = vpop.eup %1825  ;;  %v1114_v32 = vmul.f32 %v1050_v15, %v858_v60  ;;  %v1051_v62 = vadd.f32 1.0, %v1824_v53  ;;  %1835 = verf.f32 %v954_v18  ;;  %v1175_v0 = vpack.c.bf16 %v1143_v43, %v2525_v2 }
 0x153   : > { %v1116_v7 = vmul.f32 %v1052_v63, %v860_v41  ;;  %v1053_v29 = vadd.f32 1.0, %v1826_v17  ;;  %1837 = verf.f32 %v956_v49  ;;  %v1177_v23 = vpack.c.bf16 %v1145_v28, %v2534_v37 }
 0x154   : > { %v1162_v26 = vpack.c.bf16 %v1114_v32, %v1098_v21  ;;  %v1115_v4 = vmul.f32 %v1051_v62, %v859_v57  ;;  %1839 = verf.f32 %v955_v48  ;;  %1358 = vmatprep.subr.bf16.mxu0 %v1175_v0  ;;  %v874_v20 = vmul.f32 0.5, %v2531_v56 }
 0x155   : > { %v1164_v51 = vpack.c.bf16 %v1116_v7, %v1100_v31  ;;  %v1117_v30 = vmul.f32 %v1053_v29, %v861_v27  ;;  %1841 = verf.f32 %v957_v6  ;;  %1399 = vmatprep.subr.bf16.mxu1 %v1177_v23  ;;  %1359 = vmatpush1.bf16.msra.mxu0 %v1174_v22  ;;  %v876_v22 = vmul.f32 0.5, %v2540_v10 }
 0x156   : > { %v1163_v40 = vpack.c.bf16 %v1115_v4, %v1099_v55  ;;  %1400 = vmatpush1.bf16.msra.mxu1 %v1176_v35  ;;  %v875_v35 = vmul.f32 0.5, %v2544_v12  ;;  %v890_v9 = vmul.f32 0.5, %v773_v8  ;;  %v877_v1 = vmul.f32 0.5, %v2549_v33 }
 0x157   : > { %v1165_v34 = vpack.c.bf16 %v1117_v30, %v1101_v39  ;;  %v1828_v45 = vpop.eup %1827  ;;  %v892_v56 = vmul.f32 0.5, %v2571_v42  ;;  %v891_v11 = vmul.f32 0.5, %v2576_v50  ;;  %v893_v21 = vmul.f32 0.5, %v2580_v19 }
 0x158   : > { %1438 = vmatprep.subr.bf16.mxu0 %v1163_v40  ;;  %v1830_v2 = vpop.eup %1829  ;;  %1678 = vmatmul.mubr.msk.bf16.vlgmr.msra.gmra.mrb[40].mxu0 %vm399_vm0, %v2354_v52  ;;  %v1066_v46 = vadd.f32 1.0, %v1828_v45 }
 0x159   : > { %1479 = vmatprep.subr.bf16.mxu1 %v1165_v34  ;;  %v1832_v5 = vpop.eup %1831  ;;  %1679 = vmatmul.mubr.msk.bf16.vlgmr.msra.gmra.mrb[40].mxu1 %vm399_vm0, %v2354_v52  ;;  %v1068_v61 = vadd.f32 1.0, %v1830_v2 }
 0x15a   : > { %v1834_v37 = vpop.eup %1833  ;;  %1439 = vmatpush1.bf16.msra.mxu0 %v1162_v26  ;;  %1480 = vmatpush1.bf16.msra.mxu1 %v1164_v51  ;;  %v1067_v47 = vadd.f32 1.0, %v1832_v5  ;;  %v1130_v57 = vmul.f32 %v1066_v46, %v874_v20 }
 0x15b   : > { %1470 = vmatprep.mubr.bf16.mxu0 %v2651_v25  ;;  %1511 = vmatprep.mubr.bf16.mxu1 %v2651_v25  ;;  %v1069_v24 = vadd.f32 1.0, %v1834_v37  ;;  %v1132_v28 = vmul.f32 %v1068_v61, %v876_v22 }
 0x15c   : > { %v1836_v16 = vpop.eup %1835  ;;  %v1131_v54 = vmul.f32 %v1067_v47, %v875_v35 }
 0x15d   : > { %v1838_v38 = vpop.eup %1837  ;;  %v1082_v60 = vadd.f32 1.0, %v1836_v16  ;;  %v1133_v33 = vmul.f32 %v1069_v24, %v877_v1 }
 0x15e   : > { %v1840_v41 = vpop.eup %1839  ;;  %v1084_v58 = vadd.f32 1.0, %v1838_v38 }
 0x15f   : > { %v1842_v10 = vpop.eup %1841  ;;  %v1146_v27 = vmul.f32 %v1082_v60, %v890_v9  ;;  %v1083_v43 = vadd.f32 1.0, %v1840_v41 }
 0x160   : > { %v1148_v12 = vmul.f32 %v1084_v58, %v892_v56  ;;  %v1085_v3 = vadd.f32 1.0, %v1842_v10 }
 0x161   : > { %v1178_v25 = vpack.c.bf16 %v1146_v27, %v1130_v57  ;;  %v1147_v8 = vmul.f32 %v1083_v43, %v891_v11 }
 0x162   : > { %v1180_v44 = vpack.c.bf16 %v1148_v12, %v1132_v28  ;;  %v1149_v59 = vmul.f32 %v1085_v3, %v893_v21 }
 0x163   : > { %v1179_v42 = vpack.c.bf16 %v1147_v8, %v1131_v54 }
 0x164   : > { %v1181_v31 = vpack.c.bf16 %v1149_v59, %v1133_v33 }
 0x165   : > { %1440 = vmatprep.subr.bf16.mxu0 %v1179_v42 }
 0x166   : > { %1481 = vmatprep.subr.bf16.mxu1 %v1181_v31  ;;  %1441 = vmatpush1.bf16.msra.mxu0 %v1178_v25 }
 0x167   : > { %1482 = vmatpush1.bf16.msra.mxu1 %v1180_v44 }
 0x169   : > { %1680 = vmatmul.mubr.msk.bf16.vlgmr.msra.gmra.mrb[44].mxu0 %vm399_vm0, %v2354_v52 }
 0x16a   : > { %1681 = vmatmul.mubr.msk.bf16.vlgmr.msra.gmra.mrb[44].mxu1 %vm399_vm0, %v2354_v52 }
 0x1fd   : > { %v1267_v14 = vpop.f32.mrb[32].mxu1 }
 0x1fe   : > { %v1268_v36 = vadd.f32 %v1267_v14, %v1187_v13  ;;  %v1269_v15 = vpop.f32.mrb[33].mxu1 }
 0x1ff   : > { %v1226_v50 = vpop.f32.mrb[32].mxu0  ;;  %v1270_v53 = vadd.f32 %v1269_v15, %v1187_v13  ;;  %v1271_v49 = vpop.f32.mrb[34].mxu1 }
 0x200   : > { %v1227_v19 = vadd.f32 %v1226_v50, %v1187_v13  ;;  %v1228_v55 = vpop.f32.mrb[33].mxu0  ;;  %v1272_v48 = vpop.f32.mrb[35].mxu1 }
 0x201   : > { %v1229_v18 = vadd.f32 %v1228_v55, %v1187_v13  ;;  %v1230_v63 = vpop.f32.mrb[34].mxu0  ;;  %v1537_v39 = vcombine.low %v1268_v36, %v1270_v53 }
 0x202   : > { %v1231_v52 = vpop.f32.mrb[35].mxu0 }
 0x203   : > { %v1536_v17 = vcombine.low %v1227_v19, %v1229_v18  ;;  %1553 = vst [vmem:[%s2616_s24 + $0x8] sm:$0xff] %v1537_v39 }
 0x205   : > { %1552 = vst [vmem:[%s2616_s24] sm:$0xff] %v1536_v17 }
 0x218   : > { %v1308_v32 = vpop.f32.mrb[36].mxu0  ;;  %v1349_v62 = vpop.f32.mrb[36].mxu1 }
 0x219   : > { %v1309_v7 = vadd.f32 %v1308_v32, %v1187_v13  ;;  %v1350_v29 = vadd.f32 %v1349_v62, %v1187_v13  ;;  %v1310_v6 = vpop.f32.mrb[37].mxu0  ;;  %v1351_v26 = vpop.f32.mrb[37].mxu1 }
 0x21a   : > { %v1311_v4 = vadd.f32 %v1310_v6, %v1187_v13  ;;  %v1352_v0 = vadd.f32 %v1351_v26, %v1187_v13  ;;  %v1312_v51 = vpop.f32.mrb[38].mxu0  ;;  %v1353_v30 = vpop.f32.mrb[38].mxu1 }
 0x21b   : > { %v1313_v23 = vpop.f32.mrb[39].mxu0  ;;  %v1354_v40 = vpop.f32.mrb[39].mxu1 }
 0x21c   : > { %v1538_v34 = vcombine.low %v1309_v7, %v1311_v4  ;;  %v1539_v45 = vcombine.low %v1350_v29, %v1352_v0 }
 0x21e   : > { %1554 = vst [vmem:[%s2616_s24 + $0x10] sm:$0xff] %v1538_v34  ;;  %1555 = vst [vmem:[%s2616_s24 + $0x18] sm:$0xff] %v1539_v45 }
 0x22b   : > { %v1390_v2 = vpop.f32.mrb[40].mxu0 }
 0x22c   : > { %v1391_v5 = vadd.f32 %v1390_v2, %v1187_v13  ;;  %v1431_v37 = vpop.f32.mrb[40].mxu1  ;;  %v1392_v46 = vpop.f32.mrb[41].mxu0 }
 0x22d   : > { %v1432_v16 = vadd.f32 %v1431_v37, %v1187_v13  ;;  %v1393_v20 = vadd.f32 %v1392_v46, %v1187_v13  ;;  %v1433_v22 = vpop.f32.mrb[41].mxu1  ;;  %v1394_v61 = vpop.f32.mrb[42].mxu0 }
 0x22e   : > { %v1434_v38 = vadd.f32 %v1433_v22, %v1187_v13  ;;  %v1435_v35 = vpop.f32.mrb[42].mxu1  ;;  %v1395_v47 = vpop.f32.mrb[43].mxu0 }
 0x22f   : > { %v1540_v9 = vcombine.low %v1391_v5, %v1393_v20  ;;  %v1436_v60 = vpop.f32.mrb[43].mxu1 }
 0x230   : > { %v1541_v41 = vcombine.low %v1432_v16, %v1434_v38 }
 0x231   : > { %1556 = vst [vmem:[%s2616_s24 + $0x20] sm:$0xff] %v1540_v9 }
 0x232   : > { %1557 = vst [vmem:[%s2616_s24 + $0x28] sm:$0xff] %v1541_v41 }
 0x23c   : > { %v1472_v1 = vpop.f32.mrb[44].mxu0 }
 0x23d   : > { %v1473_v24 = vadd.f32 %v1472_v1, %v1187_v13  ;;  %v1513_v56 = vpop.f32.mrb[44].mxu1  ;;  %v1474_v58 = vpop.f32.mrb[45].mxu0 }
 0x23e   : > { %v1514_v10 = vadd.f32 %v1513_v56, %v1187_v13  ;;  %v1475_v57 = vadd.f32 %v1474_v58, %v1187_v13  ;;  %v1515_v27 = vpop.f32.mrb[45].mxu1  ;;  %v1476_v11 = vpop.f32.mrb[46].mxu0 }
 0x23f   : > { %v1516_v43 = vadd.f32 %v1515_v27, %v1187_v13  ;;  %v1517_v28 = vpop.f32.mrb[46].mxu1  ;;  %v1477_v12 = vpop.f32.mrb[47].mxu0 }
 0x240   : > { %v1542_v21 = vcombine.low %v1473_v24, %v1475_v57  ;;  %v1518_v3 = vpop.f32.mrb[47].mxu1 }
 0x241   : > { %v1543_v54 = vcombine.low %v1514_v10, %v1516_v43 }
 0x242   : > { %1558 = vst [vmem:[%s2616_s24 + $0x30] sm:$0xff] %v1542_v21 }
 0x243   : > { %1559 = vst [vmem:[%s2616_s24 + $0x38] sm:$0xff] %v1543_v54 }
 0x244 PF: > { %s15_s20 = sadd.s32 1, %s1865_s20   ;;  %s2664_s18 = smov %s1861_s19 }
 0x245   : > { %p12_p5 = scmp.ge.s32.totalorder %s15_s20, 4   ;;  %s2665_s19 = smov %s2667_s21 }
 0x247   :  { %14 = sbr.rel (!%p12_p5) target bundleno = 2 (0x2), region = 70 }

</bundles_post_ra>
